<compile_context>
chip_gen: v6e
topology: v6e:2x2x1
jax: 0.10.0
libtpu: 0.0.40
codegen_flags: <defaults>
</compile_context>

<pallas_src>
import math
import jax
import jax.numpy as jnp
from jax.experimental import pallas as pl
from jax.experimental.pallas import tpu as pltpu


# ------------------------------ shared math ------------------------------

def _layernorm(x, g, b, eps=1e-5):
    mu = jnp.mean(x, axis=-1, keepdims=True)
    xc = x - mu
    var = jnp.mean(xc * xc, axis=-1, keepdims=True)
    return xc * jax.lax.rsqrt(var + eps) * g + b


def _gelu_tanh(x):
    # tanh-based GELU (EUP tanh + a few VALU ops); max abs error vs exact
    # erf-GELU is ~3e-4, well inside the relaxed test tolerance below.
    c = 0.7978845608028654  # sqrt(2/pi)
    return 0.5 * x * (1.0 + jnp.tanh(c * (x + 0.044715 * (x * x * x))))


# ------------------------------ Pallas kernel ------------------------------

def _make_vit_kernel(batch, seq_len, num_heads, num_blocks):
    def kernel(patches_ref, convw_ref, convb_ref, pos_ref, bias_ref, pool_ref,
               ln1g_ref, ln1b_ref, wqkv_ref, wout_ref, bout_ref,
               ln2g_ref, ln2b_ref, w1_ref, b1_ref, w2_ref, b2_ref,
               headw_ref, headb_ref, o_ref):
        f32, bf16 = jnp.float32, jnp.bfloat16
        hd = convw_ref.shape[-1]
        dh = hd // num_heads
        scale = 1.0 / math.sqrt(dh)

        # ---- embedding: 1x1 "patch conv" == per-token linear + pos-emb add
        x = jnp.dot(patches_ref[...], convw_ref[...],
                    preferred_element_type=f32)
        x = x + convb_ref[...] + pos_ref[...]               # (B*S, Hd), f32

        bias = bias_ref[...]        # block-diagonal additive attention mask

        for l in range(num_blocks):
            # ---------------- multi-head self-attention ----------------
            ln1 = _layernorm(x, ln1g_ref[l], ln1b_ref[l])
            qkv = jnp.dot(ln1.astype(bf16), wqkv_ref[l],
                          preferred_element_type=f32)       # (B*S, 3*Hd)

            attn = jnp.zeros_like(x)                        # (B*S, Hd)
            for h in range(num_heads):
                # scale folded into Q (128x8) rather than the 128x128 scores
                q = (qkv[:, h * dh:(h + 1) * dh] * scale).astype(bf16)
                k = qkv[:, hd + h * dh:hd + (h + 1) * dh].astype(bf16)
                v = qkv[:, 2 * hd + h * dh:2 * hd + (h + 1) * dh].astype(bf16)

                # (B*S, B*S) scores; cross-image entries are masked to -1e30
                s = jax.lax.dot_general(q, k, (((1,), (1,)), ((), ())),
                                        preferred_element_type=f32)
                s = s + bias
                s = s - jnp.max(s, axis=-1, keepdims=True)
                e = jnp.exp(s)
                inv_l = pl.reciprocal(jnp.sum(e, axis=-1, keepdims=True),
                                      approx=True)          # (B*S, 1)

                # fold head-concat + out-projection: E @ (V_h @ W_out[h]),
                # softmax denominator applied to the (B*S, Hd) result.
                vw = jnp.dot(v, wout_ref[l, h],
                             preferred_element_type=f32)    # (B*S, Hd)
                attn = attn + jnp.dot(e.astype(bf16), vw.astype(bf16),
                                      preferred_element_type=f32) * inv_l

            attn = attn + bout_ref[l] + x                   # bias + residual 1

            # ---------------------------- MLP ----------------------------
            ln2 = _layernorm(attn, ln2g_ref[l], ln2b_ref[l])
            h1 = jnp.dot(ln2.astype(bf16), w1_ref[l],
                         preferred_element_type=f32) + b1_ref[l]
            h1 = _gelu_tanh(h1)
            h2 = jnp.dot(h1.astype(bf16), w2_ref[l],
                         preferred_element_type=f32) + b2_ref[l]
            x = h2 + attn                                   # residual 2

        # ---- per-image mean pool (single MXU matmul) + classification head
        pooled = jnp.dot(pool_ref[...], x,
                         preferred_element_type=f32)        # (B, Hd)
        o_ref[...] = jnp.dot(pooled, headw_ref[...],
                             preferred_element_type=f32) + headb_ref[...]

    return kernel


# ------------------------------ wrapper ------------------------------------

def vit_forward(x, params, *, patch_size, num_heads):
    assert patch_size == 1, (
        "reference forward is only shape-consistent for patch_size == 1")
    B, C, H, W = x.shape
    Hd = params["conv_w"].shape[0]
    assert Hd == C * patch_size ** 2
    S = (H // patch_size) * (W // patch_size)
    BS = B * S
    L = len(params["blocks"])
    nc = params["head_w"].shape[0]
    fc = params["blocks"][0]["w1"].shape[0]
    bf16 = jnp.bfloat16

    # --- wrapper-side glue (tiny one-time XLA ops): NCHW -> token-major,
    # weight transposes, per-layer stacking, bf16 casts, masks.
    patches = jnp.transpose(x, (0, 2, 3, 1)).reshape(BS, C).astype(bf16)
    conv_wT = params["conv_w"].reshape(Hd, C).T.astype(bf16)        # (C, Hd)
    conv_b = params["conv_b"].reshape(1, Hd)
    pos = jnp.tile(params["pos_emb"], (B, 1))                       # (BS, Hd)

    img = jnp.repeat(jnp.arange(B), S)
    attn_bias = jnp.where(img[:, None] == img[None, :],
                          0.0, -1e30).astype(jnp.float32)           # (BS, BS)
    pool_mat = (jnp.arange(B)[:, None] == img[None, :]
                ).astype(jnp.float32) / float(S)                    # (B, BS)

    def stk(name):
        return jnp.stack([blk[name] for blk in params["blocks"]])

    ln1g = stk("ln1_g").reshape(L, 1, Hd)
    ln1b = stk("ln1_b").reshape(L, 1, Hd)
    wqkv = jnp.stack([blk["w_qkv"].T for blk in params["blocks"]]
                     ).astype(bf16)                                 # (L,Hd,3Hd)
    wout = jnp.stack([blk["w_out"].T for blk in params["blocks"]]
                     ).reshape(L, num_heads, Hd // num_heads, Hd
                               ).astype(bf16)                       # (L,nh,dh,Hd)
    bout = stk("b_out").reshape(L, 1, Hd)
    ln2g = stk("ln2_g").reshape(L, 1, Hd)
    ln2b = stk("ln2_b").reshape(L, 1, Hd)
    w1 = jnp.stack([blk["w1"].T for blk in params["blocks"]]).astype(bf16)
    b1 = stk("b1").reshape(L, 1, fc)
    w2 = jnp.stack([blk["w2"].T for blk in params["blocks"]]).astype(bf16)
    b2 = stk("b2").reshape(L, 1, Hd)
    head_wT = params["head_w"].T                                    # (Hd, nc)
    head_b = params["head_b"].reshape(1, nc)

    args = (patches, conv_wT, conv_b, pos, attn_bias, pool_mat,
            ln1g, ln1b, wqkv, wout, bout, ln2g, ln2b, w1, b1, w2, b2,
            head_wT, head_b)

    # single fused call: whole-array blocks, everything resident in VMEM.
    in_specs = [pl.BlockSpec(a.shape, lambda i, _n=a.ndim: (0,) * _n)
                for a in args]
    return pl.pallas_call(
        _make_vit_kernel(B, S, num_heads, L),
        out_shape=jax.ShapeDtypeStruct((B, nc), jnp.float32),
        grid=(1,),
        in_specs=in_specs,
        out_specs=pl.BlockSpec((B, nc), lambda i: (0, 0)),
        # the single fused step is independent; at larger batch sizes this
        # axis would split into 128/256-token groups sharded across v7x's TCs.
        compiler_params=pltpu.CompilerParams(
            dimension_semantics=("parallel",)),
    )(*args)


# ------------------------------ reference & init --------------------------

def vit_reference(x, params, *, patch_size, num_heads):
    B, C, H, W = x.shape
    Hd = params["conv_w"].shape[0]
    S = H * W
    wc = params["conv_w"].reshape(Hd, C)
    y = jnp.einsum("bchw,oc->bohw", x, wc) + params["conv_b"][None, :, None, None]
    y = y.reshape(B, C, H * W).transpose(0, 2, 1)   # PyTorch view+transpose (Hd == C)
    y = y + params["pos_emb"][None]
    dh = Hd // num_heads
    for blk in params["blocks"]:
        ln1 = _layernorm(y, blk["ln1_g"], blk["ln1_b"])
        qkv = ln1 @ blk["w_qkv"].T
        q, k, v = jnp.split(qkv, 3, axis=-1)
        q = q.reshape(B, S, num_heads, dh).transpose(0, 2, 1, 3)
        k = k.reshape(B, S, num_heads, dh).transpose(0, 2, 1, 3)
        v = v.reshape(B, S, num_heads, dh).transpose(0, 2, 1, 3)
        a = jax.nn.softmax((q @ jnp.swapaxes(k, -1, -2)) / math.sqrt(dh), axis=-1)
        attn = (a @ v).transpose(0, 2, 1, 3).reshape(B, S, Hd)
        attn = attn @ blk["w_out"].T + blk["b_out"]
        attn = attn + y
        ln2 = _layernorm(attn, blk["ln2_g"], blk["ln2_b"])
        h1 = jax.nn.gelu(ln2 @ blk["w1"].T + blk["b1"], approximate=False)
        y = h1 @ blk["w2"].T + blk["b2"] + attn
    pooled = y.mean(axis=1)
    return pooled @ params["head_w"].T + params["head_b"]


def init_params(key, *, patch_size, input_shape, hidden_dim, fc_dim,
                num_heads, num_blocks, num_classes):
    C, H, W = input_shape
    S = H * W // patch_size ** 2
    keys = jax.random.split(key, 5 + num_blocks)
    params = {
        "pos_emb": 0.02 * jax.random.normal(keys[0], (S, hidden_dim), jnp.float32),
        "conv_w": 0.1 * jax.random.normal(
            keys[1], (hidden_dim, C, patch_size, patch_size), jnp.float32),
        "conv_b": 0.1 * jax.random.normal(keys[2], (hidden_dim,), jnp.float32),
        "head_w": 0.1 * jax.random.normal(keys[3], (num_classes, hidden_dim), jnp.float32),
        "head_b": 0.1 * jax.random.normal(keys[4], (num_classes,), jnp.float32),
        "blocks": [],
    }
    for i in range(num_blocks):
        bk = jax.random.split(keys[5 + i], 7)
        params["blocks"].append(dict(
            ln1_g=jnp.ones((hidden_dim,), jnp.float32),
            ln1_b=jnp.zeros((hidden_dim,), jnp.float32),
            w_qkv=0.1 * jax.random.normal(bk[0], (3 * hidden_dim, hidden_dim), jnp.float32),
            w_out=0.1 * jax.random.normal(bk[1], (hidden_dim, hidden_dim), jnp.float32),
            b_out=0.1 * jax.random.normal(bk[2], (hidden_dim,), jnp.float32),
            ln2_g=jnp.ones((hidden_dim,), jnp.float32),
            ln2_b=jnp.zeros((hidden_dim,), jnp.float32),
            w1=0.1 * jax.random.normal(bk[3], (fc_dim, hidden_dim), jnp.float32),
            b1=0.1 * jax.random.normal(bk[4], (fc_dim,), jnp.float32),
            w2=0.1 * jax.random.normal(bk[5], (hidden_dim, fc_dim), jnp.float32),
            b2=0.1 * jax.random.normal(bk[6], (hidden_dim,), jnp.float32),
        ))
    return params


# ------------------------------ main ---------------------------------------

if __name__ == "__main__":
    patch_size = 1
    C, Himg, Wimg = 32, 8, 8
    hidden_dim = C * patch_size ** 2          # required by the reference forward
    fc_dim = 64
    num_heads = 4
    num_blocks = 2
    num_classes = 10
    batch = 2                                 # B*S = 128 token rows

    root = jax.random.PRNGKey(0)
    kx, kp = jax.random.split(root)
    x = jax.random.normal(kx, (batch, C, Himg, Wimg), dtype=jnp.float32)
    params = init_params(kp, patch_size=patch_size, input_shape=(C, Himg, Wimg),
                         hidden_dim=hidden_dim, fc_dim=fc_dim,
                         num_heads=num_heads, num_blocks=num_blocks,
                         num_classes=num_classes)

    out = vit_forward(x, params, patch_size=patch_size, num_heads=num_heads)
    out = jax.block_until_ready(out)

    ref = vit_reference(x, params, patch_size=patch_size, num_heads=num_heads)
    assert out.shape == (batch, num_classes)
    # tolerance relaxed vs the exact-f32 reference to account for bf16 MXU
    # inputs (f32 accumulation), tanh-GELU and the approx softmax reciprocal.
    assert jnp.allclose(out, ref, atol=2e-2, rtol=2e-2), (
        f"max abs diff {jnp.max(jnp.abs(out - ref))}")
    print("KERNEL_OK")
</pallas_src>

<mosaic_0001>
module attributes {stable_mosaic.version = 11 : i64} {
  func.func @kernel(%arg0: i32, %arg1: memref<128x32xbf16, #tpu.memory_space<vmem>>, %arg2: memref<32x32xbf16, #tpu.memory_space<vmem>>, %arg3: memref<1x32xf32, #tpu.memory_space<vmem>>, %arg4: memref<128x32xf32, #tpu.memory_space<vmem>>, %arg5: memref<128x128xf32, #tpu.memory_space<vmem>>, %arg6: memref<2x128xf32, #tpu.memory_space<vmem>>, %arg7: memref<2x1x32xf32, #tpu.memory_space<vmem>>, %arg8: memref<2x1x32xf32, #tpu.memory_space<vmem>>, %arg9: memref<2x32x96xbf16, #tpu.memory_space<vmem>>, %arg10: memref<2x4x8x32xbf16, #tpu.memory_space<vmem>>, %arg11: memref<2x1x32xf32, #tpu.memory_space<vmem>>, %arg12: memref<2x1x32xf32, #tpu.memory_space<vmem>>, %arg13: memref<2x1x32xf32, #tpu.memory_space<vmem>>, %arg14: memref<2x32x64xbf16, #tpu.memory_space<vmem>>, %arg15: memref<2x1x64xf32, #tpu.memory_space<vmem>>, %arg16: memref<2x64x32xbf16, #tpu.memory_space<vmem>>, %arg17: memref<2x1x32xf32, #tpu.memory_space<vmem>>, %arg18: memref<32x10xf32, #tpu.memory_space<vmem>>, %arg19: memref<1x10xf32, #tpu.memory_space<vmem>>, %arg20: memref<2x10xf32, #tpu.memory_space<vmem>>) attributes {dimension_semantics = [#tpu.dimension_semantics<parallel>], iteration_bounds = array<i64: 1>, scalar_prefetch = 0 : i64, scratch_operands = 0 : i64, tpu.core_type = #tpu.core_type<tc>, window_params = [{pipeline_mode = #tpu.pipeline_mode<synchronous>, transform_indices = @transform_0, window_bounds = array<i64: 128, 32>}, {pipeline_mode = #tpu.pipeline_mode<synchronous>, transform_indices = @transform_1, window_bounds = array<i64: 32, 32>}, {pipeline_mode = #tpu.pipeline_mode<synchronous>, transform_indices = @transform_2, window_bounds = array<i64: 1, 32>}, {pipeline_mode = #tpu.pipeline_mode<synchronous>, transform_indices = @transform_3, window_bounds = array<i64: 128, 32>}, {pipeline_mode = #tpu.pipeline_mode<synchronous>, transform_indices = @transform_4, window_bounds = array<i64: 128, 128>}, {pipeline_mode = #tpu.pipeline_mode<synchronous>, transform_indices = @transform_5, window_bounds = array<i64: 2, 128>}, {pipeline_mode = #tpu.pipeline_mode<synchronous>, transform_indices = @transform_6, window_bounds = array<i64: 2, 1, 32>}, {pipeline_mode = #tpu.pipeline_mode<synchronous>, transform_indices = @transform_7, window_bounds = array<i64: 2, 1, 32>}, {pipeline_mode = #tpu.pipeline_mode<synchronous>, transform_indices = @transform_8, window_bounds = array<i64: 2, 32, 96>}, {pipeline_mode = #tpu.pipeline_mode<synchronous>, transform_indices = @transform_9, window_bounds = array<i64: 2, 4, 8, 32>}, {pipeline_mode = #tpu.pipeline_mode<synchronous>, transform_indices = @transform_10, window_bounds = array<i64: 2, 1, 32>}, {pipeline_mode = #tpu.pipeline_mode<synchronous>, transform_indices = @transform_11, window_bounds = array<i64: 2, 1, 32>}, {pipeline_mode = #tpu.pipeline_mode<synchronous>, transform_indices = @transform_12, window_bounds = array<i64: 2, 1, 32>}, {pipeline_mode = #tpu.pipeline_mode<synchronous>, transform_indices = @transform_13, window_bounds = array<i64: 2, 32, 64>}, {pipeline_mode = #tpu.pipeline_mode<synchronous>, transform_indices = @transform_14, window_bounds = array<i64: 2, 1, 64>}, {pipeline_mode = #tpu.pipeline_mode<synchronous>, transform_indices = @transform_15, window_bounds = array<i64: 2, 64, 32>}, {pipeline_mode = #tpu.pipeline_mode<synchronous>, transform_indices = @transform_16, window_bounds = array<i64: 2, 1, 32>}, {pipeline_mode = #tpu.pipeline_mode<synchronous>, transform_indices = @transform_17, window_bounds = array<i64: 32, 10>}, {pipeline_mode = #tpu.pipeline_mode<synchronous>, transform_indices = @transform_18, window_bounds = array<i64: 1, 10>}, {pipeline_mode = #tpu.pipeline_mode<synchronous>, transform_indices = @transform_19, window_bounds = array<i64: 2, 10>}]} {
    %c0 = arith.constant 0 : index
    %c0_0 = arith.constant 0 : index
    %0 = vector.load %arg1[%c0, %c0_0] : memref<128x32xbf16, #tpu.memory_space<vmem>>, vector<128x32xbf16>
    %c0_1 = arith.constant 0 : index
    %c0_2 = arith.constant 0 : index
    %1 = vector.load %arg2[%c0_1, %c0_2] : memref<32x32xbf16, #tpu.memory_space<vmem>>, vector<32x32xbf16>
    %cst = arith.constant dense<0.000000e+00> : vector<128x32xf32>
    %2 = tpu.matmul %0, %1, %cst {dimension_numbers = #tpu.dot_dimension_numbers<[1], [0], [0], [1], [0, 0, 1, 1], [], []>} : vector<128x32xbf16>, vector<32x32xbf16>, vector<128x32xf32> -> vector<128x32xf32>
    %c0_3 = arith.constant 0 : index
    %c0_4 = arith.constant 0 : index
    %3 = vector.load %arg3[%c0_3, %c0_4] : memref<1x32xf32, #tpu.memory_space<vmem>>, vector<1x32xf32>
    %4 = vector.broadcast %3 : vector<1x32xf32> to vector<128x32xf32>
    %5 = arith.addf %2, %4 : vector<128x32xf32>
    %c0_5 = arith.constant 0 : index
    %c0_6 = arith.constant 0 : index
    %6 = vector.load %arg4[%c0_5, %c0_6] : memref<128x32xf32, #tpu.memory_space<vmem>>, vector<128x32xf32>
    %7 = arith.addf %5, %6 : vector<128x32xf32>
    %c0_7 = arith.constant 0 : index
    %c0_8 = arith.constant 0 : index
    %8 = vector.load %arg5[%c0_7, %c0_8] : memref<128x128xf32, #tpu.memory_space<vmem>>, vector<128x128xf32>
    %c0_9 = arith.constant 0 : index
    %c0_10 = arith.constant 0 : index
    %c0_11 = arith.constant 0 : index
    %9 = vector.load %arg7[%c0_9, %c0_10, %c0_11] : memref<2x1x32xf32, #tpu.memory_space<vmem>>, vector<1x1x32xf32>
    %10 = vector.shape_cast %9 : vector<1x1x32xf32> to vector<1x32xf32>
    %c0_12 = arith.constant 0 : index
    %c0_13 = arith.constant 0 : index
    %c0_14 = arith.constant 0 : index
    %11 = vector.load %arg8[%c0_12, %c0_13, %c0_14] : memref<2x1x32xf32, #tpu.memory_space<vmem>>, vector<1x1x32xf32>
    %12 = vector.shape_cast %11 : vector<1x1x32xf32> to vector<1x32xf32>
    %cst_15 = arith.constant dense<0.000000e+00> : vector<128xf32>
    %13 = vector.multi_reduction <add>, %7, %cst_15 [1] : vector<128x32xf32> to vector<128xf32>
    %14 = vector.shape_cast %13 : vector<128xf32> to vector<128x1xf32>
    %cst_16 = arith.constant 3.200000e+01 : f32
    %15 = vector.broadcast %cst_16 : f32 to vector<128x1xf32>
    %16 = arith.divf %14, %15 : vector<128x1xf32>
    %17 = vector.broadcast %16 : vector<128x1xf32> to vector<128x32xf32>
    %18 = arith.subf %7, %17 : vector<128x32xf32>
    %19 = arith.mulf %18, %18 : vector<128x32xf32>
    %cst_17 = arith.constant dense<0.000000e+00> : vector<128xf32>
    %20 = vector.multi_reduction <add>, %19, %cst_17 [1] : vector<128x32xf32> to vector<128xf32>
    %21 = vector.shape_cast %20 : vector<128xf32> to vector<128x1xf32>
    %cst_18 = arith.constant 3.200000e+01 : f32
    %22 = vector.broadcast %cst_18 : f32 to vector<128x1xf32>
    %23 = arith.divf %21, %22 : vector<128x1xf32>
    %cst_19 = arith.constant 9.99999974E-6 : f32
    %24 = vector.broadcast %cst_19 : f32 to vector<128x1xf32>
    %25 = arith.addf %23, %24 : vector<128x1xf32>
    %26 = math.rsqrt %25 : vector<128x1xf32>
    %27 = vector.broadcast %26 : vector<128x1xf32> to vector<128x32xf32>
    %28 = arith.mulf %18, %27 : vector<128x32xf32>
    %29 = vector.broadcast %10 : vector<1x32xf32> to vector<128x32xf32>
    %30 = arith.mulf %28, %29 : vector<128x32xf32>
    %31 = vector.broadcast %12 : vector<1x32xf32> to vector<128x32xf32>
    %32 = arith.addf %30, %31 : vector<128x32xf32>
    %33 = arith.truncf %32 : vector<128x32xf32> to vector<128x32xbf16>
    %c0_20 = arith.constant 0 : index
    %c0_21 = arith.constant 0 : index
    %c0_22 = arith.constant 0 : index
    %34 = vector.load %arg9[%c0_20, %c0_21, %c0_22] : memref<2x32x96xbf16, #tpu.memory_space<vmem>>, vector<1x32x96xbf16>
    %35 = vector.shape_cast %34 : vector<1x32x96xbf16> to vector<32x96xbf16>
    %cst_23 = arith.constant dense<0.000000e+00> : vector<128x96xf32>
    %36 = tpu.matmul %33, %35, %cst_23 {dimension_numbers = #tpu.dot_dimension_numbers<[1], [0], [0], [1], [0, 0, 1, 1], [], []>} : vector<128x32xbf16>, vector<32x96xbf16>, vector<128x96xf32> -> vector<128x96xf32>
    %cst_24 = arith.constant 0.000000e+00 : f32
    %37 = vector.broadcast %cst_24 : f32 to vector<128x32xf32>
    %38 = vector.extract_strided_slice %36 {offsets = [0, 0], sizes = [128, 8], strides = [1, 1]} : vector<128x96xf32> to vector<128x8xf32>
    %cst_25 = arith.constant 0.353553385 : f32
    %39 = vector.broadcast %cst_25 : f32 to vector<128x8xf32>
    %40 = arith.mulf %38, %39 : vector<128x8xf32>
    %41 = arith.truncf %40 : vector<128x8xf32> to vector<128x8xbf16>
    %42 = vector.extract_strided_slice %36 {offsets = [0, 32], sizes = [128, 8], strides = [1, 1]} : vector<128x96xf32> to vector<128x8xf32>
    %43 = arith.truncf %42 : vector<128x8xf32> to vector<128x8xbf16>
    %44 = vector.extract_strided_slice %36 {offsets = [0, 64], sizes = [128, 8], strides = [1, 1]} : vector<128x96xf32> to vector<128x8xf32>
    %45 = arith.truncf %44 : vector<128x8xf32> to vector<128x8xbf16>
    %cst_26 = arith.constant dense<0.000000e+00> : vector<128x128xf32>
    %46 = tpu.matmul %41, %43, %cst_26 {dimension_numbers = #tpu.dot_dimension_numbers<[1], [1], [0], [0], [0, 0, 1, 0], [], []>} : vector<128x8xbf16>, vector<128x8xbf16>, vector<128x128xf32> -> vector<128x128xf32>
    %47 = arith.addf %46, %8 : vector<128x128xf32>
    %cst_27 = arith.constant dense<0xFF800000> : vector<128xf32>
    %48 = vector.multi_reduction <maximumf>, %47, %cst_27 [1] : vector<128x128xf32> to vector<128xf32>
    %49 = vector.shape_cast %48 : vector<128xf32> to vector<128x1xf32>
    %50 = vector.broadcast %49 : vector<128x1xf32> to vector<128x128xf32>
    %51 = arith.subf %47, %50 : vector<128x128xf32>
    %52 = math.exp %51 : vector<128x128xf32>
    %cst_28 = arith.constant dense<0.000000e+00> : vector<128xf32>
    %53 = vector.multi_reduction <add>, %52, %cst_28 [1] : vector<128x128xf32> to vector<128xf32>
    %54 = vector.shape_cast %53 : vector<128xf32> to vector<128x1xf32>
    %55 = tpu.reciprocal %54 {approx = true} : vector<128x1xf32> -> vector<128x1xf32>
    %c0_29 = arith.constant 0 : index
    %c0_30 = arith.constant 0 : index
    %c0_31 = arith.constant 0 : index
    %c0_32 = arith.constant 0 : index
    %56 = vector.load %arg10[%c0_29, %c0_30, %c0_31, %c0_32] : memref<2x4x8x32xbf16, #tpu.memory_space<vmem>>, vector<1x1x8x32xbf16>
    %57 = vector.shape_cast %56 : vector<1x1x8x32xbf16> to vector<8x32xbf16>
    %cst_33 = arith.constant dense<0.000000e+00> : vector<128x32xf32>
    %58 = tpu.matmul %45, %57, %cst_33 {dimension_numbers = #tpu.dot_dimension_numbers<[1], [0], [0], [1], [0, 0, 1, 1], [], []>} : vector<128x8xbf16>, vector<8x32xbf16>, vector<128x32xf32> -> vector<128x32xf32>
    %59 = arith.truncf %52 : vector<128x128xf32> to vector<128x128xbf16>
    %60 = arith.truncf %58 : vector<128x32xf32> to vector<128x32xbf16>
    %cst_34 = arith.constant dense<0.000000e+00> : vector<128x32xf32>
    %61 = tpu.matmul %59, %60, %cst_34 {dimension_numbers = #tpu.dot_dimension_numbers<[1], [0], [0], [1], [0, 0, 1, 1], [], []>} : vector<128x128xbf16>, vector<128x32xbf16>, vector<128x32xf32> -> vector<128x32xf32>
    %62 = vector.broadcast %55 : vector<128x1xf32> to vector<128x32xf32>
    %63 = arith.mulf %61, %62 : vector<128x32xf32>
    %64 = arith.addf %37, %63 : vector<128x32xf32>
    %65 = vector.extract_strided_slice %36 {offsets = [0, 8], sizes = [128, 8], strides = [1, 1]} : vector<128x96xf32> to vector<128x8xf32>
    %cst_35 = arith.constant 0.353553385 : f32
    %66 = vector.broadcast %cst_35 : f32 to vector<128x8xf32>
    %67 = arith.mulf %65, %66 : vector<128x8xf32>
    %68 = arith.truncf %67 : vector<128x8xf32> to vector<128x8xbf16>
    %69 = vector.extract_strided_slice %36 {offsets = [0, 40], sizes = [128, 8], strides = [1, 1]} : vector<128x96xf32> to vector<128x8xf32>
    %70 = arith.truncf %69 : vector<128x8xf32> to vector<128x8xbf16>
    %71 = vector.extract_strided_slice %36 {offsets = [0, 72], sizes = [128, 8], strides = [1, 1]} : vector<128x96xf32> to vector<128x8xf32>
    %72 = arith.truncf %71 : vector<128x8xf32> to vector<128x8xbf16>
    %cst_36 = arith.constant dense<0.000000e+00> : vector<128x128xf32>
    %73 = tpu.matmul %68, %70, %cst_36 {dimension_numbers = #tpu.dot_dimension_numbers<[1], [1], [0], [0], [0, 0, 1, 0], [], []>} : vector<128x8xbf16>, vector<128x8xbf16>, vector<128x128xf32> -> vector<128x128xf32>
    %74 = arith.addf %73, %8 : vector<128x128xf32>
    %cst_37 = arith.constant dense<0xFF800000> : vector<128xf32>
    %75 = vector.multi_reduction <maximumf>, %74, %cst_37 [1] : vector<128x128xf32> to vector<128xf32>
    %76 = vector.shape_cast %75 : vector<128xf32> to vector<128x1xf32>
    %77 = vector.broadcast %76 : vector<128x1xf32> to vector<128x128xf32>
    %78 = arith.subf %74, %77 : vector<128x128xf32>
    %79 = math.exp %78 : vector<128x128xf32>
    %cst_38 = arith.constant dense<0.000000e+00> : vector<128xf32>
    %80 = vector.multi_reduction <add>, %79, %cst_38 [1] : vector<128x128xf32> to vector<128xf32>
    %81 = vector.shape_cast %80 : vector<128xf32> to vector<128x1xf32>
    %82 = tpu.reciprocal %81 {approx = true} : vector<128x1xf32> -> vector<128x1xf32>
    %c0_39 = arith.constant 0 : index
    %c1 = arith.constant 1 : index
    %c0_40 = arith.constant 0 : index
    %c0_41 = arith.constant 0 : index
    %83 = vector.load %arg10[%c0_39, %c1, %c0_40, %c0_41] : memref<2x4x8x32xbf16, #tpu.memory_space<vmem>>, vector<1x1x8x32xbf16>
    %84 = vector.shape_cast %83 : vector<1x1x8x32xbf16> to vector<8x32xbf16>
    %cst_42 = arith.constant dense<0.000000e+00> : vector<128x32xf32>
    %85 = tpu.matmul %72, %84, %cst_42 {dimension_numbers = #tpu.dot_dimension_numbers<[1], [0], [0], [1], [0, 0, 1, 1], [], []>} : vector<128x8xbf16>, vector<8x32xbf16>, vector<128x32xf32> -> vector<128x32xf32>
    %86 = arith.truncf %79 : vector<128x128xf32> to vector<128x128xbf16>
    %87 = arith.truncf %85 : vector<128x32xf32> to vector<128x32xbf16>
    %cst_43 = arith.constant dense<0.000000e+00> : vector<128x32xf32>
    %88 = tpu.matmul %86, %87, %cst_43 {dimension_numbers = #tpu.dot_dimension_numbers<[1], [0], [0], [1], [0, 0, 1, 1], [], []>} : vector<128x128xbf16>, vector<128x32xbf16>, vector<128x32xf32> -> vector<128x32xf32>
    %89 = vector.broadcast %82 : vector<128x1xf32> to vector<128x32xf32>
    %90 = arith.mulf %88, %89 : vector<128x32xf32>
    %91 = arith.addf %64, %90 : vector<128x32xf32>
    %92 = vector.extract_strided_slice %36 {offsets = [0, 16], sizes = [128, 8], strides = [1, 1]} : vector<128x96xf32> to vector<128x8xf32>
    %cst_44 = arith.constant 0.353553385 : f32
    %93 = vector.broadcast %cst_44 : f32 to vector<128x8xf32>
    %94 = arith.mulf %92, %93 : vector<128x8xf32>
    %95 = arith.truncf %94 : vector<128x8xf32> to vector<128x8xbf16>
    %96 = vector.extract_strided_slice %36 {offsets = [0, 48], sizes = [128, 8], strides = [1, 1]} : vector<128x96xf32> to vector<128x8xf32>
    %97 = arith.truncf %96 : vector<128x8xf32> to vector<128x8xbf16>
    %98 = vector.extract_strided_slice %36 {offsets = [0, 80], sizes = [128, 8], strides = [1, 1]} : vector<128x96xf32> to vector<128x8xf32>
    %99 = arith.truncf %98 : vector<128x8xf32> to vector<128x8xbf16>
    %cst_45 = arith.constant dense<0.000000e+00> : vector<128x128xf32>
    %100 = tpu.matmul %95, %97, %cst_45 {dimension_numbers = #tpu.dot_dimension_numbers<[1], [1], [0], [0], [0, 0, 1, 0], [], []>} : vector<128x8xbf16>, vector<128x8xbf16>, vector<128x128xf32> -> vector<128x128xf32>
    %101 = arith.addf %100, %8 : vector<128x128xf32>
    %cst_46 = arith.constant dense<0xFF800000> : vector<128xf32>
    %102 = vector.multi_reduction <maximumf>, %101, %cst_46 [1] : vector<128x128xf32> to vector<128xf32>
    %103 = vector.shape_cast %102 : vector<128xf32> to vector<128x1xf32>
    %104 = vector.broadcast %103 : vector<128x1xf32> to vector<128x128xf32>
    %105 = arith.subf %101, %104 : vector<128x128xf32>
    %106 = math.exp %105 : vector<128x128xf32>
    %cst_47 = arith.constant dense<0.000000e+00> : vector<128xf32>
    %107 = vector.multi_reduction <add>, %106, %cst_47 [1] : vector<128x128xf32> to vector<128xf32>
    %108 = vector.shape_cast %107 : vector<128xf32> to vector<128x1xf32>
    %109 = tpu.reciprocal %108 {approx = true} : vector<128x1xf32> -> vector<128x1xf32>
    %c0_48 = arith.constant 0 : index
    %c2 = arith.constant 2 : index
    %c0_49 = arith.constant 0 : index
    %c0_50 = arith.constant 0 : index
    %110 = vector.load %arg10[%c0_48, %c2, %c0_49, %c0_50] : memref<2x4x8x32xbf16, #tpu.memory_space<vmem>>, vector<1x1x8x32xbf16>
    %111 = vector.shape_cast %110 : vector<1x1x8x32xbf16> to vector<8x32xbf16>
    %cst_51 = arith.constant dense<0.000000e+00> : vector<128x32xf32>
    %112 = tpu.matmul %99, %111, %cst_51 {dimension_numbers = #tpu.dot_dimension_numbers<[1], [0], [0], [1], [0, 0, 1, 1], [], []>} : vector<128x8xbf16>, vector<8x32xbf16>, vector<128x32xf32> -> vector<128x32xf32>
    %113 = arith.truncf %106 : vector<128x128xf32> to vector<128x128xbf16>
    %114 = arith.truncf %112 : vector<128x32xf32> to vector<128x32xbf16>
    %cst_52 = arith.constant dense<0.000000e+00> : vector<128x32xf32>
    %115 = tpu.matmul %113, %114, %cst_52 {dimension_numbers = #tpu.dot_dimension_numbers<[1], [0], [0], [1], [0, 0, 1, 1], [], []>} : vector<128x128xbf16>, vector<128x32xbf16>, vector<128x32xf32> -> vector<128x32xf32>
    %116 = vector.broadcast %109 : vector<128x1xf32> to vector<128x32xf32>
    %117 = arith.mulf %115, %116 : vector<128x32xf32>
    %118 = arith.addf %91, %117 : vector<128x32xf32>
    %119 = vector.extract_strided_slice %36 {offsets = [0, 24], sizes = [128, 8], strides = [1, 1]} : vector<128x96xf32> to vector<128x8xf32>
    %cst_53 = arith.constant 0.353553385 : f32
    %120 = vector.broadcast %cst_53 : f32 to vector<128x8xf32>
    %121 = arith.mulf %119, %120 : vector<128x8xf32>
    %122 = arith.truncf %121 : vector<128x8xf32> to vector<128x8xbf16>
    %123 = vector.extract_strided_slice %36 {offsets = [0, 56], sizes = [128, 8], strides = [1, 1]} : vector<128x96xf32> to vector<128x8xf32>
    %124 = arith.truncf %123 : vector<128x8xf32> to vector<128x8xbf16>
    %125 = vector.extract_strided_slice %36 {offsets = [0, 88], sizes = [128, 8], strides = [1, 1]} : vector<128x96xf32> to vector<128x8xf32>
    %126 = arith.truncf %125 : vector<128x8xf32> to vector<128x8xbf16>
    %cst_54 = arith.constant dense<0.000000e+00> : vector<128x128xf32>
    %127 = tpu.matmul %122, %124, %cst_54 {dimension_numbers = #tpu.dot_dimension_numbers<[1], [1], [0], [0], [0, 0, 1, 0], [], []>} : vector<128x8xbf16>, vector<128x8xbf16>, vector<128x128xf32> -> vector<128x128xf32>
    %128 = arith.addf %127, %8 : vector<128x128xf32>
    %cst_55 = arith.constant dense<0xFF800000> : vector<128xf32>
    %129 = vector.multi_reduction <maximumf>, %128, %cst_55 [1] : vector<128x128xf32> to vector<128xf32>
    %130 = vector.shape_cast %129 : vector<128xf32> to vector<128x1xf32>
    %131 = vector.broadcast %130 : vector<128x1xf32> to vector<128x128xf32>
    %132 = arith.subf %128, %131 : vector<128x128xf32>
    %133 = math.exp %132 : vector<128x128xf32>
    %cst_56 = arith.constant dense<0.000000e+00> : vector<128xf32>
    %134 = vector.multi_reduction <add>, %133, %cst_56 [1] : vector<128x128xf32> to vector<128xf32>
    %135 = vector.shape_cast %134 : vector<128xf32> to vector<128x1xf32>
    %136 = tpu.reciprocal %135 {approx = true} : vector<128x1xf32> -> vector<128x1xf32>
    %c0_57 = arith.constant 0 : index
    %c3 = arith.constant 3 : index
    %c0_58 = arith.constant 0 : index
    %c0_59 = arith.constant 0 : index
    %137 = vector.load %arg10[%c0_57, %c3, %c0_58, %c0_59] : memref<2x4x8x32xbf16, #tpu.memory_space<vmem>>, vector<1x1x8x32xbf16>
    %138 = vector.shape_cast %137 : vector<1x1x8x32xbf16> to vector<8x32xbf16>
    %cst_60 = arith.constant dense<0.000000e+00> : vector<128x32xf32>
    %139 = tpu.matmul %126, %138, %cst_60 {dimension_numbers = #tpu.dot_dimension_numbers<[1], [0], [0], [1], [0, 0, 1, 1], [], []>} : vector<128x8xbf16>, vector<8x32xbf16>, vector<128x32xf32> -> vector<128x32xf32>
    %140 = arith.truncf %133 : vector<128x128xf32> to vector<128x128xbf16>
    %141 = arith.truncf %139 : vector<128x32xf32> to vector<128x32xbf16>
    %cst_61 = arith.constant dense<0.000000e+00> : vector<128x32xf32>
    %142 = tpu.matmul %140, %141, %cst_61 {dimension_numbers = #tpu.dot_dimension_numbers<[1], [0], [0], [1], [0, 0, 1, 1], [], []>} : vector<128x128xbf16>, vector<128x32xbf16>, vector<128x32xf32> -> vector<128x32xf32>
    %143 = vector.broadcast %136 : vector<128x1xf32> to vector<128x32xf32>
    %144 = arith.mulf %142, %143 : vector<128x32xf32>
    %145 = arith.addf %118, %144 : vector<128x32xf32>
    %c0_62 = arith.constant 0 : index
    %c0_63 = arith.constant 0 : index
    %c0_64 = arith.constant 0 : index
    %146 = vector.load %arg11[%c0_62, %c0_63, %c0_64] : memref<2x1x32xf32, #tpu.memory_space<vmem>>, vector<1x1x32xf32>
    %147 = vector.shape_cast %146 : vector<1x1x32xf32> to vector<1x32xf32>
    %148 = vector.broadcast %147 : vector<1x32xf32> to vector<128x32xf32>
    %149 = arith.addf %145, %148 : vector<128x32xf32>
    %150 = arith.addf %149, %7 : vector<128x32xf32>
    %c0_65 = arith.constant 0 : index
    %c0_66 = arith.constant 0 : index
    %c0_67 = arith.constant 0 : index
    %151 = vector.load %arg12[%c0_65, %c0_66, %c0_67] : memref<2x1x32xf32, #tpu.memory_space<vmem>>, vector<1x1x32xf32>
    %152 = vector.shape_cast %151 : vector<1x1x32xf32> to vector<1x32xf32>
    %c0_68 = arith.constant 0 : index
    %c0_69 = arith.constant 0 : index
    %c0_70 = arith.constant 0 : index
    %153 = vector.load %arg13[%c0_68, %c0_69, %c0_70] : memref<2x1x32xf32, #tpu.memory_space<vmem>>, vector<1x1x32xf32>
    %154 = vector.shape_cast %153 : vector<1x1x32xf32> to vector<1x32xf32>
    %cst_71 = arith.constant dense<0.000000e+00> : vector<128xf32>
    %155 = vector.multi_reduction <add>, %150, %cst_71 [1] : vector<128x32xf32> to vector<128xf32>
    %156 = vector.shape_cast %155 : vector<128xf32> to vector<128x1xf32>
    %cst_72 = arith.constant 3.200000e+01 : f32
    %157 = vector.broadcast %cst_72 : f32 to vector<128x1xf32>
    %158 = arith.divf %156, %157 : vector<128x1xf32>
    %159 = vector.broadcast %158 : vector<128x1xf32> to vector<128x32xf32>
    %160 = arith.subf %150, %159 : vector<128x32xf32>
    %161 = arith.mulf %160, %160 : vector<128x32xf32>
    %cst_73 = arith.constant dense<0.000000e+00> : vector<128xf32>
    %162 = vector.multi_reduction <add>, %161, %cst_73 [1] : vector<128x32xf32> to vector<128xf32>
    %163 = vector.shape_cast %162 : vector<128xf32> to vector<128x1xf32>
    %cst_74 = arith.constant 3.200000e+01 : f32
    %164 = vector.broadcast %cst_74 : f32 to vector<128x1xf32>
    %165 = arith.divf %163, %164 : vector<128x1xf32>
    %cst_75 = arith.constant 9.99999974E-6 : f32
    %166 = vector.broadcast %cst_75 : f32 to vector<128x1xf32>
    %167 = arith.addf %165, %166 : vector<128x1xf32>
    %168 = math.rsqrt %167 : vector<128x1xf32>
    %169 = vector.broadcast %168 : vector<128x1xf32> to vector<128x32xf32>
    %170 = arith.mulf %160, %169 : vector<128x32xf32>
    %171 = vector.broadcast %152 : vector<1x32xf32> to vector<128x32xf32>
    %172 = arith.mulf %170, %171 : vector<128x32xf32>
    %173 = vector.broadcast %154 : vector<1x32xf32> to vector<128x32xf32>
    %174 = arith.addf %172, %173 : vector<128x32xf32>
    %175 = arith.truncf %174 : vector<128x32xf32> to vector<128x32xbf16>
    %c0_76 = arith.constant 0 : index
    %c0_77 = arith.constant 0 : index
    %c0_78 = arith.constant 0 : index
    %176 = vector.load %arg14[%c0_76, %c0_77, %c0_78] : memref<2x32x64xbf16, #tpu.memory_space<vmem>>, vector<1x32x64xbf16>
    %177 = vector.shape_cast %176 : vector<1x32x64xbf16> to vector<32x64xbf16>
    %cst_79 = arith.constant dense<0.000000e+00> : vector<128x64xf32>
    %178 = tpu.matmul %175, %177, %cst_79 {dimension_numbers = #tpu.dot_dimension_numbers<[1], [0], [0], [1], [0, 0, 1, 1], [], []>} : vector<128x32xbf16>, vector<32x64xbf16>, vector<128x64xf32> -> vector<128x64xf32>
    %c0_80 = arith.constant 0 : index
    %c0_81 = arith.constant 0 : index
    %c0_82 = arith.constant 0 : index
    %179 = vector.load %arg15[%c0_80, %c0_81, %c0_82] : memref<2x1x64xf32, #tpu.memory_space<vmem>>, vector<1x1x64xf32>
    %180 = vector.shape_cast %179 : vector<1x1x64xf32> to vector<1x64xf32>
    %181 = vector.broadcast %180 : vector<1x64xf32> to vector<128x64xf32>
    %182 = arith.addf %178, %181 : vector<128x64xf32>
    %cst_83 = arith.constant 5.000000e-01 : f32
    %183 = vector.broadcast %cst_83 : f32 to vector<128x64xf32>
    %184 = arith.mulf %183, %182 : vector<128x64xf32>
    %185 = arith.mulf %182, %182 : vector<128x64xf32>
    %186 = arith.mulf %185, %182 : vector<128x64xf32>
    %cst_84 = arith.constant 4.471500e-02 : f32
    %187 = vector.broadcast %cst_84 : f32 to vector<128x64xf32>
    %188 = arith.mulf %187, %186 : vector<128x64xf32>
    %189 = arith.addf %182, %188 : vector<128x64xf32>
    %cst_85 = arith.constant 0.797884583 : f32
    %190 = vector.broadcast %cst_85 : f32 to vector<128x64xf32>
    %191 = arith.mulf %190, %189 : vector<128x64xf32>
    %192 = math.tanh %191 : vector<128x64xf32>
    %cst_86 = arith.constant 1.000000e+00 : f32
    %193 = vector.broadcast %cst_86 : f32 to vector<128x64xf32>
    %194 = arith.addf %193, %192 : vector<128x64xf32>
    %195 = arith.mulf %184, %194 : vector<128x64xf32>
    %196 = arith.truncf %195 : vector<128x64xf32> to vector<128x64xbf16>
    %c0_87 = arith.constant 0 : index
    %c0_88 = arith.constant 0 : index
    %c0_89 = arith.constant 0 : index
    %197 = vector.load %arg16[%c0_87, %c0_88, %c0_89] : memref<2x64x32xbf16, #tpu.memory_space<vmem>>, vector<1x64x32xbf16>
    %198 = vector.shape_cast %197 : vector<1x64x32xbf16> to vector<64x32xbf16>
    %cst_90 = arith.constant dense<0.000000e+00> : vector<128x32xf32>
    %199 = tpu.matmul %196, %198, %cst_90 {dimension_numbers = #tpu.dot_dimension_numbers<[1], [0], [0], [1], [0, 0, 1, 1], [], []>} : vector<128x64xbf16>, vector<64x32xbf16>, vector<128x32xf32> -> vector<128x32xf32>
    %c0_91 = arith.constant 0 : index
    %c0_92 = arith.constant 0 : index
    %c0_93 = arith.constant 0 : index
    %200 = vector.load %arg17[%c0_91, %c0_92, %c0_93] : memref<2x1x32xf32, #tpu.memory_space<vmem>>, vector<1x1x32xf32>
    %201 = vector.shape_cast %200 : vector<1x1x32xf32> to vector<1x32xf32>
    %202 = vector.broadcast %201 : vector<1x32xf32> to vector<128x32xf32>
    %203 = arith.addf %199, %202 : vector<128x32xf32>
    %204 = arith.addf %203, %150 : vector<128x32xf32>
    %c1_94 = arith.constant 1 : index
    %c0_95 = arith.constant 0 : index
    %c0_96 = arith.constant 0 : index
    %205 = vector.load %arg7[%c1_94, %c0_95, %c0_96] : memref<2x1x32xf32, #tpu.memory_space<vmem>>, vector<1x1x32xf32>
    %206 = vector.shape_cast %205 : vector<1x1x32xf32> to vector<1x32xf32>
    %c1_97 = arith.constant 1 : index
    %c0_98 = arith.constant 0 : index
    %c0_99 = arith.constant 0 : index
    %207 = vector.load %arg8[%c1_97, %c0_98, %c0_99] : memref<2x1x32xf32, #tpu.memory_space<vmem>>, vector<1x1x32xf32>
    %208 = vector.shape_cast %207 : vector<1x1x32xf32> to vector<1x32xf32>
    %cst_100 = arith.constant dense<0.000000e+00> : vector<128xf32>
    %209 = vector.multi_reduction <add>, %204, %cst_100 [1] : vector<128x32xf32> to vector<128xf32>
    %210 = vector.shape_cast %209 : vector<128xf32> to vector<128x1xf32>
    %cst_101 = arith.constant 3.200000e+01 : f32
    %211 = vector.broadcast %cst_101 : f32 to vector<128x1xf32>
    %212 = arith.divf %210, %211 : vector<128x1xf32>
    %213 = vector.broadcast %212 : vector<128x1xf32> to vector<128x32xf32>
    %214 = arith.subf %204, %213 : vector<128x32xf32>
    %215 = arith.mulf %214, %214 : vector<128x32xf32>
    %cst_102 = arith.constant dense<0.000000e+00> : vector<128xf32>
    %216 = vector.multi_reduction <add>, %215, %cst_102 [1] : vector<128x32xf32> to vector<128xf32>
    %217 = vector.shape_cast %216 : vector<128xf32> to vector<128x1xf32>
    %cst_103 = arith.constant 3.200000e+01 : f32
    %218 = vector.broadcast %cst_103 : f32 to vector<128x1xf32>
    %219 = arith.divf %217, %218 : vector<128x1xf32>
    %cst_104 = arith.constant 9.99999974E-6 : f32
    %220 = vector.broadcast %cst_104 : f32 to vector<128x1xf32>
    %221 = arith.addf %219, %220 : vector<128x1xf32>
    %222 = math.rsqrt %221 : vector<128x1xf32>
    %223 = vector.broadcast %222 : vector<128x1xf32> to vector<128x32xf32>
    %224 = arith.mulf %214, %223 : vector<128x32xf32>
    %225 = vector.broadcast %206 : vector<1x32xf32> to vector<128x32xf32>
    %226 = arith.mulf %224, %225 : vector<128x32xf32>
    %227 = vector.broadcast %208 : vector<1x32xf32> to vector<128x32xf32>
    %228 = arith.addf %226, %227 : vector<128x32xf32>
    %229 = arith.truncf %228 : vector<128x32xf32> to vector<128x32xbf16>
    %c1_105 = arith.constant 1 : index
    %c0_106 = arith.constant 0 : index
    %c0_107 = arith.constant 0 : index
    %230 = vector.load %arg9[%c1_105, %c0_106, %c0_107] : memref<2x32x96xbf16, #tpu.memory_space<vmem>>, vector<1x32x96xbf16>
    %231 = vector.shape_cast %230 : vector<1x32x96xbf16> to vector<32x96xbf16>
    %cst_108 = arith.constant dense<0.000000e+00> : vector<128x96xf32>
    %232 = tpu.matmul %229, %231, %cst_108 {dimension_numbers = #tpu.dot_dimension_numbers<[1], [0], [0], [1], [0, 0, 1, 1], [], []>} : vector<128x32xbf16>, vector<32x96xbf16>, vector<128x96xf32> -> vector<128x96xf32>
    %cst_109 = arith.constant 0.000000e+00 : f32
    %233 = vector.broadcast %cst_109 : f32 to vector<128x32xf32>
    %234 = vector.extract_strided_slice %232 {offsets = [0, 0], sizes = [128, 8], strides = [1, 1]} : vector<128x96xf32> to vector<128x8xf32>
    %cst_110 = arith.constant 0.353553385 : f32
    %235 = vector.broadcast %cst_110 : f32 to vector<128x8xf32>
    %236 = arith.mulf %234, %235 : vector<128x8xf32>
    %237 = arith.truncf %236 : vector<128x8xf32> to vector<128x8xbf16>
    %238 = vector.extract_strided_slice %232 {offsets = [0, 32], sizes = [128, 8], strides = [1, 1]} : vector<128x96xf32> to vector<128x8xf32>
    %239 = arith.truncf %238 : vector<128x8xf32> to vector<128x8xbf16>
    %240 = vector.extract_strided_slice %232 {offsets = [0, 64], sizes = [128, 8], strides = [1, 1]} : vector<128x96xf32> to vector<128x8xf32>
    %241 = arith.truncf %240 : vector<128x8xf32> to vector<128x8xbf16>
    %cst_111 = arith.constant dense<0.000000e+00> : vector<128x128xf32>
    %242 = tpu.matmul %237, %239, %cst_111 {dimension_numbers = #tpu.dot_dimension_numbers<[1], [1], [0], [0], [0, 0, 1, 0], [], []>} : vector<128x8xbf16>, vector<128x8xbf16>, vector<128x128xf32> -> vector<128x128xf32>
    %243 = arith.addf %242, %8 : vector<128x128xf32>
    %cst_112 = arith.constant dense<0xFF800000> : vector<128xf32>
    %244 = vector.multi_reduction <maximumf>, %243, %cst_112 [1] : vector<128x128xf32> to vector<128xf32>
    %245 = vector.shape_cast %244 : vector<128xf32> to vector<128x1xf32>
    %246 = vector.broadcast %245 : vector<128x1xf32> to vector<128x128xf32>
    %247 = arith.subf %243, %246 : vector<128x128xf32>
    %248 = math.exp %247 : vector<128x128xf32>
    %cst_113 = arith.constant dense<0.000000e+00> : vector<128xf32>
    %249 = vector.multi_reduction <add>, %248, %cst_113 [1] : vector<128x128xf32> to vector<128xf32>
    %250 = vector.shape_cast %249 : vector<128xf32> to vector<128x1xf32>
    %251 = tpu.reciprocal %250 {approx = true} : vector<128x1xf32> -> vector<128x1xf32>
    %c1_114 = arith.constant 1 : index
    %c0_115 = arith.constant 0 : index
    %c0_116 = arith.constant 0 : index
    %c0_117 = arith.constant 0 : index
    %252 = vector.load %arg10[%c1_114, %c0_115, %c0_116, %c0_117] : memref<2x4x8x32xbf16, #tpu.memory_space<vmem>>, vector<1x1x8x32xbf16>
    %253 = vector.shape_cast %252 : vector<1x1x8x32xbf16> to vector<8x32xbf16>
    %cst_118 = arith.constant dense<0.000000e+00> : vector<128x32xf32>
    %254 = tpu.matmul %241, %253, %cst_118 {dimension_numbers = #tpu.dot_dimension_numbers<[1], [0], [0], [1], [0, 0, 1, 1], [], []>} : vector<128x8xbf16>, vector<8x32xbf16>, vector<128x32xf32> -> vector<128x32xf32>
    %255 = arith.truncf %248 : vector<128x128xf32> to vector<128x128xbf16>
    %256 = arith.truncf %254 : vector<128x32xf32> to vector<128x32xbf16>
    %cst_119 = arith.constant dense<0.000000e+00> : vector<128x32xf32>
    %257 = tpu.matmul %255, %256, %cst_119 {dimension_numbers = #tpu.dot_dimension_numbers<[1], [0], [0], [1], [0, 0, 1, 1], [], []>} : vector<128x128xbf16>, vector<128x32xbf16>, vector<128x32xf32> -> vector<128x32xf32>
    %258 = vector.broadcast %251 : vector<128x1xf32> to vector<128x32xf32>
    %259 = arith.mulf %257, %258 : vector<128x32xf32>
    %260 = arith.addf %233, %259 : vector<128x32xf32>
    %261 = vector.extract_strided_slice %232 {offsets = [0, 8], sizes = [128, 8], strides = [1, 1]} : vector<128x96xf32> to vector<128x8xf32>
    %cst_120 = arith.constant 0.353553385 : f32
    %262 = vector.broadcast %cst_120 : f32 to vector<128x8xf32>
    %263 = arith.mulf %261, %262 : vector<128x8xf32>
    %264 = arith.truncf %263 : vector<128x8xf32> to vector<128x8xbf16>
    %265 = vector.extract_strided_slice %232 {offsets = [0, 40], sizes = [128, 8], strides = [1, 1]} : vector<128x96xf32> to vector<128x8xf32>
    %266 = arith.truncf %265 : vector<128x8xf32> to vector<128x8xbf16>
    %267 = vector.extract_strided_slice %232 {offsets = [0, 72], sizes = [128, 8], strides = [1, 1]} : vector<128x96xf32> to vector<128x8xf32>
    %268 = arith.truncf %267 : vector<128x8xf32> to vector<128x8xbf16>
    %cst_121 = arith.constant dense<0.000000e+00> : vector<128x128xf32>
    %269 = tpu.matmul %264, %266, %cst_121 {dimension_numbers = #tpu.dot_dimension_numbers<[1], [1], [0], [0], [0, 0, 1, 0], [], []>} : vector<128x8xbf16>, vector<128x8xbf16>, vector<128x128xf32> -> vector<128x128xf32>
    %270 = arith.addf %269, %8 : vector<128x128xf32>
    %cst_122 = arith.constant dense<0xFF800000> : vector<128xf32>
    %271 = vector.multi_reduction <maximumf>, %270, %cst_122 [1] : vector<128x128xf32> to vector<128xf32>
    %272 = vector.shape_cast %271 : vector<128xf32> to vector<128x1xf32>
    %273 = vector.broadcast %272 : vector<128x1xf32> to vector<128x128xf32>
    %274 = arith.subf %270, %273 : vector<128x128xf32>
    %275 = math.exp %274 : vector<128x128xf32>
    %cst_123 = arith.constant dense<0.000000e+00> : vector<128xf32>
    %276 = vector.multi_reduction <add>, %275, %cst_123 [1] : vector<128x128xf32> to vector<128xf32>
    %277 = vector.shape_cast %276 : vector<128xf32> to vector<128x1xf32>
    %278 = tpu.reciprocal %277 {approx = true} : vector<128x1xf32> -> vector<128x1xf32>
    %c1_124 = arith.constant 1 : index
    %c1_125 = arith.constant 1 : index
    %c0_126 = arith.constant 0 : index
    %c0_127 = arith.constant 0 : index
    %279 = vector.load %arg10[%c1_124, %c1_125, %c0_126, %c0_127] : memref<2x4x8x32xbf16, #tpu.memory_space<vmem>>, vector<1x1x8x32xbf16>
    %280 = vector.shape_cast %279 : vector<1x1x8x32xbf16> to vector<8x32xbf16>
    %cst_128 = arith.constant dense<0.000000e+00> : vector<128x32xf32>
    %281 = tpu.matmul %268, %280, %cst_128 {dimension_numbers = #tpu.dot_dimension_numbers<[1], [0], [0], [1], [0, 0, 1, 1], [], []>} : vector<128x8xbf16>, vector<8x32xbf16>, vector<128x32xf32> -> vector<128x32xf32>
    %282 = arith.truncf %275 : vector<128x128xf32> to vector<128x128xbf16>
    %283 = arith.truncf %281 : vector<128x32xf32> to vector<128x32xbf16>
    %cst_129 = arith.constant dense<0.000000e+00> : vector<128x32xf32>
    %284 = tpu.matmul %282, %283, %cst_129 {dimension_numbers = #tpu.dot_dimension_numbers<[1], [0], [0], [1], [0, 0, 1, 1], [], []>} : vector<128x128xbf16>, vector<128x32xbf16>, vector<128x32xf32> -> vector<128x32xf32>
    %285 = vector.broadcast %278 : vector<128x1xf32> to vector<128x32xf32>
    %286 = arith.mulf %284, %285 : vector<128x32xf32>
    %287 = arith.addf %260, %286 : vector<128x32xf32>
    %288 = vector.extract_strided_slice %232 {offsets = [0, 16], sizes = [128, 8], strides = [1, 1]} : vector<128x96xf32> to vector<128x8xf32>
    %cst_130 = arith.constant 0.353553385 : f32
    %289 = vector.broadcast %cst_130 : f32 to vector<128x8xf32>
    %290 = arith.mulf %288, %289 : vector<128x8xf32>
    %291 = arith.truncf %290 : vector<128x8xf32> to vector<128x8xbf16>
    %292 = vector.extract_strided_slice %232 {offsets = [0, 48], sizes = [128, 8], strides = [1, 1]} : vector<128x96xf32> to vector<128x8xf32>
    %293 = arith.truncf %292 : vector<128x8xf32> to vector<128x8xbf16>
    %294 = vector.extract_strided_slice %232 {offsets = [0, 80], sizes = [128, 8], strides = [1, 1]} : vector<128x96xf32> to vector<128x8xf32>
    %295 = arith.truncf %294 : vector<128x8xf32> to vector<128x8xbf16>
    %cst_131 = arith.constant dense<0.000000e+00> : vector<128x128xf32>
    %296 = tpu.matmul %291, %293, %cst_131 {dimension_numbers = #tpu.dot_dimension_numbers<[1], [1], [0], [0], [0, 0, 1, 0], [], []>} : vector<128x8xbf16>, vector<128x8xbf16>, vector<128x128xf32> -> vector<128x128xf32>
    %297 = arith.addf %296, %8 : vector<128x128xf32>
    %cst_132 = arith.constant dense<0xFF800000> : vector<128xf32>
    %298 = vector.multi_reduction <maximumf>, %297, %cst_132 [1] : vector<128x128xf32> to vector<128xf32>
    %299 = vector.shape_cast %298 : vector<128xf32> to vector<128x1xf32>
    %300 = vector.broadcast %299 : vector<128x1xf32> to vector<128x128xf32>
    %301 = arith.subf %297, %300 : vector<128x128xf32>
    %302 = math.exp %301 : vector<128x128xf32>
    %cst_133 = arith.constant dense<0.000000e+00> : vector<128xf32>
    %303 = vector.multi_reduction <add>, %302, %cst_133 [1] : vector<128x128xf32> to vector<128xf32>
    %304 = vector.shape_cast %303 : vector<128xf32> to vector<128x1xf32>
    %305 = tpu.reciprocal %304 {approx = true} : vector<128x1xf32> -> vector<128x1xf32>
    %c1_134 = arith.constant 1 : index
    %c2_135 = arith.constant 2 : index
    %c0_136 = arith.constant 0 : index
    %c0_137 = arith.constant 0 : index
    %306 = vector.load %arg10[%c1_134, %c2_135, %c0_136, %c0_137] : memref<2x4x8x32xbf16, #tpu.memory_space<vmem>>, vector<1x1x8x32xbf16>
    %307 = vector.shape_cast %306 : vector<1x1x8x32xbf16> to vector<8x32xbf16>
    %cst_138 = arith.constant dense<0.000000e+00> : vector<128x32xf32>
    %308 = tpu.matmul %295, %307, %cst_138 {dimension_numbers = #tpu.dot_dimension_numbers<[1], [0], [0], [1], [0, 0, 1, 1], [], []>} : vector<128x8xbf16>, vector<8x32xbf16>, vector<128x32xf32> -> vector<128x32xf32>
    %309 = arith.truncf %302 : vector<128x128xf32> to vector<128x128xbf16>
    %310 = arith.truncf %308 : vector<128x32xf32> to vector<128x32xbf16>
    %cst_139 = arith.constant dense<0.000000e+00> : vector<128x32xf32>
    %311 = tpu.matmul %309, %310, %cst_139 {dimension_numbers = #tpu.dot_dimension_numbers<[1], [0], [0], [1], [0, 0, 1, 1], [], []>} : vector<128x128xbf16>, vector<128x32xbf16>, vector<128x32xf32> -> vector<128x32xf32>
    %312 = vector.broadcast %305 : vector<128x1xf32> to vector<128x32xf32>
    %313 = arith.mulf %311, %312 : vector<128x32xf32>
    %314 = arith.addf %287, %313 : vector<128x32xf32>
    %315 = vector.extract_strided_slice %232 {offsets = [0, 24], sizes = [128, 8], strides = [1, 1]} : vector<128x96xf32> to vector<128x8xf32>
    %cst_140 = arith.constant 0.353553385 : f32
    %316 = vector.broadcast %cst_140 : f32 to vector<128x8xf32>
    %317 = arith.mulf %315, %316 : vector<128x8xf32>
    %318 = arith.truncf %317 : vector<128x8xf32> to vector<128x8xbf16>
    %319 = vector.extract_strided_slice %232 {offsets = [0, 56], sizes = [128, 8], strides = [1, 1]} : vector<128x96xf32> to vector<128x8xf32>
    %320 = arith.truncf %319 : vector<128x8xf32> to vector<128x8xbf16>
    %321 = vector.extract_strided_slice %232 {offsets = [0, 88], sizes = [128, 8], strides = [1, 1]} : vector<128x96xf32> to vector<128x8xf32>
    %322 = arith.truncf %321 : vector<128x8xf32> to vector<128x8xbf16>
    %cst_141 = arith.constant dense<0.000000e+00> : vector<128x128xf32>
    %323 = tpu.matmul %318, %320, %cst_141 {dimension_numbers = #tpu.dot_dimension_numbers<[1], [1], [0], [0], [0, 0, 1, 0], [], []>} : vector<128x8xbf16>, vector<128x8xbf16>, vector<128x128xf32> -> vector<128x128xf32>
    %324 = arith.addf %323, %8 : vector<128x128xf32>
    %cst_142 = arith.constant dense<0xFF800000> : vector<128xf32>
    %325 = vector.multi_reduction <maximumf>, %324, %cst_142 [1] : vector<128x128xf32> to vector<128xf32>
    %326 = vector.shape_cast %325 : vector<128xf32> to vector<128x1xf32>
    %327 = vector.broadcast %326 : vector<128x1xf32> to vector<128x128xf32>
    %328 = arith.subf %324, %327 : vector<128x128xf32>
    %329 = math.exp %328 : vector<128x128xf32>
    %cst_143 = arith.constant dense<0.000000e+00> : vector<128xf32>
    %330 = vector.multi_reduction <add>, %329, %cst_143 [1] : vector<128x128xf32> to vector<128xf32>
    %331 = vector.shape_cast %330 : vector<128xf32> to vector<128x1xf32>
    %332 = tpu.reciprocal %331 {approx = true} : vector<128x1xf32> -> vector<128x1xf32>
    %c1_144 = arith.constant 1 : index
    %c3_145 = arith.constant 3 : index
    %c0_146 = arith.constant 0 : index
    %c0_147 = arith.constant 0 : index
    %333 = vector.load %arg10[%c1_144, %c3_145, %c0_146, %c0_147] : memref<2x4x8x32xbf16, #tpu.memory_space<vmem>>, vector<1x1x8x32xbf16>
    %334 = vector.shape_cast %333 : vector<1x1x8x32xbf16> to vector<8x32xbf16>
    %cst_148 = arith.constant dense<0.000000e+00> : vector<128x32xf32>
    %335 = tpu.matmul %322, %334, %cst_148 {dimension_numbers = #tpu.dot_dimension_numbers<[1], [0], [0], [1], [0, 0, 1, 1], [], []>} : vector<128x8xbf16>, vector<8x32xbf16>, vector<128x32xf32> -> vector<128x32xf32>
    %336 = arith.truncf %329 : vector<128x128xf32> to vector<128x128xbf16>
    %337 = arith.truncf %335 : vector<128x32xf32> to vector<128x32xbf16>
    %cst_149 = arith.constant dense<0.000000e+00> : vector<128x32xf32>
    %338 = tpu.matmul %336, %337, %cst_149 {dimension_numbers = #tpu.dot_dimension_numbers<[1], [0], [0], [1], [0, 0, 1, 1], [], []>} : vector<128x128xbf16>, vector<128x32xbf16>, vector<128x32xf32> -> vector<128x32xf32>
    %339 = vector.broadcast %332 : vector<128x1xf32> to vector<128x32xf32>
    %340 = arith.mulf %338, %339 : vector<128x32xf32>
    %341 = arith.addf %314, %340 : vector<128x32xf32>
    %c1_150 = arith.constant 1 : index
    %c0_151 = arith.constant 0 : index
    %c0_152 = arith.constant 0 : index
    %342 = vector.load %arg11[%c1_150, %c0_151, %c0_152] : memref<2x1x32xf32, #tpu.memory_space<vmem>>, vector<1x1x32xf32>
    %343 = vector.shape_cast %342 : vector<1x1x32xf32> to vector<1x32xf32>
    %344 = vector.broadcast %343 : vector<1x32xf32> to vector<128x32xf32>
    %345 = arith.addf %341, %344 : vector<128x32xf32>
    %346 = arith.addf %345, %204 : vector<128x32xf32>
    %c1_153 = arith.constant 1 : index
    %c0_154 = arith.constant 0 : index
    %c0_155 = arith.constant 0 : index
    %347 = vector.load %arg12[%c1_153, %c0_154, %c0_155] : memref<2x1x32xf32, #tpu.memory_space<vmem>>, vector<1x1x32xf32>
    %348 = vector.shape_cast %347 : vector<1x1x32xf32> to vector<1x32xf32>
    %c1_156 = arith.constant 1 : index
    %c0_157 = arith.constant 0 : index
    %c0_158 = arith.constant 0 : index
    %349 = vector.load %arg13[%c1_156, %c0_157, %c0_158] : memref<2x1x32xf32, #tpu.memory_space<vmem>>, vector<1x1x32xf32>
    %350 = vector.shape_cast %349 : vector<1x1x32xf32> to vector<1x32xf32>
    %cst_159 = arith.constant dense<0.000000e+00> : vector<128xf32>
    %351 = vector.multi_reduction <add>, %346, %cst_159 [1] : vector<128x32xf32> to vector<128xf32>
    %352 = vector.shape_cast %351 : vector<128xf32> to vector<128x1xf32>
    %cst_160 = arith.constant 3.200000e+01 : f32
    %353 = vector.broadcast %cst_160 : f32 to vector<128x1xf32>
    %354 = arith.divf %352, %353 : vector<128x1xf32>
    %355 = vector.broadcast %354 : vector<128x1xf32> to vector<128x32xf32>
    %356 = arith.subf %346, %355 : vector<128x32xf32>
    %357 = arith.mulf %356, %356 : vector<128x32xf32>
    %cst_161 = arith.constant dense<0.000000e+00> : vector<128xf32>
    %358 = vector.multi_reduction <add>, %357, %cst_161 [1] : vector<128x32xf32> to vector<128xf32>
    %359 = vector.shape_cast %358 : vector<128xf32> to vector<128x1xf32>
    %cst_162 = arith.constant 3.200000e+01 : f32
    %360 = vector.broadcast %cst_162 : f32 to vector<128x1xf32>
    %361 = arith.divf %359, %360 : vector<128x1xf32>
    %cst_163 = arith.constant 9.99999974E-6 : f32
    %362 = vector.broadcast %cst_163 : f32 to vector<128x1xf32>
    %363 = arith.addf %361, %362 : vector<128x1xf32>
    %364 = math.rsqrt %363 : vector<128x1xf32>
    %365 = vector.broadcast %364 : vector<128x1xf32> to vector<128x32xf32>
    %366 = arith.mulf %356, %365 : vector<128x32xf32>
    %367 = vector.broadcast %348 : vector<1x32xf32> to vector<128x32xf32>
    %368 = arith.mulf %366, %367 : vector<128x32xf32>
    %369 = vector.broadcast %350 : vector<1x32xf32> to vector<128x32xf32>
    %370 = arith.addf %368, %369 : vector<128x32xf32>
    %371 = arith.truncf %370 : vector<128x32xf32> to vector<128x32xbf16>
    %c1_164 = arith.constant 1 : index
    %c0_165 = arith.constant 0 : index
    %c0_166 = arith.constant 0 : index
    %372 = vector.load %arg14[%c1_164, %c0_165, %c0_166] : memref<2x32x64xbf16, #tpu.memory_space<vmem>>, vector<1x32x64xbf16>
    %373 = vector.shape_cast %372 : vector<1x32x64xbf16> to vector<32x64xbf16>
    %cst_167 = arith.constant dense<0.000000e+00> : vector<128x64xf32>
    %374 = tpu.matmul %371, %373, %cst_167 {dimension_numbers = #tpu.dot_dimension_numbers<[1], [0], [0], [1], [0, 0, 1, 1], [], []>} : vector<128x32xbf16>, vector<32x64xbf16>, vector<128x64xf32> -> vector<128x64xf32>
    %c1_168 = arith.constant 1 : index
    %c0_169 = arith.constant 0 : index
    %c0_170 = arith.constant 0 : index
    %375 = vector.load %arg15[%c1_168, %c0_169, %c0_170] : memref<2x1x64xf32, #tpu.memory_space<vmem>>, vector<1x1x64xf32>
    %376 = vector.shape_cast %375 : vector<1x1x64xf32> to vector<1x64xf32>
    %377 = vector.broadcast %376 : vector<1x64xf32> to vector<128x64xf32>
    %378 = arith.addf %374, %377 : vector<128x64xf32>
    %cst_171 = arith.constant 5.000000e-01 : f32
    %379 = vector.broadcast %cst_171 : f32 to vector<128x64xf32>
    %380 = arith.mulf %379, %378 : vector<128x64xf32>
    %381 = arith.mulf %378, %378 : vector<128x64xf32>
    %382 = arith.mulf %381, %378 : vector<128x64xf32>
    %cst_172 = arith.constant 4.471500e-02 : f32
    %383 = vector.broadcast %cst_172 : f32 to vector<128x64xf32>
    %384 = arith.mulf %383, %382 : vector<128x64xf32>
    %385 = arith.addf %378, %384 : vector<128x64xf32>
    %cst_173 = arith.constant 0.797884583 : f32
    %386 = vector.broadcast %cst_173 : f32 to vector<128x64xf32>
    %387 = arith.mulf %386, %385 : vector<128x64xf32>
    %388 = math.tanh %387 : vector<128x64xf32>
    %cst_174 = arith.constant 1.000000e+00 : f32
    %389 = vector.broadcast %cst_174 : f32 to vector<128x64xf32>
    %390 = arith.addf %389, %388 : vector<128x64xf32>
    %391 = arith.mulf %380, %390 : vector<128x64xf32>
    %392 = arith.truncf %391 : vector<128x64xf32> to vector<128x64xbf16>
    %c1_175 = arith.constant 1 : index
    %c0_176 = arith.constant 0 : index
    %c0_177 = arith.constant 0 : index
    %393 = vector.load %arg16[%c1_175, %c0_176, %c0_177] : memref<2x64x32xbf16, #tpu.memory_space<vmem>>, vector<1x64x32xbf16>
    %394 = vector.shape_cast %393 : vector<1x64x32xbf16> to vector<64x32xbf16>
    %cst_178 = arith.constant dense<0.000000e+00> : vector<128x32xf32>
    %395 = tpu.matmul %392, %394, %cst_178 {dimension_numbers = #tpu.dot_dimension_numbers<[1], [0], [0], [1], [0, 0, 1, 1], [], []>} : vector<128x64xbf16>, vector<64x32xbf16>, vector<128x32xf32> -> vector<128x32xf32>
    %c1_179 = arith.constant 1 : index
    %c0_180 = arith.constant 0 : index
    %c0_181 = arith.constant 0 : index
    %396 = vector.load %arg17[%c1_179, %c0_180, %c0_181] : memref<2x1x32xf32, #tpu.memory_space<vmem>>, vector<1x1x32xf32>
    %397 = vector.shape_cast %396 : vector<1x1x32xf32> to vector<1x32xf32>
    %398 = vector.broadcast %397 : vector<1x32xf32> to vector<128x32xf32>
    %399 = arith.addf %395, %398 : vector<128x32xf32>
    %400 = arith.addf %399, %346 : vector<128x32xf32>
    %c0_182 = arith.constant 0 : index
    %c0_183 = arith.constant 0 : index
    %401 = vector.load %arg6[%c0_182, %c0_183] : memref<2x128xf32, #tpu.memory_space<vmem>>, vector<2x128xf32>
    %cst_184 = arith.constant dense<0.000000e+00> : vector<2x32xf32>
    %402 = tpu.matmul %401, %400, %cst_184 {dimension_numbers = #tpu.dot_dimension_numbers<[1], [0], [0], [1], [0, 0, 1, 1], [], []>} : vector<2x128xf32>, vector<128x32xf32>, vector<2x32xf32> -> vector<2x32xf32>
    %c0_185 = arith.constant 0 : index
    %c0_186 = arith.constant 0 : index
    %403 = vector.load %arg18[%c0_185, %c0_186] : memref<32x10xf32, #tpu.memory_space<vmem>>, vector<32x10xf32>
    %cst_187 = arith.constant dense<0.000000e+00> : vector<2x10xf32>
    %404 = tpu.matmul %402, %403, %cst_187 {dimension_numbers = #tpu.dot_dimension_numbers<[1], [0], [0], [1], [0, 0, 1, 1], [], []>} : vector<2x32xf32>, vector<32x10xf32>, vector<2x10xf32> -> vector<2x10xf32>
    %c0_188 = arith.constant 0 : index
    %c0_189 = arith.constant 0 : index
    %405 = vector.load %arg19[%c0_188, %c0_189] : memref<1x10xf32, #tpu.memory_space<vmem>>, vector<1x10xf32>
    %406 = vector.broadcast %405 : vector<1x10xf32> to vector<2x10xf32>
    %407 = arith.addf %404, %406 : vector<2x10xf32>
    %c0_190 = arith.constant 0 : index
    %c0_191 = arith.constant 0 : index
    %408 = vector.load %arg20[%c0_190, %c0_191] : memref<2x10xf32, #tpu.memory_space<vmem>>, vector<2x10xf32>
    tpu.vector_store %arg20[%c0_190, %c0_191], %407 {strides = array<i32>} : memref<2x10xf32, #tpu.memory_space<vmem>>, vector<2x10xf32>,
    return
  }
  func.func @transform_0(%arg0: i32) -> (i32, i32) {
    %c0_i32 = arith.constant 0 : i32
    %c0_i32_0 = arith.constant 0 : i32
    %c0_i32_1 = arith.constant 0 : i32
    return %c0_i32, %c0_i32_0 : i32, i32
  }
  func.func @transform_1(%arg0: i32) -> (i32, i32) {
    %c0_i32 = arith.constant 0 : i32
    %c0_i32_0 = arith.constant 0 : i32
    %c0_i32_1 = arith.constant 0 : i32
    return %c0_i32, %c0_i32_0 : i32, i32
  }
  func.func @transform_2(%arg0: i32) -> (i32, i32) {
    %c0_i32 = arith.constant 0 : i32
    %c0_i32_0 = arith.constant 0 : i32
    %c0_i32_1 = arith.constant 0 : i32
    return %c0_i32, %c0_i32_0 : i32, i32
  }
  func.func @transform_3(%arg0: i32) -> (i32, i32) {
    %c0_i32 = arith.constant 0 : i32
    %c0_i32_0 = arith.constant 0 : i32
    %c0_i32_1 = arith.constant 0 : i32
    return %c0_i32, %c0_i32_0 : i32, i32
  }
  func.func @transform_4(%arg0: i32) -> (i32, i32) {
    %c0_i32 = arith.constant 0 : i32
    %c0_i32_0 = arith.constant 0 : i32
    %c0_i32_1 = arith.constant 0 : i32
    return %c0_i32, %c0_i32_0 : i32, i32
  }
  func.func @transform_5(%arg0: i32) -> (i32, i32) {
    %c0_i32 = arith.constant 0 : i32
    %c0_i32_0 = arith.constant 0 : i32
    %c0_i32_1 = arith.constant 0 : i32
    return %c0_i32, %c0_i32_0 : i32, i32
  }
  func.func @transform_6(%arg0: i32) -> (i32, i32, i32) {
    %c0_i32 = arith.constant 0 : i32
    %c0_i32_0 = arith.constant 0 : i32
    %c0_i32_1 = arith.constant 0 : i32
    %c0_i32_2 = arith.constant 0 : i32
    return %c0_i32, %c0_i32_0, %c0_i32_1 : i32, i32, i32
  }
  func.func @transform_7(%arg0: i32) -> (i32, i32, i32) {
    %c0_i32 = arith.constant 0 : i32
    %c0_i32_0 = arith.constant 0 : i32
    %c0_i32_1 = arith.constant 0 : i32
    %c0_i32_2 = arith.constant 0 : i32
    return %c0_i32, %c0_i32_0, %c0_i32_1 : i32, i32, i32
  }
  func.func @transform_8(%arg0: i32) -> (i32, i32, i32) {
    %c0_i32 = arith.constant 0 : i32
    %c0_i32_0 = arith.constant 0 : i32
    %c0_i32_1 = arith.constant 0 : i32
    %c0_i32_2 = arith.constant 0 : i32
    return %c0_i32, %c0_i32_0, %c0_i32_1 : i32, i32, i32
  }
  func.func @transform_9(%arg0: i32) -> (i32, i32, i32, i32) {
    %c0_i32 = arith.constant 0 : i32
    %c0_i32_0 = arith.constant 0 : i32
    %c0_i32_1 = arith.constant 0 : i32
    %c0_i32_2 = arith.constant 0 : i32
    %c0_i32_3 = arith.constant 0 : i32
    return %c0_i32, %c0_i32_0, %c0_i32_1, %c0_i32_2 : i32, i32, i32, i32
  }
  func.func @transform_10(%arg0: i32) -> (i32, i32, i32) {
    %c0_i32 = arith.constant 0 : i32
    %c0_i32_0 = arith.constant 0 : i32
    %c0_i32_1 = arith.constant 0 : i32
    %c0_i32_2 = arith.constant 0 : i32
    return %c0_i32, %c0_i32_0, %c0_i32_1 : i32, i32, i32
  }
  func.func @transform_11(%arg0: i32) -> (i32, i32, i32) {
    %c0_i32 = arith.constant 0 : i32
    %c0_i32_0 = arith.constant 0 : i32
    %c0_i32_1 = arith.constant 0 : i32
    %c0_i32_2 = arith.constant 0 : i32
    return %c0_i32, %c0_i32_0, %c0_i32_1 : i32, i32, i32
  }
  func.func @transform_12(%arg0: i32) -> (i32, i32, i32) {
    %c0_i32 = arith.constant 0 : i32
    %c0_i32_0 = arith.constant 0 : i32
    %c0_i32_1 = arith.constant 0 : i32
    %c0_i32_2 = arith.constant 0 : i32
    return %c0_i32, %c0_i32_0, %c0_i32_1 : i32, i32, i32
  }
  func.func @transform_13(%arg0: i32) -> (i32, i32, i32) {
    %c0_i32 = arith.constant 0 : i32
    %c0_i32_0 = arith.constant 0 : i32
    %c0_i32_1 = arith.constant 0 : i32
    %c0_i32_2 = arith.constant 0 : i32
    return %c0_i32, %c0_i32_0, %c0_i32_1 : i32, i32, i32
  }
  func.func @transform_14(%arg0: i32) -> (i32, i32, i32) {
    %c0_i32 = arith.constant 0 : i32
    %c0_i32_0 = arith.constant 0 : i32
    %c0_i32_1 = arith.constant 0 : i32
    %c0_i32_2 = arith.constant 0 : i32
    return %c0_i32, %c0_i32_0, %c0_i32_1 : i32, i32, i32
  }
  func.func @transform_15(%arg0: i32) -> (i32, i32, i32) {
    %c0_i32 = arith.constant 0 : i32
    %c0_i32_0 = arith.constant 0 : i32
    %c0_i32_1 = arith.constant 0 : i32
    %c0_i32_2 = arith.constant 0 : i32
    return %c0_i32, %c0_i32_0, %c0_i32_1 : i32, i32, i32
  }
  func.func @transform_16(%arg0: i32) -> (i32, i32, i32) {
    %c0_i32 = arith.constant 0 : i32
    %c0_i32_0 = arith.constant 0 : i32
    %c0_i32_1 = arith.constant 0 : i32
    %c0_i32_2 = arith.constant 0 : i32
    return %c0_i32, %c0_i32_0, %c0_i32_1 : i32, i32, i32
  }
  func.func @transform_17(%arg0: i32) -> (i32, i32) {
    %c0_i32 = arith.constant 0 : i32
    %c0_i32_0 = arith.constant 0 : i32
    %c0_i32_1 = arith.constant 0 : i32
    return %c0_i32, %c0_i32_0 : i32, i32
  }
  func.func @transform_18(%arg0: i32) -> (i32, i32) {
    %c0_i32 = arith.constant 0 : i32
    %c0_i32_0 = arith.constant 0 : i32
    %c0_i32_1 = arith.constant 0 : i32
    return %c0_i32, %c0_i32_0 : i32, i32
  }
  func.func @transform_19(%arg0: i32) -> (i32, i32) {
    %c0_i32 = arith.constant 0 : i32
    %c0_i32_0 = arith.constant 0 : i32
    %c0_i32_1 = arith.constant 0 : i32
    return %c0_i32, %c0_i32_0 : i32, i32
  }
}

</mosaic_0001>

<bundles_post_ra>
// kernel: tpu_custom_call.1
= control target key start
LH: loop header
LB: loop body
LE: loop exit
PB: predicated region body
PF: predicated region fallthrough
CT: control target
= control target key end

     0   :  { %s14246_s0 = inlined_call_operand.vmem [shape: bf16[128,32], index: 0, kind: input, shape index: {}]   ;;  %s14247_s1 = inlined_call_operand.vmem [shape: bf16[32,32], index: 1, kind: input, shape index: {}]   ;;  %s14248_s2 = inlined_call_operand.vmem [shape: f32[1,32], index: 2, kind: input, shape index: {}]   ;;  %s14249_s3 = inlined_call_operand.vmem [shape: f32[128,32], index: 3, kind: input, shape index: {}]   ;;  %s14250_s4 = inlined_call_operand.vmem [shape: f32[128,128], index: 4, kind: input, shape index: {}]   ;;  %s14251_s5 = inlined_call_operand.vmem [shape: f32[2,128], index: 5, kind: input, shape index: {}]   ;;  %s14252_s6 = inlined_call_operand.vmem [shape: f32[2,1,32], index: 6, kind: input, shape index: {}]   ;;  %s14253_s7 = inlined_call_operand.vmem [shape: f32[2,1,32], index: 7, kind: input, shape index: {}]   ;;  %s14254_s8 = inlined_call_operand.vmem [shape: bf16[2,32,96], index: 8, kind: input, shape index: {}]   ;;  %s14255_s9 = inlined_call_operand.vmem [shape: bf16[2,4,8,32], index: 9, kind: input, shape index: {}]   ;;  %s14256_s10 = inlined_call_operand.vmem [shape: f32[2,1,32], index: 10, kind: input, shape index: {}]   ;;  %s14257_s11 = inlined_call_operand.vmem [shape: f32[2,1,32], index: 11, kind: input, shape index: {}]   ;;  %s14258_s12 = inlined_call_operand.vmem [shape: f32[2,1,32], index: 12, kind: input, shape index: {}]   ;;  %s14259_s13 = inlined_call_operand.vmem [shape: bf16[2,32,64], index: 13, kind: input, shape index: {}]   ;;  %s14260_s14 = inlined_call_operand.vmem [shape: f32[2,1,64], index: 14, kind: input, shape index: {}]   ;;  %s14261_s15 = inlined_call_operand.vmem [shape: bf16[2,64,32], index: 15, kind: input, shape index: {}]   ;;  %s14262_s16 = inlined_call_operand.vmem [shape: f32[2,1,32], index: 16, kind: input, shape index: {}]   ;;  %s14263_s17 = inlined_call_operand.vmem [shape: f32[32,10], index: 17, kind: input, shape index: {}]   ;;  %s14264_s18 = inlined_call_operand.vmem [shape: f32[1,10], index: 18, kind: input, shape index: {}]   ;;  %s14265_s19 = inlined_call_operand.hbm [shape: f32[2,10], index: 19, kind: output, shape index: {}]  }
   0x1   :  { %14359 = sst [smem:[#allocation87_spill]] %s14246_s0 }
   0x2   :  { %14360 = sst [smem:[#allocation88_spill]] %s14247_s1 }
   0x3   :  { %14361 = sst [smem:[#allocation89_spill]] %s14248_s2 }
   0x4   :  { %14362 = sst [smem:[#allocation90_spill]] %s14249_s3 }
   0x5   :  { %s14363_s20 = sld [smem:[#allocation88_spill]]  ;;  %vm143_vm0 = vcmask 261120  }
   0x6   :  { %s14364_s23 = sld [smem:[#allocation87_spill]] }
   0xb   :  { %v9274_v0 = vld [vmem:[%s14363_s20 + $0x8] sm:$0xff]   ;;  %v9275_v1 = vld [vmem:[%s14363_s20] sm:$0xff]  }
   0xc   :  { %8322 = vmatprep.subr.bf16.mxu0 %v9274_v0  ;;  %v9276_v2 = vld [vmem:[%s14364_s23] sm:$0xff]   ;;  %v9277_v3 = vld [vmem:[%s14364_s23 + $0x8] sm:$0xff]   ;;  %v9278_v4 = vld [vmem:[%s14364_s23 + $0x10] sm:$0xff]  }
   0xd   :  { %8323 = vmatpush3.bf16.msra.mxu0 %v9274_v0  ;;  %8326 = vmatprep.mubr.msk.bf16.mxu0 %vm143_vm0, %v9276_v2  ;;  %v9279_v5 = vld [vmem:[%s14364_s23 + $0x18] sm:$0xff]   ;;  %v9280_v6 = vld [vmem:[%s14364_s23 + $0x20] sm:$0xff]  }
   0xe   :  { %8324 = vmatprep.subr.bf16.mxu0 %v9275_v1 }
  0x11   :  { %8325 = vmatpush3.bf16.msra.mxu0 %v9275_v1 }
  0x14   :  { %8327 = vmatmul.mubr.msk.bf16.vlgmr.msra.gmra.mxu0 %vm143_vm0, %v9277_v3 }
  0x15   :  { %8330 = vmatprep.mubr.msk.bf16.mxu0 %vm143_vm0, %v9278_v4 }
  0x1c   :  { %8331 = vmatmul.mubr.msk.bf16.gmra.mxu0 %vm143_vm0, %v9279_v5 }
  0x1d   :  { %8334 = vmatprep.mubr.msk.bf16.mxu0 %vm143_vm0, %v9280_v6 }
  0x1e   :  { %24 = vsyncpa [#allocation3], 0  ;;  %v9281_v7 = vld [vmem:[%s14364_s23 + $0x28] sm:$0xff]   ;;  %v9282_v8 = vld [vmem:[%s14364_s23 + $0x30] sm:$0xff]   ;;  %s14365_s3 = sld [smem:[#allocation89_spill]]  ;;  %vm769_vm1 = vcmask 64512  }
  0x1f   :  { %v9283_v9 = vld [vmem:[%s14364_s23 + $0x38] sm:$0xff]   ;;  %s14366_s28 = sld [smem:[#allocation90_spill]]  ;;  %s10074_s24 = smov 96   ;;  %vm1084_vm2 = vcmask 1043456   ;;  %vm3750_vm3 = vcmask 523264   ;;  %vm10086_vm4 = vmmov 0  }
  0x20   :  { %s10075_s26 = smov 64   ;;  %s10076_s27 = smov 88   ;;  %vm7625_vm5 = vcmask 74752  }
  0x21   :  { %s10077_s29 = smov 120   ;;  %s10078_s1 = smov 56  }
  0x22   :  { %s10079_s22 = smov 80   ;;  %s10080_s30 = smov 112  }
  0x23   :  { %s14316_s20 = smov 48   ;;  %s14291_s21 = smov 72  }
  0x24   :  { %8335 = vmatmul.mubr.msk.bf16.gmra.mxu0 %vm143_vm0, %v9281_v7  ;;  %v10229_v10 = vld [vmem:[%s14365_s3] ss:$0 sm:$0xff]  ;;  %s14314_s3 = smov 104   ;;  %s14312_s2 = smov 40  }
  0x25   :  { %8338 = vmatprep.mubr.msk.bf16.mxu0 %vm143_vm0, %v9282_v8  ;;  %v267_v12 = vld [vmem:[%s14366_s28 + $0x10] sm:$0xff]  ;;  %v265_v15 = vld [vmem:[%s14366_s28] sm:$0xff]  ;;  %v268_v19 = vld [vmem:[%s14366_s28 + $0x18] sm:$0xff]  ;;  %s14582_s23 = smov 104  }
  0x26   :  { %v266_v24 = vld [vmem:[%s14366_s28 + $0x8] sm:$0xff]  ;;  %v269_v33 = vld [vmem:[%s14366_s28 + $0x20] sm:$0xff]  ;;  %v271_v34 = vld [vmem:[%s14366_s28 + $0x30] sm:$0xff] }
  0x27   :  { %v270_v41 = vld [vmem:[%s14366_s28 + $0x28] sm:$0xff]  ;;  %v272_v45 = vld [vmem:[%s14366_s28 + $0x38] sm:$0xff]  ;;  %v273_v49 = vld [vmem:[%s14366_s28 + $0x40] sm:$0xff] }
  0x28   :  { %v275_v55 = vld [vmem:[%s14366_s28 + $0x50] sm:$0xff]  ;;  %v274_v60 = vld [vmem:[%s14366_s28 + $0x48] sm:$0xff]  ;;  %v276_v62 = vld [vmem:[%s14366_s28 + $0x58] sm:$0xff] }
  0x29   :  { %v277_v6 = vld [vmem:[%s14366_s28 + $0x60] sm:$0xff] }
  0x2c   :  { %8339 = vmatmul.mubr.msk.bf16.gmra.mxu0 %vm143_vm0, %v9283_v9 }
  0xd4   :  { %v8328_v11 = vpop.f32.mrf.mxu0 }
  0xd5   :  { %v211_v13 = vadd.f32 %v8328_v11, %v10229_v10 }
  0xd6   :  { %v202_v14 = vpop.f32.mrf.mxu0 }
  0xd7   :  { %v10238_v16 = vadd.f32 %v267_v12, %v211_v13  ;;  %v203_v17 = vadd.f32 %v10229_v10, %v202_v14  ;;  %v279_v12 = vld [vmem:[%s14366_s28 + $0x70] sm:$0xff] }
  0xd8   :  { %v8329_v18 = vpop.f32.mrf.mxu0 }
  0xd9   :  { %14367 = vst [vmem:[#allocation5_spill] sm:$0xff] %v10238_v16  ;;  %v10244_v20 = vadd.f32 %v265_v15, %v203_v17  ;;  %v214_v21 = vadd.f32 %v8329_v18, %v10229_v10  ;;  %v321_v22 = vsel %vm143_vm0, %v10238_v16, 0.0  ;;  %v278_v17 = vld [vmem:[%s14366_s28 + $0x68] sm:$0xff] }
  0xda   :  { %322 = vadd.xlane.f32.xlu1 %v321_v22  ;;  %v205_v23 = vpop.f32.mrf.mxu0 }
  0xdb   :  { %14368 = vst [vmem:[#allocation6_spill] sm:$0xff] %v10244_v20  ;;  %v10252_v25 = vadd.f32 %v268_v19, %v214_v21  ;;  %v206_v26 = vadd.f32 %v10229_v10, %v205_v23  ;;  %v315_v27 = vsel %vm143_vm0, %v10244_v20, 0.0 }
  0xdc   :  { %v8332_v28 = vpop.f32.mrf.mxu0  ;;  %316 = vadd.xlane.f32.xlu0 %v315_v27 }
  0xdd   :  { %14369 = vst [vmem:[#allocation7_spill] sm:$0xff] %v10252_v25  ;;  %v10257_v29 = vadd.f32 %v266_v24, %v206_v26  ;;  %v324_v30 = vsel %vm143_vm0, %v10252_v25, 0.0  ;;  %v227_v31 = vadd.f32 %v8332_v28, %v10229_v10  ;;  %v280_v24 = vld [vmem:[%s14366_s28 + $0x78] sm:$0xff] }
  0xde   :  { %325 = vadd.xlane.f32.xlu1 %v324_v30  ;;  %v218_v32 = vpop.f32.mrf.mxu0 }
  0xdf   :  { %14370 = vst [vmem:[#allocation8_spill] sm:$0xff] %v10257_v29  ;;  %v219_v35 = vadd.f32 %v10229_v10, %v218_v32  ;;  %v318_v36 = vsel %vm143_vm0, %v10257_v29, 0.0  ;;  %v10273_v39 = vadd.f32 %v271_v34, %v227_v31 }
  0xe0   :  { %v8333_v37 = vpop.f32.mrf.mxu0  ;;  %319 = vadd.xlane.f32.xlu0 %v318_v36 }
  0xe1   :  { %v10271_v38 = vadd.f32 %v269_v33, %v219_v35  ;;  %14372 = vst [vmem:[#allocation10_spill] sm:$0xff] %v10273_v39  ;;  %v230_v42 = vadd.f32 %v8333_v37, %v10229_v10  ;;  %v333_v50 = vsel %vm143_vm0, %v10273_v39, 0.0 }
  0xe2   :  { %v221_v40 = vpop.f32.mrf.mxu0 }
  0xe3   :  { %14371 = vst [vmem:[#allocation9_spill] sm:$0xff] %v10271_v38  ;;  %v222_v43 = vadd.f32 %v10229_v10, %v221_v40  ;;  %v327_v44 = vsel %vm143_vm0, %v10271_v38, 0.0  ;;  %v10292_v51 = vadd.f32 %v272_v45, %v230_v42 }
  0xe4   :  { %v8336_v46 = vpop.f32.mrf.mxu0  ;;  %328 = vadd.xlane.f32.xlu0 %v327_v44 }
  0xe5   :  { %v10285_v47 = vadd.f32 %v270_v41, %v222_v43  ;;  %14374 = vst [vmem:[#allocation12_spill] sm:$0xff] %v10292_v51  ;;  %v243_v52 = vadd.f32 %v8336_v46, %v10229_v10  ;;  %v336_v0 = vsel %vm143_vm0, %v10292_v51, 0.0 }
  0xe6   :  { %v234_v48 = vpop.f32.mrf.mxu0 }
  0xe7   :  { %14373 = vst [vmem:[#allocation11_spill] sm:$0xff] %v10285_v47  ;;  %v235_v53 = vadd.f32 %v10229_v10, %v234_v48  ;;  %v330_v54 = vsel %vm143_vm0, %v10285_v47, 0.0  ;;  %v10307_v61 = vadd.f32 %v275_v55, %v243_v52 }
  0xe8   :  { %v8337_v56 = vpop.f32.mrf.mxu0  ;;  %331 = vadd.xlane.f32.xlu1 %v330_v54  ;;  %334 = vadd.xlane.f32.xlu0 %v333_v50 }
  0xe9   :  { %v10301_v57 = vadd.f32 %v273_v49, %v235_v53  ;;  %v246_v58 = vadd.f32 %v8337_v56, %v10229_v10  ;;  %14376 = vst [vmem:[#allocation14_spill] sm:$0xff] %v10307_v61  ;;  %v345_v11 = vsel %vm143_vm0, %v10307_v61, 0.0 }
  0xea   :  { %v237_v59 = vpop.f32.mrf.mxu0 }
  0xeb   :  { %14375 = vst [vmem:[#allocation13_spill] sm:$0xff] %v10301_v57  ;;  %v238_v63 = vadd.f32 %v10229_v10, %v237_v59  ;;  %v339_v1 = vsel %vm143_vm0, %v10301_v57, 0.0  ;;  %v10319_v4 = vadd.f32 %v276_v62, %v246_v58 }
  0xec   :  { %v8340_v2 = vpop.f32.mrf.mxu0  ;;  %337 = vadd.xlane.f32.xlu1 %v336_v0  ;;  %340 = vadd.xlane.f32.xlu0 %v339_v1 }
  0xed   :  { %v10317_v3 = vadd.f32 %v274_v60, %v238_v63  ;;  %14378 = vst [vmem:[#allocation16_spill] sm:$0xff] %v10319_v4  ;;  %v259_v7 = vadd.f32 %v8340_v2, %v10229_v10  ;;  %v348_v18 = vsel %vm143_vm0, %v10319_v4, 0.0 }
  0xee   :  { %v250_v5 = vpop.f32.mrf.mxu0 }
  0xef   :  { %14377 = vst [vmem:[#allocation15_spill] sm:$0xff] %v10317_v3  ;;  %v251_v8 = vadd.f32 %v10229_v10, %v250_v5  ;;  %v342_v9 = vsel %vm143_vm0, %v10317_v3, 0.0  ;;  %v10340_v19 = vadd.f32 %v279_v12, %v259_v7 }
  0xf0   :  { %v8341_v13 = vpop.f32.mrf.mxu0  ;;  %343 = vadd.xlane.f32.xlu1 %v342_v9  ;;  %346 = vadd.xlane.f32.xlu0 %v345_v11 }
  0xf1   :  { %v10333_v14 = vadd.f32 %v277_v6, %v251_v8  ;;  %14380 = vst [vmem:[#allocation18_spill] sm:$0xff] %v10340_v19  ;;  %v262_v21 = vadd.f32 %v8341_v13, %v10229_v10  ;;  %v357_v30 = vsel %vm143_vm0, %v10340_v19, 0.0 }
  0xf2   :  { %v253_v15 = vpop.f32.mrf.mxu0 }
  0xf3   :  { %14379 = vst [vmem:[#allocation17_spill] sm:$0xff] %v10333_v14  ;;  %v254_v22 = vadd.f32 %v10229_v10, %v253_v15  ;;  %v351_v23 = vsel %vm143_vm0, %v10333_v14, 0.0  ;;  %v10351_v27 = vadd.f32 %v280_v24, %v262_v21 }
  0xf4   :  { %349 = vadd.xlane.f32.xlu1 %v348_v18  ;;  %352 = vadd.xlane.f32.xlu0 %v351_v23 }
  0xf5   :  { %v10349_v26 = vadd.f32 %v278_v17, %v254_v22  ;;  %14382 = vst [vmem:[#allocation20_spill] sm:$0xff] %v10351_v27  ;;  %v360_v10 = vsel %vm143_vm0, %v10351_v27, 0.0 }
  0xf7   :  { %14381 = vst [vmem:[#allocation19_spill] sm:$0xff] %v10349_v26  ;;  %v354_v28 = vsel %vm143_vm0, %v10349_v26, 0.0 }
  0xf8   :  { %355 = vadd.xlane.f32.xlu1 %v354_v28  ;;  %358 = vadd.xlane.f32.xlu0 %v357_v30 }
  0xfc   :  { %361 = vadd.xlane.f32.xlu1 %v360_v10 }
 0x163   :  { %v323_v31 = vpop.xlane.xlu1 %322 }
 0x164   :  { %v366_v32 = vmul.f32 0.03125, %v323_v31 }
 0x165   :  { %v317_v33 = vpop.xlane.xlu0 %316 }
 0x166   :  { %v364_v34 = vmul.f32 0.03125, %v317_v33  ;;  %v10360_v36 = vsub.f32 %v10238_v16, %v366_v32 }
 0x167   :  { %v326_v35 = vpop.xlane.xlu1 %325 }
 0x168   :  { %v10363_v37 = vsub.f32 %v10244_v20, %v364_v34  ;;  %v367_v40 = vmul.f32 0.03125, %v326_v35  ;;  %v398_v48 = vmul.f32 %v10360_v36, %v10360_v36 }
 0x169   :  { %v320_v41 = vpop.xlane.xlu0 %319 }
 0x16a   :  { %v365_v42 = vmul.f32 0.03125, %v320_v41  ;;  %v396_v43 = vmul.f32 %v10363_v37, %v10363_v37  ;;  %v10368_v44 = vsub.f32 %v10252_v25, %v367_v40  ;;  %v418_v54 = vsel %vm143_vm0, %v398_v48, 0.0 }
 0x16c   :  { %v10371_v45 = vsub.f32 %v10257_v29, %v365_v42  ;;  %v412_v46 = vsel %vm143_vm0, %v396_v43, 0.0  ;;  %v399_v56 = vmul.f32 %v10368_v44, %v10368_v44 }
 0x16d   :  { %413 = vadd.xlane.f32.xlu0 %v412_v46  ;;  %v329_v49 = vpop.xlane.xlu0 %328 }
 0x16e   :  { %v368_v50 = vmul.f32 0.03125, %v329_v49  ;;  %v397_v52 = vmul.f32 %v10371_v45, %v10371_v45  ;;  %v421_v2 = vsel %vm143_vm0, %v399_v56, 0.0 }
 0x170   :  { %v10379_v53 = vsub.f32 %v10271_v38, %v368_v50  ;;  %v415_v55 = vsel %vm143_vm0, %v397_v52, 0.0 }
 0x171   :  { %v332_v58 = vpop.xlane.xlu1 %331  ;;  %419 = vadd.xlane.f32.xlu0 %v418_v54  ;;  %416 = vadd.xlane.f32.xlu1 %v415_v55  ;;  %v335_v59 = vpop.xlane.xlu0 %334 }
 0x172   :  { %v369_v60 = vmul.f32 0.03125, %v332_v58  ;;  %v370_v62 = vmul.f32 0.03125, %v335_v59  ;;  %v400_v63 = vmul.f32 %v10379_v53, %v10379_v53 }
 0x174   :  { %v10388_v0 = vsub.f32 %v10285_v47, %v369_v60  ;;  %v10391_v1 = vsub.f32 %v10273_v39, %v370_v62  ;;  %v424_v5 = vsel %vm143_vm0, %v400_v63, 0.0 }
 0x175   :  { %v338_v6 = vpop.xlane.xlu1 %337  ;;  %422 = vadd.xlane.f32.xlu1 %v421_v2  ;;  %425 = vadd.xlane.f32.xlu0 %v424_v5  ;;  %v341_v7 = vpop.xlane.xlu0 %340 }
 0x176   :  { %v371_v8 = vmul.f32 0.03125, %v338_v6  ;;  %v372_v9 = vmul.f32 0.03125, %v341_v7  ;;  %v401_v11 = vmul.f32 %v10388_v0, %v10388_v0  ;;  %v402_v12 = vmul.f32 %v10391_v1, %v10391_v1 }
 0x178   :  { %v10400_v13 = vsub.f32 %v10292_v51, %v371_v8  ;;  %v10403_v15 = vsub.f32 %v10301_v57, %v372_v9  ;;  %v427_v17 = vsel %vm143_vm0, %v401_v11, 0.0  ;;  %v430_v18 = vsel %vm143_vm0, %v402_v12, 0.0 }
 0x179   :  { %v344_v21 = vpop.xlane.xlu1 %343  ;;  %428 = vadd.xlane.f32.xlu1 %v427_v17  ;;  %431 = vadd.xlane.f32.xlu0 %v430_v18  ;;  %v347_v22 = vpop.xlane.xlu0 %346 }
 0x17a   :  { %v373_v23 = vmul.f32 0.03125, %v344_v21  ;;  %v374_v24 = vmul.f32 0.03125, %v347_v22  ;;  %v403_v28 = vmul.f32 %v10400_v13, %v10400_v13  ;;  %v404_v30 = vmul.f32 %v10403_v15, %v10403_v15  ;;  %v9284_v21 = vld [vmem:[%s14254_s8 + $0x8] sm:$0xff]   ;;  %v9285_v22 = vld [vmem:[%s14254_s8] sm:$0xff]  }
 0x17b   :  { %8342 = vmatprep.subr.bf16.mxu1 %v9284_v21 }
 0x17c   :  { %v10412_v10 = vsub.f32 %v10317_v3, %v373_v23  ;;  %v10415_v31 = vsub.f32 %v10307_v61, %v374_v24  ;;  %v433_v32 = vsel %vm143_vm0, %v403_v28, 0.0  ;;  %v436_v33 = vsel %vm143_vm0, %v404_v30, 0.0  ;;  %8343 = vmatpush3.bf16.msra.mxu1 %v9284_v21 }
 0x17d   :  { %v350_v34 = vpop.xlane.xlu1 %349  ;;  %434 = vadd.xlane.f32.xlu1 %v433_v32  ;;  %437 = vadd.xlane.f32.xlu0 %v436_v33  ;;  %v353_v35 = vpop.xlane.xlu0 %352 }
 0x17e   :  { %v375_v40 = vmul.f32 0.03125, %v350_v34  ;;  %v376_v41 = vmul.f32 0.03125, %v353_v35  ;;  %v405_v42 = vmul.f32 %v10412_v10, %v10412_v10  ;;  %v406_v43 = vmul.f32 %v10415_v31, %v10415_v31  ;;  %8344 = vmatprep.subr.bf16.mxu1 %v9285_v22 }
 0x180   :  { %v10424_v46 = vsub.f32 %v10319_v4, %v375_v40  ;;  %v10427_v48 = vsub.f32 %v10333_v14, %v376_v41  ;;  %v439_v49 = vsel %vm143_vm0, %v405_v42, 0.0  ;;  %v442_v50 = vsel %vm143_vm0, %v406_v43, 0.0  ;;  %8345 = vmatpush3.bf16.msra.mxu1 %v9285_v22 }
 0x181   :  { %v356_v52 = vpop.xlane.xlu1 %355  ;;  %440 = vadd.xlane.f32.xlu1 %v439_v49  ;;  %443 = vadd.xlane.f32.xlu0 %v442_v50  ;;  %v359_v54 = vpop.xlane.xlu0 %358 }
 0x182   :  { %v377_v55 = vmul.f32 0.03125, %v356_v52  ;;  %v378_v56 = vmul.f32 0.03125, %v359_v54  ;;  %v407_v58 = vmul.f32 %v10424_v46, %v10424_v46  ;;  %v408_v59 = vmul.f32 %v10427_v48, %v10427_v48 }
 0x184   :  { %v10436_v60 = vsub.f32 %v10349_v26, %v377_v55  ;;  %v10439_v62 = vsub.f32 %v10340_v19, %v378_v56  ;;  %v445_v63 = vsel %vm143_vm0, %v407_v58, 0.0  ;;  %v448_v2 = vsel %vm143_vm0, %v408_v59, 0.0 }
 0x185   :  { %v362_v5 = vpop.xlane.xlu1 %361  ;;  %446 = vadd.xlane.f32.xlu1 %v445_v63  ;;  %449 = vadd.xlane.f32.xlu0 %v448_v2 }
 0x186   :  { %v379_v6 = vmul.f32 0.03125, %v362_v5  ;;  %v409_v7 = vmul.f32 %v10436_v60, %v10436_v60  ;;  %v410_v8 = vmul.f32 %v10439_v62, %v10439_v62 }
 0x188   :  { %v10448_v9 = vsub.f32 %v10351_v27, %v379_v6  ;;  %v451_v11 = vsel %vm143_vm0, %v409_v7, 0.0  ;;  %v454_v12 = vsel %vm143_vm0, %v410_v8, 0.0  ;;  %v10860_v27 = vld [vmem:[%s14250_s4 + $0x68] sm:$0xff] }
 0x189   :  { %452 = vadd.xlane.f32.xlu1 %v451_v11  ;;  %455 = vadd.xlane.f32.xlu0 %v454_v12 }
 0x18a   :  { %v411_v17 = vmul.f32 %v10448_v9, %v10448_v9 }
 0x18c   :  { %v457_v18 = vsel %vm143_vm0, %v411_v17, 0.0  ;;  %v10464_v17 = vld [vmem:[%s14252_s6] ss:$0 sm:$0xff] }
 0x18d   :  { %458 = vadd.xlane.f32.xlu1 %v457_v18 }
 0x1f6   :  { %v414_v23 = vpop.xlane.xlu0 %413 }
 0x1f7   :  { %v460_v24 = vmul.f32 0.03125, %v414_v23 }
 0x1f9   :  { %v476_v28 = vadd.f32 1e-05, %v460_v24 }
 0x1fa   :  { %v417_v30 = vpop.xlane.xlu1 %416  ;;  %v420_v32 = vpop.xlane.xlu0 %419 }
 0x1fb   :  { %9300 = vrsqrt.f32 %v476_v28  ;;  %v461_v33 = vmul.f32 0.03125, %v417_v30  ;;  %v462_v34 = vmul.f32 0.03125, %v420_v32 }
 0x1fd   :  { %v477_v35 = vadd.f32 1e-05, %v461_v33  ;;  %v478_v40 = vadd.f32 1e-05, %v462_v34 }
 0x1fe   :  { %v423_v41 = vpop.xlane.xlu1 %422  ;;  %v426_v42 = vpop.xlane.xlu0 %425 }
 0x1ff   :  { %9302 = vrsqrt.f32 %v477_v35  ;;  %v463_v43 = vmul.f32 0.03125, %v423_v41  ;;  %v464_v49 = vmul.f32 0.03125, %v426_v42  ;;  %v10471_v35 = vld [vmem:[%s14253_s7] ss:$0 sm:$0xff] }
 0x200   :  { %9304 = vrsqrt.f32 %v478_v40 }
 0x201   :  { %v479_v50 = vadd.f32 1e-05, %v463_v43  ;;  %v480_v52 = vadd.f32 1e-05, %v464_v49 }
 0x202   :  { %v429_v54 = vpop.xlane.xlu1 %428  ;;  %v432_v55 = vpop.xlane.xlu0 %431 }
 0x203   :  { %9306 = vrsqrt.f32 %v479_v50  ;;  %v465_v56 = vmul.f32 0.03125, %v429_v54  ;;  %v466_v58 = vmul.f32 0.03125, %v432_v55 }
 0x204   :  { %9308 = vrsqrt.f32 %v480_v52 }
 0x205   :  { %v481_v59 = vadd.f32 1e-05, %v465_v56  ;;  %v482_v63 = vadd.f32 1e-05, %v466_v58 }
 0x206   :  { %v435_v2 = vpop.xlane.xlu1 %434  ;;  %v438_v5 = vpop.xlane.xlu0 %437 }
 0x207   :  { %9310 = vrsqrt.f32 %v481_v59  ;;  %v467_v6 = vmul.f32 0.03125, %v435_v2  ;;  %v468_v7 = vmul.f32 0.03125, %v438_v5 }
 0x208   :  { %v9301_v8 = vpop.eup %9300  ;;  %9312 = vrsqrt.f32 %v482_v63 }
 0x209   :  { %v483_v11 = vadd.f32 1e-05, %v467_v6  ;;  %v484_v12 = vadd.f32 1e-05, %v468_v7  ;;  %v508_v18 = vmul.f32 %v9301_v8, %v10363_v37 }
 0x20a   :  { %v441_v21 = vpop.xlane.xlu1 %440  ;;  %v444_v22 = vpop.xlane.xlu0 %443 }
 0x20b   :  { %9314 = vrsqrt.f32 %v483_v11  ;;  %v469_v23 = vmul.f32 0.03125, %v441_v21  ;;  %v470_v24 = vmul.f32 0.03125, %v444_v22  ;;  %v530_v30 = vmul.f32 %v10464_v17, %v508_v18 }
 0x20c   :  { %v9303_v28 = vpop.eup %9302  ;;  %9316 = vrsqrt.f32 %v484_v12 }
 0x20d   :  { %v9305_v32 = vpop.eup %9304  ;;  %v485_v33 = vadd.f32 1e-05, %v469_v23  ;;  %v486_v34 = vadd.f32 1e-05, %v470_v24  ;;  %v509_v40 = vmul.f32 %v9303_v28, %v10371_v45  ;;  %v552_v54 = vadd.f32 %v10471_v35, %v530_v30 }
 0x20e   :  { %v447_v37 = vpop.xlane.xlu1 %446  ;;  %v450_v41 = vpop.xlane.xlu0 %449  ;;  %v510_v42 = vmul.f32 %v9305_v32, %v10360_v36 }
 0x20f   :  { %9318 = vrsqrt.f32 %v485_v33  ;;  %v471_v43 = vmul.f32 0.03125, %v447_v37  ;;  %v472_v49 = vmul.f32 0.03125, %v450_v41  ;;  %v531_v50 = vmul.f32 %v10464_v17, %v509_v40 }
 0x210   :  { %v9307_v52 = vpop.eup %9306  ;;  %9320 = vrsqrt.f32 %v486_v34  ;;  %v532_v36 = vmul.f32 %v10464_v17, %v510_v42 }
 0x211   :  { %v9309_v55 = vpop.eup %9308  ;;  %v487_v56 = vadd.f32 1e-05, %v471_v43  ;;  %v488_v58 = vadd.f32 1e-05, %v472_v49  ;;  %v553_v59 = vadd.f32 %v10471_v35, %v531_v50  ;;  %v511_v45 = vmul.f32 %v9307_v52, %v10368_v44 }
 0x212   :  { %v453_v63 = vpop.xlane.xlu1 %452  ;;  %v456_v2 = vpop.xlane.xlu0 %455  ;;  %v512_v5 = vmul.f32 %v9309_v55, %v10379_v53  ;;  %v554_v53 = vadd.f32 %v10471_v35, %v532_v36 }
 0x213   :  { %9322 = vrsqrt.f32 %v487_v56  ;;  %v473_v6 = vmul.f32 0.03125, %v453_v63  ;;  %v474_v7 = vmul.f32 0.03125, %v456_v2  ;;  %v568_v8 = vpack.c.bf16 %v553_v59, %v552_v54 }
 0x214   :  { %v9311_v11 = vpop.eup %9310  ;;  %9324 = vrsqrt.f32 %v488_v58  ;;  %v533_v12 = vmul.f32 %v10464_v17, %v511_v45  ;;  %v534_v18 = vmul.f32 %v10464_v17, %v512_v5 }
 0x215   :  { %v9313_v21 = vpop.eup %9312  ;;  %v489_v22 = vadd.f32 1e-05, %v473_v6  ;;  %v490_v23 = vadd.f32 1e-05, %v474_v7  ;;  %8346 = vmatprep.mubr.msk.bf16.mxu1 %vm143_vm0, %v568_v8  ;;  %v513_v44 = vmul.f32 %v9311_v11, %v10388_v0 }
 0x216   :  { %v459_v24 = vpop.xlane.xlu1 %458  ;;  %v555_v28 = vadd.f32 %v10471_v35, %v533_v12  ;;  %v514_v30 = vmul.f32 %v9313_v21, %v10391_v1  ;;  %v556_v37 = vadd.f32 %v10471_v35, %v534_v18 }
 0x217   :  { %9326 = vrsqrt.f32 %v489_v22  ;;  %v475_v32 = vmul.f32 0.03125, %v459_v24  ;;  %v535_v33 = vmul.f32 %v10464_v17, %v513_v44 }
 0x218   :  { %v9315_v34 = vpop.eup %9314  ;;  %9328 = vrsqrt.f32 %v490_v23  ;;  %v569_v40 = vpack.c.bf16 %v555_v28, %v554_v53  ;;  %v536_v49 = vmul.f32 %v10464_v17, %v514_v30 }
 0x219   :  { %v9317_v41 = vpop.eup %9316  ;;  %v491_v42 = vadd.f32 1e-05, %v475_v32  ;;  %v557_v0 = vadd.f32 %v10471_v35, %v535_v33  ;;  %v515_v43 = vmul.f32 %v9315_v34, %v10400_v13 }
 0x21a   :  { %8347 = vmatmul.mubr.msk.bf16.vlgmr.msra.gmra.mxu1 %vm143_vm0, %v569_v40  ;;  %v516_v1 = vmul.f32 %v9317_v41, %v10403_v15  ;;  %v558_v56 = vadd.f32 %v10471_v35, %v536_v49 }
 0x21b   :  { %9330 = vrsqrt.f32 %v491_v42  ;;  %v570_v50 = vpack.c.bf16 %v557_v0, %v556_v37  ;;  %v537_v52 = vmul.f32 %v10464_v17, %v515_v43 }
 0x21c   :  { %v9319_v54 = vpop.eup %9318  ;;  %v538_v59 = vmul.f32 %v10464_v17, %v516_v1 }
 0x21d   :  { %v9321_v55 = vpop.eup %9320  ;;  %8350 = vmatprep.mubr.msk.bf16.mxu1 %vm143_vm0, %v570_v50  ;;  %v559_v58 = vadd.f32 %v10471_v35, %v537_v52  ;;  %v517_v13 = vmul.f32 %v9319_v54, %v10412_v10 }
 0x21e   :  { %v518_v45 = vmul.f32 %v9321_v55, %v10415_v31  ;;  %v560_v5 = vadd.f32 %v10471_v35, %v538_v59 }
 0x21f   :  { %v571_v63 = vpack.c.bf16 %v559_v58, %v558_v56  ;;  %v539_v15 = vmul.f32 %v10464_v17, %v517_v13 }
 0x220   :  { %v9323_v2 = vpop.eup %9322  ;;  %v540_v8 = vmul.f32 %v10464_v17, %v518_v45 }
 0x221   :  { %v9325_v36 = vpop.eup %9324  ;;  %v561_v6 = vadd.f32 %v10471_v35, %v539_v15  ;;  %v519_v7 = vmul.f32 %v9323_v2, %v10424_v46 }
 0x222   :  { %8351 = vmatmul.mubr.msk.bf16.gmra.mxu1 %vm143_vm0, %v571_v63  ;;  %v520_v10 = vmul.f32 %v9325_v36, %v10427_v48  ;;  %v562_v21 = vadd.f32 %v10471_v35, %v540_v8 }
 0x223   :  { %v572_v11 = vpack.c.bf16 %v561_v6, %v560_v5  ;;  %v541_v31 = vmul.f32 %v10464_v17, %v519_v7 }
 0x224   :  { %v9327_v12 = vpop.eup %9326  ;;  %v542_v46 = vmul.f32 %v10464_v17, %v520_v10 }
 0x225   :  { %v9329_v18 = vpop.eup %9328  ;;  %8354 = vmatprep.mubr.msk.bf16.mxu1 %vm143_vm0, %v572_v11  ;;  %v563_v22 = vadd.f32 %v10471_v35, %v541_v31  ;;  %v521_v23 = vmul.f32 %v9327_v12, %v10436_v60 }
 0x226   :  { %v522_v44 = vmul.f32 %v9329_v18, %v10439_v62  ;;  %v564_v28 = vadd.f32 %v10471_v35, %v542_v46 }
 0x227   :  { %v573_v24 = vpack.c.bf16 %v563_v22, %v562_v21  ;;  %v543_v48 = vmul.f32 %v10464_v17, %v521_v23 }
 0x228   :  { %v9331_v53 = vpop.eup %9330  ;;  %v544_v33 = vmul.f32 %v10464_v17, %v522_v44  ;;  %v1043_v44 = vld [vmem:[%s14255_s9] sm:$0xf] }
 0x229   :  { %v565_v30 = vadd.f32 %v10471_v35, %v543_v48  ;;  %v523_v32 = vmul.f32 %v9331_v53, %v10448_v9  ;;  %9196 = vmatprep.subr.msk.bf16.mxu1 %vm1084_vm2, %v1043_v44 }
 0x22a   :  { %8355 = vmatmul.mubr.msk.bf16.gmra.mxu1 %vm143_vm0, %v573_v24  ;;  %v566_v62 = vadd.f32 %v10471_v35, %v544_v33  ;;  %v1086_v24 = vsel %vm1084_vm2, %v1043_v44, 0 }
 0x22b   :  { %v574_v34 = vpack.c.bf16 %v565_v30, %v564_v28  ;;  %v545_v60 = vmul.f32 %v10464_v17, %v523_v32  ;;  %8395 = vmatpush3.bf16.msra.mxu1 %v1086_v24 }
 0x22d   :  { %8358 = vmatprep.mubr.msk.bf16.mxu1 %vm143_vm0, %v574_v34  ;;  %v567_v40 = vadd.f32 %v10471_v35, %v545_v60 }
 0x22f   :  { %v575_v37 = vpack.c.bf16 %v567_v40, %v566_v62 }
 0x232   :  { %8359 = vmatmul.mubr.msk.bf16.gmra.mxu1 %vm143_vm0, %v575_v37 }
 0x2da   :  { %v8348_v41 = vpop.f32.mrf.mxu1 }
 0x2db   :  { %v715_v9 = vmul.f32 0.35355338, %v8348_v41 }
 0x2dc   :  { %v650_v42 = vpop.f32.mrf.mxu1 }
 0x2dd   :  { %v713_v1 = vmul.f32 0.35355338, %v650_v42 }
 0x2de   :  { %v8349_v0 = vpop.f32.mrf.mxu1 }
 0x2df   :  { %v716_v43 = vmul.f32 0.35355338, %v8349_v0  ;;  %v10572_v48 = vpack.c.bf16 %v8349_v0, %v8348_v41 }
 0x2e0   :  { %v653_v49 = vpop.f32.mrf.mxu1 }
 0x2e1   :  { %v10527_v50 = vpack.c.bf16 %v716_v43, %v715_v9  ;;  %v714_v52 = vmul.f32 0.35355338, %v653_v49  ;;  %v10582_v28 = vpack.c.bf16 %v653_v49, %v650_v42 }
 0x2e2   :  { %v8352_v17 = vpop.f32.mrf.mxu1 }
 0x2e3   :  { %v10529_v54 = vpack.c.bf16 %v714_v52, %v713_v1  ;;  %v719_v56 = vmul.f32 0.35355338, %v8352_v17 }
 0x2e4   :  { %v10531_v55 = vpop.f32.mrf.mxu1 }
 0x2e5   :  { %8378 = vmatprep.mubr.msk.bf16.mxu0 %vm769_vm1, %v10529_v54 }
 0x2e6   :  { %v8353_v35 = vpop.f32.mrf.mxu1 }
 0x2e7   :  { %v720_v58 = vmul.f32 0.35355338, %v8353_v35  ;;  %v10559_v23 = vpack.c.bf16 %v8353_v35, %v8352_v17 }
 0x2e8   :  { %v10535_v13 = vpop.f32.mrf.mxu1 }
 0x2e9   :  { %v10537_v59 = vpack.c.bf16 %v720_v58, %v719_v56  ;;  %v10588_v30 = vpack.c.bf16 %v10535_v13, %v10531_v55  ;;  %v718_v24 = vmul.f32 0.35355338, %v10535_v13 }
 0x2ea   :  { %v8356_v45 = vpop.f32.mrf.mxu1 }
 0x2eb   :  { %v723_v2 = vmul.f32 0.35355338, %v8356_v45 }
 0x2ec   :  { %v10539_v63 = vpop.f32.mrf.mxu1 }
 0x2ed   :  { %v721_v13 = vmul.f32 0.35355338, %v10539_v63 }
 0x2ee   :  { %v8357_v15 = vpop.f32.mrf.mxu1 }
 0x2ef   :  { %v724_v36 = vmul.f32 0.35355338, %v8357_v15  ;;  %v10563_v46 = vpack.c.bf16 %v8357_v15, %v8356_v45 }
 0x2f0   :  { %v10541_v5 = vpop.f32.mrf.mxu1 }
 0x2f1   :  { %v10543_v6 = vpack.c.bf16 %v724_v36, %v723_v2  ;;  %v10578_v53 = vpack.c.bf16 %v10541_v5, %v10539_v63 }
 0x2f2   :  { %v8360_v7 = vpop.f32.mrf.mxu1 }
 0x2f3   :  { %v727_v11 = vmul.f32 0.35355338, %v8360_v7 }
 0x2f4   :  { %v10545_v8 = vpop.f32.mrf.mxu1 }
 0x2f6   :  { %v8361_v10 = vpop.f32.mrf.mxu1 }
 0x2f7   :  { %v728_v31 = vmul.f32 0.35355338, %v8361_v10  ;;  %v10547_v12 = vpack.c.bf16 %v8361_v10, %v8360_v7 }
 0x2f8   :  { %v10549_v18 = vpop.f32.mrf.mxu1 }
 0x2f9   :  { %v10551_v21 = vpack.c.bf16 %v728_v31, %v727_v11  ;;  %v10555_v22 = vpack.c.bf16 %v10549_v18, %v10545_v8  ;;  %767 = vrot.lane.b32.xlu0 %v10547_v12, %s10074_s24 }
 0x2fb   :  { %765 = vrot.lane.b32.xlu1 %v10555_v22, %s10074_s24 }
 0x2fd   :  { %759 = vrot.lane.b32.xlu0 %v10559_v23, %s10074_s24 }
 0x2ff   :  { %763 = vrot.lane.b32.xlu1 %v10563_v46, %s10074_s24 }
 0x301   :  { %755 = vrot.lane.b32.xlu0 %v10572_v48, %s10074_s24 }
 0x303   :  { %761 = vrot.lane.b32.xlu1 %v10578_v53, %s10074_s24 }
 0x305   :  { %1044 = vrot.lane.b32.xlu0 %v10582_v28, %s10075_s26 }
 0x307   :  { %757 = vrot.lane.b32.xlu1 %v10588_v30, %s10074_s24 }
 0x309   :  { %1048 = vrot.lane.b32.xlu0 %v10588_v30, %s10075_s26 }
 0x30b   :  { %753 = vrot.lane.b32.xlu1 %v10582_v28, %s10074_s24 }
 0x30d   :  { %1052 = vrot.lane.b32.xlu0 %v10578_v53, %s10075_s26 }
 0x30f   :  { %1046 = vrot.lane.b32.xlu1 %v10572_v48, %s10075_s26 }
 0x311   :  { %1056 = vrot.lane.b32.xlu0 %v10555_v22, %s10075_s26 }
 0x313   :  { %1050 = vrot.lane.b32.xlu1 %v10559_v23, %s10075_s26 }
 0x315   :  { %1368 = vrot.lane.b32.xlu0 %v10547_v12, %s10076_s27 }
 0x317   :  { %1054 = vrot.lane.b32.xlu1 %v10563_v46, %s10075_s26 }
 0x319   :  { %1364 = vrot.lane.b32.xlu0 %v10563_v46, %s10076_s27 }
 0x31b   :  { %1058 = vrot.lane.b32.xlu1 %v10547_v12, %s10075_s26 }
 0x31d   :  { %1360 = vrot.lane.b32.xlu0 %v10559_v23, %s10076_s27 }
 0x31f   :  { %1362 = vrot.lane.b32.xlu1 %v10578_v53, %s10076_s27 }
 0x321   :  { %1354 = vrot.lane.b32.xlu0 %v10582_v28, %s10076_s27 }
 0x323   :  { %1358 = vrot.lane.b32.xlu1 %v10588_v30, %s10076_s27 }
 0x327   :  { %1356 = vrot.lane.b32.xlu1 %v10572_v48, %s10076_s27 }
 0x32b   :  { %1338 = vrot.lane.b32.xlu1 %v10529_v54, %s10077_s29 }
 0x32f   :  { %1366 = vrot.lane.b32.xlu1 %v10555_v22, %s10076_s27 }
 0x36b   :  { %v768_v32 = vpop.permute.xlu0 %767 }
 0x36c   :  { %9188 = vmatprep.subr.msk.bf16.mxu0 %vm769_vm1, %v768_v32  ;;  %v816_v33 = vsel %vm769_vm1, %v768_v32, 0 }
 0x36d   :  { %8363 = vmatpush3.bf16.xpose.msra.mxu0 %v816_v33  ;;  %v766_v34 = vpop.permute.xlu1 %765  ;;  %v717_v33 = vmul.f32 0.35355338, %v10531_v55 }
 0x36e   :  { %9189 = vmatprep.subr.msk.bf16.mxu0 %vm769_vm1, %v766_v34  ;;  %v813_v37 = vsel %vm769_vm1, %v766_v34, 0 }
 0x36f   :  { %v760_v60 = vpop.permute.xlu0 %759  ;;  %v10655_v34 = vpack.c.bf16 %v718_v24, %v717_v33 }
 0x370   :  { %v804_v58 = vsel %vm769_vm1, %v760_v60, 0 }
 0x371   :  { %v764_v62 = vpop.permute.xlu1 %763 }
 0x372   :  { %v810_v9 = vsel %vm769_vm1, %v764_v62, 0 }
 0x373   :  { %v756_v40 = vpop.permute.xlu0 %755 }
 0x374   :  { %v798_v10 = vsel %vm769_vm1, %v756_v40, 0 }
 0x375   :  { %8365 = vmatpush3.bf16.xpose.msra.mxu0 %v813_v37  ;;  %v762_v41 = vpop.permute.xlu1 %761 }
 0x376   :  { %9190 = vmatprep.subr.msk.bf16.mxu0 %vm769_vm1, %v764_v62  ;;  %v807_v52 = vsel %vm769_vm1, %v762_v41, 0 }
 0x377   :  { %v1045_v42 = vpop.permute.xlu0 %1044 }
 0x378   :  { %8396 = vmatprep.mubr.msk.bf16.mxu1 %vm769_vm1, %v1045_v42  ;;  %v726_v42 = vmul.f32 0.35355338, %v10549_v18 }
 0x379   :  { %v758_v0 = vpop.permute.xlu1 %757 }
 0x37a   :  { %v801_v2 = vsel %vm769_vm1, %v758_v0, 0 }
 0x37b   :  { %v1049_v1 = vpop.permute.xlu0 %1048 }
 0x37d   :  { %8367 = vmatpush3.bf16.xpose.msra.mxu0 %v810_v9  ;;  %v754_v43 = vpop.permute.xlu1 %753 }
 0x37e   :  { %9191 = vmatprep.subr.msk.bf16.mxu0 %vm769_vm1, %v762_v41  ;;  %v795_v31 = vsel %vm769_vm1, %v754_v43, 0 }
 0x37f   :  { %v1053_v56 = vpop.permute.xlu0 %1052 }
 0x381   :  { %v1047_v49 = vpop.permute.xlu1 %1046 }
 0x382   :  { %8397 = vmatmul.mubr.msk.bf16.vlgmr.msra.gmra.mxu1 %vm769_vm1, %v1047_v49 }
 0x383   :  { %8400 = vmatprep.mubr.msk.bf16.mxu1 %vm769_vm1, %v1049_v1  ;;  %v1057_v15 = vpop.permute.xlu0 %1056 }
 0x385   :  { %8369 = vmatpush3.bf16.xpose.msra.mxu0 %v807_v52  ;;  %v1051_v17 = vpop.permute.xlu1 %1050 }
 0x386   :  { %9192 = vmatprep.subr.msk.bf16.mxu0 %vm769_vm1, %v760_v60 }
 0x387   :  { %v1369_v44 = vpop.permute.xlu0 %1368 }
 0x388   :  { %v1416_v60 = vsel %vm769_vm1, %v1369_v44, 0 }
 0x389   :  { %v1055_v35 = vpop.permute.xlu1 %1054 }
 0x38a   :  { %8401 = vmatmul.mubr.msk.bf16.gmra.mxu1 %vm769_vm1, %v1051_v17 }
 0x38b   :  { %8404 = vmatprep.mubr.msk.bf16.mxu1 %vm769_vm1, %v1053_v56  ;;  %v1365_v41 = vpop.permute.xlu0 %1364 }
 0x38c   :  { %v1410_v63 = vsel %vm769_vm1, %v1365_v41, 0 }
 0x38d   :  { %8371 = vmatpush3.bf16.xpose.msra.mxu0 %v804_v58  ;;  %v1059_v45 = vpop.permute.xlu1 %1058 }
 0x38e   :  { %9193 = vmatprep.subr.msk.bf16.mxu0 %vm769_vm1, %v758_v0 }
 0x38f   :  { %v1361_v9 = vpop.permute.xlu0 %1360 }
 0x391   :  { %v1363_v36 = vpop.permute.xlu1 %1362 }
 0x392   :  { %8405 = vmatmul.mubr.msk.bf16.gmra.mxu1 %vm769_vm1, %v1055_v35  ;;  %v1407_v18 = vsel %vm769_vm1, %v1363_v36, 0 }
 0x393   :  { %8408 = vmatprep.mubr.msk.bf16.mxu1 %vm769_vm1, %v1057_v15  ;;  %v1355_v1 = vpop.permute.xlu0 %1354 }
 0x394   :  { %v1395_v52 = vsel %vm769_vm1, %v1355_v1, 0 }
 0x395   :  { %8373 = vmatpush3.bf16.xpose.msra.mxu0 %v801_v2  ;;  %v1359_v7 = vpop.permute.xlu1 %1358 }
 0x396   :  { %9194 = vmatprep.subr.msk.bf16.mxu0 %vm769_vm1, %v756_v40  ;;  %v722_v40 = vmul.f32 0.35355338, %v10541_v5  ;;  %v725_v5 = vmul.f32 0.35355338, %v10545_v8  ;;  %v1404_v8 = vsel %vm769_vm1, %v1361_v9, 0 }
 0x398   :  { %v10665_v37 = vpack.c.bf16 %v722_v40, %v721_v13  ;;  %v10675_v0 = vpack.c.bf16 %v726_v42, %v725_v5  ;;  %v10703_v42 = vld [vmem:[%s14250_s4] sm:$0xff] }
 0x399   :  { %v1357_v11 = vpop.permute.xlu1 %1356 }
 0x39a   :  { %8409 = vmatmul.mubr.msk.bf16.gmra.mxu1 %vm769_vm1, %v1059_v45  ;;  %v1398_v49 = vsel %vm769_vm1, %v1357_v11, 0 }
 0x39d   :  { %8375 = vmatpush3.bf16.xpose.msra.mxu0 %v798_v10  ;;  %v1339_v32 = vpop.permute.xlu1 %1338 }
 0x39e   :  { %9195 = vmatprep.subr.msk.bf16.mxu0 %vm769_vm1, %v754_v43  ;;  %v1401_v43 = vsel %vm769_vm1, %v1359_v7, 0 }
 0x3a1   :  { %v1367_v62 = vpop.permute.xlu1 %1366 }
 0x3a2   :  { %v1413_v55 = vsel %vm769_vm1, %v1367_v62, 0 }
 0x3a5   :  { %8377 = vmatpush3.bf16.xpose.msra.mxu0 %v795_v31 }
 0x3a6   :  { %9197 = vmatprep.subr.msk.bf16.mxu0 %vm769_vm1, %v1369_v44 }
 0x3ac   :  { %8379 = vmatmul.mubr.msk.bf16.vlgmr.msra.gmra.mxu0 %vm769_vm1, %v10527_v50 }
 0x3ad   :  { %8382 = vmatprep.mubr.msk.bf16.mxu0 %vm769_vm1, %v10655_v34  ;;  %8445 = vmatpush3.bf16.xpose.msra.mxu0 %v1416_v60 }
 0x3ae   :  { %9198 = vmatprep.subr.msk.bf16.mxu0 %vm769_vm1, %v1367_v62 }
 0x3b4   :  { %8383 = vmatmul.mubr.msk.bf16.gmra.mxu0 %vm769_vm1, %v10537_v59 }
 0x3b5   :  { %8386 = vmatprep.mubr.msk.bf16.mxu0 %vm769_vm1, %v10665_v37  ;;  %8447 = vmatpush3.bf16.xpose.msra.mxu0 %v1413_v55  ;;  %v10698_v55 = vld [vmem:[%s14250_s4 + $0x10] sm:$0xff] }
 0x3b6   :  { %9199 = vmatprep.subr.msk.bf16.mxu0 %vm769_vm1, %v1365_v41 }
 0x3bc   :  { %8387 = vmatmul.mubr.msk.bf16.gmra.mxu0 %vm769_vm1, %v10543_v6 }
 0x3bd   :  { %8390 = vmatprep.mubr.msk.bf16.mxu0 %vm769_vm1, %v10675_v0  ;;  %8449 = vmatpush3.bf16.xpose.msra.mxu0 %v1410_v63 }
 0x3be   :  { %9200 = vmatprep.subr.msk.bf16.mxu0 %vm769_vm1, %v1363_v36 }
 0x3c4   :  { %8391 = vmatmul.mubr.msk.bf16.gmra.mxu0 %vm769_vm1, %v10551_v21 }
 0x3c5   :  { %8451 = vmatpush3.bf16.xpose.msra.mxu0 %v1407_v18  ;;  %8460 = vmatprep.mubr.msk.bf16.mxu0 %vm769_vm1, %v1339_v32 }
 0x3c6   :  { %9201 = vmatprep.subr.msk.bf16.mxu0 %vm769_vm1, %v1361_v9  ;;  %v10711_v9 = vld [vmem:[%s14250_s4 + $0x18] sm:$0xff] }
 0x3cd   :  { %8453 = vmatpush3.bf16.xpose.msra.mxu0 %v1404_v8 }
 0x3ce   :  { %9202 = vmatprep.subr.msk.bf16.mxu0 %vm769_vm1, %v1359_v7 }
 0x3d5   :  { %8455 = vmatpush3.bf16.xpose.msra.mxu0 %v1401_v43 }
 0x3d6   :  { %9203 = vmatprep.subr.msk.bf16.mxu0 %vm769_vm1, %v1357_v11 }
 0x3dd   :  { %8457 = vmatpush3.bf16.xpose.msra.mxu0 %v1398_v49 }
 0x3de   :  { %9204 = vmatprep.subr.msk.bf16.mxu0 %vm769_vm1, %v1355_v1 }
 0x3e5   :  { %8459 = vmatpush3.bf16.xpose.msra.mxu0 %v1395_v52 }
 0x442   :  { %v8398_v17 = vpop.f32.mrf.mxu1 }
 0x444   :  { %v1122_v35 = vpop.f32.mrf.mxu1 }
 0x446   :  { %v8399_v56 = vpop.f32.mrf.mxu1 }
 0x448   :  { %v1125_v58 = vpop.f32.mrf.mxu1 }
 0x44a   :  { %v8402_v45 = vpop.f32.mrf.mxu1 }
 0x44c   :  { %v1138_v15 = vpop.f32.mrf.mxu1 }
 0x44e   :  { %v8403_v2 = vpop.f32.mrf.mxu1 }
 0x44f   :  { %v1196_v5 = vpack.c.bf16 %v8403_v2, %v8402_v45  ;;  %v10724_v45 = vld [vmem:[%s14250_s4 + $0x8] sm:$0xff] }
 0x450   :  { %v1141_v36 = vpop.f32.mrf.mxu1 }
 0x451   :  { %v1195_v49 = vpack.c.bf16 %v1141_v36, %v1138_v15  ;;  %v10733_v15 = vld [vmem:[%s14250_s4 + $0x30] sm:$0xff] }
 0x452   :  { %v8406_v7 = vpop.f32.mrf.mxu1 }
 0x454   :  { %v1154_v10 = vpop.f32.mrf.mxu1 }
 0x456   :  { %v8407_v31 = vpop.f32.mrf.mxu1 }
 0x457   :  { %v1198_v40 = vpack.c.bf16 %v8407_v31, %v8406_v7  ;;  %v1194_v7 = vpack.c.bf16 %v8399_v56, %v8398_v17  ;;  %v10742_v17 = vld [vmem:[%s14250_s4 + $0x20] sm:$0xff] }
 0x458   :  { %v1157_v44 = vpop.f32.mrf.mxu1 }
 0x459   :  { %v1197_v13 = vpack.c.bf16 %v1157_v44, %v1154_v10  ;;  %v1193_v44 = vpack.c.bf16 %v1125_v58, %v1122_v35  ;;  %v10751_v35 = vld [vmem:[%s14250_s4 + $0x38] sm:$0xff] }
 0x45a   :  { %v8410_v11 = vpop.f32.mrf.mxu1 }
 0x45c   :  { %v1170_v24 = vpop.f32.mrf.mxu1 }
 0x45e   :  { %v8411_v32 = vpop.f32.mrf.mxu1 }
 0x45f   :  { %v1200_v33 = vpack.c.bf16 %v8411_v32, %v8410_v11 }
 0x460   :  { %v1173_v60 = vpop.f32.mrf.mxu1 }
 0x461   :  { %v1199_v62 = vpack.c.bf16 %v1173_v60, %v1170_v24  ;;  %8412 = vmatprep.subr.bf16.mxu1 %v1200_v33  ;;  %v10757_v60 = vld [vmem:[%s14250_s4 + $0x48] sm:$0xff] }
 0x462   :  { %8413 = vmatpush3.bf16.msra.mxu1 %v1200_v33 }
 0x463   :  { %8414 = vmatprep.subr.bf16.mxu1 %v1199_v62 }
 0x466   :  { %8415 = vmatpush3.bf16.msra.mxu1 %v1199_v62 }
 0x467   :  { %8416 = vmatprep.subr.bf16.mxu1 %v1198_v40 }
 0x46a   :  { %8417 = vmatpush3.bf16.msra.mxu1 %v1198_v40 }
 0x46b   :  { %8418 = vmatprep.subr.bf16.mxu1 %v1197_v13 }
 0x46c   :  { %v8380_v41 = vpop.f32.mrf.mxu0 }
 0x46d   :  { %v10706_v63 = vadd.f32 %v8380_v41, %v10698_v55 }
 0x46e   :  { %v852_v18 = vpop.f32.mrf.mxu0  ;;  %8419 = vmatpush3.bf16.msra.mxu1 %v1197_v13  ;;  %v10765_v13 = vld [vmem:[%s14250_s4 + $0x28] sm:$0xff] }
 0x46f   :  { %v10714_v8 = vadd.f32 %v852_v18, %v10703_v42  ;;  %919 = vmax.xlane.f32.xlu0 %v10706_v63  ;;  %8420 = vmatprep.subr.bf16.mxu1 %v1196_v5 }
 0x470   :  { %v8381_v43 = vpop.f32.mrf.mxu0 }
 0x471   :  { %v10718_v1 = vadd.f32 %v8381_v43, %v10711_v9  ;;  %915 = vmax.xlane.f32.xlu1 %v10714_v8 }
 0x472   :  { %v855_v52 = vpop.f32.mrf.mxu0  ;;  %8421 = vmatpush3.bf16.msra.mxu1 %v1196_v5  ;;  %v10774_v5 = vld [vmem:[%s14250_s4 + $0x70] sm:$0xff] }
 0x473   :  { %921 = vmax.xlane.f32.xlu0 %v10718_v1  ;;  %8422 = vmatprep.subr.bf16.mxu1 %v1195_v49  ;;  %v10728_v10 = vadd.f32 %v855_v52, %v10724_v45 }
 0x474   :  { %v8384_v2 = vpop.f32.mrf.mxu0 }
 0x475   :  { %v10737_v11 = vadd.f32 %v8384_v2, %v10733_v15 }
 0x476   :  { %v868_v36 = vpop.f32.mrf.mxu0  ;;  %8423 = vmatpush3.bf16.msra.mxu1 %v1195_v49  ;;  %v10783_v49 = vld [vmem:[%s14250_s4 + $0x50] sm:$0xff] }
 0x477   :  { %917 = vmax.xlane.f32.xlu0 %v10728_v10  ;;  %8424 = vmatprep.subr.bf16.mxu1 %v1194_v7  ;;  %v10746_v32 = vadd.f32 %v868_v36, %v10742_v17 }
 0x478   :  { %v8385_v31 = vpop.f32.mrf.mxu0 }
 0x479   :  { %v10760_v62 = vadd.f32 %v8385_v31, %v10751_v35  ;;  %v10805_v31 = vld [vmem:[%s14250_s4 + $0x58] sm:$0xff] }
 0x47a   :  { %v871_v56 = vpop.f32.mrf.mxu0  ;;  %8425 = vmatpush3.bf16.msra.mxu1 %v1194_v7  ;;  %v10796_v7 = vld [vmem:[%s14250_s4 + $0x40] sm:$0xff] }
 0x47b   :  { %927 = vmax.xlane.f32.xlu0 %v10737_v11  ;;  %8426 = vmatprep.subr.bf16.mxu1 %v1193_v44  ;;  %v10778_v43 = vadd.f32 %v871_v56, %v10765_v13 }
 0x47c   :  { %v8388_v24 = vpop.f32.mrf.mxu0 }
 0x47d   :  { %v10790_v2 = vadd.f32 %v8388_v24, %v10783_v49  ;;  %v10814_v24 = vld [vmem:[%s14250_s4 + $0x60] sm:$0xff] }
 0x47e   :  { %v884_v58 = vpop.f32.mrf.mxu0  ;;  %8427 = vmatpush3.bf16.msra.mxu1 %v1193_v44 }
 0x47f   :  { %923 = vmax.xlane.f32.xlu0 %v10746_v32  ;;  %v10800_v36 = vadd.f32 %v884_v58, %v10796_v7 }
 0x480   :  { %v8389_v33 = vpop.f32.mrf.mxu0 }
 0x481   :  { %v10809_v44 = vadd.f32 %v8389_v33, %v10805_v31  ;;  %v10848_v33 = vld [vmem:[%s14250_s4 + $0x78] sm:$0xff] }
 0x482   :  { %v887_v40 = vpop.f32.mrf.mxu0 }
 0x483   :  { %929 = vmax.xlane.f32.xlu0 %v10760_v62  ;;  %v10769_v41 = vadd.f32 %v887_v40, %v10757_v60 }
 0x484   :  { %v8392_v18 = vpop.f32.mrf.mxu0 }
 0x485   :  { %933 = vmax.xlane.f32.xlu1 %v10769_v41  ;;  %v10786_v52 = vadd.f32 %v8392_v18, %v10774_v5 }
 0x486   :  { %v900_v56 = vpop.f32.mrf.mxu0 }
 0x487   :  { %925 = vmax.xlane.f32.xlu0 %v10778_v43  ;;  %v10818_v58 = vadd.f32 %v900_v56, %v10814_v24 }
 0x488   :  { %v8393_v40 = vpop.f32.mrf.mxu0 }
 0x489   :  { %943 = vmax.xlane.f32.xlu1 %v10786_v52  ;;  %v10853_v18 = vadd.f32 %v8393_v40, %v10848_v33  ;;  %v7696_v40 = vld [vmem:[%s14255_s9 + $0x4] sm:$0xf] }
 0x48a   :  { %v903_v56 = vpop.f32.mrf.mxu0  ;;  %9205 = vmatprep.subr.msk.bf16.mxu1 %vm1084_vm2, %v7696_v40 }
 0x48b   :  { %935 = vmax.xlane.f32.xlu0 %v10790_v2  ;;  %v10864_v26 = vadd.f32 %v903_v56, %v10860_v27 }
 0x48f   :  { %931 = vmax.xlane.f32.xlu0 %v10800_v36 }
 0x493   :  { %937 = vmax.xlane.f32.xlu0 %v10809_v44 }
 0x497   :  { %939 = vmax.xlane.f32.xlu0 %v10818_v58 }
 0x49a   :  { %1342 = vrot.lane.b32.xlu1 %v10655_v34, %s10077_s29 }
 0x49e   :  { %1344 = vrot.lane.b32.xlu1 %v10537_v59, %s10077_s29 }
 0x4a2   :  { %1346 = vrot.lane.b32.xlu1 %v10665_v37, %s10077_s29 }
 0x4a6   :  { %1348 = vrot.lane.b32.xlu1 %v10543_v6, %s10077_s29 }
 0x4aa   :  { %1350 = vrot.lane.b32.xlu1 %v10675_v0, %s10077_s29 }
 0x4ad   :  { %1340 = vrot.lane.b32.xlu0 %v10527_v50, %s10077_s29 }
 0x4b1   :  { %1645 = vrot.lane.b32.xlu0 %v10582_v28, %s10078_s1 }
 0x4b5   :  { %1649 = vrot.lane.b32.xlu0 %v10588_v30, %s10078_s1 }
 0x4b9   :  { %1653 = vrot.lane.b32.xlu0 %v10578_v53, %s10078_s1 }
 0x4bd   :  { %1657 = vrot.lane.b32.xlu0 %v10555_v22, %s10078_s1 }
 0x4c1   :  { %1960 = vrot.lane.b32.xlu0 %v10547_v12, %s10079_s22 }
 0x4c5   :  { %1956 = vrot.lane.b32.xlu0 %v10563_v46, %s10079_s22 }
 0x4c9   :  { %1952 = vrot.lane.b32.xlu0 %v10559_v23, %s10079_s22 }
 0x4cd   :  { %1946 = vrot.lane.b32.xlu0 %v10582_v28, %s10079_s22 }
 0x4ce   :  { %945 = vmax.xlane.f32.xlu1 %v10853_v18 }
 0x4d2   :  { %941 = vmax.xlane.f32.xlu1 %v10864_v26 }
 0x4e3   :  { %1352 = vrot.lane.b32.xlu1 %v10551_v21, %s10077_s29 }
 0x4e7   :  { %1647 = vrot.lane.b32.xlu1 %v10572_v48, %s10078_s1 }
 0x4eb   :  { %1651 = vrot.lane.b32.xlu1 %v10559_v23, %s10078_s1 }
 0x4ef   :  { %1655 = vrot.lane.b32.xlu1 %v10563_v46, %s10078_s1 }
 0x4f3   :  { %1659 = vrot.lane.b32.xlu1 %v10547_v12, %s10078_s1 }
 0x4f7   :  { %1958 = vrot.lane.b32.xlu1 %v10555_v22, %s10079_s22 }
 0x4f8   :  { %v920_v56 = vpop.xlane.xlu0 %919 }
 0x4f9   :  { %v949_v61 = vsub.f32 %v10706_v63, %v920_v56 }
 0x4fa   :  { %v916_v19 = vpop.xlane.xlu1 %915 }
 0x4fb   :  { %v947_v14 = vsub.f32 %v10714_v8, %v916_v19  ;;  %1954 = vrot.lane.b32.xlu1 %v10578_v53, %s10079_s22  ;;  %v967_v38 = vmul.f32 1.442695, %v949_v61 }
 0x4fc   :  { %v922_v4 = vpop.xlane.xlu0 %921 }
 0x4fd   :  { %v950_v3 = vsub.f32 %v10718_v1, %v922_v4  ;;  %v963_v57 = vmul.f32 1.442695, %v947_v14 }
 0x4ff   :  { %1950 = vrot.lane.b32.xlu1 %v10588_v30, %s10079_s22  ;;  %v969_v51 = vmul.f32 1.442695, %v950_v3  ;;  %9332 = vpow2.f32 %v963_v57 }
 0x500   :  { %v918_v47 = vpop.xlane.xlu0 %917 }
 0x501   :  { %v948_v39 = vsub.f32 %v10728_v10, %v918_v47  ;;  %9334 = vpow2.f32 %v969_v51 }
 0x503   :  { %v965_v25 = vmul.f32 1.442695, %v948_v39  ;;  %1948 = vrot.lane.b32.xlu1 %v10572_v48, %s10079_s22 }
 0x504   :  { %v928_v19 = vpop.xlane.xlu0 %927 }
 0x505   :  { %9336 = vpow2.f32 %v965_v25  ;;  %v953_v57 = vsub.f32 %v10737_v11, %v928_v19 }
 0x506   :  { %9338 = vpow2.f32 %v967_v38 }
 0x507   :  { %1930 = vrot.lane.b32.xlu1 %v10529_v54, %s10080_s30  ;;  %v975_v10 = vmul.f32 1.442695, %v953_v57 }
 0x508   :  { %v924_v4 = vpop.xlane.xlu0 %923 }
 0x509   :  { %v951_v3 = vsub.f32 %v10746_v32, %v924_v4 }
 0x50b   :  { %v971_v39 = vmul.f32 1.442695, %v951_v3  ;;  %v1686_v3 = vsel %vm1084_vm2, %v7696_v40, 0 }
 0x50c   :  { %v930_v14 = vpop.xlane.xlu0 %929  ;;  %v10898_v61 = vpop.eup %9332 }
 0x50d   :  { %v954_v47 = vsub.f32 %v10760_v62, %v930_v14  ;;  %9340 = vpow2.f32 %v971_v39 }
 0x50e   :  { %v10900_v8 = vpop.eup %9334  ;;  %v934_v25 = vpop.xlane.xlu1 %933 }
 0x50f   :  { %v977_v63 = vmul.f32 1.442695, %v954_v47  ;;  %v956_v62 = vsub.f32 %v10769_v41, %v934_v25 }
 0x510   :  { %v926_v51 = vpop.xlane.xlu0 %925 }
 0x511   :  { %v952_v38 = vsub.f32 %v10778_v43, %v926_v51  ;;  %9342 = vpow2.f32 %v977_v63  ;;  %v981_v14 = vmul.f32 1.442695, %v956_v62 }
 0x512   :  { %v10903_v1 = vpop.eup %9336  ;;  %v944_v43 = vpop.xlane.xlu1 %943 }
 0x513   :  { %v10905_v56 = vpop.eup %9338  ;;  %v973_v32 = vmul.f32 1.442695, %v952_v38  ;;  %v1185_v11 = vpack.c.bf16 %v10903_v1, %v10898_v61  ;;  %v961_v16 = vsub.f32 %v10786_v52, %v944_v43 }
 0x514   :  { %v936_v19 = vpop.xlane.xlu0 %935  ;;  %v1186_v4 = vpack.c.bf16 %v10900_v8, %v10905_v56 }
 0x515   :  { %9344 = vpow2.f32 %v973_v32  ;;  %8428 = vmatprep.mubr.bf16.mxu1 %v1185_v11  ;;  %v957_v47 = vsub.f32 %v10790_v2, %v936_v19 }
 0x516   :  { %9346 = vpow2.f32 %v975_v10  ;;  %8429 = vmatmul.mubr.bf16.vlgmr.msra.gmra.mxu1 %v1186_v4  ;;  %v1343_v25 = vpop.permute.xlu1 %1342 }
 0x517   :  { %8477 = vmatpush3.bf16.msra.mxu1 %v1686_v3  ;;  %9348 = vpow2.f32 %v981_v14  ;;  %v983_v41 = vmul.f32 1.442695, %v957_v47 }
 0x518   :  { %v932_v57 = vpop.xlane.xlu0 %931 }
 0x519   :  { %v955_v39 = vsub.f32 %v10800_v36, %v932_v57 }
 0x51a   :  { %v10916_v32 = vpop.eup %9340  ;;  %v1345_v36 = vpop.permute.xlu1 %1344 }
 0x51b   :  { %v979_v63 = vmul.f32 1.442695, %v955_v39 }
 0x51c   :  { %v938_v51 = vpop.xlane.xlu0 %937 }
 0x51d   :  { %9350 = vpow2.f32 %v979_v63  ;;  %v958_v40 = vsub.f32 %v10809_v44, %v938_v51 }
 0x51e   :  { %9352 = vpow2.f32 %v983_v41  ;;  %v10918_v11 = vpop.eup %9342  ;;  %v1347_v47 = vpop.permute.xlu1 %1346 }
 0x51f   :  { %v985_v38 = vmul.f32 1.442695, %v958_v40  ;;  %14383 = vst [vmem:[#allocation21_spill] sm:$0xff] %v10918_v11 }
 0x520   :  { %v940_v10 = vpop.xlane.xlu0 %939 }
 0x521   :  { %9354 = vpow2.f32 %v985_v38 }
 0x522   :  { %v10920_v2 = vpop.eup %9344 }
 0x523   :  { %v10922_v62 = vpop.eup %9346  ;;  %v1187_v19 = vpack.c.bf16 %v10920_v2, %v10916_v32 }
 0x524   :  { %14384 = vst [vmem:[#allocation22_spill] sm:$0xff] %v10922_v62  ;;  %v1341_v4 = vpop.permute.xlu0 %1340  ;;  %v1188_v44 = vpack.c.bf16 %v10918_v11, %v10922_v62  ;;  %v10930_v14 = vpop.eup %9348  ;;  %v11414_v11 = vld [vmem:[%s14250_s4 + $0x78] sm:$0xff] }
 0x525   :  { %8432 = vmatprep.mubr.bf16.mxu1 %v1187_v19  ;;  %8461 = vmatmul.mubr.msk.bf16.vlgmr.msra.gmra.mxu0 %vm769_vm1, %v1341_v4  ;;  %14385 = vst [vmem:[#allocation23_spill] sm:$0xff] %v10930_v14 }
 0x526   :  { %8433 = vmatmul.mubr.bf16.gmra.mxu1 %v1188_v44  ;;  %8464 = vmatprep.mubr.msk.bf16.mxu0 %vm769_vm1, %v1343_v25  ;;  %v1349_v25 = vpop.permute.xlu1 %1348 }
 0x528   :  { %v1646_v3 = vpop.permute.xlu0 %1645 }
 0x52a   :  { %v10932_v57 = vpop.eup %9350  ;;  %v1351_v4 = vpop.permute.xlu1 %1350 }
 0x52b   :  { %14386 = vst [vmem:[#allocation24_spill] sm:$0xff] %v10932_v57  ;;  %v1189_v39 = vpack.c.bf16 %v10930_v14, %v10932_v57  ;;  %v10936_v41 = vpop.eup %9352 }
 0x52c   :  { %v1650_v63 = vpop.permute.xlu0 %1649  ;;  %14387 = vst [vmem:[#allocation25_spill] sm:$0xff] %v10936_v41 }
 0x52d   :  { %8436 = vmatprep.mubr.bf16.mxu1 %v1189_v39  ;;  %8465 = vmatmul.mubr.msk.bf16.gmra.mxu0 %vm769_vm1, %v1345_v36 }
 0x52e   :  { %v10939_v51 = vpop.eup %9354  ;;  %8468 = vmatprep.mubr.msk.bf16.mxu0 %vm769_vm1, %v1347_v47  ;;  %v959_v47 = vsub.f32 %v10818_v58, %v940_v10 }
 0x52f   :  { %14388 = vst [vmem:[#allocation26_spill] sm:$0xff] %v10939_v51  ;;  %v1190_v40 = vpack.c.bf16 %v10939_v51, %v10936_v41  ;;  %v991_v51 = vmul.f32 1.442695, %v961_v16 }
 0x530   :  { %v1654_v38 = vpop.permute.xlu0 %1653 }
 0x531   :  { %8437 = vmatmul.mubr.bf16.gmra.mxu1 %v1190_v40  ;;  %v987_v40 = vmul.f32 1.442695, %v959_v47 }
 0x533   :  { %9356 = vpow2.f32 %v987_v40 }
 0x534   :  { %v1658_v19 = vpop.permute.xlu0 %1657 }
 0x535   :  { %8469 = vmatmul.mubr.msk.bf16.gmra.mxu0 %vm769_vm1, %v1349_v25 }
 0x536   :  { %8472 = vmatprep.mubr.msk.bf16.mxu0 %vm769_vm1, %v1351_v4 }
 0x538   :  { %v1961_v44 = vpop.permute.xlu0 %1960 }
 0x539   :  { %9206 = vmatprep.subr.msk.bf16.mxu0 %vm769_vm1, %v1961_v44  ;;  %v2008_v36 = vsel %vm769_vm1, %v1961_v44, 0 }
 0x53a   :  { %8527 = vmatpush3.bf16.xpose.msra.mxu0 %v2008_v36 }
 0x540   :  { %v10953_v44 = vpop.eup %9356 }
 0x541   :  { %14389 = vst [vmem:[#allocation27_spill] sm:$0xff] %v10953_v44 }
 0x557   :  { %v946_v39 = vpop.xlane.xlu1 %945 }
 0x558   :  { %v962_v29 = vsub.f32 %v10853_v18, %v946_v39 }
 0x55a   :  { %v993_v20 = vmul.f32 1.442695, %v962_v29 }
 0x55b   :  { %v942_v41 = vpop.xlane.xlu1 %941 }
 0x55c   :  { %v960_v25 = vsub.f32 %v10864_v26, %v942_v41  ;;  %9358 = vpow2.f32 %v993_v20 }
 0x55e   :  { %v989_v4 = vmul.f32 1.442695, %v960_v25 }
 0x55f   :  { %v1353_v57 = vpop.permute.xlu1 %1352 }
 0x560   :  { %9360 = vpow2.f32 %v989_v4  ;;  %8473 = vmatmul.mubr.msk.bf16.gmra.mxu0 %vm769_vm1, %v1353_v57 }
 0x561   :  { %9362 = vpow2.f32 %v991_v51  ;;  %v1957_v51 = vpop.permute.xlu0 %1956 }
 0x562   :  { %v2002_v39 = vsel %vm769_vm1, %v1957_v51, 0 }
 0x563   :  { %v1648_v58 = vpop.permute.xlu1 %1647 }
 0x565   :  { %v1953_v4 = vpop.permute.xlu0 %1952 }
 0x567   :  { %v1652_v10 = vpop.permute.xlu1 %1651 }
 0x569   :  { %v10955_v52 = vpop.eup %9358 }
 0x56a   :  { %14390 = vst [vmem:[#allocation28_spill] sm:$0xff] %v10955_v52 }
 0x56b   :  { %v1656_v18 = vpop.permute.xlu1 %1655 }
 0x56d   :  { %v10957_v29 = vpop.eup %9360 }
 0x56e   :  { %14391 = vst [vmem:[#allocation29_spill] sm:$0xff] %v10957_v29  ;;  %v10959_v43 = vpop.eup %9362  ;;  %v1191_v16 = vpack.c.bf16 %v10957_v29, %v10953_v44 }
 0x56f   :  { %14392 = vst [vmem:[#allocation30_spill] sm:$0xff] %v10959_v43  ;;  %v1660_v20 = vpop.permute.xlu1 %1659  ;;  %v1192_v26 = vpack.c.bf16 %v10955_v52, %v10959_v43 }
 0x570   :  { %8440 = vmatprep.mubr.bf16.mxu1 %v1191_v16 }
 0x571   :  { %8441 = vmatmul.mubr.bf16.gmra.mxu1 %v1192_v26 }
 0x572   :  { %8478 = vmatprep.mubr.msk.bf16.mxu1 %vm769_vm1, %v1646_v3 }
 0x573   :  { %v1959_v57 = vpop.permute.xlu1 %1958 }
 0x574   :  { %9207 = vmatprep.subr.msk.bf16.mxu0 %vm769_vm1, %v1959_v57  ;;  %v2005_v41 = vsel %vm769_vm1, %v1959_v57, 0 }
 0x575   :  { %8529 = vmatpush3.bf16.xpose.msra.mxu0 %v2005_v41 }
 0x576   :  { %9208 = vmatprep.subr.msk.bf16.mxu0 %vm769_vm1, %v1957_v51 }
 0x577   :  { %v1955_v36 = vpop.permute.xlu1 %1954 }
 0x578   :  { %v1999_v25 = vsel %vm769_vm1, %v1955_v36, 0 }
 0x579   :  { %8479 = vmatmul.mubr.msk.bf16.vlgmr.msra.gmra.mxu1 %vm769_vm1, %v1648_v58 }
 0x57a   :  { %8482 = vmatprep.mubr.msk.bf16.mxu1 %vm769_vm1, %v1650_v63  ;;  %v1996_v63 = vsel %vm769_vm1, %v1953_v4, 0 }
 0x57b   :  { %v1951_v47 = vpop.permute.xlu1 %1950 }
 0x57d   :  { %8531 = vmatpush3.bf16.xpose.msra.mxu0 %v2002_v39 }
 0x57e   :  { %9209 = vmatprep.subr.msk.bf16.mxu0 %vm769_vm1, %v1955_v36 }
 0x57f   :  { %v1949_v3 = vpop.permute.xlu1 %1948 }
 0x580   :  { %v1990_v58 = vsel %vm769_vm1, %v1949_v3, 0 }
 0x581   :  { %8483 = vmatmul.mubr.msk.bf16.gmra.mxu1 %vm769_vm1, %v1652_v10  ;;  %v1947_v10 = vpop.permute.xlu0 %1946 }
 0x582   :  { %8486 = vmatprep.mubr.msk.bf16.mxu1 %vm769_vm1, %v1654_v38  ;;  %v1993_v38 = vsel %vm769_vm1, %v1951_v47, 0 }
 0x583   :  { %v1931_v40 = vpop.permute.xlu1 %1930 }
 0x584   :  { %8542 = vmatprep.mubr.msk.bf16.mxu0 %vm769_vm1, %v1931_v40 }
 0x585   :  { %8533 = vmatpush3.bf16.xpose.msra.mxu0 %v1999_v25 }
 0x586   :  { %9210 = vmatprep.subr.msk.bf16.mxu0 %vm769_vm1, %v1953_v4 }
 0x589   :  { %8487 = vmatmul.mubr.msk.bf16.gmra.mxu1 %vm769_vm1, %v1656_v18 }
 0x58a   :  { %8490 = vmatprep.mubr.msk.bf16.mxu1 %vm769_vm1, %v1658_v19  ;;  %v1987_v19 = vsel %vm769_vm1, %v1947_v10, 0 }
 0x58d   :  { %8535 = vmatpush3.bf16.xpose.msra.mxu0 %v1996_v63 }
 0x58e   :  { %9211 = vmatprep.subr.msk.bf16.mxu0 %vm769_vm1, %v1951_v47 }
 0x591   :  { %8491 = vmatmul.mubr.msk.bf16.gmra.mxu1 %vm769_vm1, %v1660_v20 }
 0x595   :  { %8537 = vmatpush3.bf16.xpose.msra.mxu0 %v1993_v38 }
 0x596   :  { %9212 = vmatprep.subr.msk.bf16.mxu0 %vm769_vm1, %v1949_v3 }
 0x59d   :  { %8539 = vmatpush3.bf16.xpose.msra.mxu0 %v1990_v58 }
 0x59e   :  { %9213 = vmatprep.subr.msk.bf16.mxu0 %vm769_vm1, %v1947_v10 }
 0x5a5   :  { %8541 = vmatpush3.bf16.xpose.msra.mxu0 %v1987_v19 }
 0x5d6   :  { %v11031_v58 = vpop.f32.mrf.mxu1 }
 0x5d7   :  { %14393 = vst [vmem:[#allocation31_spill] sm:$0xff] %v11031_v58 }
 0x5e5   :  { %v8462_v18 = vpop.f32.mrf.mxu0 }
 0x5e6   :  { %v10989_v16 = vadd.f32 %v8462_v18, %v10698_v55 }
 0x5e7   :  { %v1452_v26 = vpop.f32.mrf.mxu0 }
 0x5e8   :  { %v10992_v20 = vadd.f32 %v1452_v26, %v10703_v42  ;;  %1519 = vmax.xlane.f32.xlu0 %v10989_v16 }
 0x5e9   :  { %v8463_v57 = vpop.f32.mrf.mxu0 }
 0x5ea   :  { %v10996_v41 = vadd.f32 %v8463_v57, %v10711_v9  ;;  %1515 = vmax.xlane.f32.xlu1 %v10992_v20 }
 0x5eb   :  { %v1455_v51 = vpop.f32.mrf.mxu0 }
 0x5ec   :  { %1521 = vmax.xlane.f32.xlu0 %v10996_v41  ;;  %v11001_v47 = vadd.f32 %v1455_v51, %v10724_v45 }
 0x5ed   :  { %v8466_v36 = vpop.f32.mrf.mxu0 }
 0x5ee   :  { %v11005_v39 = vadd.f32 %v8466_v36, %v10733_v15 }
 0x5ef   :  { %v1468_v55 = vpop.f32.mrf.mxu0 }
 0x5f0   :  { %1517 = vmax.xlane.f32.xlu0 %v11001_v47  ;;  %v11009_v40 = vadd.f32 %v1468_v55, %v10742_v17 }
 0x5f1   :  { %v8467_v42 = vpop.f32.mrf.mxu0 }
 0x5f2   :  { %v11013_v45 = vadd.f32 %v8467_v42, %v10751_v35 }
 0x5f3   :  { %v1471_v3 = vpop.f32.mrf.mxu0 }
 0x5f4   :  { %1527 = vmax.xlane.f32.xlu0 %v11005_v39  ;;  %v11020_v15 = vadd.f32 %v1471_v3, %v10765_v13  ;;  %v11037_v13 = vpop.f32.mrf.mxu1 }
 0x5f5   :  { %v8470_v9 = vpop.f32.mrf.mxu0  ;;  %14394 = vst [vmem:[#allocation32_spill] sm:$0xff] %v11037_v13 }
 0x5f6   :  { %v11025_v17 = vadd.f32 %v8470_v9, %v10783_v49  ;;  %v11040_v10 = vpop.f32.mrf.mxu1 }
 0x5f7   :  { %v1484_v25 = vpop.f32.mrf.mxu0  ;;  %14395 = vst [vmem:[#allocation33_spill] sm:$0xff] %v11040_v10 }
 0x5f8   :  { %1523 = vmax.xlane.f32.xlu0 %v11009_v40  ;;  %v11029_v35 = vadd.f32 %v1484_v25, %v10796_v7  ;;  %v11042_v49 = vpop.f32.mrf.mxu1 }
 0x5f9   :  { %v8471_v4 = vpop.f32.mrf.mxu0  ;;  %14396 = vst [vmem:[#allocation34_spill] sm:$0xff] %v11042_v49 }
 0x5fa   :  { %v11044_v19 = vpop.f32.mrf.mxu1 }
 0x5fb   :  { %v1487_v63 = vpop.f32.mrf.mxu0  ;;  %14397 = vst [vmem:[#allocation35_spill] sm:$0xff] %v11044_v19 }
 0x5fc   :  { %v11016_v38 = vadd.f32 %v1487_v63, %v10757_v60  ;;  %1529 = vmax.xlane.f32.xlu0 %v11013_v45  ;;  %v11035_v60 = vadd.f32 %v8471_v4, %v10805_v31  ;;  %v11046_v18 = vpop.f32.mrf.mxu1 }
 0x5fd   :  { %14398 = vst [vmem:[#allocation36_spill] sm:$0xff] %v11046_v18 }
 0x5fe   :  { %1533 = vmax.xlane.f32.xlu1 %v11016_v38  ;;  %v11048_v7 = vpop.f32.mrf.mxu1 }
 0x5ff   :  { %14399 = vst [vmem:[#allocation37_spill] sm:$0xff] %v11048_v7 }
 0x600   :  { %1525 = vmax.xlane.f32.xlu0 %v11020_v15  ;;  %v11050_v57 = vpop.f32.mrf.mxu1 }
 0x601   :  { %14400 = vst [vmem:[#allocation38_spill] sm:$0xff] %v11050_v57 }
 0x602   :  { %v11055_v36 = vpop.f32.mrf.mxu1 }
 0x603   :  { %14401 = vst [vmem:[#allocation39_spill] sm:$0xff] %v11055_v36 }
 0x604   :  { %1535 = vmax.xlane.f32.xlu0 %v11025_v17  ;;  %v11062_v42 = vpop.f32.mrf.mxu1 }
 0x605   :  { %14402 = vst [vmem:[#allocation40_spill] sm:$0xff] %v11062_v42 }
 0x606   :  { %v11064_v3 = vpop.f32.mrf.mxu1 }
 0x607   :  { %14403 = vst [vmem:[#allocation41_spill] sm:$0xff] %v11064_v3 }
 0x608   :  { %1531 = vmax.xlane.f32.xlu0 %v11029_v35  ;;  %v11066_v9 = vpop.f32.mrf.mxu1 }
 0x609   :  { %14404 = vst [vmem:[#allocation42_spill] sm:$0xff] %v11066_v9 }
 0x60c   :  { %1537 = vmax.xlane.f32.xlu0 %v11035_v60 }
 0x620   :  { %v8474_v26 = vpop.f32.mrf.mxu0 }
 0x621   :  { %v11053_v31 = vadd.f32 %v8474_v26, %v10774_v5 }
 0x622   :  { %v1500_v51 = vpop.f32.mrf.mxu0 }
 0x623   :  { %v11058_v55 = vadd.f32 %v1500_v51, %v10814_v24  ;;  %1543 = vmax.xlane.f32.xlu1 %v11053_v31 }
 0x624   :  { %v8475_v52 = vpop.f32.mrf.mxu0 }
 0x625   :  { %1539 = vmax.xlane.f32.xlu0 %v11058_v55 }
 0x631   :  { %v11068_v25 = vpop.f32.mrf.mxu1 }
 0x632   :  { %14405 = vst [vmem:[#allocation43_spill] sm:$0xff] %v11068_v25 }
 0x633   :  { %v11070_v5 = vpop.f32.mrf.mxu1 }
 0x634   :  { %14406 = vst [vmem:[#allocation44_spill] sm:$0xff] %v11070_v5  ;;  %1934 = vrot.lane.b32.xlu1 %v10655_v34, %s10080_s30 }
 0x635   :  { %v11074_v4 = vpop.f32.mrf.mxu1 }
 0x636   :  { %14407 = vst [vmem:[#allocation45_spill] sm:$0xff] %v11074_v4 }
 0x637   :  { %v11076_v24 = vpop.f32.mrf.mxu1 }
 0x638   :  { %14408 = vst [vmem:[#allocation46_spill] sm:$0xff] %v11076_v24  ;;  %1936 = vrot.lane.b32.xlu1 %v10537_v59, %s10080_s30 }
 0x639   :  { %v8480_v63 = vpop.f32.mrf.mxu1 }
 0x63b   :  { %1932 = vrot.lane.b32.xlu0 %v10527_v50, %s10080_s30  ;;  %v1722_v26 = vpop.f32.mrf.mxu1 }
 0x63c   :  { %1938 = vrot.lane.b32.xlu1 %v10665_v37, %s10080_s30 }
 0x63d   :  { %v8481_v51 = vpop.f32.mrf.mxu1 }
 0x63f   :  { %2237 = vrot.lane.b32.xlu0 %v10582_v28, %s14316_s20  ;;  %v1725_v5 = vpop.f32.mrf.mxu1 }
 0x640   :  { %1940 = vrot.lane.b32.xlu1 %v10543_v6, %s10080_s30 }
 0x641   :  { %v8484_v24 = vpop.f32.mrf.mxu1 }
 0x643   :  { %2241 = vrot.lane.b32.xlu0 %v10588_v30, %s14316_s20  ;;  %v1738_v4 = vpop.f32.mrf.mxu1 }
 0x644   :  { %1942 = vrot.lane.b32.xlu1 %v10675_v0, %s10080_s30 }
 0x645   :  { %v8485_v25 = vpop.f32.mrf.mxu1 }
 0x646   :  { %v1796_v44 = vpack.c.bf16 %v8485_v25, %v8484_v24 }
 0x647   :  { %2245 = vrot.lane.b32.xlu0 %v10578_v53, %s14316_s20  ;;  %v1741_v36 = vpop.f32.mrf.mxu1 }
 0x649   :  { %v8488_v3 = vpop.f32.mrf.mxu1 }
 0x64b   :  { %2249 = vrot.lane.b32.xlu0 %v10555_v22, %s14316_s20  ;;  %v1754_v42 = vpop.f32.mrf.mxu1 }
 0x64d   :  { %v8489_v9 = vpop.f32.mrf.mxu1 }
 0x64e   :  { %v1798_v58 = vpack.c.bf16 %v8489_v9, %v8488_v3 }
 0x64f   :  { %2552 = vrot.lane.b32.xlu0 %v10547_v12, %s14291_s21  ;;  %v1757_v19 = vpop.f32.mrf.mxu1 }
 0x650   :  { %v1797_v43 = vpack.c.bf16 %v1757_v19, %v1754_v42 }
 0x651   :  { %v8492_v7 = vpop.f32.mrf.mxu1 }
 0x653   :  { %2548 = vrot.lane.b32.xlu0 %v10563_v46, %s14291_s21  ;;  %v1770_v18 = vpop.f32.mrf.mxu1 }
 0x655   :  { %v8493_v57 = vpop.f32.mrf.mxu1 }
 0x656   :  { %v1800_v49 = vpack.c.bf16 %v8493_v57, %v8492_v7  ;;  %v11105_v7 = vadd.f32 %v8475_v52, %v10848_v33 }
 0x657   :  { %2544 = vrot.lane.b32.xlu0 %v10559_v23, %s14291_s21  ;;  %v1773_v10 = vpop.f32.mrf.mxu1 }
 0x658   :  { %v1799_v13 = vpack.c.bf16 %v1773_v10, %v1770_v18  ;;  %8494 = vmatprep.subr.bf16.mxu1 %v1800_v49  ;;  %v1503_v10 = vpop.f32.mrf.mxu0  ;;  %v1795_v18 = vpack.c.bf16 %v1741_v36, %v1738_v4 }
 0x659   :  { %8495 = vmatpush3.bf16.msra.mxu1 %v1800_v49  ;;  %v11109_v49 = vadd.f32 %v1503_v10, %v10860_v27 }
 0x65a   :  { %8496 = vmatprep.subr.bf16.mxu1 %v1799_v13 }
 0x65b   :  { %2538 = vrot.lane.b32.xlu0 %v10582_v28, %s14291_s21 }
 0x65d   :  { %8497 = vmatpush3.bf16.msra.mxu1 %v1799_v13  ;;  %v1794_v13 = vpack.c.bf16 %v8481_v51, %v8480_v63 }
 0x65e   :  { %8498 = vmatprep.subr.bf16.mxu1 %v1798_v58 }
 0x661   :  { %8499 = vmatpush3.bf16.msra.mxu1 %v1798_v58  ;;  %v1793_v58 = vpack.c.bf16 %v1725_v5, %v1722_v26 }
 0x662   :  { %8500 = vmatprep.subr.bf16.mxu1 %v1797_v43 }
 0x665   :  { %8501 = vmatpush3.bf16.msra.mxu1 %v1797_v43 }
 0x666   :  { %8502 = vmatprep.subr.bf16.mxu1 %v1796_v44 }
 0x668   :  { %1545 = vmax.xlane.f32.xlu1 %v11105_v7 }
 0x669   :  { %8503 = vmatpush3.bf16.msra.mxu1 %v1796_v44 }
 0x66a   :  { %8504 = vmatprep.subr.bf16.mxu1 %v1795_v18 }
 0x66c   :  { %1541 = vmax.xlane.f32.xlu1 %v11109_v49 }
 0x66d   :  { %8505 = vmatpush3.bf16.msra.mxu1 %v1795_v18 }
 0x66e   :  { %8506 = vmatprep.subr.bf16.mxu1 %v1794_v13 }
 0x671   :  { %8507 = vmatpush3.bf16.msra.mxu1 %v1794_v13  ;;  %v1520_v43 = vpop.xlane.xlu0 %1519 }
 0x672   :  { %8508 = vmatprep.subr.bf16.mxu1 %v1793_v58  ;;  %v1549_v27 = vsub.f32 %v10989_v16, %v1520_v43 }
 0x673   :  { %v1516_v33 = vpop.xlane.xlu1 %1515 }
 0x674   :  { %v1547_v52 = vsub.f32 %v10992_v20, %v1516_v33  ;;  %v1567_v9 = vmul.f32 1.442695, %v1549_v27 }
 0x675   :  { %8509 = vmatpush3.bf16.msra.mxu1 %v1793_v58  ;;  %v1522_v19 = vpop.xlane.xlu0 %1521 }
 0x676   :  { %v1550_v44 = vsub.f32 %v10996_v41, %v1522_v19  ;;  %v1563_v57 = vmul.f32 1.442695, %v1547_v52  ;;  %v7713_v19 = vld [vmem:[%s14255_s9 + $0x8] sm:$0xf] }
 0x677   :  { %9214 = vmatprep.subr.msk.bf16.mxu1 %vm1084_vm2, %v7713_v19 }
 0x678   :  { %v1569_v36 = vmul.f32 1.442695, %v1550_v44  ;;  %9364 = vpow2.f32 %v1563_v57  ;;  %v2278_v44 = vsel %vm1084_vm2, %v7713_v19, 0 }
 0x679   :  { %v1518_v42 = vpop.xlane.xlu0 %1517 }
 0x67a   :  { %v1548_v3 = vsub.f32 %v11001_v47, %v1518_v42  ;;  %9366 = vpow2.f32 %v1569_v36 }
 0x67c   :  { %v1565_v25 = vmul.f32 1.442695, %v1548_v3 }
 0x67d   :  { %1944 = vrot.lane.b32.xlu1 %v10551_v21, %s10080_s30  ;;  %v1528_v5 = vpop.xlane.xlu0 %1527 }
 0x67e   :  { %9368 = vpow2.f32 %v1565_v25  ;;  %v1553_v4 = vsub.f32 %v11005_v39, %v1528_v5 }
 0x67f   :  { %9370 = vpow2.f32 %v1567_v9 }
 0x680   :  { %v1575_v58 = vmul.f32 1.442695, %v1553_v4 }
 0x681   :  { %2239 = vrot.lane.b32.xlu1 %v10572_v48, %s14316_s20  ;;  %v1524_v20 = vpop.xlane.xlu0 %1523 }
 0x682   :  { %v1551_v16 = vsub.f32 %v11009_v40, %v1524_v20 }
 0x684   :  { %v1571_v24 = vmul.f32 1.442695, %v1551_v16 }
 0x685   :  { %2243 = vrot.lane.b32.xlu1 %v10559_v23, %s14316_s20  ;;  %v1530_v41 = vpop.xlane.xlu0 %1529  ;;  %v11125_v63 = vpop.eup %9364 }
 0x686   :  { %v1554_v47 = vsub.f32 %v11013_v45, %v1530_v41  ;;  %14409 = vst [vmem:[#allocation47_spill] sm:$0xff] %v11125_v63  ;;  %9372 = vpow2.f32 %v1571_v24 }
 0x687   :  { %v11129_v10 = vpop.eup %9366  ;;  %v1534_v18 = vpop.xlane.xlu1 %1533 }
 0x688   :  { %v1577_v26 = vmul.f32 1.442695, %v1554_v47  ;;  %14410 = vst [vmem:[#allocation48_spill] sm:$0xff] %v11129_v10  ;;  %v1556_v33 = vsub.f32 %v11016_v38, %v1534_v18 }
 0x689   :  { %2247 = vrot.lane.b32.xlu1 %v10563_v46, %s14316_s20  ;;  %v1526_v51 = vpop.xlane.xlu0 %1525 }
 0x68a   :  { %v1552_v40 = vsub.f32 %v11020_v15, %v1526_v51  ;;  %9374 = vpow2.f32 %v1577_v26  ;;  %v1581_v38 = vmul.f32 1.442695, %v1556_v33 }
 0x68b   :  { %v11132_v13 = vpop.eup %9368 }
 0x68c   :  { %14411 = vst [vmem:[#allocation49_spill] sm:$0xff] %v11132_v13  ;;  %v11134_v43 = vpop.eup %9370  ;;  %v1573_v39 = vmul.f32 1.442695, %v1552_v40  ;;  %v1785_v45 = vpack.c.bf16 %v11132_v13, %v11125_v63 }
 0x68d   :  { %2251 = vrot.lane.b32.xlu1 %v10547_v12, %s14316_s20  ;;  %v1536_v52 = vpop.xlane.xlu0 %1535  ;;  %v1786_v15 = vpack.c.bf16 %v11129_v10, %v11134_v43 }
 0x68e   :  { %9376 = vpow2.f32 %v1573_v39  ;;  %8510 = vmatprep.mubr.bf16.mxu1 %v1785_v45  ;;  %v1557_v27 = vsub.f32 %v11025_v17, %v1536_v52 }
 0x68f   :  { %9378 = vpow2.f32 %v1575_v58  ;;  %8511 = vmatmul.mubr.bf16.vlgmr.msra.gmra.mxu1 %v1786_v15 }
 0x690   :  { %8559 = vmatpush3.bf16.msra.mxu1 %v2278_v44  ;;  %9380 = vpow2.f32 %v1581_v38  ;;  %v1583_v3 = vmul.f32 1.442695, %v1557_v27 }
 0x691   :  { %2550 = vrot.lane.b32.xlu1 %v10555_v22, %s14291_s21  ;;  %v1532_v57 = vpop.xlane.xlu0 %1531 }
 0x692   :  { %v1555_v36 = vsub.f32 %v11029_v35, %v1532_v57 }
 0x693   :  { %v11155_v20 = vpop.eup %9372 }
 0x694   :  { %v1579_v42 = vmul.f32 1.442695, %v1555_v36  ;;  %14412 = vst [vmem:[#allocation50_spill] sm:$0xff] %v11155_v20 }
 0x695   :  { %2546 = vrot.lane.b32.xlu1 %v10578_v53, %s14291_s21  ;;  %v1538_v9 = vpop.xlane.xlu0 %1537 }
 0x696   :  { %9382 = vpow2.f32 %v1579_v42  ;;  %v1558_v25 = vsub.f32 %v11035_v60, %v1538_v9 }
 0x697   :  { %9384 = vpow2.f32 %v1583_v3  ;;  %v11159_v17 = vpop.eup %9374 }
 0x698   :  { %v1585_v5 = vmul.f32 1.442695, %v1558_v25  ;;  %14413 = vst [vmem:[#allocation51_spill] sm:$0xff] %v11159_v17 }
 0x699   :  { %2542 = vrot.lane.b32.xlu1 %v10588_v30, %s14291_s21 }
 0x69a   :  { %9386 = vpow2.f32 %v1585_v5 }
 0x69b   :  { %v11161_v35 = vpop.eup %9376 }
 0x69c   :  { %14414 = vst [vmem:[#allocation52_spill] sm:$0xff] %v11161_v35  ;;  %v11163_v16 = vpop.eup %9378  ;;  %v1787_v41 = vpack.c.bf16 %v11161_v35, %v11155_v20 }
 0x69d   :  { %14415 = vst [vmem:[#allocation53_spill] sm:$0xff] %v11163_v16  ;;  %2540 = vrot.lane.b32.xlu1 %v10572_v48, %s14291_s21  ;;  %v1788_v60 = vpack.c.bf16 %v11159_v17, %v11163_v16  ;;  %v11173_v47 = vpop.eup %9380 }
 0x69e   :  { %8514 = vmatprep.mubr.bf16.mxu1 %v1787_v41  ;;  %14416 = vst [vmem:[#allocation54_spill] sm:$0xff] %v11173_v47 }
 0x69f   :  { %8515 = vmatmul.mubr.bf16.gmra.mxu1 %v1788_v60 }
 0x6a1   :  { %2522 = vrot.lane.b32.xlu1 %v10529_v54, %s14314_s3 }
 0x6a3   :  { %v11175_v4 = vpop.eup %9382 }
 0x6a4   :  { %14417 = vst [vmem:[#allocation55_spill] sm:$0xff] %v11175_v4  ;;  %v1789_v24 = vpack.c.bf16 %v11173_v47, %v11175_v4  ;;  %v11179_v26 = vpop.eup %9384 }
 0x6a5   :  { %14418 = vst [vmem:[#allocation56_spill] sm:$0xff] %v11179_v26 }
 0x6a6   :  { %8518 = vmatprep.mubr.bf16.mxu1 %v1789_v24 }
 0x6a7   :  { %v11181_v51 = vpop.eup %9386 }
 0x6a8   :  { %14419 = vst [vmem:[#allocation57_spill] sm:$0xff] %v11181_v51  ;;  %v1790_v18 = vpack.c.bf16 %v11181_v51, %v11179_v26 }
 0x6aa   :  { %8519 = vmatmul.mubr.bf16.gmra.mxu1 %v1790_v18 }
 0x6ac   :  { %v1544_v40 = vpop.xlane.xlu1 %1543 }
 0x6ad   :  { %v1561_v25 = vsub.f32 %v11053_v31, %v1544_v40 }
 0x6ae   :  { %v1540_v58 = vpop.xlane.xlu0 %1539 }
 0x6af   :  { %v1559_v42 = vsub.f32 %v11058_v55, %v1540_v58  ;;  %v1591_v18 = vmul.f32 1.442695, %v1561_v25 }
 0x6b0   :  { %v1935_v39 = vpop.permute.xlu1 %1934 }
 0x6b1   :  { %v1587_v5 = vmul.f32 1.442695, %v1559_v42 }
 0x6b2   :  { %v1933_v54 = vpop.permute.xlu0 %1932 }
 0x6b3   :  { %8543 = vmatmul.mubr.msk.bf16.vlgmr.msra.gmra.mxu0 %vm769_vm1, %v1933_v54  ;;  %9388 = vpow2.f32 %v1587_v5 }
 0x6b4   :  { %v1937_v45 = vpop.permute.xlu1 %1936  ;;  %8546 = vmatprep.mubr.msk.bf16.mxu0 %vm769_vm1, %v1935_v39 }
 0x6b6   :  { %v2238_v33 = vpop.permute.xlu0 %2237 }
 0x6b8   :  { %v1939_v52 = vpop.permute.xlu1 %1938 }
 0x6ba   :  { %v2242_v15 = vpop.permute.xlu0 %2241 }
 0x6bb   :  { %8547 = vmatmul.mubr.msk.bf16.gmra.mxu0 %vm769_vm1, %v1937_v45 }
 0x6bc   :  { %8550 = vmatprep.mubr.msk.bf16.mxu0 %vm769_vm1, %v1939_v52  ;;  %v1941_v19 = vpop.permute.xlu1 %1940 }
 0x6be   :  { %v2246_v44 = vpop.permute.xlu0 %2245 }
 0x6c0   :  { %v1943_v27 = vpop.permute.xlu1 %1942  ;;  %v11198_v45 = vpop.eup %9388 }
 0x6c1   :  { %14420 = vst [vmem:[#allocation58_spill] sm:$0xff] %v11198_v45 }
 0x6c2   :  { %v2250_v38 = vpop.permute.xlu0 %2249 }
 0x6c3   :  { %8551 = vmatmul.mubr.msk.bf16.gmra.mxu0 %vm769_vm1, %v1941_v19 }
 0x6c4   :  { %8554 = vmatprep.mubr.msk.bf16.mxu0 %vm769_vm1, %v1943_v27 }
 0x6c6   :  { %v2553_v57 = vpop.permute.xlu0 %2552 }
 0x6c7   :  { %9215 = vmatprep.subr.msk.bf16.mxu0 %vm769_vm1, %v2553_v57  ;;  %v2600_v36 = vsel %vm769_vm1, %v2553_v57, 0 }
 0x6c8   :  { %8609 = vmatpush3.bf16.xpose.msra.mxu0 %v2600_v36 }
 0x6ca   :  { %v2549_v42 = vpop.permute.xlu0 %2548 }
 0x6cb   :  { %v2594_v25 = vsel %vm769_vm1, %v2549_v42, 0 }
 0x6f1   :  { %v1546_v3 = vpop.xlane.xlu1 %1545 }
 0x6f2   :  { %v1562_v9 = vsub.f32 %v11105_v7, %v1546_v3 }
 0x6f4   :  { %v1593_v41 = vmul.f32 1.442695, %v1562_v9 }
 0x6f5   :  { %v1542_v60 = vpop.xlane.xlu1 %1541 }
 0x6f6   :  { %v1560_v24 = vsub.f32 %v11109_v49, %v1542_v60  ;;  %9390 = vpow2.f32 %v1593_v41  ;;  %v2545_v60 = vpop.permute.xlu0 %2544 }
 0x6f8   :  { %v1589_v39 = vmul.f32 1.442695, %v1560_v24 }
 0x6f9   :  { %v1945_v54 = vpop.permute.xlu1 %1944 }
 0x6fa   :  { %9392 = vpow2.f32 %v1589_v39  ;;  %8555 = vmatmul.mubr.msk.bf16.gmra.mxu0 %vm769_vm1, %v1945_v54  ;;  %v11236_v54 = vld [vmem:[%s14250_s4 + $0x10] sm:$0xff] }
 0x6fb   :  { %9394 = vpow2.f32 %v1591_v18  ;;  %v2539_v18 = vpop.permute.xlu0 %2538 }
 0x6fd   :  { %v2240_v55 = vpop.permute.xlu1 %2239 }
 0x701   :  { %v2244_v58 = vpop.permute.xlu1 %2243 }
 0x703   :  { %v11200_v31 = vpop.eup %9390 }
 0x704   :  { %14421 = vst [vmem:[#allocation59_spill] sm:$0xff] %v11200_v31 }
 0x705   :  { %v2248_v7 = vpop.permute.xlu1 %2247 }
 0x707   :  { %v11202_v40 = vpop.eup %9392 }
 0x708   :  { %14422 = vst [vmem:[#allocation60_spill] sm:$0xff] %v11202_v40  ;;  %v11204_v52 = vpop.eup %9394  ;;  %v1791_v49 = vpack.c.bf16 %v11202_v40, %v11198_v45  ;;  %v11326_v45 = vld [vmem:[%s14250_s4 + $0x40] sm:$0xff] }
 0x709   :  { %14423 = vst [vmem:[#allocation61_spill] sm:$0xff] %v11204_v52  ;;  %v2252_v19 = vpop.permute.xlu1 %2251  ;;  %v1792_v27 = vpack.c.bf16 %v11200_v31, %v11204_v52  ;;  %v11335_v31 = vld [vmem:[%s14250_s4 + $0x58] sm:$0xff] }
 0x70a   :  { %8522 = vmatprep.mubr.bf16.mxu1 %v1791_v49 }
 0x70b   :  { %8523 = vmatmul.mubr.bf16.gmra.mxu1 %v1792_v27  ;;  %v11253_v27 = vld [vmem:[%s14250_s4 + $0x18] sm:$0xff] }
 0x70c   :  { %8560 = vmatprep.mubr.msk.bf16.mxu1 %vm769_vm1, %v2238_v33 }
 0x70d   :  { %v2551_v57 = vpop.permute.xlu1 %2550 }
 0x70e   :  { %9216 = vmatprep.subr.msk.bf16.mxu0 %vm769_vm1, %v2551_v57  ;;  %v2597_v36 = vsel %vm769_vm1, %v2551_v57, 0 }
 0x70f   :  { %8611 = vmatpush3.bf16.xpose.msra.mxu0 %v2597_v36 }
 0x710   :  { %9217 = vmatprep.subr.msk.bf16.mxu0 %vm769_vm1, %v2549_v42 }
 0x711   :  { %v2547_v3 = vpop.permute.xlu1 %2546 }
 0x712   :  { %v2591_v41 = vsel %vm769_vm1, %v2547_v3, 0 }
 0x713   :  { %8561 = vmatmul.mubr.msk.bf16.vlgmr.msra.gmra.mxu1 %vm769_vm1, %v2240_v55 }
 0x714   :  { %8564 = vmatprep.mubr.msk.bf16.mxu1 %vm769_vm1, %v2242_v15  ;;  %v2588_v15 = vsel %vm769_vm1, %v2545_v60, 0 }
 0x715   :  { %v2543_v9 = vpop.permute.xlu1 %2542 }
 0x717   :  { %8613 = vmatpush3.bf16.xpose.msra.mxu0 %v2594_v25 }
 0x718   :  { %9218 = vmatprep.subr.msk.bf16.mxu0 %vm769_vm1, %v2547_v3  ;;  %v11263_v3 = vld [vmem:[%s14250_s4 + $0x8] sm:$0xff] }
 0x719   :  { %v2541_v33 = vpop.permute.xlu1 %2540 }
 0x71a   :  { %v2582_v24 = vsel %vm769_vm1, %v2541_v33, 0 }
 0x71b   :  { %8565 = vmatmul.mubr.msk.bf16.gmra.mxu1 %vm769_vm1, %v2244_v58 }
 0x71c   :  { %8568 = vmatprep.mubr.msk.bf16.mxu1 %vm769_vm1, %v2246_v44  ;;  %v2585_v44 = vsel %vm769_vm1, %v2543_v9, 0 }
 0x71d   :  { %v2523_v5 = vpop.permute.xlu1 %2522 }
 0x71e   :  { %8624 = vmatprep.mubr.msk.bf16.mxu0 %vm769_vm1, %v2523_v5  ;;  %v11272_v5 = vld [vmem:[%s14250_s4 + $0x30] sm:$0xff] }
 0x71f   :  { %8615 = vmatpush3.bf16.xpose.msra.mxu0 %v2591_v41 }
 0x720   :  { %9219 = vmatprep.subr.msk.bf16.mxu0 %vm769_vm1, %v2545_v60 }
 0x723   :  { %8569 = vmatmul.mubr.msk.bf16.gmra.mxu1 %vm769_vm1, %v2248_v7  ;;  %v11244_v7 = vld [vmem:[%s14250_s4] sm:$0xff] }
 0x724   :  { %8572 = vmatprep.mubr.msk.bf16.mxu1 %vm769_vm1, %v2250_v38  ;;  %v2579_v38 = vsel %vm769_vm1, %v2539_v18, 0 }
 0x727   :  { %8617 = vmatpush3.bf16.xpose.msra.mxu0 %v2588_v15 }
 0x728   :  { %9220 = vmatprep.subr.msk.bf16.mxu0 %vm769_vm1, %v2543_v9 }
 0x72b   :  { %8573 = vmatmul.mubr.msk.bf16.gmra.mxu1 %vm769_vm1, %v2252_v19 }
 0x72f   :  { %8619 = vmatpush3.bf16.xpose.msra.mxu0 %v2585_v44  ;;  %v11281_v44 = vld [vmem:[%s14250_s4 + $0x20] sm:$0xff] }
 0x730   :  { %9221 = vmatprep.subr.msk.bf16.mxu0 %vm769_vm1, %v2541_v33 }
 0x737   :  { %8621 = vmatpush3.bf16.xpose.msra.mxu0 %v2582_v24 }
 0x738   :  { %9222 = vmatprep.subr.msk.bf16.mxu0 %vm769_vm1, %v2539_v18 }
 0x73f   :  { %8623 = vmatpush3.bf16.xpose.msra.mxu0 %v2579_v38 }
 0x74f   :  { %v11341_v52 = vpop.f32.mrf.mxu1 }
 0x750   :  { %14424 = vst [vmem:[#allocation62_spill] sm:$0xff] %v11341_v52 }
 0x751   :  { %v11343_v47 = vpop.f32.mrf.mxu1 }
 0x752   :  { %14425 = vst [vmem:[#allocation63_spill] sm:$0xff] %v11343_v47 }
 0x753   :  { %v11345_v4 = vpop.f32.mrf.mxu1 }
 0x754   :  { %14426 = vst [vmem:[#allocation64_spill] sm:$0xff] %v11345_v4 }
 0x773   :  { %v8544_v39 = vpop.f32.mrf.mxu0 }
 0x774   :  { %v11239_v55 = vadd.f32 %v11236_v54, %v8544_v39  ;;  %v11290_v39 = vld [vmem:[%s14250_s4 + $0x38] sm:$0xff] }
 0x775   :  { %v2044_v58 = vpop.f32.mrf.mxu0 }
 0x776   :  { %v11247_v49 = vadd.f32 %v11244_v7, %v2044_v58  ;;  %2111 = vmax.xlane.f32.xlu0 %v11239_v55 }
 0x777   :  { %v8545_v19 = vpop.f32.mrf.mxu0 }
 0x778   :  { %v11256_v57 = vadd.f32 %v11253_v27, %v8545_v19  ;;  %2107 = vmax.xlane.f32.xlu1 %v11247_v49 }
 0x779   :  { %v2047_v36 = vpop.f32.mrf.mxu0 }
 0x77a   :  { %2113 = vmax.xlane.f32.xlu0 %v11256_v57  ;;  %v11266_v9 = vadd.f32 %v11263_v3, %v2047_v36  ;;  %v11298_v36 = vld [vmem:[%s14250_s4 + $0x48] sm:$0xff] }
 0x77b   :  { %v8548_v42 = vpop.f32.mrf.mxu0 }
 0x77c   :  { %v11275_v41 = vadd.f32 %v11272_v5, %v8548_v42 }
 0x77d   :  { %v2060_v25 = vpop.f32.mrf.mxu0 }
 0x77e   :  { %2109 = vmax.xlane.f32.xlu0 %v11266_v9  ;;  %v11284_v24 = vadd.f32 %v11281_v44, %v2060_v25  ;;  %v11307_v25 = vld [vmem:[%s14250_s4 + $0x28] sm:$0xff] }
 0x77f   :  { %v8549_v33 = vpop.f32.mrf.mxu0 }
 0x780   :  { %v11293_v58 = vadd.f32 %v11290_v39, %v8549_v33  ;;  %v11317_v33 = vld [vmem:[%s14250_s4 + $0x50] sm:$0xff] }
 0x781   :  { %v2063_v60 = vpop.f32.mrf.mxu0 }
 0x782   :  { %2119 = vmax.xlane.f32.xlu0 %v11275_v41  ;;  %v11310_v40 = vadd.f32 %v11307_v25, %v2063_v60 }
 0x783   :  { %v8552_v15 = vpop.f32.mrf.mxu0 }
 0x785   :  { %v2076_v18 = vpop.f32.mrf.mxu0 }
 0x786   :  { %2115 = vmax.xlane.f32.xlu0 %v11284_v24  ;;  %v11329_v60 = vadd.f32 %v11326_v45, %v2076_v18  ;;  %v11347_v18 = vpop.f32.mrf.mxu1 }
 0x787   :  { %v8553_v38 = vpop.f32.mrf.mxu0  ;;  %14427 = vst [vmem:[#allocation65_spill] sm:$0xff] %v11347_v18 }
 0x788   :  { %v11349_v51 = vpop.f32.mrf.mxu1 }
 0x789   :  { %v2079_v19 = vpop.f32.mrf.mxu0  ;;  %14428 = vst [vmem:[#allocation66_spill] sm:$0xff] %v11349_v51 }
 0x78a   :  { %v11301_v42 = vadd.f32 %v11298_v36, %v2079_v19  ;;  %2121 = vmax.xlane.f32.xlu0 %v11293_v58  ;;  %v11320_v19 = vadd.f32 %v11317_v33, %v8552_v15  ;;  %v11338_v15 = vadd.f32 %v11335_v31, %v8553_v38  ;;  %v11351_v26 = vpop.f32.mrf.mxu1  ;;  %v11360_v38 = vld [vmem:[%s14250_s4 + $0x70] sm:$0xff] }
 0x78b   :  { %14429 = vst [vmem:[#allocation67_spill] sm:$0xff] %v11351_v26  ;;  %v11370_v26 = vld [vmem:[%s14250_s4 + $0x60] sm:$0xff] }
 0x78c   :  { %2125 = vmax.xlane.f32.xlu1 %v11301_v42  ;;  %v11353_v35 = vpop.f32.mrf.mxu1 }
 0x78d   :  { %14430 = vst [vmem:[#allocation68_spill] sm:$0xff] %v11353_v35 }
 0x78e   :  { %2117 = vmax.xlane.f32.xlu0 %v11310_v40  ;;  %v11355_v17 = vpop.f32.mrf.mxu1 }
 0x78f   :  { %14431 = vst [vmem:[#allocation69_spill] sm:$0xff] %v11355_v17 }
 0x790   :  { %v11365_v52 = vpop.f32.mrf.mxu1 }
 0x791   :  { %14432 = vst [vmem:[#allocation70_spill] sm:$0xff] %v11365_v52 }
 0x792   :  { %2127 = vmax.xlane.f32.xlu0 %v11320_v19  ;;  %v11377_v17 = vpop.f32.mrf.mxu1 }
 0x793   :  { %14433 = vst [vmem:[#allocation71_spill] sm:$0xff] %v11377_v17 }
 0x794   :  { %v11379_v51 = vpop.f32.mrf.mxu1 }
 0x795   :  { %14434 = vst [vmem:[#allocation72_spill] sm:$0xff] %v11379_v51 }
 0x796   :  { %2123 = vmax.xlane.f32.xlu0 %v11329_v60 }
 0x79a   :  { %2129 = vmax.xlane.f32.xlu0 %v11338_v15 }
 0x7ba   :  { %v8556_v20 = vpop.f32.mrf.mxu0 }
 0x7bb   :  { %v11363_v47 = vadd.f32 %v11360_v38, %v8556_v20  ;;  %v11381_v20 = vpop.f32.mrf.mxu1 }
 0x7bc   :  { %v2092_v4 = vpop.f32.mrf.mxu0  ;;  %14435 = vst [vmem:[#allocation73_spill] sm:$0xff] %v11381_v20 }
 0x7bd   :  { %v11373_v35 = vadd.f32 %v11370_v26, %v2092_v4  ;;  %2135 = vmax.xlane.f32.xlu1 %v11363_v47 }
 0x7be   :  { %v8557_v14 = vpop.f32.mrf.mxu0 }
 0x7bf   :  { %2131 = vmax.xlane.f32.xlu0 %v11373_v35 }
 0x7cb   :  { %v11383_v18 = vpop.f32.mrf.mxu1 }
 0x7cc   :  { %14436 = vst [vmem:[#allocation74_spill] sm:$0xff] %v11383_v18 }
 0x7cd   :  { %v11385_v52 = vpop.f32.mrf.mxu1 }
 0x7ce   :  { %14437 = vst [vmem:[#allocation75_spill] sm:$0xff] %v11385_v52  ;;  %2526 = vrot.lane.b32.xlu1 %v10655_v34, %s14314_s3 }
 0x7cf   :  { %v11389_v16 = vpop.f32.mrf.mxu1 }
 0x7d0   :  { %14438 = vst [vmem:[#allocation76_spill] sm:$0xff] %v11389_v16 }
 0x7d1   :  { %v11391_v4 = vpop.f32.mrf.mxu1 }
 0x7d2   :  { %14439 = vst [vmem:[#allocation77_spill] sm:$0xff] %v11391_v4  ;;  %2528 = vrot.lane.b32.xlu1 %v10537_v59, %s14314_s3 }
 0x7d3   :  { %v8562_v13 = vpop.f32.mrf.mxu1 }
 0x7d5   :  { %2524 = vrot.lane.b32.xlu0 %v10527_v50, %s14314_s3  ;;  %v2314_v51 = vpop.f32.mrf.mxu1 }
 0x7d6   :  { %2530 = vrot.lane.b32.xlu1 %v10665_v37, %s14314_s3 }
 0x7d7   :  { %v8563_v18 = vpop.f32.mrf.mxu1 }
 0x7d9   :  { %2829 = vrot.lane.b32.xlu0 %v10582_v28, %s14312_s2  ;;  %v2317_v34 = vpop.f32.mrf.mxu1 }
 0x7da   :  { %2532 = vrot.lane.b32.xlu1 %v10543_v6, %s14314_s3 }
 0x7db   :  { %v8566_v4 = vpop.f32.mrf.mxu1 }
 0x7dd   :  { %2833 = vrot.lane.b32.xlu0 %v10588_v30, %s14312_s2  ;;  %v2330_v59 = vpop.f32.mrf.mxu1 }
 0x7de   :  { %2534 = vrot.lane.b32.xlu1 %v10675_v0, %s14314_s3 }
 0x7df   :  { %v8567_v50 = vpop.f32.mrf.mxu1 }
 0x7e1   :  { %2837 = vrot.lane.b32.xlu0 %v10578_v53, %s14312_s2  ;;  %v2333_v37 = vpop.f32.mrf.mxu1 }
 0x7e3   :  { %v8570_v16 = vpop.f32.mrf.mxu1 }
 0x7e5   :  { %2841 = vrot.lane.b32.xlu0 %v10555_v22, %s14312_s2  ;;  %v2346_v28 = vpop.f32.mrf.mxu1  ;;  %v2388_v22 = vpack.c.bf16 %v8567_v50, %v8566_v4 }
 0x7e7   :  { %v8571_v52 = vpop.f32.mrf.mxu1 }
 0x7e8   :  { %v2390_v0 = vpack.c.bf16 %v8571_v52, %v8570_v16 }
 0x7e9   :  { %v2349_v6 = vpop.f32.mrf.mxu1 }
 0x7ea   :  { %v2389_v53 = vpack.c.bf16 %v2349_v6, %v2346_v28 }
 0x7eb   :  { %v8574_v20 = vpop.f32.mrf.mxu1 }
 0x7ed   :  { %v2362_v17 = vpop.f32.mrf.mxu1 }
 0x7ef   :  { %v8575_v63 = vpop.f32.mrf.mxu1 }
 0x7f0   :  { %v2392_v30 = vpack.c.bf16 %v8575_v63, %v8574_v20  ;;  %v11417_v63 = vadd.f32 %v11414_v11, %v8557_v14  ;;  %v11424_v20 = vld [vmem:[%s14250_s4 + $0x68] sm:$0xff] }
 0x7f1   :  { %v2365_v10 = vpop.f32.mrf.mxu1 }
 0x7f2   :  { %v2391_v29 = vpack.c.bf16 %v2365_v10, %v2362_v17  ;;  %8576 = vmatprep.subr.bf16.mxu1 %v2392_v30  ;;  %v2095_v10 = vpop.f32.mrf.mxu0 }
 0x7f3   :  { %8577 = vmatpush3.bf16.msra.mxu1 %v2392_v30  ;;  %v11427_v4 = vadd.f32 %v11424_v20, %v2095_v10 }
 0x7f4   :  { %8578 = vmatprep.subr.bf16.mxu1 %v2391_v29 }
 0x7f7   :  { %8579 = vmatpush3.bf16.msra.mxu1 %v2391_v29  ;;  %v2387_v29 = vpack.c.bf16 %v2333_v37, %v2330_v59  ;;  %v2386_v59 = vpack.c.bf16 %v8563_v18, %v8562_v13 }
 0x7f8   :  { %8580 = vmatprep.subr.bf16.mxu1 %v2390_v0 }
 0x7fb   :  { %8581 = vmatpush3.bf16.msra.mxu1 %v2390_v0  ;;  %v2385_v0 = vpack.c.bf16 %v2317_v34, %v2314_v51 }
 0x7fc   :  { %8582 = vmatprep.subr.bf16.mxu1 %v2389_v53 }
 0x7ff   :  { %8583 = vmatpush3.bf16.msra.mxu1 %v2389_v53  ;;  %v2112_v62 = vpop.xlane.xlu0 %2111 }
 0x800   :  { %8584 = vmatprep.subr.bf16.mxu1 %v2388_v22  ;;  %v2141_v50 = vsub.f32 %v11239_v55, %v2112_v62 }
 0x801   :  { %v2108_v17 = vpop.xlane.xlu1 %2107 }
 0x802   :  { %v2139_v16 = vsub.f32 %v11247_v49, %v2108_v17  ;;  %2137 = vmax.xlane.f32.xlu1 %v11417_v63  ;;  %v2159_v30 = vmul.f32 1.442695, %v2141_v50 }
 0x803   :  { %8585 = vmatpush3.bf16.msra.mxu1 %v2388_v22  ;;  %v2114_v52 = vpop.xlane.xlu0 %2113 }
 0x804   :  { %v2142_v14 = vsub.f32 %v11256_v57, %v2114_v52  ;;  %8586 = vmatprep.subr.bf16.mxu1 %v2387_v29  ;;  %v2155_v37 = vmul.f32 1.442695, %v2139_v16 }
 0x806   :  { %2133 = vmax.xlane.f32.xlu1 %v11427_v4  ;;  %v2161_v49 = vmul.f32 1.442695, %v2142_v14  ;;  %9396 = vpow2.f32 %v2155_v37 }
 0x807   :  { %8587 = vmatpush3.bf16.msra.mxu1 %v2387_v29  ;;  %v2110_v28 = vpop.xlane.xlu0 %2109 }
 0x808   :  { %v2140_v6 = vsub.f32 %v11266_v9, %v2110_v28  ;;  %8588 = vmatprep.subr.bf16.mxu1 %v2386_v59  ;;  %9398 = vpow2.f32 %v2161_v49 }
 0x80a   :  { %v2157_v53 = vmul.f32 1.442695, %v2140_v6 }
 0x80b   :  { %8589 = vmatpush3.bf16.msra.mxu1 %v2386_v59  ;;  %v2120_v57 = vpop.xlane.xlu0 %2119 }
 0x80c   :  { %9400 = vpow2.f32 %v2157_v53  ;;  %8590 = vmatprep.subr.bf16.mxu1 %v2385_v0  ;;  %v2145_v9 = vsub.f32 %v11275_v41, %v2120_v57 }
 0x80d   :  { %9402 = vpow2.f32 %v2159_v30 }
 0x80f   :  { %8591 = vmatpush3.bf16.msra.mxu1 %v2385_v0  ;;  %v2116_v62 = vpop.xlane.xlu0 %2115 }
 0x810   :  { %v2143_v13 = vsub.f32 %v11284_v24, %v2116_v62  ;;  %v2167_v24 = vmul.f32 1.442695, %v2145_v9 }
 0x812   :  { %v2163_v22 = vmul.f32 1.442695, %v2143_v13 }
 0x813   :  { %v2122_v55 = vpop.xlane.xlu0 %2121  ;;  %v11436_v10 = vpop.eup %9396 }
 0x814   :  { %v2146_v18 = vsub.f32 %v11293_v58, %v2122_v55  ;;  %9404 = vpow2.f32 %v2163_v22 }
 0x815   :  { %v11440_v17 = vpop.eup %9398  ;;  %v2126_v29 = vpop.xlane.xlu1 %2125 }
 0x816   :  { %v2169_v51 = vmul.f32 1.442695, %v2146_v18  ;;  %v2148_v50 = vsub.f32 %v11301_v42, %v2126_v29 }
 0x817   :  { %2536 = vrot.lane.b32.xlu1 %v10551_v21, %s14314_s3  ;;  %v2118_v34 = vpop.xlane.xlu0 %2117 }
 0x818   :  { %v2144_v16 = vsub.f32 %v11310_v40, %v2118_v34  ;;  %9406 = vpow2.f32 %v2169_v51  ;;  %v2173_v59 = vmul.f32 1.442695, %v2148_v50 }
 0x819   :  { %v11443_v52 = vpop.eup %9400 }
 0x81a   :  { %v11445_v14 = vpop.eup %9402  ;;  %v2165_v41 = vmul.f32 1.442695, %v2144_v16  ;;  %v2377_v58 = vpack.c.bf16 %v11443_v52, %v11436_v10 }
 0x81b   :  { %2831 = vrot.lane.b32.xlu1 %v10572_v48, %s14312_s2  ;;  %v2128_v21 = vpop.xlane.xlu0 %2127  ;;  %v2378_v40 = vpack.c.bf16 %v11440_v17, %v11445_v14 }
 0x81c   :  { %9408 = vpow2.f32 %v2165_v41  ;;  %8592 = vmatprep.mubr.bf16.mxu1 %v2377_v58  ;;  %v2149_v37 = vsub.f32 %v11320_v19, %v2128_v21  ;;  %v7730_v19 = vld [vmem:[%s14255_s9 + $0xc] sm:$0xf] }
 0x81d   :  { %9410 = vpow2.f32 %v2167_v24  ;;  %8593 = vmatmul.mubr.bf16.vlgmr.msra.gmra.mxu1 %v2378_v40  ;;  %9223 = vmatprep.subr.msk.bf16.mxu1 %vm1084_vm2, %v7730_v19 }
 0x81e   :  { %9412 = vpow2.f32 %v2173_v59  ;;  %v2175_v48 = vmul.f32 1.442695, %v2149_v37 }
 0x81f   :  { %2835 = vrot.lane.b32.xlu1 %v10559_v23, %s14312_s2  ;;  %v2124_v49 = vpop.xlane.xlu0 %2123  ;;  %v2870_v23 = vsel %vm1084_vm2, %v7730_v19, 0 }
 0x820   :  { %v2147_v42 = vsub.f32 %v11329_v60, %v2124_v49  ;;  %8641 = vmatpush3.bf16.msra.mxu1 %v2870_v23 }
 0x821   :  { %v11464_v53 = vpop.eup %9404 }
 0x822   :  { %v2171_v28 = vmul.f32 1.442695, %v2147_v42 }
 0x823   :  { %2839 = vrot.lane.b32.xlu1 %v10563_v46, %s14312_s2  ;;  %v2130_v6 = vpop.xlane.xlu0 %2129 }
 0x824   :  { %9414 = vpow2.f32 %v2171_v28  ;;  %v2150_v30 = vsub.f32 %v11338_v15, %v2130_v6 }
 0x825   :  { %9416 = vpow2.f32 %v2175_v48  ;;  %v11470_v46 = vpop.eup %9406 }
 0x826   :  { %v2177_v0 = vmul.f32 1.442695, %v2150_v30 }
 0x827   :  { %2843 = vrot.lane.b32.xlu1 %v10547_v12, %s14312_s2  ;;  %s14607_s2 = smov 40  }
 0x828   :  { %9418 = vpow2.f32 %v2177_v0 }
 0x829   :  { %v11472_v60 = vpop.eup %9408 }
 0x82a   :  { %v11474_v15 = vpop.eup %9410  ;;  %v2379_v57 = vpack.c.bf16 %v11472_v60, %v11464_v53 }
 0x82b   :  { %v2380_v62 = vpack.c.bf16 %v11470_v46, %v11474_v15  ;;  %v11480_v12 = vpop.eup %9412 }
 0x82c   :  { %8596 = vmatprep.mubr.bf16.mxu1 %v2379_v57 }
 0x82d   :  { %8597 = vmatmul.mubr.bf16.gmra.mxu1 %v2380_v62 }
 0x831   :  { %v11482_v13 = vpop.eup %9414 }
 0x832   :  { %v2381_v55 = vpack.c.bf16 %v11480_v12, %v11482_v13  ;;  %v11486_v18 = vpop.eup %9416 }
 0x834   :  { %8600 = vmatprep.mubr.bf16.mxu1 %v2381_v55 }
 0x835   :  { %v11488_v9 = vpop.eup %9418 }
 0x836   :  { %v2382_v22 = vpack.c.bf16 %v11488_v9, %v11486_v18 }
 0x838   :  { %8601 = vmatmul.mubr.bf16.gmra.mxu1 %v2382_v22 }
 0x846   :  { %v2136_v51 = vpop.xlane.xlu1 %2135 }
 0x847   :  { %v2153_v37 = vsub.f32 %v11363_v47, %v2136_v51 }
 0x848   :  { %v2132_v34 = vpop.xlane.xlu0 %2131 }
 0x849   :  { %v2151_v21 = vsub.f32 %v11373_v35, %v2132_v34  ;;  %v2183_v6 = vmul.f32 1.442695, %v2153_v37 }
 0x84a   :  { %v2527_v29 = vpop.permute.xlu1 %2526 }
 0x84b   :  { %v2179_v49 = vmul.f32 1.442695, %v2151_v21 }
 0x84c   :  { %v2525_v16 = vpop.permute.xlu0 %2524 }
 0x84d   :  { %8625 = vmatmul.mubr.msk.bf16.vlgmr.msra.gmra.mxu0 %vm769_vm1, %v2525_v16  ;;  %9420 = vpow2.f32 %v2179_v49 }
 0x84e   :  { %v2529_v24 = vpop.permute.xlu1 %2528  ;;  %8628 = vmatprep.mubr.msk.bf16.mxu0 %vm769_vm1, %v2527_v29 }
 0x850   :  { %v2830_v57 = vpop.permute.xlu0 %2829 }
 0x852   :  { %v2531_v41 = vpop.permute.xlu1 %2530 }
 0x854   :  { %v2834_v55 = vpop.permute.xlu0 %2833 }
 0x855   :  { %8629 = vmatmul.mubr.msk.bf16.gmra.mxu0 %vm769_vm1, %v2529_v24 }
 0x856   :  { %8632 = vmatprep.mubr.msk.bf16.mxu0 %vm769_vm1, %v2531_v41  ;;  %v2533_v58 = vpop.permute.xlu1 %2532 }
 0x858   :  { %v2838_v51 = vpop.permute.xlu0 %2837 }
 0x85a   :  { %v2535_v50 = vpop.permute.xlu1 %2534  ;;  %v11503_v35 = vpop.eup %9420 }
 0x85c   :  { %v2842_v29 = vpop.permute.xlu0 %2841 }
 0x85d   :  { %8633 = vmatmul.mubr.msk.bf16.gmra.mxu0 %vm769_vm1, %v2533_v58 }
 0x85e   :  { %8636 = vmatprep.mubr.msk.bf16.mxu0 %vm769_vm1, %v2535_v50 }
 0x88b   :  { %v2138_v40 = vpop.xlane.xlu1 %2137 }
 0x88c   :  { %v2154_v59 = vsub.f32 %v11417_v63, %v2138_v40 }
 0x88e   :  { %v2185_v42 = vmul.f32 1.442695, %v2154_v59 }
 0x88f   :  { %v2134_v28 = vpop.xlane.xlu1 %2133 }
 0x890   :  { %v2152_v48 = vsub.f32 %v11427_v4, %v2134_v28  ;;  %9422 = vpow2.f32 %v2185_v42 }
 0x892   :  { %v2181_v30 = vmul.f32 1.442695, %v2152_v48 }
 0x893   :  { %v2537_v0 = vpop.permute.xlu1 %2536 }
 0x894   :  { %9424 = vpow2.f32 %v2181_v30  ;;  %8637 = vmatmul.mubr.msk.bf16.gmra.mxu0 %vm769_vm1, %v2537_v0 }
 0x895   :  { %9426 = vpow2.f32 %v2183_v6 }
 0x897   :  { %v2832_v62 = vpop.permute.xlu1 %2831 }
 0x89b   :  { %v2836_v22 = vpop.permute.xlu1 %2835 }
 0x89d   :  { %v11505_v19 = vpop.eup %9422 }
 0x89f   :  { %v2840_v34 = vpop.permute.xlu1 %2839 }
 0x8a1   :  { %v11507_v63 = vpop.eup %9424 }
 0x8a2   :  { %v11509_v47 = vpop.eup %9426  ;;  %v2383_v4 = vpack.c.bf16 %v11507_v63, %v11503_v35 }
 0x8a3   :  { %v2384_v23 = vpack.c.bf16 %v11505_v19, %v11509_v47  ;;  %v2844_v16 = vpop.permute.xlu1 %2843 }
 0x8a4   :  { %8604 = vmatprep.mubr.bf16.mxu1 %v2383_v4 }
 0x8a5   :  { %8605 = vmatmul.mubr.bf16.gmra.mxu1 %v2384_v23 }
 0x8a6   :  { %8642 = vmatprep.mubr.msk.bf16.mxu1 %vm769_vm1, %v2830_v57 }
 0x8ad   :  { %8643 = vmatmul.mubr.msk.bf16.vlgmr.msra.gmra.mxu1 %vm769_vm1, %v2832_v62 }
 0x8ae   :  { %8646 = vmatprep.mubr.msk.bf16.mxu1 %vm769_vm1, %v2834_v55 }
 0x8b5   :  { %8647 = vmatmul.mubr.msk.bf16.gmra.mxu1 %vm769_vm1, %v2836_v22 }
 0x8b6   :  { %8650 = vmatprep.mubr.msk.bf16.mxu1 %vm769_vm1, %v2838_v51 }
 0x8bd   :  { %8651 = vmatmul.mubr.msk.bf16.gmra.mxu1 %vm769_vm1, %v2840_v34 }
 0x8be   :  { %8654 = vmatprep.mubr.msk.bf16.mxu1 %vm769_vm1, %v2842_v29 }
 0x8c5   :  { %8655 = vmatmul.mubr.msk.bf16.gmra.mxu1 %vm769_vm1, %v2844_v16 }
 0x8dd   :  { %v11571_v23 = vpop.f32.mrf.mxu1 }
 0x90d   :  { %v8626_v24 = vpop.f32.mrf.mxu0 }
 0x90e   :  { %v11528_v40 = vadd.f32 %v11236_v54, %v8626_v24 }
 0x90f   :  { %v2636_v41 = vpop.f32.mrf.mxu0 }
 0x910   :  { %v11524_v58 = vadd.f32 %v11244_v7, %v2636_v41 }
 0x911   :  { %v8627_v50 = vpop.f32.mrf.mxu0 }
 0x912   :  { %2699 = vmax.xlane.f32.xlu0 %v11524_v58  ;;  %v11536_v42 = vadd.f32 %v11253_v27, %v8627_v50 }
 0x913   :  { %v2639_v21 = vpop.f32.mrf.mxu0 }
 0x914   :  { %v11531_v59 = vadd.f32 %v11263_v3, %v2639_v21 }
 0x915   :  { %v8630_v37 = vpop.f32.mrf.mxu0 }
 0x916   :  { %2701 = vmax.xlane.f32.xlu1 %v11531_v59  ;;  %2703 = vmax.xlane.f32.xlu0 %v11528_v40  ;;  %v11548_v30 = vadd.f32 %v11272_v5, %v8630_v37 }
 0x917   :  { %v2652_v49 = vpop.f32.mrf.mxu0 }
 0x918   :  { %v11540_v48 = vadd.f32 %v11281_v44, %v2652_v49 }
 0x919   :  { %v8631_v7 = vpop.f32.mrf.mxu0 }
 0x91a   :  { %2705 = vmax.xlane.f32.xlu0 %v11536_v42  ;;  %v11551_v27 = vadd.f32 %v11290_v39, %v8631_v7 }
 0x91b   :  { %v2655_v28 = vpop.f32.mrf.mxu0 }
 0x91c   :  { %v11543_v54 = vadd.f32 %v11307_v25, %v2655_v28 }
 0x91d   :  { %v8634_v3 = vpop.f32.mrf.mxu0 }
 0x91e   :  { %2709 = vmax.xlane.f32.xlu1 %v11543_v54  ;;  %2707 = vmax.xlane.f32.xlu0 %v11540_v48  ;;  %v11564_v5 = vadd.f32 %v11317_v33, %v8634_v3 }
 0x91f   :  { %v2668_v6 = vpop.f32.mrf.mxu0 }
 0x920   :  { %v11556_v25 = vadd.f32 %v11326_v45, %v2668_v6  ;;  %v11573_v45 = vpop.f32.mrf.mxu1 }
 0x921   :  { %v8635_v0 = vpop.f32.mrf.mxu0 }
 0x922   :  { %2713 = vmax.xlane.f32.xlu1 %v11551_v27  ;;  %2711 = vmax.xlane.f32.xlu0 %v11548_v30  ;;  %v11567_v39 = vadd.f32 %v11335_v31, %v8635_v0 }
 0x923   :  { %v2671_v44 = vpop.f32.mrf.mxu0 }
 0x924   :  { %v11559_v4 = vadd.f32 %v11298_v36, %v2671_v44  ;;  %v11575_v36 = vpop.f32.mrf.mxu1 }
 0x926   :  { %2717 = vmax.xlane.f32.xlu1 %v11559_v4  ;;  %2715 = vmax.xlane.f32.xlu0 %v11556_v25  ;;  %v11577_v57 = vpop.f32.mrf.mxu1 }
 0x928   :  { %v11579_v62 = vpop.f32.mrf.mxu1 }
 0x92a   :  { %2721 = vmax.xlane.f32.xlu1 %v11567_v39  ;;  %2719 = vmax.xlane.f32.xlu0 %v11564_v5  ;;  %v11581_v55 = vpop.f32.mrf.mxu1 }
 0x92c   :  { %v11583_v33 = vpop.f32.mrf.mxu1 }
 0x92e   :  { %v11585_v22 = vpop.f32.mrf.mxu1 }
 0x92f   :  { %14440 = vst [vmem:[#allocation78_spill] sm:$0xff] %v11585_v22  ;;  %v14465_v22 = vld [vmem:[#allocation52_spill] sm:$0xff] }
 0x930   :  { %v11587_v34 = vpop.f32.mrf.mxu1 }
 0x931   :  { %14441 = vst [vmem:[#allocation79_spill] sm:$0xff] %v11587_v34 }
 0x932   :  { %v11593_v41 = vpop.f32.mrf.mxu1 }
 0x933   :  { %14442 = vst [vmem:[#allocation80_spill] sm:$0xff] %v11593_v41 }
 0x934   :  { %v11603_v37 = vpop.f32.mrf.mxu1 }
 0x935   :  { %14443 = vst [vmem:[#allocation81_spill] sm:$0xff] %v11603_v37  ;;  %v14462_v37 = vld [vmem:[#allocation53_spill] sm:$0xff] }
 0x936   :  { %v11610_v49 = vpop.f32.mrf.mxu1 }
 0x937   :  { %14444 = vst [vmem:[#allocation82_spill] sm:$0xff] %v11610_v49  ;;  %v14461_v49 = vld [vmem:[#allocation49_spill] sm:$0xff] }
 0x954   :  { %v8638_v31 = vpop.f32.mrf.mxu0 }
 0x955   :  { %v11596_v50 = vadd.f32 %v11360_v38, %v8638_v31 }
 0x956   :  { %v2684_v51 = vpop.f32.mrf.mxu0 }
 0x957   :  { %v11590_v29 = vadd.f32 %v11370_v26, %v2684_v51 }
 0x958   :  { %v8639_v16 = vpop.f32.mrf.mxu0 }
 0x959   :  { %2723 = vmax.xlane.f32.xlu0 %v11590_v29  ;;  %v11606_v26 = vadd.f32 %v11414_v11, %v8639_v16  ;;  %v14455_v16 = vld [vmem:[#allocation29_spill] sm:$0xff] }
 0x95a   :  { %v2687_v24 = vpop.f32.mrf.mxu0 }
 0x95b   :  { %v11599_v21 = vadd.f32 %v11424_v20, %v2687_v24  ;;  %v14456_v24 = vld [vmem:[#allocation27_spill] sm:$0xff] }
 0x95d   :  { %2725 = vmax.xlane.f32.xlu1 %v11599_v21  ;;  %2727 = vmax.xlane.f32.xlu0 %v11596_v50 }
 0x961   :  { %2729 = vmax.xlane.f32.xlu1 %v11606_v26  ;;  %995 = vadd.xlane.f32.xlu0 %v10898_v61 }
 0x965   :  { %v11612_v38 = vpop.f32.mrf.mxu1  ;;  %997 = vadd.xlane.f32.xlu1 %v10903_v1  ;;  %999 = vadd.xlane.f32.xlu0 %v10905_v56  ;;  %v14449_v1 = vld [vmem:[#allocation21_spill] sm:$0xff]  ;;  %v14450_v56 = vld [vmem:[#allocation22_spill] sm:$0xff] }
 0x966   :  { %14445 = vst [vmem:[#allocation83_spill] sm:$0xff] %v11612_v38  ;;  %v14460_v38 = vld [vmem:[#allocation47_spill] sm:$0xff] }
 0x967   :  { %v11616_v20 = vpop.f32.mrf.mxu1 }
 0x968   :  { %14446 = vst [vmem:[#allocation84_spill] sm:$0xff] %v11616_v20  ;;  %v14459_v20 = vld [vmem:[#allocation48_spill] sm:$0xff] }
 0x969   :  { %v11618_v7 = vpop.f32.mrf.mxu1  ;;  %1001 = vadd.xlane.f32.xlu1 %v10900_v8  ;;  %1599 = vadd.xlane.f32.xlu0 %v11134_v43  ;;  %v14451_v8 = vld [vmem:[#allocation23_spill] sm:$0xff]  ;;  %v14452_v43 = vld [vmem:[#allocation24_spill] sm:$0xff] }
 0x96a   :  { %14447 = vst [vmem:[#allocation85_spill] sm:$0xff] %v11618_v7  ;;  %v14458_v7 = vld [vmem:[#allocation30_spill] sm:$0xff] }
 0x96b   :  { %v11622_v11 = vpop.f32.mrf.mxu1 }
 0x96c   :  { %14448 = vst [vmem:[#allocation86_spill] sm:$0xff] %v11622_v11  ;;  %v14457_v11 = vld [vmem:[#allocation28_spill] sm:$0xff] }
 0x96d   :  { %1005 = vadd.xlane.f32.xlu1 %v10920_v2  ;;  %1003 = vadd.xlane.f32.xlu0 %v10916_v32  ;;  %v11626_v61 = vpop.f32.mrf.mxu1  ;;  %v14453_v2 = vld [vmem:[#allocation26_spill] sm:$0xff]  ;;  %v14454_v32 = vld [vmem:[#allocation25_spill] sm:$0xff] }
 0x96f   :  { %v11628_v28 = vpop.f32.mrf.mxu1 }
 0x971   :  { %1009 = vadd.xlane.f32.xlu1 %v14449_v1  ;;  %1007 = vadd.xlane.f32.xlu0 %v14450_v56  ;;  %v8645_v3 = vpop.f32.mrf.mxu1 }
 0x973   :  { %v11632_v6 = vpop.f32.mrf.mxu1 }
 0x975   :  { %1013 = vadd.xlane.f32.xlu1 %v14451_v8  ;;  %1011 = vadd.xlane.f32.xlu0 %v14452_v43  ;;  %v8648_v0 = vpop.f32.mrf.mxu1 }
 0x977   :  { %v2922_v44 = vpop.f32.mrf.mxu1 }
 0x979   :  { %1017 = vadd.xlane.f32.xlu1 %v14453_v2  ;;  %1015 = vadd.xlane.f32.xlu0 %v14454_v32  ;;  %v8649_v31 = vpop.f32.mrf.mxu1 }
 0x97b   :  { %v2925_v51 = vpop.f32.mrf.mxu1 }
 0x97d   :  { %1021 = vadd.xlane.f32.xlu1 %v14455_v16  ;;  %1019 = vadd.xlane.f32.xlu0 %v14456_v24  ;;  %v8652_v1 = vpop.f32.mrf.mxu1 }
 0x97f   :  { %v2938_v56 = vpop.f32.mrf.mxu1 }
 0x981   :  { %1025 = vadd.xlane.f32.xlu1 %v14457_v11  ;;  %1023 = vadd.xlane.f32.xlu0 %v14458_v7  ;;  %v8653_v8 = vpop.f32.mrf.mxu1  ;;  %v14463_v11 = vld [vmem:[#allocation51_spill] sm:$0xff]  ;;  %v14464_v7 = vld [vmem:[#allocation50_spill] sm:$0xff] }
 0x983   :  { %v2941_v43 = vpop.f32.mrf.mxu1 }
 0x985   :  { %1601 = vadd.xlane.f32.xlu1 %v14459_v20  ;;  %1595 = vadd.xlane.f32.xlu0 %v14460_v38  ;;  %v8656_v2 = vpop.f32.mrf.mxu1  ;;  %v2982_v20 = vpack.c.bf16 %v8653_v8, %v8652_v1  ;;  %v14466_v38 = vld [vmem:[#allocation56_spill] sm:$0xff]  ;;  %v2979_v8 = vpack.c.bf16 %v2925_v51, %v2922_v44 }
 0x987   :  { %v2954_v32 = vpop.f32.mrf.mxu1 }
 0x989   :  { %1597 = vadd.xlane.f32.xlu1 %v14461_v49  ;;  %1607 = vadd.xlane.f32.xlu0 %v14462_v37  ;;  %v8657_v16 = vpop.f32.mrf.mxu1  ;;  %v2981_v49 = vpack.c.bf16 %v2941_v43, %v2938_v56  ;;  %v14467_v37 = vld [vmem:[#allocation57_spill] sm:$0xff]  ;;  %v14472_v56 = vld [vmem:[#allocation58_spill] sm:$0xff] }
 0x98a   :  { %v2984_v24 = vpack.c.bf16 %v8657_v16, %v8656_v2  ;;  %v14468_v2 = vld [vmem:[#allocation55_spill] sm:$0xff]  ;;  %v14470_v16 = vld [vmem:[#allocation61_spill] sm:$0xff] }
 0x98b   :  { %v2957_v41 = vpop.f32.mrf.mxu1 }
 0x98c   :  { %v2983_v34 = vpack.c.bf16 %v2957_v41, %v2954_v32  ;;  %8658 = vmatprep.subr.bf16.mxu1 %v2984_v24  ;;  %v2980_v41 = vpack.c.bf16 %v8649_v31, %v8648_v0  ;;  %v14469_v32 = vld [vmem:[#allocation54_spill] sm:$0xff] }
 0x98d   :  { %1609 = vadd.xlane.f32.xlu1 %v14463_v11  ;;  %1603 = vadd.xlane.f32.xlu0 %v14464_v7  ;;  %v2978_v7 = vpack.c.bf16 %v8645_v3, %v11626_v61 }
 0x98e   :  { %8659 = vmatpush3.bf16.msra.mxu1 %v2984_v24 }
 0x98f   :  { %8660 = vmatprep.subr.bf16.mxu1 %v2983_v34 }
 0x991   :  { %1605 = vadd.xlane.f32.xlu1 %v14465_v22  ;;  %1615 = vadd.xlane.f32.xlu0 %v14466_v38 }
 0x992   :  { %8661 = vmatpush3.bf16.msra.mxu1 %v2983_v34  ;;  %v14471_v34 = vld [vmem:[#allocation59_spill] sm:$0xff] }
 0x993   :  { %8662 = vmatprep.subr.bf16.mxu1 %v2982_v20 }
 0x995   :  { %1617 = vadd.xlane.f32.xlu1 %v14467_v37  ;;  %1611 = vadd.xlane.f32.xlu0 %v14468_v2 }
 0x996   :  { %8663 = vmatpush3.bf16.msra.mxu1 %v2982_v20  ;;  %v14473_v20 = vld [vmem:[#allocation60_spill] sm:$0xff] }
 0x997   :  { %8664 = vmatprep.subr.bf16.mxu1 %v2981_v49 }
 0x999   :  { %1613 = vadd.xlane.f32.xlu1 %v14469_v32  ;;  %1623 = vadd.xlane.f32.xlu0 %v14470_v16 }
 0x99a   :  { %8665 = vmatpush3.bf16.msra.mxu1 %v2981_v49 }
 0x99b   :  { %8666 = vmatprep.subr.bf16.mxu1 %v2980_v41  ;;  %v2700_v1 = vpop.xlane.xlu0 %2699 }
 0x99c   :  { %v2731_v22 = vsub.f32 %v11524_v58, %v2700_v1 }
 0x99d   :  { %1625 = vadd.xlane.f32.xlu1 %v14471_v34  ;;  %1619 = vadd.xlane.f32.xlu0 %v14472_v56 }
 0x99e   :  { %8667 = vmatpush3.bf16.msra.mxu1 %v2980_v41  ;;  %v2747_v43 = vmul.f32 1.442695, %v2731_v22 }
 0x99f   :  { %8668 = vmatprep.subr.bf16.mxu1 %v2979_v8  ;;  %v2702_v24 = vpop.xlane.xlu1 %2701  ;;  %v2704_v11 = vpop.xlane.xlu0 %2703 }
 0x9a0   :  { %v2732_v0 = vsub.f32 %v11531_v59, %v2702_v24  ;;  %v2733_v31 = vsub.f32 %v11528_v40, %v2704_v11  ;;  %9428 = vpow2.f32 %v2747_v43  ;;  %v2977_v59 = vpack.c.bf16 %v11632_v6, %v11628_v28 }
 0x9a1   :  { %1621 = vadd.xlane.f32.xlu1 %v14473_v20  ;;  %2191 = vadd.xlane.f32.xlu0 %v11445_v14 }
 0x9a2   :  { %v2749_v58 = vmul.f32 1.442695, %v2732_v0  ;;  %8669 = vmatpush3.bf16.msra.mxu1 %v2979_v8  ;;  %v2751_v44 = vmul.f32 1.442695, %v2733_v31 }
 0x9a3   :  { %8670 = vmatprep.subr.bf16.mxu1 %v2978_v7  ;;  %v2706_v51 = vpop.xlane.xlu0 %2705 }
 0x9a4   :  { %9430 = vpow2.f32 %v2749_v58  ;;  %v2734_v38 = vsub.f32 %v11536_v42, %v2706_v51 }
 0x9a5   :  { %2193 = vadd.xlane.f32.xlu1 %v11440_v17  ;;  %2187 = vadd.xlane.f32.xlu0 %v11436_v10  ;;  %9432 = vpow2.f32 %v2751_v44 }
 0x9a6   :  { %v2753_v40 = vmul.f32 1.442695, %v2734_v38  ;;  %8671 = vmatpush3.bf16.msra.mxu1 %v2978_v7 }
 0x9a7   :  { %8672 = vmatprep.subr.bf16.mxu1 %v2977_v59  ;;  %v2710_v14 = vpop.xlane.xlu1 %2709  ;;  %v2708_v61 = vpop.xlane.xlu0 %2707 }
 0x9a8   :  { %9434 = vpow2.f32 %v2753_v40  ;;  %v2736_v3 = vsub.f32 %v11543_v54, %v2710_v14  ;;  %v2735_v49 = vsub.f32 %v11540_v48, %v2708_v61 }
 0x9a9   :  { %2189 = vadd.xlane.f32.xlu1 %v11443_v52  ;;  %2199 = vadd.xlane.f32.xlu0 %v11474_v15 }
 0x9aa   :  { %v2757_v42 = vmul.f32 1.442695, %v2736_v3  ;;  %v2755_v28 = vmul.f32 1.442695, %v2735_v49  ;;  %8673 = vmatpush3.bf16.msra.mxu1 %v2977_v59 }
 0x9ab   :  { %v2714_v17 = vpop.xlane.xlu1 %2713  ;;  %v2712_v10 = vpop.xlane.xlu0 %2711 }
 0x9ac   :  { %9436 = vpow2.f32 %v2757_v42  ;;  %v2738_v6 = vsub.f32 %v11551_v27, %v2714_v17  ;;  %v2737_v37 = vsub.f32 %v11548_v30, %v2712_v10 }
 0x9ad   :  { %9438 = vpow2.f32 %v2755_v28  ;;  %2201 = vadd.xlane.f32.xlu1 %v11470_v46  ;;  %2195 = vadd.xlane.f32.xlu0 %v11464_v53  ;;  %v9429_v15 = vpop.eup %9428 }
 0x9ae   :  { %v2761_v48 = vmul.f32 1.442695, %v2738_v6  ;;  %v2759_v54 = vmul.f32 1.442695, %v2737_v37 }
 0x9af   :  { %v2718_v52 = vpop.xlane.xlu1 %2717  ;;  %v2716_v2 = vpop.xlane.xlu0 %2715 }
 0x9b0   :  { %9440 = vpow2.f32 %v2761_v48  ;;  %v2740_v41 = vsub.f32 %v11559_v4, %v2718_v52  ;;  %v2739_v32 = vsub.f32 %v11556_v25, %v2716_v2 }
 0x9b1   :  { %v9431_v16 = vpop.eup %9430  ;;  %9442 = vpow2.f32 %v2759_v54  ;;  %2197 = vadd.xlane.f32.xlu1 %v11472_v60  ;;  %2207 = vadd.xlane.f32.xlu0 %v11486_v18 }
 0x9b2   :  { %v2765_v30 = vmul.f32 1.442695, %v2740_v41  ;;  %v2763_v46 = vmul.f32 1.442695, %v2739_v32  ;;  %v2969_v27 = vpack.c.bf16 %v9431_v16, %v9429_v15  ;;  %v9433_v22 = vpop.eup %9432 }
 0x9b3   :  { %v2722_v53 = vpop.xlane.xlu1 %2721  ;;  %v2720_v1 = vpop.xlane.xlu0 %2719 }
 0x9b4   :  { %9444 = vpow2.f32 %v2765_v30  ;;  %v2742_v8 = vsub.f32 %v11567_v39, %v2722_v53  ;;  %v2741_v34 = vsub.f32 %v11564_v5, %v2720_v1  ;;  %8674 = vmatprep.mubr.bf16.mxu1 %v2969_v27 }
 0x9b5   :  { %v9435_v4 = vpop.eup %9434  ;;  %9446 = vpow2.f32 %v2763_v46  ;;  %2209 = vadd.xlane.f32.xlu1 %v11488_v9  ;;  %2203 = vadd.xlane.f32.xlu0 %v11482_v13 }
 0x9b6   :  { %v2970_v60 = vpack.c.bf16 %v9435_v4, %v9433_v22  ;;  %v2769_v18 = vmul.f32 1.442695, %v2742_v8  ;;  %v2767_v25 = vmul.f32 1.442695, %v2741_v34 }
 0x9b8   :  { %9448 = vpow2.f32 %v2769_v18  ;;  %8675 = vmatmul.mubr.bf16.vlgmr.msra.gmra.mxu1 %v2970_v60 }
 0x9b9   :  { %v9437_v56 = vpop.eup %9436  ;;  %9450 = vpow2.f32 %v2767_v25  ;;  %2205 = vadd.xlane.f32.xlu1 %v11480_v12  ;;  %2211 = vadd.xlane.f32.xlu0 %v11503_v35 }
 0x9ba   :  { %v9439_v39 = vpop.eup %9438 }
 0x9bb   :  { %v2971_v5 = vpack.c.bf16 %v9437_v56, %v9439_v39 }
 0x9bd   :  { %v9441_v43 = vpop.eup %9440  ;;  %8678 = vmatprep.mubr.bf16.mxu1 %v2971_v5  ;;  %2213 = vadd.xlane.f32.xlu1 %v11507_v63 }
 0x9be   :  { %v9443_v9 = vpop.eup %9442  ;;  %2783 = vadd.xlane.f32.xlu0 %v9433_v22 }
 0x9bf   :  { %v2972_v13 = vpack.c.bf16 %v9441_v43, %v9443_v9 }
 0x9c1   :  { %v9445_v24 = vpop.eup %9444  ;;  %8679 = vmatmul.mubr.bf16.gmra.mxu1 %v2972_v13  ;;  %2785 = vadd.xlane.f32.xlu1 %v9435_v4 }
 0x9c2   :  { %v9447_v11 = vpop.eup %9446  ;;  %2779 = vadd.xlane.f32.xlu0 %v9429_v15 }
 0x9c3   :  { %v2973_v0 = vpack.c.bf16 %v9445_v24, %v9447_v11 }
 0x9c5   :  { %v9449_v31 = vpop.eup %9448  ;;  %8682 = vmatprep.mubr.bf16.mxu1 %v2973_v0  ;;  %2781 = vadd.xlane.f32.xlu1 %v9431_v16 }
 0x9c6   :  { %v9451_v12 = vpop.eup %9450  ;;  %2791 = vadd.xlane.f32.xlu0 %v9443_v9 }
 0x9c7   :  { %v2974_v35 = vpack.c.bf16 %v9449_v31, %v9451_v12 }
 0x9c9   :  { %8683 = vmatmul.mubr.bf16.gmra.mxu1 %v2974_v35  ;;  %2793 = vadd.xlane.f32.xlu1 %v9441_v43 }
 0x9ca   :  { %2787 = vadd.xlane.f32.xlu0 %v9439_v39 }
 0x9cd   :  { %2789 = vadd.xlane.f32.xlu1 %v9437_v56 }
 0x9ce   :  { %2799 = vadd.xlane.f32.xlu0 %v9451_v12 }
 0x9d1   :  { %2801 = vadd.xlane.f32.xlu1 %v9449_v31 }
 0x9d2   :  { %2795 = vadd.xlane.f32.xlu0 %v9447_v11 }
 0x9d5   :  { %2797 = vadd.xlane.f32.xlu1 %v9445_v24 }
 0x9d6   :  { %2215 = vadd.xlane.f32.xlu0 %v11509_v47 }
 0x9d9   :  { %2217 = vadd.xlane.f32.xlu1 %v11505_v19 }
 0x9e2   :  { %v2724_v63 = vpop.xlane.xlu0 %2723 }
 0x9e3   :  { %v2743_v7 = vsub.f32 %v11590_v29, %v2724_v63 }
 0x9e5   :  { %v2771_v20 = vmul.f32 1.442695, %v2743_v7 }
 0x9e6   :  { %v2726_v58 = vpop.xlane.xlu1 %2725  ;;  %v2728_v44 = vpop.xlane.xlu0 %2727 }
 0x9e7   :  { %9452 = vpow2.f32 %v2771_v20  ;;  %v2744_v51 = vsub.f32 %v11599_v21, %v2726_v58  ;;  %v2745_v38 = vsub.f32 %v11596_v50, %v2728_v44 }
 0x9e9   :  { %v2773_v59 = vmul.f32 1.442695, %v2744_v51  ;;  %v2775_v40 = vmul.f32 1.442695, %v2745_v38 }
 0x9ea   :  { %v2730_v14 = vpop.xlane.xlu1 %2729  ;;  %v996_v61 = vpop.xlane.xlu0 %995 }
 0x9eb   :  { %9454 = vpow2.f32 %v2773_v59  ;;  %v2746_v47 = vsub.f32 %v11606_v26, %v2730_v14 }
 0x9ec   :  { %9456 = vpow2.f32 %v2775_v40 }
 0x9ed   :  { %v2777_v19 = vmul.f32 1.442695, %v2746_v47 }
 0x9ee   :  { %v998_v3 = vpop.xlane.xlu1 %997  ;;  %v1000_v49 = vpop.xlane.xlu0 %999 }
 0x9ef   :  { %9458 = vpow2.f32 %v2777_v19 }
 0x9f0   :  { %9460 = vrcp.f32 %v996_v61 }
 0x9f1   :  { %9462 = vrcp.f32 %v998_v3 }
 0x9f2   :  { %v1002_v29 = vpop.xlane.xlu1 %1001  ;;  %v1600_v42 = vpop.xlane.xlu0 %1599  ;;  %9464 = vrcp.f32 %v1000_v49 }
 0x9f3   :  { %9466 = vrcp.f32 %v1002_v29 }
 0x9f4   :  { %v9453_v28 = vpop.eup %9452  ;;  %9468 = vrcp.f32 %v1600_v42 }
 0x9f5   :  { %2803 = vadd.xlane.f32.xlu0 %v9453_v28 }
 0x9f6   :  { %v1006_v17 = vpop.xlane.xlu1 %1005  ;;  %v1004_v21 = vpop.xlane.xlu0 %1003 }
 0x9f7   :  { %9470 = vrcp.f32 %v1006_v17 }
 0x9f8   :  { %v9455_v10 = vpop.eup %9454  ;;  %9472 = vrcp.f32 %v1004_v21 }
 0x9f9   :  { %v9457_v50 = vpop.eup %9456  ;;  %2805 = vadd.xlane.f32.xlu1 %v9455_v10  ;;  %v2975_v6 = vpack.c.bf16 %v9455_v10, %v9453_v28 }
 0x9fa   :  { %2807 = vadd.xlane.f32.xlu0 %v9457_v50  ;;  %v1010_v37 = vpop.xlane.xlu1 %1009  ;;  %v1008_v48 = vpop.xlane.xlu0 %1007 }
 0x9fb   :  { %8686 = vmatprep.mubr.bf16.mxu1 %v2975_v6  ;;  %9474 = vrcp.f32 %v1010_v37 }
 0x9fc   :  { %v9459_v26 = vpop.eup %9458  ;;  %9476 = vrcp.f32 %v1008_v48 }
 0x9fd   :  { %2809 = vadd.xlane.f32.xlu1 %v9459_v26  ;;  %v2976_v54 = vpack.c.bf16 %v9459_v26, %v9457_v50  ;;  %v9461_v59 = vpop.eup %9460 }
 0x9fe   :  { %v1014_v52 = vpop.xlane.xlu1 %1013  ;;  %v1012_v2 = vpop.xlane.xlu0 %1011 }
 0x9ff   :  { %8687 = vmatmul.mubr.bf16.gmra.mxu1 %v2976_v54  ;;  %9478 = vrcp.f32 %v1014_v52  ;;  %v9463_v14 = vpop.eup %9462 }
 0xa00   :  { %9480 = vrcp.f32 %v1012_v2  ;;  %v9465_v61 = vpop.eup %9464 }
 0xa01   :  { %v9467_v47 = vpop.eup %9466 }
 0xa02   :  { %v1018_v15 = vpop.xlane.xlu1 %1017  ;;  %v1016_v41 = vpop.xlane.xlu0 %1015 }
 0xa03   :  { %9482 = vrcp.f32 %v1018_v15  ;;  %v9469_v19 = vpop.eup %9468 }
 0xa04   :  { %9484 = vrcp.f32 %v1016_v41  ;;  %v9471_v49 = vpop.eup %9470 }
 0xa05   :  { %v9473_v29 = vpop.eup %9472 }
 0xa06   :  { %v11692_v32 = vpop.xlane.xlu1 %1021  ;;  %v11694_v16 = vpop.xlane.xlu0 %1019 }
 0xa08   :  { %v9475_v28 = vpop.eup %9474 }
 0xa09   :  { %v9477_v17 = vpop.eup %9476 }
 0xa0a   :  { %v11696_v30 = vpop.xlane.xlu1 %1025  ;;  %v11698_v46 = vpop.xlane.xlu0 %1023 }
 0xa0c   :  { %v9479_v21 = vpop.eup %9478 }
 0xa0d   :  { %v9481_v10 = vpop.eup %9480 }
 0xa0e   :  { %v1602_v27 = vpop.xlane.xlu1 %1601  ;;  %v1596_v53 = vpop.xlane.xlu0 %1595 }
 0xa0f   :  { %9486 = vrcp.f32 %v1602_v27 }
 0xa10   :  { %9488 = vrcp.f32 %v1596_v53  ;;  %v9483_v6 = vpop.eup %9482 }
 0xa11   :  { %v9485_v37 = vpop.eup %9484 }
 0xa12   :  { %v1598_v1 = vpop.xlane.xlu1 %1597  ;;  %v1608_v22 = vpop.xlane.xlu0 %1607 }
 0xa13   :  { %9490 = vrcp.f32 %v1598_v1  ;;  %v14474_v1 = vld [vmem:[#allocation62_spill] sm:$0xff] }
 0xa14   :  { %9492 = vrcp.f32 %v1608_v22  ;;  %v1900_v22 = vmul.f32 %v9469_v19, %v14474_v1  ;;  %v14479_v19 = vld [vmem:[#allocation64_spill] sm:$0xff] }
 0xa16   :  { %v1610_v8 = vpop.xlane.xlu1 %1609  ;;  %v1604_v34 = vpop.xlane.xlu0 %1603 }
 0xa17   :  { %9494 = vrcp.f32 %v1610_v8 }
 0xa18   :  { %9496 = vrcp.f32 %v1604_v34 }
 0xa1a   :  { %v1606_v4 = vpop.xlane.xlu1 %1605  ;;  %v1616_v60 = vpop.xlane.xlu0 %1615 }
 0xa1b   :  { %9498 = vrcp.f32 %v1606_v4  ;;  %v14475_v4 = vld [vmem:[#allocation31_spill] sm:$0xff] }
 0xa1c   :  { %9500 = vrcp.f32 %v1616_v60  ;;  %v9487_v26 = vpop.eup %9486  ;;  %v1300_v60 = vmul.f32 %v9465_v61, %v14475_v4 }
 0xa1d   :  { %v9489_v54 = vpop.eup %9488 }
 0xa1e   :  { %v1618_v18 = vpop.xlane.xlu1 %1617  ;;  %v1612_v25 = vpop.xlane.xlu0 %1611 }
 0xa20   :  { %v9491_v52 = vpop.eup %9490 }
 0xa21   :  { %v9493_v2 = vpop.eup %9492 }
 0xa22   :  { %v11700_v56 = vpop.xlane.xlu1 %1613  ;;  %v11702_v39 = vpop.xlane.xlu0 %1623 }
 0xa24   :  { %v9495_v41 = vpop.eup %9494 }
 0xa25   :  { %v9497_v27 = vpop.eup %9496 }
 0xa26   :  { %v11704_v5 = vpop.xlane.xlu1 %1625  ;;  %v11706_v43 = vpop.xlane.xlu0 %1619 }
 0xa28   :  { %v11727_v8 = vpop.eup %9498 }
 0xa29   :  { %v11730_v34 = vpop.eup %9500 }
 0xa2a   :  { %v11708_v9 = vpop.xlane.xlu1 %1621  ;;  %v2192_v13 = vpop.xlane.xlu0 %2191 }
 0xa2b   :  { %9502 = vrcp.f32 %v2192_v13 }
 0xa2c   :  { %9504 = vrcp.f32 %v1618_v18 }
 0xa2e   :  { %v2194_v24 = vpop.xlane.xlu1 %2193  ;;  %v2188_v11 = vpop.xlane.xlu0 %2187 }
 0xa2f   :  { %9506 = vrcp.f32 %v2188_v11 }
 0xa30   :  { %9508 = vrcp.f32 %v1612_v25  ;;  %v14476_v25 = vld [vmem:[#allocation32_spill] sm:$0xff] }
 0xa31   :  { %9510 = vrcp.f32 %v2194_v24  ;;  %v1298_v13 = vmul.f32 %v9461_v59, %v14476_v25  ;;  %v14477_v24 = vld [vmem:[#allocation33_spill] sm:$0xff]  ;;  %v14482_v59 = vld [vmem:[#allocation36_spill] sm:$0xff] }
 0xa32   :  { %v2190_v0 = vpop.xlane.xlu1 %2189  ;;  %v2200_v31 = vpop.xlane.xlu0 %2199  ;;  %v1301_v11 = vmul.f32 %v9467_v47, %v14477_v24  ;;  %v1302_v4 = vmul.f32 %v9473_v29, %v14482_v59  ;;  %v14483_v47 = vld [vmem:[#allocation37_spill] sm:$0xff]  ;;  %v14485_v24 = vld [vmem:[#allocation42_spill] sm:$0xff] }
 0xa33   :  { %9512 = vrcp.f32 %v2190_v0  ;;  %v14478_v0 = vld [vmem:[#allocation34_spill] sm:$0xff]  ;;  %v1305_v25 = vmul.f32 %v9475_v28, %v14483_v47  ;;  %v14488_v28 = vld [vmem:[#allocation41_spill] sm:$0xff] }
 0xa34   :  { %v14490_v47 = vld [vmem:[#allocation66_spill] sm:$0xff] }
 0xa36   :  { %v2202_v12 = vpop.xlane.xlu1 %2201  ;;  %v11710_v35 = vpop.xlane.xlu0 %2195 }
 0xa38   :  { %v9503_v18 = vpop.eup %9502 }
 0xa3a   :  { %v11712_v63 = vpop.xlane.xlu1 %2197  ;;  %v11714_v7 = vpop.xlane.xlu0 %2207 }
 0xa3e   :  { %v11716_v20 = vpop.xlane.xlu1 %2209  ;;  %v11718_v58 = vpop.xlane.xlu0 %2203 }
 0xa42   :  { %v11720_v44 = vpop.xlane.xlu1 %2205  ;;  %v11722_v51 = vpop.xlane.xlu0 %2211 }
 0xa46   :  { %v11724_v38 = vpop.xlane.xlu1 %2213 }
 0xa47   :  { %v2784_v40 = vpop.xlane.xlu0 %2783 }
 0xa48   :  { %9514 = vrcp.f32 %v2784_v40 }
 0xa49   :  { %9516 = vrcp.f32 %v2200_v31  ;;  %v1299_v31 = vmul.f32 %v9463_v14, %v14478_v0 }
 0xa4a   :  { %v2786_v3 = vpop.xlane.xlu1 %2785 }
 0xa4b   :  { %v2780_v42 = vpop.xlane.xlu0 %2779 }
 0xa4c   :  { %9518 = vrcp.f32 %v2780_v42  ;;  %v14480_v42 = vld [vmem:[#allocation38_spill] sm:$0xff] }
 0xa4d   :  { %9520 = vrcp.f32 %v2202_v12  ;;  %v11737_v12 = vpop.eup %9504 }
 0xa4e   :  { %v2782_v50 = vpop.xlane.xlu1 %2781  ;;  %9522 = vrcp.f32 %v2786_v3  ;;  %v1901_v3 = vmul.f32 %v9487_v26, %v14479_v19  ;;  %v9507_v61 = vpop.eup %9506  ;;  %v14487_v19 = vld [vmem:[#allocation40_spill] sm:$0xff] }
 0xa4f   :  { %v2792_v48 = vpop.xlane.xlu0 %2791  ;;  %9524 = vrcp.f32 %v11710_v35  ;;  %v1916_v35 = vadd.f32 %v1900_v22, %v1300_v60  ;;  %v11747_v14 = vpop.eup %9508  ;;  %v2492_v22 = vmul.f32 %v9503_v18, %v11571_v23  ;;  %v14484_v60 = vld [vmem:[#allocation35_spill] sm:$0xff]  ;;  %v11757_v29 = vmul.f32 %v9481_v10, %v14487_v19 }
 0xa50   :  { %9526 = vrcp.f32 %v2782_v50  ;;  %v11742_v50 = vmul.f32 %v9471_v49, %v14480_v42  ;;  %v1304_v26 = vmul.f32 %v9477_v17, %v14484_v60  ;;  %v11753_v49 = vmul.f32 %v9479_v21, %v14485_v24  ;;  %v9511_v0 = vpop.eup %9510  ;;  %v14489_v17 = vld [vmem:[#allocation39_spill] sm:$0xff]  ;;  %v14491_v60 = vld [vmem:[#allocation68_spill] sm:$0xff] }
 0xa51   :  { %9528 = vrcp.f32 %v11712_v63  ;;  %v14481_v63 = vld [vmem:[#allocation63_spill] sm:$0xff]  ;;  %v11760_v42 = vmul.f32 %v9483_v6, %v14488_v28  ;;  %v2490_v23 = vmul.f32 %v9507_v61, %v11573_v45  ;;  %v1308_v18 = vmul.f32 %v9485_v37, %v14489_v17 }
 0xa52   :  { %v2794_v15 = vpop.xlane.xlu1 %2793  ;;  %9530 = vrcp.f32 %v11714_v7  ;;  %v1898_v1 = vmul.f32 %v9489_v54, %v14481_v63  ;;  %v9513_v63 = vpop.eup %9512  ;;  %v1905_v10 = vmul.f32 %v9495_v41, %v14491_v60 }
 0xa53   :  { %v2788_v53 = vpop.xlane.xlu0 %2787  ;;  %9532 = vrcp.f32 %v2792_v48  ;;  %v14486_v48 = vld [vmem:[#allocation65_spill] sm:$0xff] }
 0xa54   :  { %9534 = vrcp.f32 %v11718_v58  ;;  %v1899_v54 = vmul.f32 %v9491_v52, %v14486_v48  ;;  %v1917_v58 = vadd.f32 %v1901_v3, %v1301_v11  ;;  %v1904_v52 = vmul.f32 %v9493_v2, %v14490_v47  ;;  %v14492_v3 = vld [vmem:[#allocation67_spill] sm:$0xff] }
 0xa55   :  { %9536 = vrcp.f32 %v2788_v53  ;;  %v9515_v21 = vpop.eup %9514  ;;  %v1914_v53 = vadd.f32 %v1898_v1, %v1298_v13  ;;  %v2508_v48 = vadd.f32 %v2492_v22, %v1916_v35  ;;  %v1902_v13 = vmul.f32 %v9497_v27, %v14492_v3  ;;  %v14493_v35 = vld [vmem:[#allocation69_spill] sm:$0xff]  ;;  %v14494_v27 = vld [vmem:[#allocation70_spill] sm:$0xff] }
 0xa56   :  { %v2790_v40 = vpop.xlane.xlu1 %2789  ;;  %9538 = vrcp.f32 %v11700_v56  ;;  %v9517_v24 = vpop.eup %9516  ;;  %v2493_v56 = vmul.f32 %v9511_v0, %v11575_v36  ;;  %v1915_v37 = vadd.f32 %v1899_v54, %v1299_v31  ;;  %v11775_v36 = vld [vmem:[%s14256_s10] ss:$0 sm:$0xff]  ;;  %v1920_v31 = vadd.f32 %v1904_v52, %v1304_v26 }
 0xa57   :  { %v2800_v7 = vpop.xlane.xlu0 %2799  ;;  %9540 = vrcp.f32 %v2794_v15  ;;  %v2491_v15 = vmul.f32 %v9513_v63, %v11577_v57  ;;  %v2506_v1 = vadd.f32 %v2490_v23, %v1914_v53  ;;  %v1903_v57 = vmul.f32 %v11727_v8, %v14493_v35 }
 0xa58   :  { %9542 = vrcp.f32 %v11716_v20  ;;  %v1908_v22 = vmul.f32 %v11730_v34, %v14494_v27  ;;  %v2509_v54 = vadd.f32 %v2493_v56, %v1917_v58  ;;  %v1921_v23 = vadd.f32 %v1905_v10, %v1305_v25 }
 0xa59   :  { %v9519_v45 = vpop.eup %9518  ;;  %9544 = vrcp.f32 %v2790_v40  ;;  %v1918_v53 = vadd.f32 %v1902_v13, %v1302_v4  ;;  %v1919_v25 = vadd.f32 %v1903_v57, %v11742_v50  ;;  %v14495_v4 = vld [vmem:[#allocation6_spill] sm:$0xff] }
 0xa5a   :  { %v2802_v6 = vpop.xlane.xlu1 %2801  ;;  %v9521_v61 = vpop.eup %9520  ;;  %9546 = vrcp.f32 %v11720_v44  ;;  %v1924_v10 = vadd.f32 %v1908_v22, %v1308_v18  ;;  %v14497_v13 = vld [vmem:[#allocation78_spill] sm:$0xff] }
 0xa5b   :  { %v2796_v2 = vpop.xlane.xlu0 %2795  ;;  %v9523_v28 = vpop.eup %9522  ;;  %9548 = vrcp.f32 %v2800_v7  ;;  %v2507_v7 = vadd.f32 %v2491_v15, %v1915_v37 }
 0xa5c   :  { %v9525_v44 = vpop.eup %9524  ;;  %9550 = vrcp.f32 %v2796_v2 }
 0xa5d   :  { %v9527_v17 = vpop.eup %9526  ;;  %9552 = vrcp.f32 %v2802_v6  ;;  %v2494_v58 = vmul.f32 %v9525_v44, %v11581_v55  ;;  %v14500_v44 = vld [vmem:[#allocation8_spill] sm:$0xff] }
 0xa5e   :  { %v9529_v47 = vpop.eup %9528  ;;  %v2798_v26 = vpop.xlane.xlu1 %2797 }
 0xa5f   :  { %9554 = vrcp.f32 %v2798_v26  ;;  %v2495_v55 = vmul.f32 %v9529_v47, %v14497_v13 }
 0xa60   :  { %9556 = vrcp.f32 %v11692_v32 }
 0xa61   :  { %v2511_v47 = vadd.f32 %v2495_v55, %v1919_v25  ;;  %9558 = vrcp.f32 %v11694_v16 }
 0xa62   :  { %9560 = vrcp.f32 %v11696_v30 }
 0xa78   :  { %v8676_v59 = vpop.f32.mrf.mxu1 }
 0xa79   :  { %v3084_v19 = vmul.f32 %v9515_v21, %v8676_v59  ;;  %v2496_v59 = vmul.f32 %v9517_v24, %v11579_v62  ;;  %v2497_v62 = vmul.f32 %v9521_v61, %v11583_v33  ;;  %v14498_v61 = vld [vmem:[#allocation5_spill] sm:$0xff] }
 0xa7a   :  { %v3019_v11 = vpop.f32.mrf.mxu1 }
 0xa7b   :  { %v3100_v41 = vadd.f32 %v3084_v19, %v2508_v48  ;;  %v3082_v20 = vmul.f32 %v9519_v45, %v3019_v11  ;;  %v9531_v48 = vpop.eup %9530  ;;  %v14496_v11 = vld [vmem:[#allocation71_spill] sm:$0xff]  ;;  %v2512_v3 = vadd.f32 %v2496_v59, %v1920_v31  ;;  %v14499_v31 = vld [vmem:[#allocation72_spill] sm:$0xff]  ;;  %v2513_v27 = vadd.f32 %v2497_v62, %v1921_v23 }
 0xa7c   :  { %v8677_v40 = vpop.f32.mrf.mxu1  ;;  %v9533_v19 = vpop.eup %9532  ;;  %v1906_v37 = vmul.f32 %v11747_v14, %v14496_v11  ;;  %v1909_v35 = vmul.f32 %v11737_v12, %v14499_v31  ;;  %v14504_v11 = vld [vmem:[#allocation81_spill] sm:$0xff]  ;;  %9562 = vrcp.f32 %v11698_v46 }
 0xa7d   :  { %v3098_v0 = vadd.f32 %v3082_v20, %v2506_v1  ;;  %v3085_v63 = vmul.f32 %v9523_v28, %v8677_v40  ;;  %v3123_v52 = vadd.f32 %v11775_v36, %v3100_v41  ;;  %v9535_v15 = vpop.eup %9534  ;;  %v2510_v28 = vadd.f32 %v2494_v58, %v1918_v53  ;;  %v14502_v53 = vld [vmem:[#allocation80_spill] sm:$0xff] }
 0xa7e   :  { %v3022_v21 = vpop.f32.mrf.mxu1  ;;  %v9537_v2 = vpop.eup %9536  ;;  %v2498_v26 = vmul.f32 %v9535_v15, %v14502_v53  ;;  %v14505_v15 = vld [vmem:[#allocation73_spill] sm:$0xff]  ;;  %9564 = vrcp.f32 %v11702_v39 }
 0xa7f   :  { %v3121_v8 = vadd.f32 %v11775_v36, %v3098_v0  ;;  %v3101_v60 = vadd.f32 %v3085_v63, %v2509_v54  ;;  %v3083_v34 = vmul.f32 %v9527_v17, %v3022_v21  ;;  %v11798_v1 = vadd.f32 %v3123_v52, %v14498_v61  ;;  %v9539_v20 = vpop.eup %9538  ;;  %v14501_v54 = vld [vmem:[#allocation79_spill] sm:$0xff]  ;;  %v14507_v61 = vld [vmem:[#allocation82_spill] sm:$0xff] }
 0xa80   :  { %v9541_v57 = vpop.eup %9540  ;;  %v2500_v63 = vmul.f32 %v9531_v48, %v14501_v54  ;;  %v1922_v17 = vadd.f32 %v1906_v37, %v11757_v29  ;;  %9566 = vrcp.f32 %v11706_v43 }
 0xa81   :  { %v3099_v56 = vadd.f32 %v3083_v34, %v2507_v7  ;;  %v8680_v45 = vpop.f32.mrf.mxu1  ;;  %v11788_v24 = vadd.f32 %v3121_v8, %v14495_v4  ;;  %v3124_v50 = vadd.f32 %v11775_v36, %v3101_v60  ;;  %v9543_v7 = vpop.eup %9542  ;;  %v3161_v60 = vsel %vm143_vm0, %v11798_v1, 0.0  ;;  %v14503_v34 = vld [vmem:[#allocation7_spill] sm:$0xff] }
 0xa82   :  { %v3088_v6 = vmul.f32 %v9533_v19, %v8680_v45  ;;  %v9545_v52 = vpop.eup %9544  ;;  %v2516_v45 = vadd.f32 %v2500_v63, %v1924_v10  ;;  %v1925_v4 = vadd.f32 %v1909_v35, %v11760_v42  ;;  %v2501_v37 = vmul.f32 %v9543_v7, %v14504_v11  ;;  %v14508_v42 = vld [vmem:[#allocation10_spill] sm:$0xff]  ;;  %v14513_v11 = vld [vmem:[#allocation15_spill] sm:$0xff] }
 0xa83   :  { %v3122_v18 = vadd.f32 %v11775_v36, %v3099_v56  ;;  %v3035_v41 = vpop.f32.mrf.mxu1  ;;  %v3155_v33 = vsel %vm143_vm0, %v11788_v24, 0.0  ;;  %v11814_v48 = vadd.f32 %v3124_v50, %v14503_v34  ;;  %v9547_v29 = vpop.eup %9546  ;;  %v2514_v55 = vadd.f32 %v2498_v26, %v1922_v17  ;;  %v14509_v17 = vld [vmem:[#allocation11_spill] sm:$0xff] }
 0xa84   :  { %v3104_v14 = vadd.f32 %v3088_v6, %v2512_v3  ;;  %v3086_v40 = vmul.f32 %v9537_v2, %v3035_v41  ;;  %3156 = vadd.xlane.f32.xlu0 %v3155_v33  ;;  %v9549_v56 = vpop.eup %9548  ;;  %v1907_v3 = vmul.f32 %v9539_v20, %v14505_v15  ;;  %v14506_v2 = vld [vmem:[#allocation9_spill] sm:$0xff]  ;;  %v2517_v54 = vadd.f32 %v2501_v37, %v1925_v4 }
 0xa85   :  { %v8681_v22 = vpop.f32.mrf.mxu1  ;;  %v11803_v0 = vadd.f32 %v3122_v18, %v14500_v44  ;;  %v9551_v18 = vpop.eup %9550  ;;  %v3164_v10 = vsel %vm143_vm0, %v11814_v48, 0.0 }
 0xa86   :  { %v3102_v21 = vadd.f32 %v3086_v40, %v2510_v28  ;;  %v3089_v59 = vmul.f32 %v9541_v57, %v8681_v22  ;;  %v3127_v8 = vadd.f32 %v11775_v36, %v3104_v14  ;;  %v2499_v14 = vmul.f32 %v9547_v29, %v14507_v61  ;;  %v9553_v57 = vpop.eup %9552  ;;  %v14511_v29 = vld [vmem:[#allocation13_spill] sm:$0xff] }
 0xa87   :  { %v3038_v12 = vpop.f32.mrf.mxu1  ;;  %v3158_v23 = vsel %vm143_vm0, %v11803_v0, 0.0  ;;  %v1923_v22 = vadd.f32 %v1907_v3, %v11753_v49 }
 0xa88   :  { %v3125_v58 = vadd.f32 %v11775_v36, %v3102_v21  ;;  %v3105_v19 = vadd.f32 %v3089_v59, %v2513_v27  ;;  %v3087_v25 = vmul.f32 %v9545_v52, %v3038_v12  ;;  %3159 = vadd.xlane.f32.xlu1 %v3158_v23  ;;  %3162 = vadd.xlane.f32.xlu0 %v3161_v60  ;;  %v9555_v21 = vpop.eup %9554  ;;  %v14510_v52 = vld [vmem:[#allocation12_spill] sm:$0xff] }
 0xa89   :  { %v8684_v62 = vpop.f32.mrf.mxu1  ;;  %v11828_v28 = vadd.f32 %v3127_v8, %v14508_v42  ;;  %v9557_v16 = vpop.eup %9556 }
 0xa8a   :  { %v3103_v6 = vadd.f32 %v3087_v25, %v2511_v47  ;;  %v3092_v13 = vmul.f32 %v9549_v56, %v8684_v62  ;;  %v11821_v50 = vadd.f32 %v3125_v58, %v14506_v2  ;;  %v3128_v41 = vadd.f32 %v11775_v36, %v3105_v19  ;;  %v14512_v62 = vld [vmem:[#allocation14_spill] sm:$0xff]  ;;  %v2216_v2 = vpop.xlane.xlu0 %2215  ;;  %v9559_v46 = vpop.eup %9558 }
 0xa8b   :  { %v3051_v33 = vpop.f32.mrf.mxu1  ;;  %v2515_v47 = vadd.f32 %v2499_v14, %v1923_v22  ;;  %v3173_v26 = vsel %vm143_vm0, %v11828_v28, 0.0  ;;  %9568 = vrcp.f32 %v2216_v2  ;;  %v9561_v39 = vpop.eup %9560 }
 0xa8c   :  { %v3126_v20 = vadd.f32 %v11775_v36, %v3103_v6  ;;  %v3108_v40 = vadd.f32 %v3092_v13, %v2516_v45  ;;  %v3090_v31 = vmul.f32 %v9551_v18, %v3051_v33  ;;  %3165 = vadd.xlane.f32.xlu1 %v3164_v10  ;;  %v3167_v35 = vsel %vm143_vm0, %v11821_v50, 0.0  ;;  %v14514_v6 = vld [vmem:[#allocation16_spill] sm:$0xff]  ;;  %v2218_v18 = vpop.xlane.xlu1 %2217  ;;  %v9563_v10 = vpop.eup %9562 }
 0xa8d   :  { %v8685_v27 = vpop.f32.mrf.mxu1  ;;  %3168 = vadd.xlane.f32.xlu0 %v3167_v35  ;;  %v11841_v8 = vadd.f32 %v3128_v41, %v14510_v52  ;;  %9570 = vrcp.f32 %v11704_v5  ;;  %v9565_v43 = vpop.eup %9564 }
 0xa8e   :  { %v3106_v44 = vadd.f32 %v3090_v31, %v2514_v55  ;;  %v3093_v63 = vmul.f32 %v9553_v57, %v8685_v27  ;;  %v11835_v7 = vadd.f32 %v3126_v20, %v14509_v17  ;;  %v3131_v59 = vadd.f32 %v11775_v36, %v3108_v40  ;;  %v2804_v41 = vpop.xlane.xlu0 %2803  ;;  %v9567_v61 = vpop.eup %9566  ;;  %v14516_v40 = vld [vmem:[#allocation43_spill] sm:$0xff] }
 0xa8f   :  { %v3054_v53 = vpop.f32.mrf.mxu1  ;;  %v3176_v19 = vsel %vm143_vm0, %v11841_v8, 0.0  ;;  %9572 = vrcp.f32 %v11722_v51  ;;  %v14515_v51 = vld [vmem:[#allocation74_spill] sm:$0xff]  ;;  %v1312_v31 = vmul.f32 %v9563_v10, %v14516_v40  ;;  %v14518_v57 = vld [vmem:[#allocation75_spill] sm:$0xff] }
 0xa90   :  { %v3129_v12 = vadd.f32 %v11775_v36, %v3106_v44  ;;  %v3109_v49 = vadd.f32 %v3093_v63, %v2517_v54  ;;  %v3091_v23 = vmul.f32 %v9555_v21, %v3054_v53  ;;  %v3170_v60 = vsel %vm143_vm0, %v11835_v7, 0.0  ;;  %v2806_v33 = vpop.xlane.xlu1 %2805  ;;  %v14519_v63 = vld [vmem:[#allocation44_spill] sm:$0xff] }
 0xa91   :  { %3171 = vadd.xlane.f32.xlu1 %v3170_v60  ;;  %3174 = vadd.xlane.f32.xlu0 %v3173_v26  ;;  %v11856_v4 = vadd.f32 %v3131_v59, %v14512_v62  ;;  %9574 = vrcp.f32 %v11708_v9  ;;  %v1912_v42 = vmul.f32 %v9565_v43, %v14515_v51  ;;  %v1910_v27 = vmul.f32 %v9567_v61, %v14518_v57  ;;  %v14520_v21 = vld [vmem:[#allocation84_spill] sm:$0xff]  ;;  %v14528_v57 = vld [vmem:[#allocation18_spill] sm:$0xff] }
 0xa92   :  { %v3107_v34 = vadd.f32 %v3091_v23, %v2515_v47  ;;  %v11847_v58 = vadd.f32 %v3129_v12, %v14511_v29  ;;  %v3132_v25 = vadd.f32 %v11775_v36, %v3109_v49  ;;  %v2808_v32 = vpop.xlane.xlu0 %2807  ;;  %9576 = vrcp.f32 %v2218_v18  ;;  %v14521_v47 = vld [vmem:[#allocation76_spill] sm:$0xff]  ;;  %v14522_v12 = vld [vmem:[#allocation45_spill] sm:$0xff] }
 0xa93   :  { %v3185_v3 = vsel %vm143_vm0, %v11856_v4, 0.0  ;;  %9578 = vrcp.f32 %v11724_v38  ;;  %v14517_v38 = vld [vmem:[#allocation83_spill] sm:$0xff]  ;;  %v1928_v54 = vadd.f32 %v1912_v42, %v1312_v31  ;;  %v1310_v17 = vmul.f32 %v9559_v46, %v14519_v63  ;;  %v14523_v23 = vld [vmem:[#allocation77_spill] sm:$0xff] }
 0xa94   :  { %v3130_v56 = vadd.f32 %v11775_v36, %v3107_v34  ;;  %v3179_v45 = vsel %vm143_vm0, %v11847_v58, 0.0  ;;  %v11866_v13 = vadd.f32 %v3132_v25, %v14514_v6  ;;  %9580 = vrcp.f32 %v2808_v32  ;;  %v2810_v30 = vpop.xlane.xlu1 %2809  ;;  %v14524_v25 = vld [vmem:[#allocation85_spill] sm:$0xff] }
 0xa95   :  { %3177 = vadd.xlane.f32.xlu1 %v3176_v19  ;;  %3180 = vadd.xlane.f32.xlu0 %v3179_v45  ;;  %9582 = vrcp.f32 %v2804_v41  ;;  %v1313_v49 = vmul.f32 %v9561_v39, %v14522_v12  ;;  %v1926_v19 = vadd.f32 %v1910_v27, %v1310_v17  ;;  %v14530_v17 = vld [vmem:[#allocation20_spill] sm:$0xff] }
 0xa96   :  { %v11859_v37 = vadd.f32 %v3130_v56, %v14513_v11  ;;  %v3188_v55 = vsel %vm143_vm0, %v11866_v13, 0.0  ;;  %9584 = vrcp.f32 %v2810_v30  ;;  %v14525_v11 = vld [vmem:[#allocation46_spill] sm:$0xff] }
 0xa97   :  { %9586 = vrcp.f32 %v2806_v33 }
 0xa98   :  { %v3182_v15 = vsel %vm143_vm0, %v11859_v37, 0.0  ;;  %v9569_v5 = vpop.eup %9568 }
 0xa99   :  { %3183 = vadd.xlane.f32.xlu1 %v3182_v15  ;;  %3186 = vadd.xlane.f32.xlu0 %v3185_v3  ;;  %v2504_v35 = vmul.f32 %v9569_v5, %v14517_v38  ;;  %v1311_v15 = vmul.f32 %v9557_v16, %v14525_v11  ;;  %v14526_v3 = vld [vmem:[#allocation86_spill] sm:$0xff] }
 0xa9a   :  { %v9571_v14 = vpop.eup %9570 }
 0xa9b   :  { %v1913_v53 = vmul.f32 %v9571_v14, %v14521_v47  ;;  %v2520_v34 = vadd.f32 %v2504_v35, %v1928_v54 }
 0xa9c   :  { %v9573_v9 = vpop.eup %9572 }
 0xa9d   :  { %3189 = vadd.xlane.f32.xlu1 %v3188_v55  ;;  %v2502_v59 = vmul.f32 %v9573_v9, %v14520_v21  ;;  %v1929_v41 = vadd.f32 %v1913_v53, %v1313_v49 }
 0xa9e   :  { %v9575_v20 = vpop.eup %9574 }
 0xa9f   :  { %v9577_v22 = vpop.eup %9576  ;;  %v1911_v60 = vmul.f32 %v9575_v20, %v14523_v23  ;;  %v2518_v2 = vadd.f32 %v2502_v59, %v1926_v19  ;;  %v14527_v20 = vld [vmem:[#allocation17_spill] sm:$0xff] }
 0xaa0   :  { %v9579_v44 = vpop.eup %9578  ;;  %v2505_v56 = vmul.f32 %v9577_v22, %v14524_v25  ;;  %v14529_v22 = vld [vmem:[#allocation19_spill] sm:$0xff] }
 0xaa1   :  { %v9581_v26 = vpop.eup %9580  ;;  %v2503_v6 = vmul.f32 %v9579_v44, %v14526_v3  ;;  %v1927_v30 = vadd.f32 %v1911_v60, %v1311_v15 }
 0xaa2   :  { %v9583_v45 = vpop.eup %9582  ;;  %v2521_v39 = vadd.f32 %v2505_v56, %v1929_v41 }
 0xaa3   :  { %v9585_v33 = vpop.eup %9584  ;;  %v2519_v61 = vadd.f32 %v2503_v6, %v1927_v30 }
 0xaa4   :  { %v9587_v43 = vpop.eup %9586 }
 0xabf   :  { %v8688_v52 = vpop.f32.mrf.mxu1 }
 0xac0   :  { %v3096_v29 = vmul.f32 %v9581_v26, %v8688_v52 }
 0xac1   :  { %v3067_v62 = vpop.f32.mrf.mxu1 }
 0xac2   :  { %v3112_v55 = vadd.f32 %v3096_v29, %v2520_v34  ;;  %v3094_v18 = vmul.f32 %v9583_v45, %v3067_v62 }
 0xac3   :  { %v8689_v32 = vpop.f32.mrf.mxu1 }
 0xac4   :  { %v3110_v46 = vadd.f32 %v3094_v18, %v2518_v2  ;;  %v3097_v10 = vmul.f32 %v9585_v33, %v8689_v32  ;;  %v3135_v14 = vadd.f32 %v11775_v36, %v3112_v55 }
 0xac5   :  { %v3070_v5 = vpop.f32.mrf.mxu1 }
 0xac6   :  { %v3133_v51 = vadd.f32 %v11775_v36, %v3110_v46  ;;  %v3113_v16 = vadd.f32 %v3097_v10, %v2521_v39  ;;  %v3095_v42 = vmul.f32 %v9587_v43, %v3070_v5  ;;  %v11902_v27 = vadd.f32 %v3135_v14, %v14528_v57 }
 0xac8   :  { %v3111_v9 = vadd.f32 %v3095_v42, %v2519_v61  ;;  %v11895_v40 = vadd.f32 %v3133_v51, %v14527_v20  ;;  %v3136_v31 = vadd.f32 %v11775_v36, %v3113_v16  ;;  %v3197_v63 = vsel %vm143_vm0, %v11902_v27, 0.0 }
 0xaca   :  { %v3134_v38 = vadd.f32 %v11775_v36, %v3111_v9  ;;  %v3191_v35 = vsel %vm143_vm0, %v11895_v40, 0.0  ;;  %v11912_v21 = vadd.f32 %v3136_v31, %v14530_v17 }
 0xacb   :  { %3192 = vadd.xlane.f32.xlu0 %v3191_v35 }
 0xacc   :  { %v11905_v44 = vadd.f32 %v3134_v38, %v14529_v22  ;;  %v3200_v36 = vsel %vm143_vm0, %v11912_v21, 0.0 }
 0xace   :  { %v3194_v54 = vsel %vm143_vm0, %v11905_v44, 0.0 }
 0xacf   :  { %3195 = vadd.xlane.f32.xlu1 %v3194_v54  ;;  %3198 = vadd.xlane.f32.xlu0 %v3197_v63 }
 0xad3   :  { %3201 = vadd.xlane.f32.xlu1 %v3200_v36 }
 0xb0d   :  { %v3157_v59 = vpop.xlane.xlu0 %3156 }
 0xb0e   :  { %v3203_v47 = vmul.f32 0.03125, %v3157_v59 }
 0xb10   :  { %v11917_v53 = vsub.f32 %v11788_v24, %v3203_v47 }
 0xb11   :  { %v3160_v26 = vpop.xlane.xlu1 %3159  ;;  %v3163_v52 = vpop.xlane.xlu0 %3162 }
 0xb12   :  { %v3204_v12 = vmul.f32 0.03125, %v3160_v26  ;;  %v3205_v49 = vmul.f32 0.03125, %v3163_v52  ;;  %v3235_v23 = vmul.f32 %v11917_v53, %v11917_v53 }
 0xb14   :  { %v11922_v60 = vsub.f32 %v11803_v0, %v3204_v12  ;;  %v11925_v34 = vsub.f32 %v11798_v1, %v3205_v49  ;;  %v3251_v29 = vsel %vm143_vm0, %v3235_v23, 0.0 }
 0xb15   :  { %v3166_v19 = vpop.xlane.xlu1 %3165  ;;  %3252 = vadd.xlane.f32.xlu0 %v3251_v29 }
 0xb16   :  { %v3206_v25 = vmul.f32 0.03125, %v3166_v19  ;;  %v3169_v56 = vpop.xlane.xlu0 %3168  ;;  %v3236_v45 = vmul.f32 %v11922_v60, %v11922_v60  ;;  %v3237_v62 = vmul.f32 %v11925_v34, %v11925_v34 }
 0xb17   :  { %v3207_v11 = vmul.f32 0.03125, %v3169_v56 }
 0xb18   :  { %v11933_v15 = vsub.f32 %v11814_v48, %v3206_v25  ;;  %v3254_v3 = vsel %vm143_vm0, %v3236_v45, 0.0  ;;  %v3257_v6 = vsel %vm143_vm0, %v3237_v62, 0.0  ;;  %v9286_v62 = vld [vmem:[%s14259_s13 + $0x8] sm:$0xff]  }
 0xb19   :  { %v11938_v55 = vsub.f32 %v11821_v50, %v3207_v11  ;;  %3255 = vadd.xlane.f32.xlu1 %v3254_v3  ;;  %3258 = vadd.xlane.f32.xlu0 %v3257_v6  ;;  %v9287_v11 = vld [vmem:[%s14259_s13] sm:$0xff]  }
 0xb1a   :  { %v3172_v2 = vpop.xlane.xlu1 %3171  ;;  %v3175_v18 = vpop.xlane.xlu0 %3174  ;;  %v3238_v41 = vmul.f32 %v11933_v15, %v11933_v15  ;;  %8690 = vmatprep.subr.bf16.mxu0 %v9286_v62 }
 0xb1b   :  { %v3208_v33 = vmul.f32 0.03125, %v3172_v2  ;;  %v3209_v32 = vmul.f32 0.03125, %v3175_v18  ;;  %v3239_v30 = vmul.f32 %v11938_v55, %v11938_v55  ;;  %8691 = vmatpush3.bf16.msra.mxu0 %v9286_v62 }
 0xb1c   :  { %v3260_v46 = vsel %vm143_vm0, %v3238_v41, 0.0  ;;  %8692 = vmatprep.subr.bf16.mxu0 %v9287_v11 }
 0xb1d   :  { %v11946_v39 = vsub.f32 %v11835_v7, %v3208_v33  ;;  %v11949_v10 = vsub.f32 %v11828_v28, %v3209_v32  ;;  %3261 = vadd.xlane.f32.xlu1 %v3260_v46  ;;  %v3263_v43 = vsel %vm143_vm0, %v3239_v30, 0.0 }
 0xb1e   :  { %v3178_v61 = vpop.xlane.xlu1 %3177  ;;  %3264 = vadd.xlane.f32.xlu0 %v3263_v43  ;;  %v3181_v5 = vpop.xlane.xlu0 %3180 }
 0xb1f   :  { %v3210_v14 = vmul.f32 0.03125, %v3178_v61  ;;  %v3211_v51 = vmul.f32 0.03125, %v3181_v5  ;;  %v3240_v16 = vmul.f32 %v11946_v39, %v11946_v39  ;;  %v3241_v42 = vmul.f32 %v11949_v10, %v11949_v10  ;;  %8693 = vmatpush3.bf16.msra.mxu0 %v9287_v11 }
 0xb21   :  { %v11957_v9 = vsub.f32 %v11841_v8, %v3210_v14  ;;  %v11960_v20 = vsub.f32 %v11847_v58, %v3211_v51  ;;  %v3266_v31 = vsel %vm143_vm0, %v3240_v16, 0.0  ;;  %v3269_v38 = vsel %vm143_vm0, %v3241_v42, 0.0 }
 0xb22   :  { %v3184_v35 = vpop.xlane.xlu1 %3183  ;;  %3267 = vadd.xlane.f32.xlu1 %v3266_v31  ;;  %3270 = vadd.xlane.f32.xlu0 %v3269_v38  ;;  %v3187_v57 = vpop.xlane.xlu0 %3186 }
 0xb23   :  { %v3212_v22 = vmul.f32 0.03125, %v3184_v35  ;;  %v3213_v54 = vmul.f32 0.03125, %v3187_v57  ;;  %v3242_v63 = vmul.f32 %v11957_v9, %v11957_v9  ;;  %v3243_v17 = vmul.f32 %v11960_v20, %v11960_v20 }
 0xb25   :  { %v11969_v36 = vsub.f32 %v11859_v37, %v3212_v22  ;;  %v11972_v59 = vsub.f32 %v11856_v4, %v3213_v54  ;;  %v3272_v47 = vsel %vm143_vm0, %v3242_v63, 0.0  ;;  %v3275_v26 = vsel %vm143_vm0, %v3243_v17, 0.0 }
 0xb26   :  { %v3190_v52 = vpop.xlane.xlu1 %3189  ;;  %3273 = vadd.xlane.f32.xlu1 %v3272_v47  ;;  %3276 = vadd.xlane.f32.xlu0 %v3275_v26 }
 0xb27   :  { %v3214_v12 = vmul.f32 0.03125, %v3190_v52  ;;  %v3244_v49 = vmul.f32 %v11969_v36, %v11969_v36  ;;  %v3245_v23 = vmul.f32 %v11972_v59, %v11972_v59 }
 0xb29   :  { %v11981_v29 = vsub.f32 %v11866_v13, %v3214_v12  ;;  %v3278_v19 = vsel %vm143_vm0, %v3244_v49, 0.0  ;;  %v3281_v25 = vsel %vm143_vm0, %v3245_v23, 0.0 }
 0xb2a   :  { %3279 = vadd.xlane.f32.xlu1 %v3278_v19  ;;  %3282 = vadd.xlane.f32.xlu0 %v3281_v25 }
 0xb2b   :  { %v3246_v56 = vmul.f32 %v11981_v29, %v11981_v29 }
 0xb2d   :  { %v3284_v45 = vsel %vm143_vm0, %v3246_v56, 0.0 }
 0xb2e   :  { %3285 = vadd.xlane.f32.xlu1 %v3284_v45 }
 0xb54   :  { %v3193_v3 = vpop.xlane.xlu0 %3192 }
 0xb55   :  { %v3215_v6 = vmul.f32 0.03125, %v3193_v3 }
 0xb57   :  { %v11995_v2 = vsub.f32 %v11895_v40, %v3215_v6 }
 0xb58   :  { %v3196_v18 = vpop.xlane.xlu1 %3195  ;;  %v3199_v41 = vpop.xlane.xlu0 %3198 }
 0xb59   :  { %v3216_v33 = vmul.f32 0.03125, %v3196_v18  ;;  %v3217_v32 = vmul.f32 0.03125, %v3199_v41  ;;  %v3247_v30 = vmul.f32 %v11995_v2, %v11995_v2 }
 0xb5b   :  { %v12000_v46 = vsub.f32 %v11905_v44, %v3216_v33  ;;  %v12003_v43 = vsub.f32 %v11902_v27, %v3217_v32  ;;  %v3287_v61 = vsel %vm143_vm0, %v3247_v30, 0.0 }
 0xb5c   :  { %v3202_v5 = vpop.xlane.xlu1 %3201  ;;  %3288 = vadd.xlane.f32.xlu0 %v3287_v61 }
 0xb5d   :  { %v3218_v14 = vmul.f32 0.03125, %v3202_v5  ;;  %v3248_v51 = vmul.f32 %v12000_v46, %v12000_v46  ;;  %v3249_v16 = vmul.f32 %v12003_v43, %v12003_v43 }
 0xb5f   :  { %v12011_v42 = vsub.f32 %v11912_v21, %v3218_v14  ;;  %v3290_v31 = vsel %vm143_vm0, %v3248_v51, 0.0  ;;  %v3293_v38 = vsel %vm143_vm0, %v3249_v16, 0.0  ;;  %v12021_v51 = vld [vmem:[%s14257_s11] ss:$0 sm:$0xff] }
 0xb60   :  { %3291 = vadd.xlane.f32.xlu1 %v3290_v31  ;;  %3294 = vadd.xlane.f32.xlu0 %v3293_v38 }
 0xb61   :  { %v3250_v35 = vmul.f32 %v12011_v42, %v12011_v42 }
 0xb63   :  { %v3296_v57 = vsel %vm143_vm0, %v3250_v35, 0.0 }
 0xb64   :  { %3297 = vadd.xlane.f32.xlu1 %v3296_v57 }
 0xb9e   :  { %v3253_v22 = vpop.xlane.xlu0 %3252 }
 0xb9f   :  { %v3299_v54 = vmul.f32 0.03125, %v3253_v22 }
 0xba1   :  { %v3315_v63 = vadd.f32 1e-05, %v3299_v54 }
 0xba2   :  { %v3256_v17 = vpop.xlane.xlu1 %3255  ;;  %v3259_v47 = vpop.xlane.xlu0 %3258 }
 0xba3   :  { %9588 = vrsqrt.f32 %v3315_v63  ;;  %v3300_v26 = vmul.f32 0.03125, %v3256_v17  ;;  %v3301_v52 = vmul.f32 0.03125, %v3259_v47 }
 0xba5   :  { %v3316_v12 = vadd.f32 1e-05, %v3300_v26  ;;  %v3317_v49 = vadd.f32 1e-05, %v3301_v52  ;;  %v12028_v26 = vld [vmem:[%s14258_s12] ss:$0 sm:$0xff] }
 0xba6   :  { %v3262_v23 = vpop.xlane.xlu1 %3261 }
 0xba7   :  { %9590 = vrsqrt.f32 %v3316_v12  ;;  %v3302_v19 = vmul.f32 0.03125, %v3262_v23  ;;  %v3265_v25 = vpop.xlane.xlu0 %3264 }
 0xba8   :  { %9592 = vrsqrt.f32 %v3317_v49  ;;  %v3303_v56 = vmul.f32 0.03125, %v3265_v25 }
 0xba9   :  { %v3318_v45 = vadd.f32 1e-05, %v3302_v19 }
 0xbaa   :  { %v3319_v62 = vadd.f32 1e-05, %v3303_v56 }
 0xbab   :  { %9594 = vrsqrt.f32 %v3318_v45  ;;  %v3268_v11 = vpop.xlane.xlu1 %3267  ;;  %v3271_v3 = vpop.xlane.xlu0 %3270 }
 0xbac   :  { %9596 = vrsqrt.f32 %v3319_v62  ;;  %v3304_v6 = vmul.f32 0.03125, %v3268_v11  ;;  %v3305_v18 = vmul.f32 0.03125, %v3271_v3 }
 0xbae   :  { %v3320_v41 = vadd.f32 1e-05, %v3304_v6  ;;  %v3321_v33 = vadd.f32 1e-05, %v3305_v18 }
 0xbaf   :  { %v3274_v32 = vpop.xlane.xlu1 %3273  ;;  %v3277_v30 = vpop.xlane.xlu0 %3276 }
 0xbb0   :  { %v9589_v61 = vpop.eup %9588  ;;  %9598 = vrsqrt.f32 %v3320_v41  ;;  %v3306_v5 = vmul.f32 0.03125, %v3274_v32  ;;  %v3307_v14 = vmul.f32 0.03125, %v3277_v30 }
 0xbb1   :  { %9600 = vrsqrt.f32 %v3321_v33  ;;  %v3347_v16 = vmul.f32 %v9589_v61, %v11917_v53 }
 0xbb2   :  { %v3322_v31 = vadd.f32 1e-05, %v3306_v5  ;;  %v3323_v38 = vadd.f32 1e-05, %v3307_v14 }
 0xbb3   :  { %v3280_v35 = vpop.xlane.xlu1 %3279  ;;  %v3283_v57 = vpop.xlane.xlu0 %3282  ;;  %v3369_v17 = vmul.f32 %v12021_v51, %v3347_v16 }
 0xbb4   :  { %v9591_v22 = vpop.eup %9590  ;;  %9602 = vrsqrt.f32 %v3322_v31  ;;  %v3308_v54 = vmul.f32 0.03125, %v3280_v35  ;;  %v3309_v63 = vmul.f32 0.03125, %v3283_v57 }
 0xbb5   :  { %v9593_v47 = vpop.eup %9592  ;;  %9604 = vrsqrt.f32 %v3323_v38  ;;  %v3348_v52 = vmul.f32 %v9591_v22, %v11922_v60  ;;  %v3391_v45 = vadd.f32 %v12028_v26, %v3369_v17 }
 0xbb6   :  { %v3349_v53 = vmul.f32 %v9593_v47, %v11925_v34  ;;  %v3324_v12 = vadd.f32 1e-05, %v3308_v54  ;;  %v3325_v49 = vadd.f32 1e-05, %v3309_v63 }
 0xbb7   :  { %v3286_v23 = vpop.xlane.xlu1 %3285  ;;  %v3370_v19 = vmul.f32 %v12021_v51, %v3348_v52 }
 0xbb8   :  { %v9595_v25 = vpop.eup %9594  ;;  %9606 = vrsqrt.f32 %v3324_v12  ;;  %v3310_v56 = vmul.f32 0.03125, %v3286_v23  ;;  %v3371_v11 = vmul.f32 %v12021_v51, %v3349_v53 }
 0xbb9   :  { %v9597_v62 = vpop.eup %9596  ;;  %v3350_v3 = vmul.f32 %v9595_v25, %v11933_v15  ;;  %9608 = vrsqrt.f32 %v3325_v49  ;;  %v3392_v60 = vadd.f32 %v12028_v26, %v3370_v19 }
 0xbba   :  { %v3326_v6 = vadd.f32 1e-05, %v3310_v56  ;;  %v3351_v34 = vmul.f32 %v9597_v62, %v11938_v55  ;;  %v3393_v32 = vadd.f32 %v12028_v26, %v3371_v11 }
 0xbbb   :  { %v3372_v18 = vmul.f32 %v12021_v51, %v3350_v3  ;;  %v3407_v41 = vpack.c.bf16 %v3392_v60, %v3391_v45 }
 0xbbc   :  { %9610 = vrsqrt.f32 %v3326_v6  ;;  %v3373_v5 = vmul.f32 %v12021_v51, %v3351_v34 }
 0xbbd   :  { %v9599_v33 = vpop.eup %9598  ;;  %8694 = vmatprep.mubr.msk.bf16.mxu0 %vm143_vm0, %v3407_v41  ;;  %v3394_v30 = vadd.f32 %v12028_v26, %v3372_v18 }
 0xbbe   :  { %v9601_v61 = vpop.eup %9600  ;;  %v3352_v15 = vmul.f32 %v9599_v33, %v11946_v39  ;;  %v3395_v35 = vadd.f32 %v12028_v26, %v3373_v5 }
 0xbbf   :  { %v3408_v14 = vpack.c.bf16 %v3394_v30, %v3393_v32  ;;  %v3353_v16 = vmul.f32 %v9601_v61, %v11949_v10 }
 0xbc0   :  { %v3374_v55 = vmul.f32 %v12021_v51, %v3352_v15 }
 0xbc1   :  { %v9603_v31 = vpop.eup %9602  ;;  %8695 = vmatmul.mubr.msk.bf16.vlgmr.msra.gmra.mxu0 %vm143_vm0, %v3408_v14  ;;  %v3375_v54 = vmul.f32 %v12021_v51, %v3353_v16 }
 0xbc2   :  { %v9605_v38 = vpop.eup %9604  ;;  %v3396_v57 = vadd.f32 %v12028_v26, %v3374_v55  ;;  %v3354_v22 = vmul.f32 %v9603_v31, %v11957_v9 }
 0xbc3   :  { %v3355_v39 = vmul.f32 %v9605_v38, %v11960_v20  ;;  %v3397_v52 = vadd.f32 %v12028_v26, %v3375_v54 }
 0xbc4   :  { %v3409_v63 = vpack.c.bf16 %v3396_v57, %v3395_v35  ;;  %v3376_v17 = vmul.f32 %v12021_v51, %v3354_v22 }
 0xbc5   :  { %v9607_v10 = vpop.eup %9606  ;;  %v3377_v49 = vmul.f32 %v12021_v51, %v3355_v39 }
 0xbc6   :  { %v9609_v47 = vpop.eup %9608  ;;  %8698 = vmatprep.mubr.msk.bf16.mxu0 %vm143_vm0, %v3409_v63  ;;  %v3398_v53 = vadd.f32 %v12028_v26, %v3376_v17  ;;  %v3356_v12 = vmul.f32 %v9607_v10, %v11969_v36 }
 0xbc7   :  { %v3357_v9 = vmul.f32 %v9609_v47, %v11972_v59  ;;  %v3399_v25 = vadd.f32 %v12028_v26, %v3377_v49  ;;  %v12099_v49 = vld [vmem:[%s14260_s14] ss:$0 sm:$0xff] }
 0xbc8   :  { %v3410_v23 = vpack.c.bf16 %v3398_v53, %v3397_v52  ;;  %v3378_v20 = vmul.f32 %v12021_v51, %v3356_v12  ;;  %v9288_v12 = vld [vmem:[%s14261_s15 + $0x18] sm:$0xff]  }
 0xbc9   :  { %v9611_v19 = vpop.eup %9610  ;;  %v3379_v62 = vmul.f32 %v12021_v51, %v3357_v9  ;;  %8710 = vmatprep.subr.bf16.mxu1 %v9288_v12 }
 0xbca   :  { %8699 = vmatmul.mubr.msk.bf16.gmra.mxu0 %vm143_vm0, %v3410_v23  ;;  %v3400_v56 = vadd.f32 %v12028_v26, %v3378_v20  ;;  %v3358_v45 = vmul.f32 %v9611_v19, %v11981_v29  ;;  %8711 = vmatpush3.bf16.msra.mxu1 %v9288_v12 }
 0xbcb   :  { %v3401_v59 = vadd.f32 %v12028_v26, %v3379_v62 }
 0xbcc   :  { %v3411_v11 = vpack.c.bf16 %v3400_v56, %v3399_v25  ;;  %v3380_v36 = vmul.f32 %v12021_v51, %v3358_v45 }
 0xbce   :  { %8702 = vmatprep.mubr.msk.bf16.mxu0 %vm143_vm0, %v3411_v11  ;;  %v3402_v3 = vadd.f32 %v12028_v26, %v3380_v36 }
 0xbd0   :  { %v3412_v60 = vpack.c.bf16 %v3402_v3, %v3401_v59 }
 0xbd2   :  { %8703 = vmatmul.mubr.msk.bf16.gmra.mxu0 %vm143_vm0, %v3412_v60 }
 0xbe5   :  { %v3289_v6 = vpop.xlane.xlu0 %3288 }
 0xbe6   :  { %v3311_v34 = vmul.f32 0.03125, %v3289_v6 }
 0xbe8   :  { %v3327_v18 = vadd.f32 1e-05, %v3311_v34 }
 0xbe9   :  { %v3292_v41 = vpop.xlane.xlu1 %3291  ;;  %v3295_v33 = vpop.xlane.xlu0 %3294 }
 0xbea   :  { %9612 = vrsqrt.f32 %v3327_v18  ;;  %v3312_v29 = vmul.f32 0.03125, %v3292_v41  ;;  %v3313_v32 = vmul.f32 0.03125, %v3295_v33 }
 0xbec   :  { %v3328_v30 = vadd.f32 1e-05, %v3312_v29  ;;  %v3329_v61 = vadd.f32 1e-05, %v3313_v32 }
 0xbed   :  { %v3298_v15 = vpop.xlane.xlu1 %3297 }
 0xbee   :  { %9614 = vrsqrt.f32 %v3328_v30  ;;  %v3314_v5 = vmul.f32 0.03125, %v3298_v15 }
 0xbef   :  { %9616 = vrsqrt.f32 %v3329_v61 }
 0xbf0   :  { %v3330_v14 = vadd.f32 1e-05, %v3314_v5 }
 0xbf2   :  { %9618 = vrsqrt.f32 %v3330_v14 }
 0xbf7   :  { %v9613_v16 = vpop.eup %9612 }
 0xbf8   :  { %v3359_v55 = vmul.f32 %v9613_v16, %v11995_v2 }
 0xbfa   :  { %v3381_v57 = vmul.f32 %v12021_v51, %v3359_v55 }
 0xbfb   :  { %v9615_v31 = vpop.eup %9614 }
 0xbfc   :  { %v9617_v38 = vpop.eup %9616  ;;  %v3360_v35 = vmul.f32 %v9615_v31, %v12000_v46  ;;  %v3403_v63 = vadd.f32 %v12028_v26, %v3381_v57 }
 0xbfd   :  { %v3361_v22 = vmul.f32 %v9617_v38, %v12003_v43 }
 0xbfe   :  { %v3382_v54 = vmul.f32 %v12021_v51, %v3360_v35 }
 0xbff   :  { %v9619_v39 = vpop.eup %9618  ;;  %v3383_v47 = vmul.f32 %v12021_v51, %v3361_v22 }
 0xc00   :  { %v3404_v17 = vadd.f32 %v12028_v26, %v3382_v54  ;;  %v3362_v10 = vmul.f32 %v9619_v39, %v12011_v42  ;;  %v9289_v42 = vld [vmem:[%s14261_s15 + $0x10] sm:$0xff]  }
 0xc01   :  { %v3405_v46 = vadd.f32 %v12028_v26, %v3383_v47  ;;  %8712 = vmatprep.subr.bf16.mxu1 %v9289_v42 }
 0xc02   :  { %v3413_v2 = vpack.c.bf16 %v3404_v17, %v3403_v63  ;;  %v3384_v52 = vmul.f32 %v12021_v51, %v3362_v10  ;;  %8713 = vmatpush3.bf16.msra.mxu1 %v9289_v42  ;;  %v9290_v51 = vld [vmem:[%s14261_s15 + $0x8] sm:$0xff]  }
 0xc03   :  { %8714 = vmatprep.subr.bf16.mxu1 %v9290_v51 }
 0xc04   :  { %8706 = vmatprep.mubr.msk.bf16.mxu0 %vm143_vm0, %v3413_v2  ;;  %v3406_v43 = vadd.f32 %v12028_v26, %v3384_v52  ;;  %v9291_v26 = vld [vmem:[%s14261_s15] sm:$0xff]  }
 0xc06   :  { %v3414_v53 = vpack.c.bf16 %v3406_v43, %v3405_v46  ;;  %8715 = vmatpush3.bf16.msra.mxu1 %v9290_v51 }
 0xc07   :  { %8716 = vmatprep.subr.bf16.mxu1 %v9291_v26 }
 0xc08   :  { %8707 = vmatmul.mubr.msk.bf16.gmra.mxu0 %vm143_vm0, %v3414_v53 }
 0xc0a   :  { %8717 = vmatpush3.bf16.msra.mxu1 %v9291_v26 }
 0xc81   :  { %v8696_v9 = vpop.f32.mrf.mxu0 }
 0xc82   :  { %v12102_v23 = vadd.f32 %v8696_v9, %v12099_v49 }
 0xc83   :  { %v3496_v20 = vpop.f32.mrf.mxu0 }
 0xc84   :  { %v3577_v19 = vmul.f32 %v12102_v23, %v12102_v23  ;;  %v12107_v25 = vadd.f32 %v12099_v49, %v3496_v20 }
 0xc85   :  { %v8697_v56 = vpop.f32.mrf.mxu0 }
 0xc86   :  { %v3593_v45 = vmul.f32 %v3577_v19, %v12102_v23  ;;  %v3575_v62 = vmul.f32 %v12107_v25, %v12107_v25  ;;  %v12113_v11 = vadd.f32 %v8697_v56, %v12099_v49 }
 0xc87   :  { %v3499_v36 = vpop.f32.mrf.mxu0 }
 0xc88   :  { %v3609_v59 = vmul.f32 0.044715, %v3593_v45  ;;  %v3591_v3 = vmul.f32 %v3575_v62, %v12107_v25  ;;  %v3578_v60 = vmul.f32 %v12113_v11, %v12113_v11  ;;  %v12119_v6 = vadd.f32 %v12099_v49, %v3499_v36 }
 0xc8a   :  { %v3625_v34 = vadd.f32 %v3609_v59, %v12102_v23  ;;  %v3607_v18 = vmul.f32 0.044715, %v3591_v3  ;;  %v3594_v41 = vmul.f32 %v3578_v60, %v12113_v11  ;;  %v8700_v33 = vpop.f32.mrf.mxu0  ;;  %v3576_v29 = vmul.f32 %v12119_v6, %v12119_v6 }
 0xc8b   :  { %v12126_v32 = vadd.f32 %v8700_v33, %v12099_v49 }
 0xc8c   :  { %v3641_v30 = vmul.f32 0.7978846, %v3625_v34  ;;  %v3623_v61 = vadd.f32 %v3607_v18, %v12107_v25  ;;  %v3610_v15 = vmul.f32 0.044715, %v3594_v41  ;;  %v3512_v5 = vpop.f32.mrf.mxu0  ;;  %v3592_v14 = vmul.f32 %v3576_v29, %v12119_v6 }
 0xc8d   :  { %v3581_v16 = vmul.f32 %v12126_v32, %v12126_v32  ;;  %v12133_v55 = vadd.f32 %v12099_v49, %v3512_v5 }
 0xc8e   :  { %v3639_v31 = vmul.f32 0.7978846, %v3623_v61  ;;  %v3626_v38 = vadd.f32 %v3610_v15, %v12113_v11  ;;  %v8701_v35 = vpop.f32.mrf.mxu0  ;;  %9620 = vtanh.f32 %v3641_v30  ;;  %v3608_v57 = vmul.f32 0.044715, %v3592_v14 }
 0xc8f   :  { %v3597_v22 = vmul.f32 %v3581_v16, %v12126_v32  ;;  %v3579_v54 = vmul.f32 %v12133_v55, %v12133_v55  ;;  %v12140_v63 = vadd.f32 %v8701_v35, %v12099_v49 }
 0xc90   :  { %9622 = vtanh.f32 %v3639_v31  ;;  %v3642_v39 = vmul.f32 0.7978846, %v3626_v38  ;;  %v3515_v17 = vpop.f32.mrf.mxu0  ;;  %v3624_v10 = vadd.f32 %v3608_v57, %v12119_v6 }
 0xc91   :  { %v3613_v47 = vmul.f32 0.044715, %v3597_v22  ;;  %v3595_v2 = vmul.f32 %v3579_v54, %v12133_v55  ;;  %v12145_v52 = vadd.f32 %v12099_v49, %v3515_v17  ;;  %v3582_v46 = vmul.f32 %v12140_v63, %v12140_v63 }
 0xc92   :  { %9624 = vtanh.f32 %v3642_v39  ;;  %v8704_v43 = vpop.f32.mrf.mxu0  ;;  %v3640_v53 = vmul.f32 0.7978846, %v3624_v10 }
 0xc93   :  { %v3629_v12 = vadd.f32 %v3613_v47, %v12126_v32  ;;  %v3611_v42 = vmul.f32 0.044715, %v3595_v2  ;;  %v3598_v51 = vmul.f32 %v3582_v46, %v12140_v63  ;;  %v3580_v26 = vmul.f32 %v12145_v52, %v12145_v52 }
 0xc94   :  { %v12154_v9 = vadd.f32 %v8704_v43, %v12099_v49  ;;  %v3528_v20 = vpop.f32.mrf.mxu0  ;;  %9626 = vtanh.f32 %v3640_v53 }
 0xc95   :  { %v3627_v19 = vadd.f32 %v3611_v42, %v12133_v55  ;;  %v12158_v56 = vadd.f32 %v12099_v49, %v3528_v20  ;;  %v3614_v45 = vmul.f32 0.044715, %v3598_v51  ;;  %v3596_v62 = vmul.f32 %v3580_v26, %v12145_v52 }
 0xc96   :  { %v3585_v36 = vmul.f32 %v12154_v9, %v12154_v9  ;;  %v8705_v59 = vpop.f32.mrf.mxu0  ;;  %v3645_v3 = vmul.f32 0.7978846, %v3629_v12  ;;  %v3559_v51 = vmul.f32 0.5, %v12107_v25 }
 0xc97   :  { %v3643_v60 = vmul.f32 0.7978846, %v3627_v19  ;;  %v3583_v34 = vmul.f32 %v12158_v56, %v12158_v56  ;;  %v3630_v18 = vadd.f32 %v3614_v45, %v12140_v63  ;;  %v3612_v41 = vmul.f32 0.044715, %v3596_v62 }
 0xc98   :  { %v3601_v33 = vmul.f32 %v3585_v36, %v12154_v9  ;;  %v12168_v29 = vadd.f32 %v8705_v59, %v12099_v49  ;;  %v3531_v30 = vpop.f32.mrf.mxu0  ;;  %v3562_v36 = vmul.f32 0.5, %v12113_v11  ;;  %v3560_v59 = vmul.f32 0.5, %v12119_v6 }
 0xc99   :  { %v3599_v61 = vmul.f32 %v3583_v34, %v12158_v56  ;;  %v12172_v15 = vadd.f32 %v12099_v49, %v3531_v30  ;;  %9628 = vtanh.f32 %v3643_v60  ;;  %v3646_v5 = vmul.f32 0.7978846, %v3630_v18 }
 0xc9a   :  { %v3628_v14 = vadd.f32 %v3612_v41, %v12145_v52  ;;  %v3617_v16 = vmul.f32 0.044715, %v3601_v33  ;;  %9630 = vtanh.f32 %v3645_v3  ;;  %v3586_v38 = vmul.f32 %v12168_v29, %v12168_v29 }
 0xc9b   :  { %v3615_v31 = vmul.f32 0.044715, %v3599_v61  ;;  %v3584_v35 = vmul.f32 %v12172_v15, %v12172_v15  ;;  %v9621_v57 = vpop.eup %9620  ;;  %9632 = vtanh.f32 %v3646_v5  ;;  %v3561_v18 = vmul.f32 0.5, %v12102_v23 }
 0xc9c   :  { %v3644_v22 = vmul.f32 0.7978846, %v3628_v14  ;;  %v3633_v54 = vadd.f32 %v3617_v16, %v12154_v9  ;;  %v3602_v10 = vmul.f32 %v3586_v38, %v12168_v29  ;;  %v3673_v62 = vadd.f32 1.0, %v9621_v57 }
 0xc9d   :  { %v9623_v39 = vpop.eup %9622  ;;  %v3631_v17 = vadd.f32 %v3615_v31, %v12158_v56  ;;  %v3600_v47 = vmul.f32 %v3584_v35, %v12172_v15  ;;  %v3566_v35 = vmul.f32 0.5, %v12140_v63  ;;  %v3563_v57 = vmul.f32 0.5, %v12133_v55 }
 0xc9e   :  { %9634 = vtanh.f32 %v3644_v22  ;;  %v3649_v2 = vmul.f32 0.7978846, %v3633_v54  ;;  %v3618_v53 = vmul.f32 0.044715, %v3602_v10  ;;  %v3671_v19 = vadd.f32 1.0, %v9623_v39 }
 0xc9f   :  { %v9625_v46 = vpop.eup %9624  ;;  %v3647_v43 = vmul.f32 0.7978846, %v3631_v17  ;;  %v3616_v12 = vmul.f32 0.044715, %v3600_v47  ;;  %v3689_v30 = vmul.f32 %v3673_v62, %v3561_v18  ;;  %v3564_v22 = vmul.f32 0.5, %v12145_v52 }
 0xca0   :  { %v3674_v42 = vadd.f32 1.0, %v9625_v46  ;;  %v3634_v26 = vadd.f32 %v3618_v53, %v12168_v29  ;;  %v3687_v25 = vmul.f32 %v3671_v19, %v3559_v51  ;;  %v3565_v39 = vmul.f32 0.5, %v12126_v32 }
 0xca1   :  { %v3632_v20 = vadd.f32 %v3616_v12, %v12172_v15  ;;  %v9627_v45 = vpop.eup %9626  ;;  %9636 = vtanh.f32 %v3647_v43  ;;  %v3570_v55 = vmul.f32 0.5, %v12168_v29  ;;  %v3567_v32 = vmul.f32 0.5, %v12158_v56 }
 0xca2   :  { %9638 = vtanh.f32 %v3649_v2  ;;  %v3650_v3 = vmul.f32 0.7978846, %v3634_v26  ;;  %v3672_v34 = vadd.f32 1.0, %v9627_v45  ;;  %v3690_v41 = vmul.f32 %v3674_v42, %v3562_v36 }
 0xca3   :  { %v3648_v60 = vmul.f32 0.7978846, %v3632_v20  ;;  %v3568_v20 = vmul.f32 0.5, %v12172_v15  ;;  %v3569_v45 = vmul.f32 0.5, %v12154_v9 }
 0xca4   :  { %9640 = vtanh.f32 %v3650_v3  ;;  %v3688_v33 = vmul.f32 %v3672_v34, %v3560_v59  ;;  %v3704_v11 = vpack.c.bf16 %v3690_v41, %v3689_v30 }
 0xca5   :  { %9642 = vtanh.f32 %v3648_v60 }
 0xca6   :  { %v9629_v61 = vpop.eup %9628  ;;  %v3703_v5 = vpack.c.bf16 %v3688_v33, %v3687_v25 }
 0xca7   :  { %v9631_v14 = vpop.eup %9630  ;;  %v3675_v31 = vadd.f32 1.0, %v9629_v61 }
 0xca8   :  { %v9633_v16 = vpop.eup %9632  ;;  %8718 = vmatprep.mubr.msk.bf16.mxu1 %vm3750_vm3, %v3703_v5  ;;  %v3677_v23 = vadd.f32 1.0, %v9631_v14 }
 0xca9   :  { %v3678_v6 = vadd.f32 1.0, %v9633_v16  ;;  %8719 = vmatmul.mubr.msk.bf16.vlgmr.msra.gmra.mxu1 %vm3750_vm3, %v3704_v11  ;;  %v3691_v10 = vmul.f32 %v3675_v31, %v3563_v57 }
 0xcaa   :  { %v3693_v46 = vmul.f32 %v3677_v23, %v3565_v39 }
 0xcab   :  { %v9635_v38 = vpop.eup %9634  ;;  %v3694_v17 = vmul.f32 %v3678_v6, %v3566_v35 }
 0xcac   :  { %v3676_v54 = vadd.f32 1.0, %v9635_v38 }
 0xcad   :  { %v3706_v12 = vpack.c.bf16 %v3694_v17, %v3693_v46 }
 0xcae   :  { %v3692_v47 = vmul.f32 %v3676_v54, %v3564_v22  ;;  %v9637_v2 = vpop.eup %9636 }
 0xcaf   :  { %v9639_v43 = vpop.eup %9638  ;;  %v3679_v51 = vadd.f32 1.0, %v9637_v2 }
 0xcb0   :  { %v3705_v53 = vpack.c.bf16 %v3692_v47, %v3691_v10  ;;  %v3681_v26 = vadd.f32 1.0, %v9639_v43 }
 0xcb1   :  { %v9641_v42 = vpop.eup %9640  ;;  %v3695_v36 = vmul.f32 %v3679_v51, %v3567_v32 }
 0xcb2   :  { %8722 = vmatprep.mubr.msk.bf16.mxu1 %vm3750_vm3, %v3705_v53  ;;  %v9643_v63 = vpop.eup %9642  ;;  %v3682_v52 = vadd.f32 1.0, %v9641_v42  ;;  %v3697_v3 = vmul.f32 %v3681_v26, %v3569_v45 }
 0xcb3   :  { %8723 = vmatmul.mubr.msk.bf16.gmra.mxu1 %vm3750_vm3, %v3706_v12  ;;  %v3680_v19 = vadd.f32 1.0, %v9643_v63 }
 0xcb4   :  { %v3698_v62 = vmul.f32 %v3682_v52, %v3570_v55 }
 0xcb5   :  { %v3696_v59 = vmul.f32 %v3680_v19, %v3568_v20 }
 0xcb6   :  { %v3708_v34 = vpack.c.bf16 %v3698_v62, %v3697_v3 }
 0xcb7   :  { %v3707_v60 = vpack.c.bf16 %v3696_v59, %v3695_v36 }
 0xcb9   :  { %8726 = vmatprep.mubr.msk.bf16.mxu1 %vm3750_vm3, %v3707_v60 }
 0xcbb   :  { %8727 = vmatmul.mubr.msk.bf16.gmra.mxu1 %vm3750_vm3, %v3708_v34  ;;  %v12212_v34 = vld [vmem:[%s14262_s16] ss:$0 sm:$0xff] }
 0xcc8   :  { %v8708_v29 = vpop.f32.mrf.mxu0 }
 0xcc9   :  { %v3553_v18 = vadd.f32 %v8708_v29, %v12099_v49 }
 0xcca   :  { %v3544_v41 = vpop.f32.mrf.mxu0 }
 0xccb   :  { %v3589_v56 = vmul.f32 %v3553_v18, %v3553_v18  ;;  %v3545_v15 = vadd.f32 %v12099_v49, %v3544_v41  ;;  %v3573_v20 = vmul.f32 0.5, %v3553_v18 }
 0xccc   :  { %v8709_v25 = vpop.f32.mrf.mxu0 }
 0xccd   :  { %v3605_v33 = vmul.f32 %v3589_v56, %v3553_v18  ;;  %v3587_v9 = vmul.f32 %v3545_v15, %v3545_v15  ;;  %v3556_v30 = vadd.f32 %v8709_v25, %v12099_v49  ;;  %v3571_v55 = vmul.f32 0.5, %v3545_v15 }
 0xcce   :  { %v3547_v61 = vpop.f32.mrf.mxu0 }
 0xccf   :  { %v3621_v5 = vmul.f32 0.044715, %v3605_v33  ;;  %v3603_v14 = vmul.f32 %v3587_v9, %v3545_v15  ;;  %v3590_v11 = vmul.f32 %v3556_v30, %v3556_v30  ;;  %v3548_v16 = vadd.f32 %v12099_v49, %v3547_v61 }
 0xcd0   :  { %v3574_v26 = vmul.f32 0.5, %v3556_v30 }
 0xcd1   :  { %v3637_v6 = vadd.f32 %v3621_v5, %v3553_v18  ;;  %v3619_v31 = vmul.f32 0.044715, %v3603_v14  ;;  %v3606_v38 = vmul.f32 %v3590_v11, %v3556_v30  ;;  %v3588_v23 = vmul.f32 %v3548_v16, %v3548_v16 }
 0xcd2   :  { %v3572_v52 = vmul.f32 0.5, %v3548_v16 }
 0xcd3   :  { %v3653_v35 = vmul.f32 0.7978846, %v3637_v6  ;;  %v3635_v57 = vadd.f32 %v3619_v31, %v3545_v15  ;;  %v3622_v22 = vmul.f32 0.044715, %v3606_v38  ;;  %v3604_v54 = vmul.f32 %v3588_v23, %v3548_v16 }
 0xcd5   :  { %v3651_v39 = vmul.f32 0.7978846, %v3635_v57  ;;  %v3638_v17 = vadd.f32 %v3622_v22, %v3556_v30  ;;  %v3620_v10 = vmul.f32 0.044715, %v3604_v54  ;;  %9644 = vtanh.f32 %v3653_v35 }
 0xcd7   :  { %v3654_v47 = vmul.f32 0.7978846, %v3638_v17  ;;  %9646 = vtanh.f32 %v3651_v39  ;;  %v3636_v2 = vadd.f32 %v3620_v10, %v3548_v16 }
 0xcd9   :  { %9648 = vtanh.f32 %v3654_v47  ;;  %v3652_v46 = vmul.f32 0.7978846, %v3636_v2 }
 0xcdb   :  { %9650 = vtanh.f32 %v3652_v46 }
 0xce2   :  { %v9645_v43 = vpop.eup %9644 }
 0xce3   :  { %v3685_v63 = vadd.f32 1.0, %v9645_v43 }
 0xce4   :  { %v9647_v49 = vpop.eup %9646 }
 0xce5   :  { %v3683_v42 = vadd.f32 1.0, %v9647_v49  ;;  %v3701_v36 = vmul.f32 %v3685_v63, %v3573_v20 }
 0xce6   :  { %v9649_v53 = vpop.eup %9648 }
 0xce7   :  { %v3686_v12 = vadd.f32 1.0, %v9649_v53  ;;  %v3699_v45 = vmul.f32 %v3683_v42, %v3571_v55 }
 0xce8   :  { %v9651_v51 = vpop.eup %9650 }
 0xce9   :  { %v3684_v32 = vadd.f32 1.0, %v9651_v51  ;;  %v3702_v19 = vmul.f32 %v3686_v12, %v3574_v26 }
 0xceb   :  { %v3700_v62 = vmul.f32 %v3684_v32, %v3572_v52  ;;  %v3710_v3 = vpack.c.bf16 %v3702_v19, %v3701_v36 }
 0xced   :  { %v3709_v59 = vpack.c.bf16 %v3700_v62, %v3699_v45 }
 0xcef   :  { %8730 = vmatprep.mubr.msk.bf16.mxu1 %vm3750_vm3, %v3709_v59 }
 0xcf0   :  { %8731 = vmatmul.mubr.msk.bf16.gmra.mxu1 %vm3750_vm3, %v3710_v3 }
 0xd69   :  { %v8720_v60 = vpop.f32.mrf.mxu1 }
 0xd6a   :  { %v3818_v41 = vadd.f32 %v8720_v60, %v12212_v34 }
 0xd6b   :  { %v3809_v29 = vpop.f32.mrf.mxu1 }
 0xd6c   :  { %v3810_v18 = vadd.f32 %v12212_v34, %v3809_v29  ;;  %v12220_v33 = vadd.f32 %v3818_v41, %v11798_v1 }
 0xd6d   :  { %v8721_v56 = vpop.f32.mrf.mxu1 }
 0xd6e   :  { %v12217_v15 = vadd.f32 %v3810_v18, %v11788_v24  ;;  %14532 = vst [vmem:[#allocation22_spill] sm:$0xff] %v12220_v33  ;;  %v3821_v9 = vadd.f32 %v8721_v56, %v12212_v34  ;;  %v3898_v16 = vsel %vm143_vm0, %v12220_v33, 0.0 }
 0xd6f   :  { %v3812_v25 = vpop.f32.mrf.mxu1 }
 0xd70   :  { %14531 = vst [vmem:[#allocation21_spill] sm:$0xff] %v12217_v15  ;;  %v3813_v30 = vadd.f32 %v12212_v34, %v3812_v25  ;;  %v3892_v61 = vsel %vm143_vm0, %v12217_v15, 0.0  ;;  %v12230_v11 = vadd.f32 %v3821_v9, %v11814_v48 }
 0xd71   :  { %3893 = vadd.xlane.f32.xlu0 %v3892_v61 }
 0xd72   :  { %v12227_v5 = vadd.f32 %v3813_v30, %v11803_v0  ;;  %14534 = vst [vmem:[#allocation24_spill] sm:$0xff] %v12230_v11  ;;  %v3901_v35 = vsel %vm143_vm0, %v12230_v11, 0.0 }
 0xd73   :  { %v8724_v14 = vpop.f32.mrf.mxu1 }
 0xd74   :  { %14533 = vst [vmem:[#allocation23_spill] sm:$0xff] %v12227_v5  ;;  %v3895_v1 = vsel %vm143_vm0, %v12227_v5, 0.0  ;;  %v3834_v6 = vadd.f32 %v8724_v14, %v12212_v34 }
 0xd75   :  { %v3825_v24 = vpop.f32.mrf.mxu1  ;;  %3896 = vadd.xlane.f32.xlu1 %v3895_v1  ;;  %3899 = vadd.xlane.f32.xlu0 %v3898_v16 }
 0xd76   :  { %v3826_v31 = vadd.f32 %v12212_v34, %v3825_v24  ;;  %v12245_v57 = vadd.f32 %v3834_v6, %v11828_v28 }
 0xd77   :  { %v8725_v38 = vpop.f32.mrf.mxu1 }
 0xd78   :  { %v12239_v0 = vadd.f32 %v3826_v31, %v11821_v50  ;;  %v3837_v48 = vadd.f32 %v8725_v38, %v12212_v34  ;;  %14536 = vst [vmem:[#allocation25_spill] sm:$0xff] %v12245_v57  ;;  %v3910_v46 = vsel %vm143_vm0, %v12245_v57, 0.0 }
 0xd79   :  { %v3828_v23 = vpop.f32.mrf.mxu1  ;;  %3902 = vadd.xlane.f32.xlu1 %v3901_v35 }
 0xd7a   :  { %14535 = vst [vmem:[#allocation26_spill] sm:$0xff] %v12239_v0  ;;  %v3829_v22 = vadd.f32 %v12212_v34, %v3828_v23  ;;  %v3904_v54 = vsel %vm143_vm0, %v12239_v0, 0.0  ;;  %v12254_v17 = vadd.f32 %v3837_v48, %v11841_v8 }
 0xd7b   :  { %3905 = vadd.xlane.f32.xlu0 %v3904_v54  ;;  %v8728_v39 = vpop.f32.mrf.mxu1 }
 0xd7c   :  { %v12251_v50 = vadd.f32 %v3829_v22, %v11835_v7  ;;  %14538 = vst [vmem:[#allocation27_spill] sm:$0xff] %v12254_v17  ;;  %v3850_v47 = vadd.f32 %v8728_v39, %v12212_v34  ;;  %v3913_v8 = vsel %vm143_vm0, %v12254_v17, 0.0 }
 0xd7d   :  { %v3841_v10 = vpop.f32.mrf.mxu1 }
 0xd7e   :  { %14537 = vst [vmem:[#allocation29_spill] sm:$0xff] %v12251_v50  ;;  %v3842_v28 = vadd.f32 %v12212_v34, %v3841_v10  ;;  %v3907_v2 = vsel %vm143_vm0, %v12251_v50, 0.0  ;;  %v12268_v53 = vadd.f32 %v3850_v47, %v11856_v4 }
 0xd7f   :  { %3908 = vadd.xlane.f32.xlu1 %v3907_v2  ;;  %3911 = vadd.xlane.f32.xlu0 %v3910_v46  ;;  %v8729_v43 = vpop.f32.mrf.mxu1 }
 0xd80   :  { %v12263_v7 = vadd.f32 %v3842_v28, %v11847_v58  ;;  %14540 = vst [vmem:[#allocation30_spill] sm:$0xff] %v12268_v53  ;;  %v3853_v12 = vadd.f32 %v8729_v43, %v12212_v34  ;;  %v3922_v4 = vsel %vm143_vm0, %v12268_v53, 0.0 }
 0xd81   :  { %v3844_v49 = vpop.f32.mrf.mxu1 }
 0xd82   :  { %14539 = vst [vmem:[#allocation28_spill] sm:$0xff] %v12263_v7  ;;  %v3845_v42 = vadd.f32 %v12212_v34, %v3844_v49  ;;  %v3916_v51 = vsel %vm143_vm0, %v12263_v7, 0.0  ;;  %v12278_v58 = vadd.f32 %v3853_v12, %v11866_v13 }
 0xd83   :  { %3914 = vadd.xlane.f32.xlu1 %v3913_v8  ;;  %3917 = vadd.xlane.f32.xlu0 %v3916_v51 }
 0xd84   :  { %v12275_v63 = vadd.f32 %v3845_v42, %v11859_v37  ;;  %14542 = vst [vmem:[#allocation47_spill] sm:$0xff] %v12278_v58  ;;  %v3925_v55 = vsel %vm143_vm0, %v12278_v58, 0.0 }
 0xd86   :  { %14541 = vst [vmem:[#allocation48_spill] sm:$0xff] %v12275_v63  ;;  %v3919_v26 = vsel %vm143_vm0, %v12275_v63, 0.0 }
 0xd87   :  { %3920 = vadd.xlane.f32.xlu1 %v3919_v26  ;;  %3923 = vadd.xlane.f32.xlu0 %v3922_v4 }
 0xd8b   :  { %3926 = vadd.xlane.f32.xlu1 %v3925_v55 }
 0xdb0   :  { %v8732_v52 = vpop.f32.mrf.mxu1 }
 0xdb1   :  { %v3866_v37 = vadd.f32 %v8732_v52, %v12212_v34 }
 0xdb2   :  { %v3857_v32 = vpop.f32.mrf.mxu1 }
 0xdb3   :  { %v3858_v20 = vadd.f32 %v12212_v34, %v3857_v32  ;;  %v12292_v62 = vadd.f32 %v3866_v37, %v11902_v27 }
 0xdb4   :  { %v8733_v13 = vpop.f32.mrf.mxu1 }
 0xdb5   :  { %v12289_v19 = vadd.f32 %v3858_v20, %v11895_v40  ;;  %14544 = vst [vmem:[#allocation53_spill] sm:$0xff] %v12292_v62  ;;  %v3869_v36 = vadd.f32 %v8733_v13, %v12212_v34  ;;  %v3934_v27 = vsel %vm143_vm0, %v12292_v62, 0.0 }
 0xdb6   :  { %v3860_v45 = vpop.f32.mrf.mxu1 }
 0xdb7   :  { %14543 = vst [vmem:[#allocation49_spill] sm:$0xff] %v12289_v19  ;;  %v3861_v59 = vadd.f32 %v12212_v34, %v3860_v45  ;;  %v3928_v3 = vsel %vm143_vm0, %v12289_v19, 0.0  ;;  %v12302_v29 = vadd.f32 %v3869_v36, %v11912_v21 }
 0xdb8   :  { %3929 = vadd.xlane.f32.xlu0 %v3928_v3 }
 0xdb9   :  { %v12299_v60 = vadd.f32 %v3861_v59, %v11905_v44  ;;  %14546 = vst [vmem:[#allocation50_spill] sm:$0xff] %v12302_v29  ;;  %v3937_v34 = vsel %vm143_vm0, %v12302_v29, 0.0 }
 0xdbb   :  { %14545 = vst [vmem:[#allocation51_spill] sm:$0xff] %v12299_v60  ;;  %v3931_v40 = vsel %vm143_vm0, %v12299_v60, 0.0 }
 0xdbc   :  { %3932 = vadd.xlane.f32.xlu1 %v3931_v40  ;;  %3935 = vadd.xlane.f32.xlu0 %v3934_v27 }
 0xdc0   :  { %3938 = vadd.xlane.f32.xlu1 %v3937_v34 }
 0xdfa   :  { %v3894_v41 = vpop.xlane.xlu0 %3893 }
 0xdfb   :  { %v3940_v18 = vmul.f32 0.03125, %v3894_v41 }
 0xdfd   :  { %v12311_v44 = vsub.f32 %v12217_v15, %v3940_v18 }
 0xdfe   :  { %v3897_v56 = vpop.xlane.xlu1 %3896  ;;  %v3900_v21 = vpop.xlane.xlu0 %3899 }
 0xdff   :  { %v3941_v25 = vmul.f32 0.03125, %v3897_v56  ;;  %v3942_v9 = vmul.f32 0.03125, %v3900_v21  ;;  %v3972_v30 = vmul.f32 %v12311_v44, %v12311_v44 }
 0xe01   :  { %v12316_v61 = vsub.f32 %v12227_v5, %v3941_v25  ;;  %v12319_v14 = vsub.f32 %v12220_v33, %v3942_v9  ;;  %v3988_v24 = vsel %vm143_vm0, %v3972_v30, 0.0 }
 0xe02   :  { %v3903_v1 = vpop.xlane.xlu1 %3902  ;;  %3989 = vadd.xlane.f32.xlu0 %v3988_v24 }
 0xe03   :  { %v3943_v16 = vmul.f32 0.03125, %v3903_v1  ;;  %v3973_v31 = vmul.f32 %v12316_v61, %v12316_v61  ;;  %v3974_v38 = vmul.f32 %v12319_v14, %v12319_v14 }
 0xe04   :  { %v3906_v6 = vpop.xlane.xlu0 %3905 }
 0xe05   :  { %v3944_v48 = vmul.f32 0.03125, %v3906_v6  ;;  %v12327_v23 = vsub.f32 %v12230_v11, %v3943_v16  ;;  %v3991_v35 = vsel %vm143_vm0, %v3973_v31, 0.0  ;;  %v3994_v22 = vsel %vm143_vm0, %v3974_v38, 0.0  ;;  %v9292_v38 = vld [vmem:[%s14254_s8 + $0x18] sm:$0xff]  }
 0xe06   :  { %3992 = vadd.xlane.f32.xlu1 %v3991_v35  ;;  %3995 = vadd.xlane.f32.xlu0 %v3994_v22 }
 0xe07   :  { %v12332_v54 = vsub.f32 %v12239_v0, %v3944_v48  ;;  %v3975_v47 = vmul.f32 %v12327_v23, %v12327_v23  ;;  %8734 = vmatprep.subr.bf16.mxu0 %v9292_v38  ;;  %v9293_v48 = vld [vmem:[%s14254_s8 + $0x10] sm:$0xff]  }
 0xe08   :  { %v3909_v39 = vpop.xlane.xlu1 %3908  ;;  %v3912_v10 = vpop.xlane.xlu0 %3911  ;;  %8735 = vmatpush3.bf16.msra.mxu0 %v9292_v38 }
 0xe09   :  { %v3945_v28 = vmul.f32 0.03125, %v3909_v39  ;;  %v3946_v2 = vmul.f32 0.03125, %v3912_v10  ;;  %v3976_v46 = vmul.f32 %v12332_v54, %v12332_v54  ;;  %v3997_v43 = vsel %vm143_vm0, %v3975_v47, 0.0  ;;  %8736 = vmatprep.subr.bf16.mxu0 %v9293_v48 }
 0xe0a   :  { %3998 = vadd.xlane.f32.xlu1 %v3997_v43 }
 0xe0b   :  { %v12340_v49 = vsub.f32 %v12251_v50, %v3945_v28  ;;  %v12343_v8 = vsub.f32 %v12245_v57, %v3946_v2  ;;  %v4000_v12 = vsel %vm143_vm0, %v3976_v46, 0.0 }
 0xe0c   :  { %v3915_v42 = vpop.xlane.xlu1 %3914  ;;  %4001 = vadd.xlane.f32.xlu0 %v4000_v12  ;;  %v3918_v51 = vpop.xlane.xlu0 %3917  ;;  %8737 = vmatpush3.bf16.msra.mxu0 %v9293_v48 }
 0xe0d   :  { %v3947_v26 = vmul.f32 0.03125, %v3915_v42  ;;  %v3948_v4 = vmul.f32 0.03125, %v3918_v51  ;;  %v3977_v55 = vmul.f32 %v12340_v49, %v12340_v49  ;;  %v3978_v52 = vmul.f32 %v12343_v8, %v12343_v8 }
 0xe0f   :  { %v12351_v32 = vsub.f32 %v12254_v17, %v3947_v26  ;;  %v12354_v37 = vsub.f32 %v12263_v7, %v3948_v4  ;;  %v4003_v20 = vsel %vm143_vm0, %v3977_v55, 0.0  ;;  %v4006_v13 = vsel %vm143_vm0, %v3978_v52, 0.0 }
 0xe10   :  { %v3921_v45 = vpop.xlane.xlu1 %3920  ;;  %4004 = vadd.xlane.f32.xlu1 %v4003_v20  ;;  %4007 = vadd.xlane.f32.xlu0 %v4006_v13  ;;  %v3924_v36 = vpop.xlane.xlu0 %3923 }
 0xe11   :  { %v3949_v59 = vmul.f32 0.03125, %v3921_v45  ;;  %v3950_v3 = vmul.f32 0.03125, %v3924_v36  ;;  %v3979_v40 = vmul.f32 %v12351_v32, %v12351_v32  ;;  %v3980_v27 = vmul.f32 %v12354_v37, %v12354_v37 }
 0xe13   :  { %v12363_v34 = vsub.f32 %v12275_v63, %v3949_v59  ;;  %v12366_v41 = vsub.f32 %v12268_v53, %v3950_v3  ;;  %v4009_v18 = vsel %vm143_vm0, %v3979_v40, 0.0  ;;  %v4012_v56 = vsel %vm143_vm0, %v3980_v27, 0.0 }
 0xe14   :  { %v3927_v21 = vpop.xlane.xlu1 %3926  ;;  %4010 = vadd.xlane.f32.xlu1 %v4009_v18  ;;  %4013 = vadd.xlane.f32.xlu0 %v4012_v56 }
 0xe15   :  { %v3951_v25 = vmul.f32 0.03125, %v3927_v21  ;;  %v3981_v9 = vmul.f32 %v12363_v34, %v12363_v34  ;;  %v3982_v30 = vmul.f32 %v12366_v41, %v12366_v41 }
 0xe17   :  { %v12375_v24 = vsub.f32 %v12278_v58, %v3951_v25  ;;  %v4015_v1 = vsel %vm143_vm0, %v3981_v9, 0.0  ;;  %v4018_v16 = vsel %vm143_vm0, %v3982_v30, 0.0 }
 0xe18   :  { %4016 = vadd.xlane.f32.xlu1 %v4015_v1  ;;  %4019 = vadd.xlane.f32.xlu0 %v4018_v16 }
 0xe19   :  { %v3983_v6 = vmul.f32 %v12375_v24, %v12375_v24 }
 0xe1b   :  { %v4021_v31 = vsel %vm143_vm0, %v3983_v6, 0.0 }
 0xe1c   :  { %4022 = vadd.xlane.f32.xlu1 %v4021_v31 }
 0xe41   :  { %v3930_v35 = vpop.xlane.xlu0 %3929 }
 0xe42   :  { %v3952_v22 = vmul.f32 0.03125, %v3930_v35 }
 0xe44   :  { %v12389_v39 = vsub.f32 %v12289_v19, %v3952_v22 }
 0xe45   :  { %v3933_v10 = vpop.xlane.xlu1 %3932  ;;  %v3936_v47 = vpop.xlane.xlu0 %3935 }
 0xe46   :  { %v3953_v28 = vmul.f32 0.03125, %v3933_v10  ;;  %v3954_v2 = vmul.f32 0.03125, %v3936_v47  ;;  %v3984_v46 = vmul.f32 %v12389_v39, %v12389_v39 }
 0xe48   :  { %v12394_v43 = vsub.f32 %v12299_v60, %v3953_v28  ;;  %v12397_v12 = vsub.f32 %v12292_v62, %v3954_v2  ;;  %v4024_v42 = vsel %vm143_vm0, %v3984_v46, 0.0 }
 0xe49   :  { %v3939_v51 = vpop.xlane.xlu1 %3938  ;;  %4025 = vadd.xlane.f32.xlu0 %v4024_v42 }
 0xe4a   :  { %v3955_v26 = vmul.f32 0.03125, %v3939_v51  ;;  %v3985_v4 = vmul.f32 %v12394_v43, %v12394_v43  ;;  %v3986_v55 = vmul.f32 %v12397_v12, %v12397_v12 }
 0xe4c   :  { %v12405_v52 = vsub.f32 %v12302_v29, %v3955_v26  ;;  %v4027_v20 = vsel %vm143_vm0, %v3985_v4, 0.0  ;;  %v4030_v13 = vsel %vm143_vm0, %v3986_v55, 0.0  ;;  %v12415_v4 = vld [vmem:[%s14252_s6 + $0x1] ss:$0 sm:$0xff]  ;;  %v12812_v29 = vld [vmem:[%s14250_s4 + $0x68] sm:$0xff] }
 0xe4d   :  { %4028 = vadd.xlane.f32.xlu1 %v4027_v20  ;;  %4031 = vadd.xlane.f32.xlu0 %v4030_v13 }
 0xe4e   :  { %v3987_v45 = vmul.f32 %v12405_v52, %v12405_v52 }
 0xe50   :  { %v4033_v36 = vsel %vm143_vm0, %v3987_v45, 0.0 }
 0xe51   :  { %4034 = vadd.xlane.f32.xlu1 %v4033_v36 }
 0xe8b   :  { %v3990_v59 = vpop.xlane.xlu0 %3989 }
 0xe8c   :  { %v4036_v3 = vmul.f32 0.03125, %v3990_v59 }
 0xe8e   :  { %v4052_v40 = vadd.f32 1e-05, %v4036_v3 }
 0xe8f   :  { %v3993_v27 = vpop.xlane.xlu1 %3992  ;;  %v3996_v18 = vpop.xlane.xlu0 %3995 }
 0xe90   :  { %9652 = vrsqrt.f32 %v4052_v40  ;;  %v4037_v56 = vmul.f32 0.03125, %v3993_v27  ;;  %v4038_v21 = vmul.f32 0.03125, %v3996_v18 }
 0xe92   :  { %v4053_v25 = vadd.f32 1e-05, %v4037_v56  ;;  %v4054_v9 = vadd.f32 1e-05, %v4038_v21  ;;  %v12422_v56 = vld [vmem:[%s14253_s7 + $0x1] ss:$0 sm:$0xff] }
 0xe93   :  { %v3999_v30 = vpop.xlane.xlu1 %3998 }
 0xe94   :  { %9654 = vrsqrt.f32 %v4053_v25  ;;  %v4039_v1 = vmul.f32 0.03125, %v3999_v30 }
 0xe95   :  { %v4002_v16 = vpop.xlane.xlu0 %4001  ;;  %9656 = vrsqrt.f32 %v4054_v9 }
 0xe96   :  { %v4040_v6 = vmul.f32 0.03125, %v4002_v16  ;;  %v4055_v31 = vadd.f32 1e-05, %v4039_v1 }
 0xe98   :  { %v4056_v38 = vadd.f32 1e-05, %v4040_v6  ;;  %9658 = vrsqrt.f32 %v4055_v31 }
 0xe99   :  { %v4005_v48 = vpop.xlane.xlu1 %4004  ;;  %v4008_v35 = vpop.xlane.xlu0 %4007 }
 0xe9a   :  { %9660 = vrsqrt.f32 %v4056_v38  ;;  %v4041_v22 = vmul.f32 0.03125, %v4005_v48  ;;  %v4042_v10 = vmul.f32 0.03125, %v4008_v35 }
 0xe9c   :  { %v4057_v47 = vadd.f32 1e-05, %v4041_v22  ;;  %v4058_v28 = vadd.f32 1e-05, %v4042_v10 }
 0xe9d   :  { %v4011_v2 = vpop.xlane.xlu1 %4010  ;;  %v4014_v46 = vpop.xlane.xlu0 %4013 }
 0xe9e   :  { %v9653_v42 = vpop.eup %9652  ;;  %9662 = vrsqrt.f32 %v4057_v47  ;;  %v4043_v51 = vmul.f32 0.03125, %v4011_v2  ;;  %v4044_v26 = vmul.f32 0.03125, %v4014_v46 }
 0xe9f   :  { %9664 = vrsqrt.f32 %v4058_v28  ;;  %v4084_v55 = vmul.f32 %v9653_v42, %v12311_v44 }
 0xea0   :  { %v4059_v20 = vadd.f32 1e-05, %v4043_v51  ;;  %v4060_v13 = vadd.f32 1e-05, %v4044_v26 }
 0xea1   :  { %v4017_v45 = vpop.xlane.xlu1 %4016  ;;  %v4020_v36 = vpop.xlane.xlu0 %4019  ;;  %v4106_v27 = vmul.f32 %v12415_v4, %v4084_v55 }
 0xea2   :  { %v9655_v59 = vpop.eup %9654  ;;  %9666 = vrsqrt.f32 %v4059_v20  ;;  %v4045_v3 = vmul.f32 0.03125, %v4017_v45  ;;  %v4046_v40 = vmul.f32 0.03125, %v4020_v36 }
 0xea3   :  { %v9657_v18 = vpop.eup %9656  ;;  %9668 = vrsqrt.f32 %v4060_v13  ;;  %v4085_v21 = vmul.f32 %v9655_v59, %v12316_v61  ;;  %v4128_v31 = vadd.f32 %v12422_v56, %v4106_v27 }
 0xea4   :  { %v4086_v44 = vmul.f32 %v9657_v18, %v12319_v14  ;;  %v4061_v25 = vadd.f32 1e-05, %v4045_v3  ;;  %v4062_v9 = vadd.f32 1e-05, %v4046_v40 }
 0xea5   :  { %v4023_v30 = vpop.xlane.xlu1 %4022  ;;  %v4107_v1 = vmul.f32 %v12415_v4, %v4085_v21  ;;  %v9659_v16 = vpop.eup %9658 }
 0xea6   :  { %9670 = vrsqrt.f32 %v4061_v25  ;;  %v4047_v6 = vmul.f32 0.03125, %v4023_v30  ;;  %v4108_v48 = vmul.f32 %v12415_v4, %v4086_v44  ;;  %v4087_v35 = vmul.f32 %v9659_v16, %v12327_v23 }
 0xea7   :  { %v9661_v38 = vpop.eup %9660  ;;  %9672 = vrsqrt.f32 %v4062_v9  ;;  %v4129_v61 = vadd.f32 %v12422_v56, %v4107_v1 }
 0xea8   :  { %v4063_v22 = vadd.f32 1e-05, %v4047_v6  ;;  %v4088_v14 = vmul.f32 %v9661_v38, %v12332_v54  ;;  %v4109_v10 = vmul.f32 %v12415_v4, %v4087_v35  ;;  %v4130_v2 = vadd.f32 %v12422_v56, %v4108_v48 }
 0xea9   :  { %v4144_v47 = vpack.c.bf16 %v4129_v61, %v4128_v31 }
 0xeaa   :  { %9674 = vrsqrt.f32 %v4063_v22  ;;  %v4131_v46 = vadd.f32 %v12422_v56, %v4109_v10  ;;  %v4110_v51 = vmul.f32 %v12415_v4, %v4088_v14 }
 0xeab   :  { %v9663_v28 = vpop.eup %9662  ;;  %8738 = vmatprep.mubr.msk.bf16.mxu0 %vm143_vm0, %v4144_v47 }
 0xeac   :  { %v9665_v42 = vpop.eup %9664  ;;  %v4089_v23 = vmul.f32 %v9663_v28, %v12340_v49  ;;  %v4145_v26 = vpack.c.bf16 %v4131_v46, %v4130_v2  ;;  %v4132_v45 = vadd.f32 %v12422_v56, %v4110_v51 }
 0xead   :  { %v4090_v55 = vmul.f32 %v9665_v42, %v12343_v8 }
 0xeae   :  { %v4111_v54 = vmul.f32 %v12415_v4, %v4089_v23  ;;  %8739 = vmatmul.mubr.msk.bf16.vlgmr.msra.gmra.mxu0 %vm143_vm0, %v4145_v26 }
 0xeaf   :  { %v9667_v20 = vpop.eup %9666  ;;  %v4112_v3 = vmul.f32 %v12415_v4, %v4090_v55 }
 0xeb0   :  { %v9669_v13 = vpop.eup %9668  ;;  %v4133_v36 = vadd.f32 %v12422_v56, %v4111_v54  ;;  %v4091_v59 = vmul.f32 %v9667_v20, %v12351_v32 }
 0xeb1   :  { %v4092_v49 = vmul.f32 %v9669_v13, %v12354_v37  ;;  %v4134_v21 = vadd.f32 %v12422_v56, %v4112_v3 }
 0xeb2   :  { %v4146_v40 = vpack.c.bf16 %v4133_v36, %v4132_v45  ;;  %v4113_v27 = vmul.f32 %v12415_v4, %v4091_v59 }
 0xeb3   :  { %v9671_v8 = vpop.eup %9670  ;;  %v4114_v9 = vmul.f32 %v12415_v4, %v4092_v49 }
 0xeb4   :  { %v9673_v18 = vpop.eup %9672  ;;  %8742 = vmatprep.mubr.msk.bf16.mxu0 %vm143_vm0, %v4146_v40  ;;  %v4135_v44 = vadd.f32 %v12422_v56, %v4113_v27  ;;  %v4093_v25 = vmul.f32 %v9671_v8, %v12363_v34 }
 0xeb5   :  { %v4094_v32 = vmul.f32 %v9673_v18, %v12366_v41  ;;  %v4136_v16 = vadd.f32 %v12422_v56, %v4114_v9 }
 0xeb6   :  { %v4147_v30 = vpack.c.bf16 %v4135_v44, %v4134_v21  ;;  %v4115_v37 = vmul.f32 %v12415_v4, %v4093_v25 }
 0xeb7   :  { %v9675_v1 = vpop.eup %9674  ;;  %v4116_v38 = vmul.f32 %v12415_v4, %v4094_v32 }
 0xeb8   :  { %8743 = vmatmul.mubr.msk.bf16.gmra.mxu0 %vm143_vm0, %v4147_v30  ;;  %v4137_v6 = vadd.f32 %v12422_v56, %v4115_v37  ;;  %v4095_v31 = vmul.f32 %v9675_v1, %v12375_v24 }
 0xeb9   :  { %v4138_v41 = vadd.f32 %v12422_v56, %v4116_v38 }
 0xeba   :  { %v4148_v48 = vpack.c.bf16 %v4137_v6, %v4136_v16  ;;  %v4117_v34 = vmul.f32 %v12415_v4, %v4095_v31 }
 0xebc   :  { %8746 = vmatprep.mubr.msk.bf16.mxu0 %vm143_vm0, %v4148_v48  ;;  %v4139_v35 = vadd.f32 %v12422_v56, %v4117_v34 }
 0xebe   :  { %v4149_v61 = vpack.c.bf16 %v4139_v35, %v4138_v41 }
 0xec0   :  { %8747 = vmatmul.mubr.msk.bf16.gmra.mxu0 %vm143_vm0, %v4149_v61 }
 0xed2   :  { %v4026_v22 = vpop.xlane.xlu0 %4025 }
 0xed3   :  { %v4048_v14 = vmul.f32 0.03125, %v4026_v22 }
 0xed5   :  { %v4064_v10 = vadd.f32 1e-05, %v4048_v14 }
 0xed6   :  { %v4029_v47 = vpop.xlane.xlu1 %4028  ;;  %v4032_v28 = vpop.xlane.xlu0 %4031 }
 0xed7   :  { %9676 = vrsqrt.f32 %v4064_v10  ;;  %v4049_v24 = vmul.f32 0.03125, %v4029_v47  ;;  %v4050_v2 = vmul.f32 0.03125, %v4032_v28 }
 0xed9   :  { %v4065_v46 = vadd.f32 1e-05, %v4049_v24  ;;  %v4066_v42 = vadd.f32 1e-05, %v4050_v2 }
 0xeda   :  { %v4035_v23 = vpop.xlane.xlu1 %4034 }
 0xedb   :  { %9678 = vrsqrt.f32 %v4065_v46  ;;  %v4051_v51 = vmul.f32 0.03125, %v4035_v23 }
 0xedc   :  { %9680 = vrsqrt.f32 %v4066_v42 }
 0xedd   :  { %v4067_v26 = vadd.f32 1e-05, %v4051_v51 }
 0xedf   :  { %9682 = vrsqrt.f32 %v4067_v26 }
 0xee4   :  { %v9677_v55 = vpop.eup %9676 }
 0xee5   :  { %v4096_v54 = vmul.f32 %v9677_v55, %v12389_v39 }
 0xee7   :  { %v4118_v36 = vmul.f32 %v12415_v4, %v4096_v54 }
 0xee8   :  { %v9679_v20 = vpop.eup %9678 }
 0xee9   :  { %v9681_v13 = vpop.eup %9680  ;;  %v4097_v45 = vmul.f32 %v9679_v20, %v12394_v43  ;;  %v4140_v40 = vadd.f32 %v12422_v56, %v4118_v36 }
 0xeea   :  { %v4098_v59 = vmul.f32 %v9681_v13, %v12397_v12 }
 0xeeb   :  { %v4119_v3 = vmul.f32 %v12415_v4, %v4097_v45 }
 0xeec   :  { %v9683_v49 = vpop.eup %9682  ;;  %v4120_v18 = vmul.f32 %v12415_v4, %v4098_v59  ;;  %v7792_v59 = vld [vmem:[%s14255_s9 + $0x10] sm:$0xf] }
 0xeed   :  { %v4141_v27 = vadd.f32 %v12422_v56, %v4119_v3  ;;  %v4099_v8 = vmul.f32 %v9683_v49, %v12405_v52  ;;  %9232 = vmatprep.subr.msk.bf16.mxu0 %vm1084_vm2, %v7792_v59  ;;  %v4662_v3 = vsel %vm1084_vm2, %v7792_v59, 0 }
 0xeee   :  { %v4142_v43 = vadd.f32 %v12422_v56, %v4120_v18  ;;  %8787 = vmatpush3.bf16.msra.mxu0 %v4662_v3 }
 0xeef   :  { %v4150_v39 = vpack.c.bf16 %v4141_v27, %v4140_v40  ;;  %v4121_v21 = vmul.f32 %v12415_v4, %v4099_v8 }
 0xef1   :  { %8750 = vmatprep.mubr.msk.bf16.mxu0 %vm143_vm0, %v4150_v39  ;;  %v4143_v12 = vadd.f32 %v12422_v56, %v4121_v21 }
 0xef3   :  { %v4151_v44 = vpack.c.bf16 %v4143_v12, %v4142_v43 }
 0xef5   :  { %8751 = vmatmul.mubr.msk.bf16.gmra.mxu0 %vm143_vm0, %v4151_v44 }
 0xf6e   :  { %v8740_v25 = vpop.f32.mrf.mxu0 }
 0xf6f   :  { %v4292_v30 = vmul.f32 0.35355338, %v8740_v25 }
 0xf70   :  { %v4227_v9 = vpop.f32.mrf.mxu0 }
 0xf71   :  { %v4290_v16 = vmul.f32 0.35355338, %v4227_v9 }
 0xf72   :  { %v8741_v32 = vpop.f32.mrf.mxu0 }
 0xf73   :  { %v4293_v37 = vmul.f32 0.35355338, %v8741_v32  ;;  %v12478_v52 = vpack.c.bf16 %v8741_v32, %v8740_v25 }
 0xf74   :  { %v4230_v1 = vpop.f32.mrf.mxu0 }
 0xf75   :  { %v12480_v6 = vpack.c.bf16 %v4293_v37, %v4292_v30  ;;  %v4291_v4 = vmul.f32 0.35355338, %v4230_v1  ;;  %v12533_v40 = vpack.c.bf16 %v4230_v1, %v4227_v9 }
 0xf77   :  { %v12482_v31 = vpack.c.bf16 %v4291_v4, %v4290_v16 }
 0xf78   :  { %v8744_v38 = vpop.f32.mrf.mxu0 }
 0xf79   :  { %8770 = vmatprep.mubr.msk.bf16.mxu1 %vm769_vm1, %v12482_v31  ;;  %v4296_v34 = vmul.f32 0.35355338, %v8744_v38 }
 0xf7a   :  { %v12484_v48 = vpop.f32.mrf.mxu0 }
 0xf7c   :  { %v8745_v56 = vpop.f32.mrf.mxu0 }
 0xf7d   :  { %v4297_v41 = vmul.f32 0.35355338, %v8745_v56  ;;  %v12512_v45 = vpack.c.bf16 %v8745_v56, %v8744_v38 }
 0xf7e   :  { %v12488_v35 = vpop.f32.mrf.mxu0 }
 0xf7f   :  { %v12490_v61 = vpack.c.bf16 %v4297_v41, %v4296_v34  ;;  %v12539_v27 = vpack.c.bf16 %v12488_v35, %v12484_v48  ;;  %v4295_v3 = vmul.f32 0.35355338, %v12488_v35 }
 0xf80   :  { %v8748_v22 = vpop.f32.mrf.mxu0 }
 0xf81   :  { %v4300_v47 = vmul.f32 0.35355338, %v8748_v22 }
 0xf82   :  { %v12492_v14 = vpop.f32.mrf.mxu0 }
 0xf83   :  { %v4298_v35 = vmul.f32 0.35355338, %v12492_v14 }
 0xf84   :  { %v8749_v10 = vpop.f32.mrf.mxu0 }
 0xf85   :  { %v4301_v28 = vmul.f32 0.35355338, %v8749_v10  ;;  %v12516_v36 = vpack.c.bf16 %v8749_v10, %v8748_v22 }
 0xf86   :  { %v12496_v2 = vpop.f32.mrf.mxu0 }
 0xf87   :  { %v12494_v24 = vpack.c.bf16 %v4301_v28, %v4300_v47  ;;  %v12529_v49 = vpack.c.bf16 %v12496_v2, %v12492_v14 }
 0xfb5   :  { %v8752_v46 = vpop.f32.mrf.mxu0 }
 0xfb6   :  { %v4304_v51 = vmul.f32 0.35355338, %v8752_v46 }
 0xfb7   :  { %v12498_v42 = vpop.f32.mrf.mxu0 }
 0xfb9   :  { %v8753_v23 = vpop.f32.mrf.mxu0 }
 0xfba   :  { %v4305_v26 = vmul.f32 0.35355338, %v8753_v23  ;;  %v12500_v55 = vpack.c.bf16 %v8753_v23, %v8752_v46 }
 0xfbb   :  { %v12502_v54 = vpop.f32.mrf.mxu0 }
 0xfbc   :  { %v12504_v20 = vpack.c.bf16 %v4305_v26, %v4304_v51  ;;  %v12508_v13 = vpack.c.bf16 %v12502_v54, %v12498_v42  ;;  %4344 = vrot.lane.b32.xlu0 %v12500_v55, %s10074_s24 }
 0xfbe   :  { %4342 = vrot.lane.b32.xlu1 %v12508_v13, %s10074_s24 }
 0xfc0   :  { %4336 = vrot.lane.b32.xlu0 %v12512_v45, %s10074_s24 }
 0xfc2   :  { %4340 = vrot.lane.b32.xlu1 %v12516_v36, %s10074_s24 }
 0xfc4   :  { %4332 = vrot.lane.b32.xlu0 %v12478_v52, %s10074_s24 }
 0xfc6   :  { %4338 = vrot.lane.b32.xlu1 %v12529_v49, %s10074_s24 }
 0xfc8   :  { %4621 = vrot.lane.b32.xlu0 %v12533_v40, %s10075_s26 }
 0xfca   :  { %4334 = vrot.lane.b32.xlu1 %v12539_v27, %s10074_s24 }
 0xfcc   :  { %4625 = vrot.lane.b32.xlu0 %v12539_v27, %s10075_s26 }
 0xfce   :  { %4330 = vrot.lane.b32.xlu1 %v12533_v40, %s10074_s24 }
 0xfd0   :  { %4629 = vrot.lane.b32.xlu0 %v12529_v49, %s10075_s26 }
 0xfd2   :  { %4623 = vrot.lane.b32.xlu1 %v12478_v52, %s10075_s26 }
 0xfd4   :  { %4633 = vrot.lane.b32.xlu0 %v12508_v13, %s10075_s26 }
 0xfd6   :  { %4627 = vrot.lane.b32.xlu1 %v12512_v45, %s10075_s26 }
 0xfd8   :  { %4944 = vrot.lane.b32.xlu0 %v12500_v55, %s10076_s27 }
 0xfda   :  { %4631 = vrot.lane.b32.xlu1 %v12516_v36, %s10075_s26 }
 0xfdc   :  { %4940 = vrot.lane.b32.xlu0 %v12516_v36, %s10076_s27 }
 0xfde   :  { %4635 = vrot.lane.b32.xlu1 %v12500_v55, %s10075_s26 }
 0xfe0   :  { %4936 = vrot.lane.b32.xlu0 %v12512_v45, %s10076_s27 }
 0xfe2   :  { %4938 = vrot.lane.b32.xlu1 %v12529_v49, %s10076_s27 }
 0xfe4   :  { %4930 = vrot.lane.b32.xlu0 %v12533_v40, %s10076_s27 }
 0xfe6   :  { %4934 = vrot.lane.b32.xlu1 %v12539_v27, %s10076_s27 }
 0xfea   :  { %4932 = vrot.lane.b32.xlu1 %v12478_v52, %s10076_s27 }
 0xfee   :  { %4914 = vrot.lane.b32.xlu1 %v12482_v31, %s10077_s29 }
 0xff2   :  { %4942 = vrot.lane.b32.xlu1 %v12508_v13, %s10076_s27 }
0x102e   :  { %v4345_v8 = vpop.permute.xlu0 %4344 }
0x102f   :  { %9224 = vmatprep.subr.msk.bf16.mxu1 %vm769_vm1, %v4345_v8  ;;  %v4392_v18 = vsel %vm769_vm1, %v4345_v8, 0 }
0x1030   :  { %8755 = vmatpush3.bf16.xpose.msra.mxu1 %v4392_v18  ;;  %v4343_v39 = vpop.permute.xlu1 %4342  ;;  %v4294_v18 = vmul.f32 0.35355338, %v12484_v48 }
0x1031   :  { %9225 = vmatprep.subr.msk.bf16.mxu1 %vm769_vm1, %v4343_v39  ;;  %v4389_v44 = vsel %vm769_vm1, %v4343_v39, 0 }
0x1032   :  { %v4337_v21 = vpop.permute.xlu0 %4336  ;;  %v12606_v39 = vpack.c.bf16 %v4295_v3, %v4294_v18 }
0x1033   :  { %v4380_v41 = vsel %vm769_vm1, %v4337_v21, 0 }
0x1034   :  { %v4341_v43 = vpop.permute.xlu1 %4340 }
0x1035   :  { %v4386_v30 = vsel %vm769_vm1, %v4341_v43, 0 }
0x1036   :  { %v4333_v12 = vpop.permute.xlu0 %4332 }
0x1037   :  { %v4374_v23 = vsel %vm769_vm1, %v4333_v12, 0 }
0x1038   :  { %8757 = vmatpush3.bf16.xpose.msra.mxu1 %v4389_v44  ;;  %v4339_v25 = vpop.permute.xlu1 %4338 }
0x1039   :  { %9226 = vmatprep.subr.msk.bf16.mxu1 %vm769_vm1, %v4341_v43  ;;  %v4383_v4 = vsel %vm769_vm1, %v4339_v25, 0 }
0x103a   :  { %v4622_v9 = vpop.permute.xlu0 %4621 }
0x103b   :  { %8788 = vmatprep.mubr.msk.bf16.mxu0 %vm769_vm1, %v4622_v9  ;;  %v4303_v9 = vmul.f32 0.35355338, %v12502_v54 }
0x103c   :  { %v4335_v32 = vpop.permute.xlu1 %4334 }
0x103d   :  { %v4377_v47 = vsel %vm769_vm1, %v4335_v32, 0 }
0x103e   :  { %v4626_v16 = vpop.permute.xlu0 %4625 }
0x1040   :  { %8759 = vmatpush3.bf16.xpose.msra.mxu1 %v4386_v30  ;;  %v4331_v37 = vpop.permute.xlu1 %4330 }
0x1041   :  { %9227 = vmatprep.subr.msk.bf16.mxu1 %vm769_vm1, %v4339_v25  ;;  %v4371_v26 = vsel %vm769_vm1, %v4331_v37, 0 }
0x1042   :  { %v4630_v34 = vpop.permute.xlu0 %4629 }
0x1044   :  { %v4624_v1 = vpop.permute.xlu1 %4623 }
0x1045   :  { %8789 = vmatmul.mubr.msk.bf16.vlgmr.msra.gmra.mxu0 %vm769_vm1, %v4624_v1 }
0x1046   :  { %8792 = vmatprep.mubr.msk.bf16.mxu0 %vm769_vm1, %v4626_v16  ;;  %v4634_v10 = vpop.permute.xlu0 %4633 }
0x1048   :  { %8761 = vmatpush3.bf16.xpose.msra.mxu1 %v4383_v4  ;;  %v4628_v38 = vpop.permute.xlu1 %4627 }
0x1049   :  { %9228 = vmatprep.subr.msk.bf16.mxu1 %vm769_vm1, %v4337_v21 }
0x104a   :  { %v4945_v59 = vpop.permute.xlu0 %4944 }
0x104b   :  { %v4992_v21 = vsel %vm769_vm1, %v4945_v59, 0 }
0x104c   :  { %v4632_v56 = vpop.permute.xlu1 %4631 }
0x104d   :  { %8793 = vmatmul.mubr.msk.bf16.gmra.mxu0 %vm769_vm1, %v4628_v38 }
0x104e   :  { %8796 = vmatprep.mubr.msk.bf16.mxu0 %vm769_vm1, %v4630_v34  ;;  %v4941_v25 = vpop.permute.xlu0 %4940 }
0x104f   :  { %v4986_v14 = vsel %vm769_vm1, %v4941_v25, 0 }
0x1050   :  { %8763 = vmatpush3.bf16.xpose.msra.mxu1 %v4380_v41  ;;  %v4636_v22 = vpop.permute.xlu1 %4635 }
0x1051   :  { %9229 = vmatprep.subr.msk.bf16.mxu1 %vm769_vm1, %v4335_v32 }
0x1052   :  { %v4937_v30 = vpop.permute.xlu0 %4936 }
0x1054   :  { %v4939_v28 = vpop.permute.xlu1 %4938 }
0x1055   :  { %8797 = vmatmul.mubr.msk.bf16.gmra.mxu0 %vm769_vm1, %v4632_v56  ;;  %v4983_v54 = vsel %vm769_vm1, %v4939_v28, 0 }
0x1056   :  { %8800 = vmatprep.mubr.msk.bf16.mxu0 %vm769_vm1, %v4634_v10  ;;  %v4931_v16 = vpop.permute.xlu0 %4930 }
0x1057   :  { %v4971_v4 = vsel %vm769_vm1, %v4931_v16, 0 }
0x1058   :  { %8765 = vmatpush3.bf16.xpose.msra.mxu1 %v4377_v47  ;;  %v4935_v46 = vpop.permute.xlu1 %4934 }
0x1059   :  { %9230 = vmatprep.subr.msk.bf16.mxu1 %vm769_vm1, %v4333_v12  ;;  %v4299_v12 = vmul.f32 0.35355338, %v12496_v2  ;;  %v4302_v2 = vmul.f32 0.35355338, %v12498_v42  ;;  %v4980_v42 = vsel %vm769_vm1, %v4937_v30, 0 }
0x105b   :  { %v12616_v44 = vpack.c.bf16 %v4299_v12, %v4298_v35  ;;  %v12626_v32 = vpack.c.bf16 %v4303_v9, %v4302_v2  ;;  %v12649_v9 = vld [vmem:[%s14250_s4 + $0x10] sm:$0xff] }
0x105c   :  { %v4933_v51 = vpop.permute.xlu1 %4932 }
0x105d   :  { %8801 = vmatmul.mubr.msk.bf16.gmra.mxu0 %vm769_vm1, %v4636_v22  ;;  %v4974_v1 = vsel %vm769_vm1, %v4933_v51, 0 }
0x1060   :  { %8767 = vmatpush3.bf16.xpose.msra.mxu1 %v4374_v23  ;;  %v4915_v8 = vpop.permute.xlu1 %4914 }
0x1061   :  { %9231 = vmatprep.subr.msk.bf16.mxu1 %vm769_vm1, %v4331_v37  ;;  %v4977_v37 = vsel %vm769_vm1, %v4935_v46, 0 }
0x1064   :  { %v4943_v43 = vpop.permute.xlu1 %4942 }
0x1065   :  { %v4989_v48 = vsel %vm769_vm1, %v4943_v43, 0 }
0x1068   :  { %8769 = vmatpush3.bf16.xpose.msra.mxu1 %v4371_v26 }
0x1069   :  { %9233 = vmatprep.subr.msk.bf16.mxu1 %vm769_vm1, %v4945_v59 }
0x106f   :  { %8771 = vmatmul.mubr.msk.bf16.vlgmr.msra.gmra.mxu1 %vm769_vm1, %v12480_v6 }
0x1070   :  { %8774 = vmatprep.mubr.msk.bf16.mxu1 %vm769_vm1, %v12606_v39  ;;  %8837 = vmatpush3.bf16.xpose.msra.mxu1 %v4992_v21 }
0x1071   :  { %9234 = vmatprep.subr.msk.bf16.mxu1 %vm769_vm1, %v4943_v43 }
0x1077   :  { %8775 = vmatmul.mubr.msk.bf16.gmra.mxu1 %vm769_vm1, %v12490_v61 }
0x1078   :  { %8778 = vmatprep.mubr.msk.bf16.mxu1 %vm769_vm1, %v12616_v44  ;;  %8839 = vmatpush3.bf16.xpose.msra.mxu1 %v4989_v48 }
0x1079   :  { %9235 = vmatprep.subr.msk.bf16.mxu1 %vm769_vm1, %v4941_v25 }
0x107f   :  { %8779 = vmatmul.mubr.msk.bf16.gmra.mxu1 %vm769_vm1, %v12494_v24 }
0x1080   :  { %8782 = vmatprep.mubr.msk.bf16.mxu1 %vm769_vm1, %v12626_v32  ;;  %8841 = vmatpush3.bf16.xpose.msra.mxu1 %v4986_v14 }
0x1081   :  { %9236 = vmatprep.subr.msk.bf16.mxu1 %vm769_vm1, %v4939_v28 }
0x1087   :  { %8783 = vmatmul.mubr.msk.bf16.gmra.mxu1 %vm769_vm1, %v12504_v20 }
0x1088   :  { %8843 = vmatpush3.bf16.xpose.msra.mxu1 %v4983_v54  ;;  %8852 = vmatprep.mubr.msk.bf16.mxu1 %vm769_vm1, %v4915_v8  ;;  %v12657_v54 = vld [vmem:[%s14250_s4] sm:$0xff] }
0x1089   :  { %9237 = vmatprep.subr.msk.bf16.mxu1 %vm769_vm1, %v4937_v30 }
0x1090   :  { %8845 = vmatpush3.bf16.xpose.msra.mxu1 %v4980_v42 }
0x1091   :  { %9238 = vmatprep.subr.msk.bf16.mxu1 %vm769_vm1, %v4935_v46 }
0x1098   :  { %8847 = vmatpush3.bf16.xpose.msra.mxu1 %v4977_v37 }
0x1099   :  { %9239 = vmatprep.subr.msk.bf16.mxu1 %vm769_vm1, %v4933_v51 }
0x10a0   :  { %8849 = vmatpush3.bf16.xpose.msra.mxu1 %v4974_v1  ;;  %v12666_v1 = vld [vmem:[%s14250_s4 + $0x18] sm:$0xff] }
0x10a1   :  { %9240 = vmatprep.subr.msk.bf16.mxu1 %vm769_vm1, %v4931_v16 }
0x10a8   :  { %8851 = vmatpush3.bf16.xpose.msra.mxu1 %v4971_v4 }
0x1105   :  { %v8790_v38 = vpop.f32.mrf.mxu0 }
0x1107   :  { %v4698_v56 = vpop.f32.mrf.mxu0 }
0x1109   :  { %v8791_v34 = vpop.f32.mrf.mxu0 }
0x110b   :  { %v4701_v41 = vpop.f32.mrf.mxu0 }
0x110d   :  { %v8794_v22 = vpop.f32.mrf.mxu0 }
0x110f   :  { %v4714_v10 = vpop.f32.mrf.mxu0 }
0x1111   :  { %v8795_v47 = vpop.f32.mrf.mxu0 }
0x1112   :  { %v4772_v25 = vpack.c.bf16 %v8795_v47, %v8794_v22  ;;  %v4770_v47 = vpack.c.bf16 %v8791_v34, %v8790_v38 }
0x1113   :  { %v4717_v28 = vpop.f32.mrf.mxu0 }
0x1114   :  { %v4771_v37 = vpack.c.bf16 %v4717_v28, %v4714_v10  ;;  %v12676_v10 = vld [vmem:[%s14250_s4 + $0x8] sm:$0xff] }
0x1115   :  { %v8798_v46 = vpop.f32.mrf.mxu0 }
0x1117   :  { %v4730_v23 = vpop.f32.mrf.mxu0 }
0x1119   :  { %v8799_v26 = vpop.f32.mrf.mxu0 }
0x111a   :  { %v4774_v12 = vpack.c.bf16 %v8799_v26, %v8798_v46  ;;  %v4769_v26 = vpack.c.bf16 %v4701_v41, %v4698_v56 }
0x111b   :  { %v4733_v59 = vpop.f32.mrf.mxu0 }
0x111c   :  { %v4773_v35 = vpack.c.bf16 %v4733_v59, %v4730_v23  ;;  %v12685_v59 = vld [vmem:[%s14250_s4 + $0x30] sm:$0xff] }
0x111d   :  { %v8802_v51 = vpop.f32.mrf.mxu0 }
0x111f   :  { %v4746_v3 = vpop.f32.mrf.mxu0 }
0x1121   :  { %v8803_v8 = vpop.f32.mrf.mxu0 }
0x1122   :  { %v4776_v18 = vpack.c.bf16 %v8803_v8, %v8802_v51 }
0x1123   :  { %v4749_v21 = vpop.f32.mrf.mxu0 }
0x1124   :  { %v4775_v43 = vpack.c.bf16 %v4749_v21, %v4746_v3  ;;  %8804 = vmatprep.subr.bf16.mxu0 %v4776_v18  ;;  %v12694_v3 = vld [vmem:[%s14250_s4 + $0x20] sm:$0xff] }
0x1125   :  { %8805 = vmatpush3.bf16.msra.mxu0 %v4776_v18  ;;  %v12703_v18 = vld [vmem:[%s14250_s4 + $0x38] sm:$0xff] }
0x1126   :  { %8806 = vmatprep.subr.bf16.mxu0 %v4775_v43 }
0x1129   :  { %8807 = vmatpush3.bf16.msra.mxu0 %v4775_v43 }
0x112a   :  { %8808 = vmatprep.subr.bf16.mxu0 %v4774_v12 }
0x112d   :  { %8809 = vmatpush3.bf16.msra.mxu0 %v4774_v12  ;;  %v12711_v12 = vld [vmem:[%s14250_s4 + $0x48] sm:$0xff] }
0x112e   :  { %8810 = vmatprep.subr.bf16.mxu0 %v4773_v35 }
0x112f   :  { %v8772_v48 = vpop.f32.mrf.mxu1 }
0x1130   :  { %v12652_v2 = vadd.f32 %v12649_v9, %v8772_v48 }
0x1131   :  { %v4428_v14 = vpop.f32.mrf.mxu1  ;;  %8811 = vmatpush3.bf16.msra.mxu0 %v4773_v35 }
0x1132   :  { %v12660_v30 = vadd.f32 %v12657_v54, %v4428_v14  ;;  %4495 = vmax.xlane.f32.xlu0 %v12652_v2  ;;  %8812 = vmatprep.subr.bf16.mxu0 %v4772_v25 }
0x1133   :  { %v8773_v42 = vpop.f32.mrf.mxu1 }
0x1134   :  { %v12669_v16 = vadd.f32 %v12666_v1, %v8773_v42  ;;  %4491 = vmax.xlane.f32.xlu1 %v12660_v30  ;;  %v12729_v42 = vld [vmem:[%s14250_s4 + $0x70] sm:$0xff] }
0x1135   :  { %v4431_v4 = vpop.f32.mrf.mxu1  ;;  %8813 = vmatpush3.bf16.msra.mxu0 %v4772_v25  ;;  %v12720_v25 = vld [vmem:[%s14250_s4 + $0x28] sm:$0xff] }
0x1136   :  { %4497 = vmax.xlane.f32.xlu0 %v12669_v16  ;;  %8814 = vmatprep.subr.bf16.mxu0 %v4771_v37  ;;  %v12679_v28 = vadd.f32 %v12676_v10, %v4431_v4  ;;  %v12738_v4 = vld [vmem:[%s14250_s4 + $0x50] sm:$0xff] }
0x1137   :  { %v8776_v22 = vpop.f32.mrf.mxu1 }
0x1138   :  { %v12688_v38 = vadd.f32 %v12685_v59, %v8776_v22 }
0x1139   :  { %v4444_v46 = vpop.f32.mrf.mxu1  ;;  %8815 = vmatpush3.bf16.msra.mxu0 %v4771_v37 }
0x113a   :  { %4493 = vmax.xlane.f32.xlu0 %v12679_v28  ;;  %8816 = vmatprep.subr.bf16.mxu0 %v4770_v47  ;;  %v12697_v56 = vadd.f32 %v12694_v3, %v4444_v46 }
0x113b   :  { %v8777_v23 = vpop.f32.mrf.mxu1 }
0x113c   :  { %v12706_v21 = vadd.f32 %v12703_v18, %v8777_v23  ;;  %v12757_v23 = vld [vmem:[%s14250_s4 + $0x58] sm:$0xff] }
0x113d   :  { %v4447_v34 = vpop.f32.mrf.mxu1  ;;  %8817 = vmatpush3.bf16.msra.mxu0 %v4770_v47  ;;  %v12748_v47 = vld [vmem:[%s14250_s4 + $0x40] sm:$0xff] }
0x113e   :  { %4503 = vmax.xlane.f32.xlu0 %v12688_v38  ;;  %8818 = vmatprep.subr.bf16.mxu0 %v4769_v26  ;;  %v12723_v14 = vadd.f32 %v12720_v25, %v4447_v34 }
0x113f   :  { %v8780_v51 = vpop.f32.mrf.mxu1 }
0x1140   :  { %v12741_v22 = vadd.f32 %v12738_v4, %v8780_v51  ;;  %v12766_v51 = vld [vmem:[%s14250_s4 + $0x60] sm:$0xff] }
0x1141   :  { %v4460_v41 = vpop.f32.mrf.mxu1  ;;  %8819 = vmatpush3.bf16.msra.mxu0 %v4769_v26 }
0x1142   :  { %4499 = vmax.xlane.f32.xlu0 %v12697_v56  ;;  %v12751_v46 = vadd.f32 %v12748_v47, %v4460_v41 }
0x1143   :  { %v8781_v8 = vpop.f32.mrf.mxu1 }
0x1144   :  { %v12760_v26 = vadd.f32 %v12757_v23, %v8781_v8 }
0x1145   :  { %v4463_v43 = vpop.f32.mrf.mxu1 }
0x1146   :  { %v12714_v35 = vadd.f32 %v12711_v12, %v4463_v43  ;;  %4505 = vmax.xlane.f32.xlu0 %v12706_v21  ;;  %v12801_v43 = vld [vmem:[%s14250_s4 + $0x78] sm:$0xff] }
0x1147   :  { %v8784_v48 = vpop.f32.mrf.mxu1 }
0x1148   :  { %4509 = vmax.xlane.f32.xlu1 %v12714_v35  ;;  %v12732_v37 = vadd.f32 %v12729_v42, %v8784_v48 }
0x1149   :  { %v4476_v34 = vpop.f32.mrf.mxu1 }
0x114a   :  { %4501 = vmax.xlane.f32.xlu0 %v12723_v14  ;;  %v12769_v41 = vadd.f32 %v12766_v51, %v4476_v34 }
0x114b   :  { %v8785_v8 = vpop.f32.mrf.mxu1 }
0x114c   :  { %4519 = vmax.xlane.f32.xlu1 %v12732_v37  ;;  %v12804_v48 = vadd.f32 %v12801_v43, %v8785_v8  ;;  %v7809_v8 = vld [vmem:[%s14255_s9 + $0x14] sm:$0xf] }
0x114d   :  { %v4479_v34 = vpop.f32.mrf.mxu1  ;;  %9241 = vmatprep.subr.msk.bf16.mxu0 %vm1084_vm2, %v7809_v8 }
0x114e   :  { %4511 = vmax.xlane.f32.xlu0 %v12741_v22  ;;  %v12815_v60 = vadd.f32 %v12812_v29, %v4479_v34 }
0x1152   :  { %4507 = vmax.xlane.f32.xlu0 %v12751_v46 }
0x1156   :  { %4513 = vmax.xlane.f32.xlu0 %v12760_v26 }
0x115a   :  { %4515 = vmax.xlane.f32.xlu0 %v12769_v41 }
0x115d   :  { %4918 = vrot.lane.b32.xlu1 %v12606_v39, %s10077_s29 }
0x1161   :  { %4920 = vrot.lane.b32.xlu1 %v12490_v61, %s10077_s29 }
0x1165   :  { %4922 = vrot.lane.b32.xlu1 %v12616_v44, %s10077_s29 }
0x1169   :  { %4924 = vrot.lane.b32.xlu1 %v12494_v24, %s10077_s29 }
0x116d   :  { %4926 = vrot.lane.b32.xlu1 %v12626_v32, %s10077_s29 }
0x1170   :  { %4916 = vrot.lane.b32.xlu0 %v12480_v6, %s10077_s29 }
0x1174   :  { %5221 = vrot.lane.b32.xlu0 %v12533_v40, %s10078_s1 }
0x1178   :  { %5225 = vrot.lane.b32.xlu0 %v12539_v27, %s10078_s1 }
0x117c   :  { %5229 = vrot.lane.b32.xlu0 %v12529_v49, %s10078_s1 }
0x1180   :  { %5233 = vrot.lane.b32.xlu0 %v12508_v13, %s10078_s1 }
0x1184   :  { %5536 = vrot.lane.b32.xlu0 %v12500_v55, %s10079_s22 }
0x1188   :  { %5532 = vrot.lane.b32.xlu0 %v12516_v36, %s10079_s22 }
0x118c   :  { %5528 = vrot.lane.b32.xlu0 %v12512_v45, %s10079_s22 }
0x1190   :  { %5522 = vrot.lane.b32.xlu0 %v12533_v40, %s10079_s22 }
0x1191   :  { %4521 = vmax.xlane.f32.xlu1 %v12804_v48 }
0x1195   :  { %4517 = vmax.xlane.f32.xlu1 %v12815_v60 }
0x11a6   :  { %4928 = vrot.lane.b32.xlu1 %v12504_v20, %s10077_s29  ;;  %s14573_s29 = smov 48  }
0x11aa   :  { %5223 = vrot.lane.b32.xlu1 %v12478_v52, %s10078_s1 }
0x11ae   :  { %5227 = vrot.lane.b32.xlu1 %v12512_v45, %s10078_s1 }
0x11b2   :  { %5231 = vrot.lane.b32.xlu1 %v12516_v36, %s10078_s1 }
0x11b6   :  { %5235 = vrot.lane.b32.xlu1 %v12500_v55, %s10078_s1  ;;  %s14574_s1 = smov 72  }
0x11ba   :  { %5534 = vrot.lane.b32.xlu1 %v12508_v13, %s10079_s22 }
0x11bb   :  { %v4496_v34 = vpop.xlane.xlu0 %4495 }
0x11bc   :  { %v4525_v53 = vsub.f32 %v12652_v2, %v4496_v34 }
0x11bd   :  { %v4492_v62 = vpop.xlane.xlu1 %4491 }
0x11be   :  { %v4523_v19 = vsub.f32 %v12660_v30, %v4492_v62  ;;  %5530 = vrot.lane.b32.xlu1 %v12529_v49, %s10079_s22  ;;  %v4543_v0 = vmul.f32 1.442695, %v4525_v53 }
0x11bf   :  { %v4498_v58 = vpop.xlane.xlu0 %4497 }
0x11c0   :  { %v4526_v63 = vsub.f32 %v12669_v16, %v4498_v58  ;;  %v4539_v7 = vmul.f32 1.442695, %v4523_v19 }
0x11c2   :  { %5526 = vrot.lane.b32.xlu1 %v12539_v27, %s10079_s22  ;;  %v4545_v17 = vmul.f32 1.442695, %v4526_v63  ;;  %9684 = vpow2.f32 %v4539_v7 }
0x11c3   :  { %v4494_v50 = vpop.xlane.xlu0 %4493 }
0x11c4   :  { %v4524_v57 = vsub.f32 %v12679_v28, %v4494_v50  ;;  %9686 = vpow2.f32 %v4545_v17 }
0x11c6   :  { %v4541_v11 = vmul.f32 1.442695, %v4524_v57  ;;  %5524 = vrot.lane.b32.xlu1 %v12478_v52, %s10079_s22 }
0x11c7   :  { %v4504_v62 = vpop.xlane.xlu0 %4503 }
0x11c8   :  { %9688 = vpow2.f32 %v4541_v11  ;;  %v4529_v50 = vsub.f32 %v12688_v38, %v4504_v62 }
0x11c9   :  { %9690 = vpow2.f32 %v4543_v0 }
0x11ca   :  { %5506 = vrot.lane.b32.xlu1 %v12482_v31, %s10080_s30  ;;  %v4551_v28 = vmul.f32 1.442695, %v4529_v50 }
0x11cb   :  { %v4500_v58 = vpop.xlane.xlu0 %4499 }
0x11cc   :  { %v4527_v19 = vsub.f32 %v12697_v56, %v4500_v58 }
0x11ce   :  { %v4547_v7 = vmul.f32 1.442695, %v4527_v19  ;;  %v5262_v19 = vsel %vm1084_vm2, %v7809_v8, 0 }
0x11cf   :  { %v4506_v63 = vpop.xlane.xlu0 %4505  ;;  %v12849_v57 = vpop.eup %9684 }
0x11d0   :  { %v4530_v2 = vsub.f32 %v12706_v21, %v4506_v63  ;;  %9692 = vpow2.f32 %v4547_v7 }
0x11d1   :  { %v12851_v17 = vpop.eup %9686  ;;  %v4510_v11 = vpop.xlane.xlu1 %4509 }
0x11d2   :  { %v4553_v53 = vmul.f32 1.442695, %v4530_v2  ;;  %v4532_v62 = vsub.f32 %v12714_v35, %v4510_v11 }
0x11d3   :  { %v4502_v30 = vpop.xlane.xlu0 %4501 }
0x11d4   :  { %v4528_v0 = vsub.f32 %v12723_v14, %v4502_v30  ;;  %9694 = vpow2.f32 %v4553_v53  ;;  %v4557_v63 = vmul.f32 1.442695, %v4532_v62 }
0x11d5   :  { %v12854_v16 = vpop.eup %9688  ;;  %v4520_v14 = vpop.xlane.xlu1 %4519 }
0x11d6   :  { %v12856_v34 = vpop.eup %9690  ;;  %v4549_v56 = vmul.f32 1.442695, %v4528_v0  ;;  %v4761_v38 = vpack.c.bf16 %v12854_v16, %v12849_v57  ;;  %v4537_v33 = vsub.f32 %v12732_v37, %v4520_v14 }
0x11d7   :  { %v4762_v21 = vpack.c.bf16 %v12851_v17, %v12856_v34  ;;  %v4512_v58 = vpop.xlane.xlu0 %4511 }
0x11d8   :  { %9696 = vpow2.f32 %v4549_v56  ;;  %8820 = vmatprep.mubr.bf16.mxu0 %v4761_v38  ;;  %v4533_v2 = vsub.f32 %v12741_v22, %v4512_v58 }
0x11d9   :  { %9698 = vpow2.f32 %v4551_v28  ;;  %8821 = vmatmul.mubr.bf16.vlgmr.msra.gmra.mxu0 %v4762_v21  ;;  %v4919_v35 = vpop.permute.xlu1 %4918 }
0x11da   :  { %8869 = vmatpush3.bf16.msra.mxu0 %v5262_v19  ;;  %9700 = vpow2.f32 %v4557_v63  ;;  %v4559_v53 = vmul.f32 1.442695, %v4533_v2 }
0x11db   :  { %v4508_v50 = vpop.xlane.xlu0 %4507 }
0x11dc   :  { %v4531_v7 = vsub.f32 %v12751_v46, %v4508_v50 }
0x11dd   :  { %v12867_v56 = vpop.eup %9692  ;;  %v4921_v46 = vpop.permute.xlu1 %4920 }
0x11de   :  { %v4555_v30 = vmul.f32 1.442695, %v4531_v7 }
0x11df   :  { %v4514_v0 = vpop.xlane.xlu0 %4513 }
0x11e0   :  { %9702 = vpow2.f32 %v4555_v30  ;;  %v4534_v8 = vsub.f32 %v12760_v26, %v4514_v0 }
0x11e1   :  { %9704 = vpow2.f32 %v4559_v53  ;;  %v12869_v38 = vpop.eup %9694  ;;  %v4923_v2 = vpop.permute.xlu1 %4922 }
0x11e2   :  { %v4561_v11 = vmul.f32 1.442695, %v4534_v8  ;;  %14547 = vst [vmem:[#allocation52_spill] sm:$0xff] %v12869_v38 }
0x11e3   :  { %v4516_v28 = vpop.xlane.xlu0 %4515 }
0x11e4   :  { %9706 = vpow2.f32 %v4561_v11 }
0x11e5   :  { %v12871_v22 = vpop.eup %9696 }
0x11e6   :  { %v12873_v21 = vpop.eup %9698  ;;  %v4763_v62 = vpack.c.bf16 %v12871_v22, %v12867_v56 }
0x11e7   :  { %14548 = vst [vmem:[#allocation56_spill] sm:$0xff] %v12873_v21  ;;  %v4917_v58 = vpop.permute.xlu0 %4916  ;;  %v4764_v26 = vpack.c.bf16 %v12869_v38, %v12873_v21  ;;  %v12881_v63 = vpop.eup %9700  ;;  %v13365_v38 = vld [vmem:[%s14250_s4 + $0x78] sm:$0xff] }
0x11e8   :  { %8824 = vmatprep.mubr.bf16.mxu0 %v4763_v62  ;;  %8853 = vmatmul.mubr.msk.bf16.vlgmr.msra.gmra.mxu1 %vm769_vm1, %v4917_v58  ;;  %14549 = vst [vmem:[#allocation57_spill] sm:$0xff] %v12881_v63 }
0x11e9   :  { %8825 = vmatmul.mubr.bf16.gmra.mxu0 %v4764_v26  ;;  %8856 = vmatprep.mubr.msk.bf16.mxu1 %vm769_vm1, %v4919_v35  ;;  %v4925_v35 = vpop.permute.xlu1 %4924 }
0x11eb   :  { %v5222_v19 = vpop.permute.xlu0 %5221 }
0x11ed   :  { %v12883_v50 = vpop.eup %9702  ;;  %v4927_v58 = vpop.permute.xlu1 %4926 }
0x11ee   :  { %14550 = vst [vmem:[#allocation55_spill] sm:$0xff] %v12883_v50  ;;  %v4765_v7 = vpack.c.bf16 %v12881_v63, %v12883_v50  ;;  %v12887_v53 = vpop.eup %9704 }
0x11ef   :  { %v5226_v30 = vpop.permute.xlu0 %5225  ;;  %14551 = vst [vmem:[#allocation54_spill] sm:$0xff] %v12887_v53 }
0x11f0   :  { %8828 = vmatprep.mubr.bf16.mxu0 %v4765_v7  ;;  %8857 = vmatmul.mubr.msk.bf16.gmra.mxu1 %vm769_vm1, %v4921_v46 }
0x11f1   :  { %v12890_v0 = vpop.eup %9706  ;;  %8860 = vmatprep.mubr.msk.bf16.mxu1 %vm769_vm1, %v4923_v2  ;;  %v4535_v2 = vsub.f32 %v12769_v41, %v4516_v28 }
0x11f2   :  { %14552 = vst [vmem:[#allocation61_spill] sm:$0xff] %v12890_v0  ;;  %v4766_v8 = vpack.c.bf16 %v12890_v0, %v12887_v53  ;;  %v4567_v0 = vmul.f32 1.442695, %v4537_v33 }
0x11f3   :  { %v5230_v11 = vpop.permute.xlu0 %5229 }
0x11f4   :  { %8829 = vmatmul.mubr.bf16.gmra.mxu0 %v4766_v8  ;;  %v4563_v8 = vmul.f32 1.442695, %v4535_v2 }
0x11f6   :  { %9708 = vpow2.f32 %v4563_v8 }
0x11f7   :  { %v5234_v62 = vpop.permute.xlu0 %5233 }
0x11f8   :  { %8861 = vmatmul.mubr.msk.bf16.gmra.mxu1 %vm769_vm1, %v4925_v35 }
0x11f9   :  { %8864 = vmatprep.mubr.msk.bf16.mxu1 %vm769_vm1, %v4927_v58 }
0x11fb   :  { %v5537_v26 = vpop.permute.xlu0 %5536 }
0x11fc   :  { %9242 = vmatprep.subr.msk.bf16.mxu1 %vm769_vm1, %v5537_v26  ;;  %v5584_v46 = vsel %vm769_vm1, %v5537_v26, 0 }
0x11fd   :  { %8919 = vmatpush3.bf16.xpose.msra.mxu1 %v5584_v46 }
0x1203   :  { %v12904_v26 = vpop.eup %9708 }
0x1204   :  { %14553 = vst [vmem:[#allocation59_spill] sm:$0xff] %v12904_v26 }
0x121a   :  { %v4522_v7 = vpop.xlane.xlu1 %4521 }
0x121b   :  { %v4538_v5 = vsub.f32 %v12804_v48, %v4522_v7 }
0x121d   :  { %v4569_v15 = vmul.f32 1.442695, %v4538_v5 }
0x121e   :  { %v4518_v53 = vpop.xlane.xlu1 %4517 }
0x121f   :  { %v4536_v35 = vsub.f32 %v12815_v60, %v4518_v53  ;;  %9710 = vpow2.f32 %v4569_v15 }
0x1221   :  { %v4565_v58 = vmul.f32 1.442695, %v4536_v35 }
0x1222   :  { %v4929_v50 = vpop.permute.xlu1 %4928 }
0x1223   :  { %9712 = vpow2.f32 %v4565_v58  ;;  %8865 = vmatmul.mubr.msk.bf16.gmra.mxu1 %vm769_vm1, %v4929_v50 }
0x1224   :  { %9714 = vpow2.f32 %v4567_v0  ;;  %v5533_v0 = vpop.permute.xlu0 %5532 }
0x1225   :  { %v5578_v7 = vsel %vm769_vm1, %v5533_v0, 0 }
0x1226   :  { %v5224_v41 = vpop.permute.xlu1 %5223 }
0x1228   :  { %v5529_v58 = vpop.permute.xlu0 %5528 }
0x122a   :  { %v5228_v28 = vpop.permute.xlu1 %5227 }
0x122c   :  { %v12906_v37 = vpop.eup %9710 }
0x122d   :  { %14554 = vst [vmem:[#allocation58_spill] sm:$0xff] %v12906_v37 }
0x122e   :  { %v5232_v48 = vpop.permute.xlu1 %5231 }
0x1230   :  { %v12908_v5 = vpop.eup %9712 }
0x1231   :  { %14555 = vst [vmem:[#allocation60_spill] sm:$0xff] %v12908_v5  ;;  %v12910_v14 = vpop.eup %9714  ;;  %v4767_v33 = vpack.c.bf16 %v12908_v5, %v12904_v26 }
0x1232   :  { %14556 = vst [vmem:[#allocation62_spill] sm:$0xff] %v12910_v14  ;;  %v5236_v15 = vpop.permute.xlu1 %5235  ;;  %v4768_v60 = vpack.c.bf16 %v12906_v37, %v12910_v14 }
0x1233   :  { %8832 = vmatprep.mubr.bf16.mxu0 %v4767_v33 }
0x1234   :  { %8833 = vmatmul.mubr.bf16.gmra.mxu0 %v4768_v60 }
0x1235   :  { %8870 = vmatprep.mubr.msk.bf16.mxu0 %vm769_vm1, %v5222_v19 }
0x1236   :  { %v5535_v50 = vpop.permute.xlu1 %5534 }
0x1237   :  { %9243 = vmatprep.subr.msk.bf16.mxu1 %vm769_vm1, %v5535_v50  ;;  %v5581_v53 = vsel %vm769_vm1, %v5535_v50, 0 }
0x1238   :  { %8921 = vmatpush3.bf16.xpose.msra.mxu1 %v5581_v53 }
0x1239   :  { %9244 = vmatprep.subr.msk.bf16.mxu1 %vm769_vm1, %v5533_v0 }
0x123a   :  { %v5531_v46 = vpop.permute.xlu1 %5530 }
0x123b   :  { %v5575_v35 = vsel %vm769_vm1, %v5531_v46, 0 }
0x123c   :  { %8871 = vmatmul.mubr.msk.bf16.vlgmr.msra.gmra.mxu0 %vm769_vm1, %v5224_v41 }
0x123d   :  { %8874 = vmatprep.mubr.msk.bf16.mxu0 %vm769_vm1, %v5226_v30  ;;  %v5572_v30 = vsel %vm769_vm1, %v5529_v58, 0 }
0x123e   :  { %v5527_v2 = vpop.permute.xlu1 %5526 }
0x1240   :  { %8923 = vmatpush3.bf16.xpose.msra.mxu1 %v5578_v7 }
0x1241   :  { %9245 = vmatprep.subr.msk.bf16.mxu1 %vm769_vm1, %v5531_v46 }
0x1242   :  { %v5525_v19 = vpop.permute.xlu1 %5524 }
0x1243   :  { %v5566_v41 = vsel %vm769_vm1, %v5525_v19, 0 }
0x1244   :  { %8875 = vmatmul.mubr.msk.bf16.gmra.mxu0 %vm769_vm1, %v5228_v28  ;;  %v5523_v28 = vpop.permute.xlu0 %5522 }
0x1245   :  { %8878 = vmatprep.mubr.msk.bf16.mxu0 %vm769_vm1, %v5230_v11  ;;  %v5569_v11 = vsel %vm769_vm1, %v5527_v2, 0 }
0x1246   :  { %v5507_v8 = vpop.permute.xlu1 %5506 }
0x1247   :  { %8934 = vmatprep.mubr.msk.bf16.mxu1 %vm769_vm1, %v5507_v8 }
0x1248   :  { %8925 = vmatpush3.bf16.xpose.msra.mxu1 %v5575_v35 }
0x1249   :  { %9246 = vmatprep.subr.msk.bf16.mxu1 %vm769_vm1, %v5529_v58 }
0x124c   :  { %8879 = vmatmul.mubr.msk.bf16.gmra.mxu0 %vm769_vm1, %v5232_v48 }
0x124d   :  { %8882 = vmatprep.mubr.msk.bf16.mxu0 %vm769_vm1, %v5234_v62  ;;  %v5563_v62 = vsel %vm769_vm1, %v5523_v28, 0 }
0x1250   :  { %8927 = vmatpush3.bf16.xpose.msra.mxu1 %v5572_v30 }
0x1251   :  { %9247 = vmatprep.subr.msk.bf16.mxu1 %vm769_vm1, %v5527_v2 }
0x1254   :  { %8883 = vmatmul.mubr.msk.bf16.gmra.mxu0 %vm769_vm1, %v5236_v15 }
0x1258   :  { %8929 = vmatpush3.bf16.xpose.msra.mxu1 %v5569_v11 }
0x1259   :  { %9248 = vmatprep.subr.msk.bf16.mxu1 %vm769_vm1, %v5525_v19 }
0x1260   :  { %8931 = vmatpush3.bf16.xpose.msra.mxu1 %v5566_v41 }
0x1261   :  { %9249 = vmatprep.subr.msk.bf16.mxu1 %vm769_vm1, %v5523_v28 }
0x1268   :  { %8933 = vmatpush3.bf16.xpose.msra.mxu1 %v5563_v62 }
0x1299   :  { %v12982_v41 = vpop.f32.mrf.mxu0 }
0x129a   :  { %14557 = vst [vmem:[#allocation31_spill] sm:$0xff] %v12982_v41 }
0x12a8   :  { %v8854_v48 = vpop.f32.mrf.mxu1 }
0x12a9   :  { %v12940_v33 = vadd.f32 %v12649_v9, %v8854_v48 }
0x12aa   :  { %v5028_v60 = vpop.f32.mrf.mxu1 }
0x12ab   :  { %v12943_v15 = vadd.f32 %v12657_v54, %v5028_v60  ;;  %5095 = vmax.xlane.f32.xlu0 %v12940_v33 }
0x12ac   :  { %v8855_v50 = vpop.f32.mrf.mxu1 }
0x12ad   :  { %v12947_v53 = vadd.f32 %v12666_v1, %v8855_v50  ;;  %5091 = vmax.xlane.f32.xlu1 %v12943_v15 }
0x12ae   :  { %v5031_v0 = vpop.f32.mrf.mxu1 }
0x12af   :  { %5097 = vmax.xlane.f32.xlu0 %v12947_v53  ;;  %v12952_v2 = vadd.f32 %v12676_v10, %v5031_v0 }
0x12b0   :  { %v8858_v46 = vpop.f32.mrf.mxu1 }
0x12b1   :  { %v12956_v7 = vadd.f32 %v12685_v59, %v8858_v46 }
0x12b2   :  { %v5044_v9 = vpop.f32.mrf.mxu1 }
0x12b3   :  { %5093 = vmax.xlane.f32.xlu0 %v12952_v2  ;;  %v12960_v8 = vadd.f32 %v12694_v3, %v5044_v9 }
0x12b4   :  { %v8859_v54 = vpop.f32.mrf.mxu1 }
0x12b5   :  { %v12964_v10 = vadd.f32 %v12703_v18, %v8859_v54 }
0x12b6   :  { %v5047_v19 = vpop.f32.mrf.mxu1 }
0x12b7   :  { %5103 = vmax.xlane.f32.xlu0 %v12956_v7  ;;  %v12971_v59 = vadd.f32 %v12720_v25, %v5047_v19  ;;  %v12988_v25 = vpop.f32.mrf.mxu0 }
0x12b8   :  { %v8862_v1 = vpop.f32.mrf.mxu1  ;;  %14558 = vst [vmem:[#allocation32_spill] sm:$0xff] %v12988_v25 }
0x12b9   :  { %v12976_v3 = vadd.f32 %v12738_v4, %v8862_v1  ;;  %v12991_v28 = vpop.f32.mrf.mxu0 }
0x12ba   :  { %v5060_v35 = vpop.f32.mrf.mxu1  ;;  %14559 = vst [vmem:[#allocation33_spill] sm:$0xff] %v12991_v28 }
0x12bb   :  { %5099 = vmax.xlane.f32.xlu0 %v12960_v8  ;;  %v12980_v18 = vadd.f32 %v12748_v47, %v5060_v35  ;;  %v12993_v4 = vpop.f32.mrf.mxu0 }
0x12bc   :  { %v8863_v58 = vpop.f32.mrf.mxu1  ;;  %14560 = vst [vmem:[#allocation34_spill] sm:$0xff] %v12993_v4 }
0x12bd   :  { %v12995_v62 = vpop.f32.mrf.mxu0 }
0x12be   :  { %v5063_v30 = vpop.f32.mrf.mxu1  ;;  %14561 = vst [vmem:[#allocation64_spill] sm:$0xff] %v12995_v62 }
0x12bf   :  { %v12967_v11 = vadd.f32 %v12711_v12, %v5063_v30  ;;  %5105 = vmax.xlane.f32.xlu0 %v12964_v10  ;;  %v12986_v12 = vadd.f32 %v12757_v23, %v8863_v58  ;;  %v12997_v48 = vpop.f32.mrf.mxu0 }
0x12c0   :  { %14562 = vst [vmem:[#allocation38_spill] sm:$0xff] %v12997_v48 }
0x12c1   :  { %5109 = vmax.xlane.f32.xlu1 %v12967_v11  ;;  %v12999_v47 = vpop.f32.mrf.mxu0 }
0x12c2   :  { %14563 = vst [vmem:[#allocation63_spill] sm:$0xff] %v12999_v47 }
0x12c3   :  { %5101 = vmax.xlane.f32.xlu0 %v12971_v59  ;;  %v13001_v50 = vpop.f32.mrf.mxu0 }
0x12c4   :  { %14564 = vst [vmem:[#allocation36_spill] sm:$0xff] %v13001_v50 }
0x12c5   :  { %v13006_v46 = vpop.f32.mrf.mxu0 }
0x12c6   :  { %14565 = vst [vmem:[#allocation37_spill] sm:$0xff] %v13006_v46 }
0x12c7   :  { %5111 = vmax.xlane.f32.xlu0 %v12976_v3  ;;  %v13013_v54 = vpop.f32.mrf.mxu0 }
0x12c8   :  { %14566 = vst [vmem:[#allocation35_spill] sm:$0xff] %v13013_v54 }
0x12c9   :  { %v13015_v19 = vpop.f32.mrf.mxu0 }
0x12ca   :  { %14567 = vst [vmem:[#allocation42_spill] sm:$0xff] %v13015_v19 }
0x12cb   :  { %5107 = vmax.xlane.f32.xlu0 %v12980_v18  ;;  %v13017_v1 = vpop.f32.mrf.mxu0 }
0x12cc   :  { %14568 = vst [vmem:[#allocation65_spill] sm:$0xff] %v13017_v1 }
0x12cf   :  { %5113 = vmax.xlane.f32.xlu0 %v12986_v12 }
0x12e3   :  { %v8866_v60 = vpop.f32.mrf.mxu1 }
0x12e4   :  { %v13004_v23 = vadd.f32 %v12729_v42, %v8866_v60 }
0x12e5   :  { %v5076_v0 = vpop.f32.mrf.mxu1 }
0x12e6   :  { %v13009_v9 = vadd.f32 %v12766_v51, %v5076_v0  ;;  %5119 = vmax.xlane.f32.xlu1 %v13004_v23 }
0x12e7   :  { %v8867_v37 = vpop.f32.mrf.mxu1 }
0x12e8   :  { %5115 = vmax.xlane.f32.xlu0 %v13009_v9 }
0x12f4   :  { %v13019_v35 = vpop.f32.mrf.mxu0 }
0x12f5   :  { %14569 = vst [vmem:[#allocation40_spill] sm:$0xff] %v13019_v35 }
0x12f6   :  { %v13021_v42 = vpop.f32.mrf.mxu0 }
0x12f7   :  { %14570 = vst [vmem:[#allocation41_spill] sm:$0xff] %v13021_v42  ;;  %5510 = vrot.lane.b32.xlu1 %v12606_v39, %s10080_s30 }
0x12f8   :  { %v13025_v58 = vpop.f32.mrf.mxu0 }
0x12f9   :  { %14571 = vst [vmem:[#allocation39_spill] sm:$0xff] %v13025_v58 }
0x12fa   :  { %v13027_v51 = vpop.f32.mrf.mxu0 }
0x12fb   :  { %14572 = vst [vmem:[#allocation66_spill] sm:$0xff] %v13027_v51  ;;  %5512 = vrot.lane.b32.xlu1 %v12490_v61, %s10080_s30 }
0x12fc   :  { %v8872_v30 = vpop.f32.mrf.mxu0 }
0x12fe   :  { %5508 = vrot.lane.b32.xlu0 %v12480_v6, %s10080_s30  ;;  %v5298_v60 = vpop.f32.mrf.mxu0 }
0x12ff   :  { %5514 = vrot.lane.b32.xlu1 %v12616_v44, %s10080_s30 }
0x1300   :  { %v8873_v0 = vpop.f32.mrf.mxu0 }
0x1302   :  { %5813 = vrot.lane.b32.xlu0 %v12533_v40, %s14573_s29  ;;  %v5301_v1 = vpop.f32.mrf.mxu0 }
0x1303   :  { %5516 = vrot.lane.b32.xlu1 %v12494_v24, %s10080_s30 }
0x1304   :  { %v8876_v54 = vpop.f32.mrf.mxu0 }
0x1306   :  { %5817 = vrot.lane.b32.xlu0 %v12539_v27, %s14573_s29  ;;  %v5314_v48 = vpop.f32.mrf.mxu0 }
0x1307   :  { %5518 = vrot.lane.b32.xlu1 %v12626_v32, %s10080_s30 }
0x1308   :  { %v8877_v50 = vpop.f32.mrf.mxu0 }
0x1309   :  { %v5372_v26 = vpack.c.bf16 %v8877_v50, %v8876_v54 }
0x130a   :  { %5821 = vrot.lane.b32.xlu0 %v12529_v49, %s14573_s29  ;;  %v5317_v4 = vpop.f32.mrf.mxu0 }
0x130c   :  { %v8880_v25 = vpop.f32.mrf.mxu0 }
0x130e   :  { %5825 = vrot.lane.b32.xlu0 %v12508_v13, %s14573_s29  ;;  %v5330_v51 = vpop.f32.mrf.mxu0 }
0x1310   :  { %v8881_v42 = vpop.f32.mrf.mxu0 }
0x1311   :  { %v5374_v41 = vpack.c.bf16 %v8881_v42, %v8880_v25  ;;  %v5370_v25 = vpack.c.bf16 %v8873_v0, %v8872_v30 }
0x1312   :  { %6128 = vrot.lane.b32.xlu0 %v12500_v55, %s14574_s1  ;;  %v5333_v58 = vpop.f32.mrf.mxu0 }
0x1313   :  { %v5373_v14 = vpack.c.bf16 %v5333_v58, %v5330_v51 }
0x1314   :  { %v8884_v35 = vpop.f32.mrf.mxu0 }
0x1316   :  { %6124 = vrot.lane.b32.xlu0 %v12516_v36, %s14574_s1  ;;  %v5346_v19 = vpop.f32.mrf.mxu0 }
0x1318   :  { %v8885_v46 = vpop.f32.mrf.mxu0 }
0x1319   :  { %v5376_v47 = vpack.c.bf16 %v8885_v46, %v8884_v35  ;;  %v13056_v46 = vadd.f32 %v12801_v43, %v8867_v37 }
0x131a   :  { %6120 = vrot.lane.b32.xlu0 %v12512_v45, %s14574_s1  ;;  %v5349_v62 = vpop.f32.mrf.mxu0 }
0x131b   :  { %v5375_v28 = vpack.c.bf16 %v5349_v62, %v5346_v19  ;;  %8886 = vmatprep.subr.bf16.mxu0 %v5376_v47  ;;  %v5079_v62 = vpop.f32.mrf.mxu1  ;;  %v5371_v19 = vpack.c.bf16 %v5317_v4, %v5314_v48 }
0x131c   :  { %8887 = vmatpush3.bf16.msra.mxu0 %v5376_v47  ;;  %v13060_v47 = vadd.f32 %v12812_v29, %v5079_v62 }
0x131d   :  { %8888 = vmatprep.subr.bf16.mxu0 %v5375_v28 }
0x131e   :  { %6114 = vrot.lane.b32.xlu0 %v12533_v40, %s14574_s1 }
0x1320   :  { %8889 = vmatpush3.bf16.msra.mxu0 %v5375_v28 }
0x1321   :  { %8890 = vmatprep.subr.bf16.mxu0 %v5374_v41 }
0x1324   :  { %8891 = vmatpush3.bf16.msra.mxu0 %v5374_v41  ;;  %v5369_v41 = vpack.c.bf16 %v5301_v1, %v5298_v60 }
0x1325   :  { %8892 = vmatprep.subr.bf16.mxu0 %v5373_v14 }
0x1328   :  { %8893 = vmatpush3.bf16.msra.mxu0 %v5373_v14 }
0x1329   :  { %8894 = vmatprep.subr.bf16.mxu0 %v5372_v26 }
0x132b   :  { %5121 = vmax.xlane.f32.xlu1 %v13056_v46 }
0x132c   :  { %8895 = vmatpush3.bf16.msra.mxu0 %v5372_v26 }
0x132d   :  { %8896 = vmatprep.subr.bf16.mxu0 %v5371_v19 }
0x132f   :  { %5117 = vmax.xlane.f32.xlu1 %v13060_v47 }
0x1330   :  { %8897 = vmatpush3.bf16.msra.mxu0 %v5371_v19 }
0x1331   :  { %8898 = vmatprep.subr.bf16.mxu0 %v5370_v25 }
0x1334   :  { %8899 = vmatpush3.bf16.msra.mxu0 %v5370_v25  ;;  %v5096_v14 = vpop.xlane.xlu0 %5095 }
0x1335   :  { %8900 = vmatprep.subr.bf16.mxu0 %v5369_v41  ;;  %v5125_v29 = vsub.f32 %v12940_v33, %v5096_v14 }
0x1336   :  { %v5092_v43 = vpop.xlane.xlu1 %5091 }
0x1337   :  { %v5123_v37 = vsub.f32 %v12943_v15, %v5092_v43  ;;  %v5143_v35 = vmul.f32 1.442695, %v5125_v29 }
0x1338   :  { %8901 = vmatpush3.bf16.msra.mxu0 %v5369_v41  ;;  %v5098_v28 = vpop.xlane.xlu0 %5097 }
0x1339   :  { %v5126_v26 = vsub.f32 %v12947_v53, %v5098_v28  ;;  %v5139_v4 = vmul.f32 1.442695, %v5123_v37  ;;  %v7826_v28 = vld [vmem:[%s14255_s9 + $0x18] sm:$0xf] }
0x133a   :  { %9250 = vmatprep.subr.msk.bf16.mxu0 %vm1084_vm2, %v7826_v28 }
0x133b   :  { %v5145_v48 = vmul.f32 1.442695, %v5126_v26  ;;  %9716 = vpow2.f32 %v5139_v4  ;;  %v5854_v26 = vsel %vm1084_vm2, %v7826_v28, 0 }
0x133c   :  { %v5094_v50 = vpop.xlane.xlu0 %5093 }
0x133d   :  { %v5124_v54 = vsub.f32 %v12952_v2, %v5094_v50  ;;  %9718 = vpow2.f32 %v5145_v48 }
0x133f   :  { %v5141_v1 = vmul.f32 1.442695, %v5124_v54 }
0x1340   :  { %5520 = vrot.lane.b32.xlu1 %v12504_v20, %s10080_s30  ;;  %v5104_v42 = vpop.xlane.xlu0 %5103 }
0x1341   :  { %9720 = vpow2.f32 %v5141_v1  ;;  %v5129_v58 = vsub.f32 %v12956_v7, %v5104_v42 }
0x1342   :  { %9722 = vpow2.f32 %v5143_v35 }
0x1343   :  { %v5151_v41 = vmul.f32 1.442695, %v5129_v58 }
0x1344   :  { %5815 = vrot.lane.b32.xlu1 %v12478_v52, %s14573_s29  ;;  %v5100_v15 = vpop.xlane.xlu0 %5099 }
0x1345   :  { %v5127_v33 = vsub.f32 %v12960_v8, %v5100_v15 }
0x1347   :  { %v5147_v51 = vmul.f32 1.442695, %v5127_v33 }
0x1348   :  { %5819 = vrot.lane.b32.xlu1 %v12512_v45, %s14573_s29  ;;  %v5106_v53 = vpop.xlane.xlu0 %5105  ;;  %v13076_v30 = vpop.eup %9716 }
0x1349   :  { %v5130_v2 = vsub.f32 %v12964_v10, %v5106_v53  ;;  %14575 = vst [vmem:[#allocation68_spill] sm:$0xff] %v13076_v30  ;;  %9724 = vpow2.f32 %v5147_v51 }
0x134a   :  { %v13080_v62 = vpop.eup %9718  ;;  %v5110_v19 = vpop.xlane.xlu1 %5109 }
0x134b   :  { %v5153_v60 = vmul.f32 1.442695, %v5130_v2  ;;  %14576 = vst [vmem:[#allocation67_spill] sm:$0xff] %v13080_v62  ;;  %v5132_v37 = vsub.f32 %v12967_v11, %v5110_v19 }
0x134c   :  { %5823 = vrot.lane.b32.xlu1 %v12516_v36, %s14573_s29  ;;  %v5102_v0 = vpop.xlane.xlu0 %5101 }
0x134d   :  { %v5128_v8 = vsub.f32 %v12971_v59, %v5102_v0  ;;  %9726 = vpow2.f32 %v5153_v60  ;;  %v5157_v29 = vmul.f32 1.442695, %v5132_v37 }
0x134e   :  { %v13083_v25 = vpop.eup %9720 }
0x134f   :  { %14577 = vst [vmem:[#allocation69_spill] sm:$0xff] %v13083_v25  ;;  %v13085_v14 = vpop.eup %9722  ;;  %v5149_v7 = vmul.f32 1.442695, %v5128_v8  ;;  %v5361_v10 = vpack.c.bf16 %v13083_v25, %v13076_v30 }
0x1350   :  { %v5362_v43 = vpack.c.bf16 %v13080_v62, %v13085_v14  ;;  %5827 = vrot.lane.b32.xlu1 %v12500_v55, %s14573_s29  ;;  %v5112_v59 = vpop.xlane.xlu0 %5111 }
0x1351   :  { %9728 = vpow2.f32 %v5149_v7  ;;  %8902 = vmatprep.mubr.bf16.mxu0 %v5361_v10  ;;  %v5133_v11 = vsub.f32 %v12976_v3, %v5112_v59 }
0x1352   :  { %9730 = vpow2.f32 %v5151_v41  ;;  %8903 = vmatmul.mubr.bf16.vlgmr.msra.gmra.mxu0 %v5362_v43 }
0x1353   :  { %8951 = vmatpush3.bf16.msra.mxu0 %v5854_v26  ;;  %9732 = vpow2.f32 %v5157_v29  ;;  %v5159_v54 = vmul.f32 1.442695, %v5133_v11 }
0x1354   :  { %6126 = vrot.lane.b32.xlu1 %v12508_v13, %s14574_s1  ;;  %v5108_v4 = vpop.xlane.xlu0 %5107 }
0x1355   :  { %v5131_v48 = vsub.f32 %v12980_v18, %v5108_v4 }
0x1356   :  { %v13106_v15 = vpop.eup %9724 }
0x1357   :  { %v5155_v50 = vmul.f32 1.442695, %v5131_v48  ;;  %14578 = vst [vmem:[#allocation70_spill] sm:$0xff] %v13106_v15 }
0x1358   :  { %6122 = vrot.lane.b32.xlu1 %v12529_v49, %s14574_s1  ;;  %v5114_v35 = vpop.xlane.xlu0 %5113 }
0x1359   :  { %9734 = vpow2.f32 %v5155_v50  ;;  %v5134_v1 = vsub.f32 %v12986_v12, %v5114_v35 }
0x135a   :  { %9736 = vpow2.f32 %v5159_v54  ;;  %v13110_v3 = vpop.eup %9726 }
0x135b   :  { %v5161_v42 = vmul.f32 1.442695, %v5134_v1  ;;  %14579 = vst [vmem:[#allocation6_spill] sm:$0xff] %v13110_v3 }
0x135c   :  { %6118 = vrot.lane.b32.xlu1 %v12539_v27, %s14574_s1 }
0x135d   :  { %9738 = vpow2.f32 %v5161_v42 }
0x135e   :  { %v13112_v18 = vpop.eup %9728 }
0x135f   :  { %14580 = vst [vmem:[#allocation71_spill] sm:$0xff] %v13112_v18  ;;  %v13114_v33 = vpop.eup %9730  ;;  %v5363_v53 = vpack.c.bf16 %v13112_v18, %v13106_v15 }
0x1360   :  { %14581 = vst [vmem:[#allocation78_spill] sm:$0xff] %v13114_v33  ;;  %6116 = vrot.lane.b32.xlu1 %v12478_v52, %s14574_s1  ;;  %v5364_v12 = vpack.c.bf16 %v13110_v3, %v13114_v33  ;;  %v13124_v2 = vpop.eup %9732 }
0x1361   :  { %8906 = vmatprep.mubr.bf16.mxu0 %v5363_v53  ;;  %14583 = vst [vmem:[#allocation5_spill] sm:$0xff] %v13124_v2 }
0x1362   :  { %8907 = vmatmul.mubr.bf16.gmra.mxu0 %v5364_v12 }
0x1364   :  { %6098 = vrot.lane.b32.xlu1 %v12482_v31, %s14582_s23 }
0x1366   :  { %v13126_v58 = vpop.eup %9734 }
0x1367   :  { %14584 = vst [vmem:[#allocation72_spill] sm:$0xff] %v13126_v58  ;;  %v5365_v51 = vpack.c.bf16 %v13124_v2, %v13126_v58  ;;  %v13130_v60 = vpop.eup %9736 }
0x1368   :  { %14585 = vst [vmem:[#allocation8_spill] sm:$0xff] %v13130_v60 }
0x1369   :  { %8910 = vmatprep.mubr.bf16.mxu0 %v5365_v51 }
0x136a   :  { %v13132_v0 = vpop.eup %9738 }
0x136b   :  { %14586 = vst [vmem:[#allocation79_spill] sm:$0xff] %v13132_v0  ;;  %v5366_v19 = vpack.c.bf16 %v13132_v0, %v13130_v60 }
0x136d   :  { %8911 = vmatmul.mubr.bf16.gmra.mxu0 %v5366_v19 }
0x136f   :  { %v5120_v8 = vpop.xlane.xlu1 %5119 }
0x1370   :  { %v5137_v1 = vsub.f32 %v13004_v23, %v5120_v8 }
0x1371   :  { %v5116_v41 = vpop.xlane.xlu0 %5115 }
0x1372   :  { %v5135_v50 = vsub.f32 %v13009_v9, %v5116_v41  ;;  %v5167_v19 = vmul.f32 1.442695, %v5137_v1 }
0x1373   :  { %v5511_v7 = vpop.permute.xlu1 %5510 }
0x1374   :  { %v5163_v42 = vmul.f32 1.442695, %v5135_v50 }
0x1375   :  { %v5509_v31 = vpop.permute.xlu0 %5508 }
0x1376   :  { %8935 = vmatmul.mubr.msk.bf16.vlgmr.msra.gmra.mxu1 %vm769_vm1, %v5509_v31  ;;  %9740 = vpow2.f32 %v5163_v42 }
0x1377   :  { %v5513_v10 = vpop.permute.xlu1 %5512  ;;  %8938 = vmatprep.mubr.msk.bf16.mxu1 %vm769_vm1, %v5511_v7 }
0x1379   :  { %v5814_v43 = vpop.permute.xlu0 %5813 }
0x137b   :  { %v5515_v37 = vpop.permute.xlu1 %5514 }
0x137d   :  { %v5818_v59 = vpop.permute.xlu0 %5817 }
0x137e   :  { %8939 = vmatmul.mubr.msk.bf16.gmra.mxu1 %vm769_vm1, %v5513_v10 }
0x137f   :  { %8942 = vmatprep.mubr.msk.bf16.mxu1 %vm769_vm1, %v5515_v37  ;;  %v5517_v28 = vpop.permute.xlu1 %5516 }
0x1381   :  { %v5822_v26 = vpop.permute.xlu0 %5821 }
0x1383   :  { %v5519_v11 = vpop.permute.xlu1 %5518  ;;  %v13149_v10 = vpop.eup %9740 }
0x1384   :  { %14587 = vst [vmem:[#allocation80_spill] sm:$0xff] %v13149_v10 }
0x1385   :  { %v5826_v29 = vpop.permute.xlu0 %5825 }
0x1386   :  { %8943 = vmatmul.mubr.msk.bf16.gmra.mxu1 %vm769_vm1, %v5517_v28 }
0x1387   :  { %8946 = vmatprep.mubr.msk.bf16.mxu1 %vm769_vm1, %v5519_v11 }
0x1389   :  { %v6129_v4 = vpop.permute.xlu0 %6128 }
0x138a   :  { %9251 = vmatprep.subr.msk.bf16.mxu1 %vm769_vm1, %v6129_v4  ;;  %v6176_v48 = vsel %vm769_vm1, %v6129_v4, 0 }
0x138b   :  { %9001 = vmatpush3.bf16.xpose.msra.mxu1 %v6176_v48 }
0x138d   :  { %v6125_v50 = vpop.permute.xlu0 %6124 }
0x138e   :  { %v6170_v1 = vsel %vm769_vm1, %v6125_v50, 0 }
0x13b4   :  { %v5122_v54 = vpop.xlane.xlu1 %5121 }
0x13b5   :  { %v5138_v35 = vsub.f32 %v13056_v46, %v5122_v54 }
0x13b7   :  { %v5169_v53 = vmul.f32 1.442695, %v5138_v35 }
0x13b8   :  { %v5118_v12 = vpop.xlane.xlu1 %5117 }
0x13b9   :  { %v5136_v51 = vsub.f32 %v13060_v47, %v5118_v12  ;;  %9742 = vpow2.f32 %v5169_v53  ;;  %v6121_v12 = vpop.permute.xlu0 %6120 }
0x13bb   :  { %v5165_v7 = vmul.f32 1.442695, %v5136_v51 }
0x13bc   :  { %v5521_v31 = vpop.permute.xlu1 %5520 }
0x13bd   :  { %9744 = vpow2.f32 %v5165_v7  ;;  %8947 = vmatmul.mubr.msk.bf16.gmra.mxu1 %vm769_vm1, %v5521_v31  ;;  %v13187_v31 = vld [vmem:[%s14250_s4 + $0x10] sm:$0xff] }
0x13be   :  { %9746 = vpow2.f32 %v5167_v19  ;;  %v6115_v19 = vpop.permute.xlu0 %6114 }
0x13c0   :  { %v5816_v9 = vpop.permute.xlu1 %5815 }
0x13c4   :  { %v5820_v41 = vpop.permute.xlu1 %5819 }
0x13c6   :  { %v13151_v23 = vpop.eup %9742 }
0x13c7   :  { %14588 = vst [vmem:[#allocation7_spill] sm:$0xff] %v13151_v23 }
0x13c8   :  { %v5824_v46 = vpop.permute.xlu1 %5823 }
0x13ca   :  { %v13153_v8 = vpop.eup %9744 }
0x13cb   :  { %14589 = vst [vmem:[#allocation81_spill] sm:$0xff] %v13153_v8  ;;  %v13155_v37 = vpop.eup %9746  ;;  %v5367_v47 = vpack.c.bf16 %v13153_v8, %v13149_v10  ;;  %v13277_v10 = vld [vmem:[%s14250_s4 + $0x40] sm:$0xff] }
0x13cc   :  { %14590 = vst [vmem:[#allocation73_spill] sm:$0xff] %v13155_v37  ;;  %v5828_v28 = vpop.permute.xlu1 %5827  ;;  %v5368_v11 = vpack.c.bf16 %v13151_v23, %v13155_v37  ;;  %v13286_v23 = vld [vmem:[%s14250_s4 + $0x58] sm:$0xff] }
0x13cd   :  { %8914 = vmatprep.mubr.bf16.mxu0 %v5367_v47 }
0x13ce   :  { %8915 = vmatmul.mubr.bf16.gmra.mxu0 %v5368_v11  ;;  %v13204_v11 = vld [vmem:[%s14250_s4 + $0x18] sm:$0xff] }
0x13cf   :  { %8952 = vmatprep.mubr.msk.bf16.mxu0 %vm769_vm1, %v5814_v43 }
0x13d0   :  { %v6127_v4 = vpop.permute.xlu1 %6126 }
0x13d1   :  { %9252 = vmatprep.subr.msk.bf16.mxu1 %vm769_vm1, %v6127_v4  ;;  %v6173_v48 = vsel %vm769_vm1, %v6127_v4, 0 }
0x13d2   :  { %9003 = vmatpush3.bf16.xpose.msra.mxu1 %v6173_v48 }
0x13d3   :  { %9253 = vmatprep.subr.msk.bf16.mxu1 %vm769_vm1, %v6125_v50 }
0x13d4   :  { %v6123_v54 = vpop.permute.xlu1 %6122 }
0x13d5   :  { %v6167_v53 = vsel %vm769_vm1, %v6123_v54, 0 }
0x13d6   :  { %8953 = vmatmul.mubr.msk.bf16.vlgmr.msra.gmra.mxu0 %vm769_vm1, %v5816_v9 }
0x13d7   :  { %8956 = vmatprep.mubr.msk.bf16.mxu0 %vm769_vm1, %v5818_v59  ;;  %v6164_v59 = vsel %vm769_vm1, %v6121_v12, 0 }
0x13d8   :  { %v6119_v35 = vpop.permute.xlu1 %6118 }
0x13da   :  { %9005 = vmatpush3.bf16.xpose.msra.mxu1 %v6170_v1 }
0x13db   :  { %9254 = vmatprep.subr.msk.bf16.mxu1 %vm769_vm1, %v6123_v54  ;;  %v13214_v54 = vld [vmem:[%s14250_s4 + $0x8] sm:$0xff] }
0x13dc   :  { %v6117_v43 = vpop.permute.xlu1 %6116 }
0x13dd   :  { %v6158_v51 = vsel %vm769_vm1, %v6117_v43, 0 }
0x13de   :  { %8957 = vmatmul.mubr.msk.bf16.gmra.mxu0 %vm769_vm1, %v5820_v41 }
0x13df   :  { %8960 = vmatprep.mubr.msk.bf16.mxu0 %vm769_vm1, %v5822_v26  ;;  %v6161_v26 = vsel %vm769_vm1, %v6119_v35, 0 }
0x13e0   :  { %v6099_v42 = vpop.permute.xlu1 %6098 }
0x13e1   :  { %9016 = vmatprep.mubr.msk.bf16.mxu1 %vm769_vm1, %v6099_v42  ;;  %v13223_v42 = vld [vmem:[%s14250_s4 + $0x30] sm:$0xff] }
0x13e2   :  { %9007 = vmatpush3.bf16.xpose.msra.mxu1 %v6167_v53 }
0x13e3   :  { %9255 = vmatprep.subr.msk.bf16.mxu1 %vm769_vm1, %v6121_v12 }
0x13e6   :  { %8961 = vmatmul.mubr.msk.bf16.gmra.mxu0 %vm769_vm1, %v5824_v46  ;;  %v13195_v46 = vld [vmem:[%s14250_s4] sm:$0xff] }
0x13e7   :  { %8964 = vmatprep.mubr.msk.bf16.mxu0 %vm769_vm1, %v5826_v29  ;;  %v6155_v29 = vsel %vm769_vm1, %v6115_v19, 0 }
0x13ea   :  { %9009 = vmatpush3.bf16.xpose.msra.mxu1 %v6164_v59 }
0x13eb   :  { %9256 = vmatprep.subr.msk.bf16.mxu1 %vm769_vm1, %v6119_v35 }
0x13ee   :  { %8965 = vmatmul.mubr.msk.bf16.gmra.mxu0 %vm769_vm1, %v5828_v28 }
0x13f2   :  { %9011 = vmatpush3.bf16.xpose.msra.mxu1 %v6161_v26  ;;  %v13232_v26 = vld [vmem:[%s14250_s4 + $0x20] sm:$0xff] }
0x13f3   :  { %9257 = vmatprep.subr.msk.bf16.mxu1 %vm769_vm1, %v6117_v43 }
0x13fa   :  { %9013 = vmatpush3.bf16.xpose.msra.mxu1 %v6158_v51 }
0x13fb   :  { %9258 = vmatprep.subr.msk.bf16.mxu1 %vm769_vm1, %v6115_v19 }
0x1402   :  { %9015 = vmatpush3.bf16.xpose.msra.mxu1 %v6155_v29 }
0x1412   :  { %v13292_v37 = vpop.f32.mrf.mxu0 }
0x1413   :  { %14591 = vst [vmem:[#allocation9_spill] sm:$0xff] %v13292_v37 }
0x1414   :  { %v13294_v2 = vpop.f32.mrf.mxu0 }
0x1415   :  { %14592 = vst [vmem:[#allocation82_spill] sm:$0xff] %v13294_v2 }
0x1416   :  { %v13296_v58 = vpop.f32.mrf.mxu0 }
0x1417   :  { %14593 = vst [vmem:[#allocation10_spill] sm:$0xff] %v13296_v58 }
0x1436   :  { %v8936_v7 = vpop.f32.mrf.mxu1 }
0x1437   :  { %v13190_v9 = vadd.f32 %v13187_v31, %v8936_v7  ;;  %v13241_v7 = vld [vmem:[%s14250_s4 + $0x38] sm:$0xff] }
0x1438   :  { %v5620_v41 = vpop.f32.mrf.mxu1 }
0x1439   :  { %v13198_v47 = vadd.f32 %v13195_v46, %v5620_v41  ;;  %5687 = vmax.xlane.f32.xlu0 %v13190_v9 }
0x143a   :  { %v8937_v28 = vpop.f32.mrf.mxu1 }
0x143b   :  { %v13207_v4 = vadd.f32 %v13204_v11, %v8937_v28  ;;  %5683 = vmax.xlane.f32.xlu1 %v13198_v47 }
0x143c   :  { %v5623_v48 = vpop.f32.mrf.mxu1 }
0x143d   :  { %5689 = vmax.xlane.f32.xlu0 %v13207_v4  ;;  %v13217_v35 = vadd.f32 %v13214_v54, %v5623_v48  ;;  %v13249_v48 = vld [vmem:[%s14250_s4 + $0x48] sm:$0xff] }
0x143e   :  { %v8940_v50 = vpop.f32.mrf.mxu1 }
0x143f   :  { %v13226_v53 = vadd.f32 %v13223_v42, %v8940_v50 }
0x1440   :  { %v5636_v1 = vpop.f32.mrf.mxu1 }
0x1441   :  { %5685 = vmax.xlane.f32.xlu0 %v13217_v35  ;;  %v13235_v51 = vadd.f32 %v13232_v26, %v5636_v1  ;;  %v13258_v1 = vld [vmem:[%s14250_s4 + $0x28] sm:$0xff] }
0x1442   :  { %v8941_v43 = vpop.f32.mrf.mxu1 }
0x1443   :  { %v13244_v41 = vadd.f32 %v13241_v7, %v8941_v43  ;;  %v13268_v43 = vld [vmem:[%s14250_s4 + $0x50] sm:$0xff] }
0x1444   :  { %v5639_v12 = vpop.f32.mrf.mxu1 }
0x1445   :  { %5695 = vmax.xlane.f32.xlu0 %v13226_v53  ;;  %v13261_v8 = vadd.f32 %v13258_v1, %v5639_v12 }
0x1446   :  { %v8944_v59 = vpop.f32.mrf.mxu1 }
0x1448   :  { %v5652_v19 = vpop.f32.mrf.mxu1 }
0x1449   :  { %5691 = vmax.xlane.f32.xlu0 %v13235_v51  ;;  %v13280_v12 = vadd.f32 %v13277_v10, %v5652_v19  ;;  %v13298_v19 = vpop.f32.mrf.mxu0 }
0x144a   :  { %v8945_v29 = vpop.f32.mrf.mxu1  ;;  %14594 = vst [vmem:[#allocation11_spill] sm:$0xff] %v13298_v19 }
0x144b   :  { %v13300_v0 = vpop.f32.mrf.mxu0 }
0x144c   :  { %v5655_v28 = vpop.f32.mrf.mxu1  ;;  %14595 = vst [vmem:[#allocation12_spill] sm:$0xff] %v13300_v0 }
0x144d   :  { %v13252_v50 = vadd.f32 %v13249_v48, %v5655_v28  ;;  %5697 = vmax.xlane.f32.xlu0 %v13244_v41  ;;  %v13271_v28 = vadd.f32 %v13268_v43, %v8944_v59  ;;  %v13289_v59 = vadd.f32 %v13286_v23, %v8945_v29  ;;  %v13302_v60 = vpop.f32.mrf.mxu0  ;;  %v13311_v29 = vld [vmem:[%s14250_s4 + $0x70] sm:$0xff] }
0x144e   :  { %14596 = vst [vmem:[#allocation13_spill] sm:$0xff] %v13302_v60  ;;  %v13321_v60 = vld [vmem:[%s14250_s4 + $0x60] sm:$0xff] }
0x144f   :  { %5701 = vmax.xlane.f32.xlu1 %v13252_v50  ;;  %v13304_v18 = vpop.f32.mrf.mxu0 }
0x1450   :  { %14597 = vst [vmem:[#allocation14_spill] sm:$0xff] %v13304_v18 }
0x1451   :  { %5693 = vmax.xlane.f32.xlu0 %v13261_v8  ;;  %v13306_v3 = vpop.f32.mrf.mxu0 }
0x1452   :  { %14598 = vst [vmem:[#allocation15_spill] sm:$0xff] %v13306_v3 }
0x1453   :  { %v13316_v37 = vpop.f32.mrf.mxu0 }
0x1454   :  { %14599 = vst [vmem:[#allocation16_spill] sm:$0xff] %v13316_v37 }
0x1455   :  { %5703 = vmax.xlane.f32.xlu0 %v13271_v28  ;;  %v13328_v3 = vpop.f32.mrf.mxu0 }
0x1456   :  { %14600 = vst [vmem:[#allocation74_spill] sm:$0xff] %v13328_v3 }
0x1457   :  { %v13330_v18 = vpop.f32.mrf.mxu0 }
0x1458   :  { %14601 = vst [vmem:[#allocation43_spill] sm:$0xff] %v13330_v18 }
0x1459   :  { %5699 = vmax.xlane.f32.xlu0 %v13280_v12 }
0x145d   :  { %5705 = vmax.xlane.f32.xlu0 %v13289_v59 }
0x147d   :  { %v8948_v15 = vpop.f32.mrf.mxu1 }
0x147e   :  { %v13314_v2 = vadd.f32 %v13311_v29, %v8948_v15  ;;  %v13332_v15 = vpop.f32.mrf.mxu0 }
0x147f   :  { %v5668_v58 = vpop.f32.mrf.mxu1  ;;  %14602 = vst [vmem:[#allocation83_spill] sm:$0xff] %v13332_v15 }
0x1480   :  { %v13324_v19 = vadd.f32 %v13321_v60, %v5668_v58  ;;  %5711 = vmax.xlane.f32.xlu1 %v13314_v2 }
0x1481   :  { %v8949_v63 = vpop.f32.mrf.mxu1 }
0x1482   :  { %5707 = vmax.xlane.f32.xlu0 %v13324_v19 }
0x148e   :  { %v13334_v0 = vpop.f32.mrf.mxu0 }
0x148f   :  { %14603 = vst [vmem:[#allocation75_spill] sm:$0xff] %v13334_v0 }
0x1490   :  { %v13336_v37 = vpop.f32.mrf.mxu0 }
0x1491   :  { %14604 = vst [vmem:[#allocation44_spill] sm:$0xff] %v13336_v37  ;;  %6102 = vrot.lane.b32.xlu1 %v12606_v39, %s14582_s23 }
0x1492   :  { %v13340_v33 = vpop.f32.mrf.mxu0 }
0x1493   :  { %14605 = vst [vmem:[#allocation84_spill] sm:$0xff] %v13340_v33 }
0x1494   :  { %v13342_v58 = vpop.f32.mrf.mxu0 }
0x1495   :  { %14606 = vst [vmem:[#allocation76_spill] sm:$0xff] %v13342_v58  ;;  %6104 = vrot.lane.b32.xlu1 %v12490_v61, %s14582_s23 }
0x1496   :  { %v8954_v25 = vpop.f32.mrf.mxu0 }
0x1498   :  { %6100 = vrot.lane.b32.xlu0 %v12480_v6, %s14582_s23  ;;  %v5890_v3 = vpop.f32.mrf.mxu0 }
0x1499   :  { %6106 = vrot.lane.b32.xlu1 %v12616_v44, %s14582_s23 }
0x149a   :  { %v8955_v15 = vpop.f32.mrf.mxu0 }
0x149c   :  { %6405 = vrot.lane.b32.xlu0 %v12533_v40, %s14607_s2  ;;  %v5893_v39 = vpop.f32.mrf.mxu0 }
0x149d   :  { %6108 = vrot.lane.b32.xlu1 %v12494_v24, %s14582_s23 }
0x149e   :  { %v8958_v58 = vpop.f32.mrf.mxu0 }
0x14a0   :  { %6409 = vrot.lane.b32.xlu0 %v12539_v27, %s14607_s2  ;;  %v5906_v61 = vpop.f32.mrf.mxu0 }
0x14a1   :  { %6110 = vrot.lane.b32.xlu1 %v12626_v32, %s14582_s23 }
0x14a2   :  { %v8959_v6 = vpop.f32.mrf.mxu0 }
0x14a4   :  { %6413 = vrot.lane.b32.xlu0 %v12529_v49, %s14607_s2  ;;  %v5909_v44 = vpop.f32.mrf.mxu0 }
0x14a6   :  { %v8962_v37 = vpop.f32.mrf.mxu0 }
0x14a8   :  { %6417 = vrot.lane.b32.xlu0 %v12508_v13, %s14607_s2  ;;  %v5922_v40 = vpop.f32.mrf.mxu0  ;;  %v5964_v13 = vpack.c.bf16 %v8959_v6, %v8958_v58 }
0x14aa   :  { %v8963_v33 = vpop.f32.mrf.mxu0 }
0x14ab   :  { %v5966_v32 = vpack.c.bf16 %v8963_v33, %v8962_v37  ;;  %v13375_v37 = vld [vmem:[%s14250_s4 + $0x68] sm:$0xff] }
0x14ac   :  { %v5925_v24 = vpop.f32.mrf.mxu0 }
0x14ad   :  { %v5965_v49 = vpack.c.bf16 %v5925_v24, %v5922_v40 }
0x14ae   :  { %v8966_v0 = vpop.f32.mrf.mxu0 }
0x14b0   :  { %v5938_v18 = vpop.f32.mrf.mxu0 }
0x14b2   :  { %v8967_v30 = vpop.f32.mrf.mxu0 }
0x14b3   :  { %v5968_v27 = vpack.c.bf16 %v8967_v30, %v8966_v0  ;;  %v13368_v30 = vadd.f32 %v13365_v38, %v8949_v63 }
0x14b4   :  { %v5941_v62 = vpop.f32.mrf.mxu0 }
0x14b5   :  { %v5967_v5 = vpack.c.bf16 %v5941_v62, %v5938_v18  ;;  %8968 = vmatprep.subr.bf16.mxu0 %v5968_v27  ;;  %v5671_v62 = vpop.f32.mrf.mxu1 }
0x14b6   :  { %8969 = vmatpush3.bf16.msra.mxu0 %v5968_v27  ;;  %v13378_v58 = vadd.f32 %v13375_v37, %v5671_v62 }
0x14b7   :  { %8970 = vmatprep.subr.bf16.mxu0 %v5967_v5 }
0x14ba   :  { %8971 = vmatpush3.bf16.msra.mxu0 %v5967_v5  ;;  %v5963_v5 = vpack.c.bf16 %v5909_v44, %v5906_v61  ;;  %v5962_v61 = vpack.c.bf16 %v8955_v15, %v8954_v25 }
0x14bb   :  { %8972 = vmatprep.subr.bf16.mxu0 %v5966_v32 }
0x14be   :  { %8973 = vmatpush3.bf16.msra.mxu0 %v5966_v32  ;;  %v5961_v32 = vpack.c.bf16 %v5893_v39, %v5890_v3 }
0x14bf   :  { %8974 = vmatprep.subr.bf16.mxu0 %v5965_v49 }
0x14c2   :  { %8975 = vmatpush3.bf16.msra.mxu0 %v5965_v49  ;;  %v5688_v21 = vpop.xlane.xlu0 %5687 }
0x14c3   :  { %8976 = vmatprep.subr.bf16.mxu0 %v5964_v13  ;;  %v5717_v6 = vsub.f32 %v13190_v9, %v5688_v21 }
0x14c4   :  { %v5684_v18 = vpop.xlane.xlu1 %5683 }
0x14c5   :  { %v5715_v33 = vsub.f32 %v13198_v47, %v5684_v18  ;;  %5713 = vmax.xlane.f32.xlu1 %v13368_v30  ;;  %v5735_v27 = vmul.f32 1.442695, %v5717_v6 }
0x14c6   :  { %8977 = vmatpush3.bf16.msra.mxu0 %v5964_v13  ;;  %v5690_v0 = vpop.xlane.xlu0 %5689 }
0x14c7   :  { %v5718_v63 = vsub.f32 %v13207_v4, %v5690_v0  ;;  %8978 = vmatprep.subr.bf16.mxu0 %v5963_v5  ;;  %v5731_v44 = vmul.f32 1.442695, %v5715_v33 }
0x14c9   :  { %5709 = vmax.xlane.f32.xlu1 %v13378_v58  ;;  %v5737_v47 = vmul.f32 1.442695, %v5718_v63  ;;  %9748 = vpow2.f32 %v5731_v44 }
0x14ca   :  { %8979 = vmatpush3.bf16.msra.mxu0 %v5963_v5  ;;  %v5686_v40 = vpop.xlane.xlu0 %5685 }
0x14cb   :  { %v5716_v24 = vsub.f32 %v13217_v35, %v5686_v40  ;;  %8980 = vmatprep.subr.bf16.mxu0 %v5962_v61  ;;  %9750 = vpow2.f32 %v5737_v47 }
0x14cd   :  { %v5733_v49 = vmul.f32 1.442695, %v5716_v24 }
0x14ce   :  { %8981 = vmatpush3.bf16.msra.mxu0 %v5962_v61  ;;  %v5696_v4 = vpop.xlane.xlu0 %5695 }
0x14cf   :  { %9752 = vpow2.f32 %v5733_v49  ;;  %8982 = vmatprep.subr.bf16.mxu0 %v5961_v32  ;;  %v5721_v35 = vsub.f32 %v13226_v53, %v5696_v4 }
0x14d0   :  { %9754 = vpow2.f32 %v5735_v27 }
0x14d2   :  { %8983 = vmatpush3.bf16.msra.mxu0 %v5961_v32  ;;  %v5692_v21 = vpop.xlane.xlu0 %5691 }
0x14d3   :  { %v5719_v25 = vsub.f32 %v13235_v51, %v5692_v21  ;;  %v5743_v51 = vmul.f32 1.442695, %v5721_v35 }
0x14d5   :  { %v5739_v13 = vmul.f32 1.442695, %v5719_v25 }
0x14d6   :  { %v5698_v9 = vpop.xlane.xlu0 %5697  ;;  %v13387_v62 = vpop.eup %9748 }
0x14d7   :  { %v5722_v15 = vsub.f32 %v13244_v41, %v5698_v9  ;;  %9756 = vpow2.f32 %v5739_v13 }
0x14d8   :  { %v13391_v18 = vpop.eup %9750  ;;  %v5702_v5 = vpop.xlane.xlu1 %5701 }
0x14d9   :  { %v5745_v3 = vmul.f32 1.442695, %v5722_v15 }
0x14da   :  { %6112 = vrot.lane.b32.xlu1 %v12504_v20, %s14582_s23  ;;  %v5694_v39 = vpop.xlane.xlu0 %5693  ;;  %v5724_v20 = vsub.f32 %v13252_v50, %v5702_v5 }
0x14db   :  { %v5720_v33 = vsub.f32 %v13261_v8, %v5694_v39  ;;  %9758 = vpow2.f32 %v5745_v3 }
0x14dc   :  { %v13394_v0 = vpop.eup %9752  ;;  %v5749_v61 = vmul.f32 1.442695, %v5724_v20 }
0x14dd   :  { %v13396_v63 = vpop.eup %9754  ;;  %v5741_v53 = vmul.f32 1.442695, %v5720_v33  ;;  %v5953_v41 = vpack.c.bf16 %v13394_v0, %v13387_v62 }
0x14de   :  { %v5954_v6 = vpack.c.bf16 %v13391_v18, %v13396_v63  ;;  %6407 = vrot.lane.b32.xlu1 %v12478_v52, %s14607_s2  ;;  %v5704_v8 = vpop.xlane.xlu0 %5703 }
0x14df   :  { %9760 = vpow2.f32 %v5741_v53  ;;  %8984 = vmatprep.mubr.bf16.mxu0 %v5953_v41  ;;  %v5725_v44 = vsub.f32 %v13271_v28, %v5704_v8  ;;  %v7843_v28 = vld [vmem:[%s14255_s9 + $0x1c] sm:$0xf] }
0x14e0   :  { %9762 = vpow2.f32 %v5743_v51  ;;  %8985 = vmatmul.mubr.bf16.vlgmr.msra.gmra.mxu0 %v5954_v6  ;;  %9259 = vmatprep.subr.msk.bf16.mxu0 %vm1084_vm2, %v7843_v28 }
0x14e1   :  { %9764 = vpow2.f32 %v5749_v61  ;;  %v5751_v50 = vmul.f32 1.442695, %v5725_v44 }
0x14e2   :  { %6411 = vrot.lane.b32.xlu1 %v12512_v45, %s14607_s2  ;;  %v5700_v47 = vpop.xlane.xlu0 %5699  ;;  %v6446_v45 = vsel %vm1084_vm2, %v7843_v28, 0 }
0x14e3   :  { %v5723_v40 = vsub.f32 %v13280_v12, %v5700_v47  ;;  %9033 = vmatpush3.bf16.msra.mxu0 %v6446_v45 }
0x14e4   :  { %v13415_v49 = vpop.eup %9756 }
0x14e5   :  { %v5747_v24 = vmul.f32 1.442695, %v5723_v40 }
0x14e6   :  { %6415 = vrot.lane.b32.xlu1 %v12516_v36, %s14607_s2  ;;  %v5706_v52 = vpop.xlane.xlu0 %5705 }
0x14e7   :  { %9766 = vpow2.f32 %v5747_v24  ;;  %v5726_v27 = vsub.f32 %v13289_v59, %v5706_v52 }
0x14e8   :  { %9768 = vpow2.f32 %v5751_v50  ;;  %v13421_v36 = vpop.eup %9758 }
0x14e9   :  { %v5753_v32 = vmul.f32 1.442695, %v5726_v27 }
0x14ea   :  { %6419 = vrot.lane.b32.xlu1 %v12500_v55, %s14607_s2 }
0x14eb   :  { %9770 = vpow2.f32 %v5753_v32 }
0x14ec   :  { %v13423_v12 = vpop.eup %9760 }
0x14ed   :  { %v13425_v59 = vpop.eup %9762  ;;  %v5955_v4 = vpack.c.bf16 %v13423_v12, %v13415_v49 }
0x14ee   :  { %v5956_v21 = vpack.c.bf16 %v13421_v36, %v13425_v59  ;;  %v13431_v55 = vpop.eup %9764 }
0x14ef   :  { %8988 = vmatprep.mubr.bf16.mxu0 %v5955_v4 }
0x14f0   :  { %8989 = vmatmul.mubr.bf16.gmra.mxu0 %v5956_v21 }
0x14f4   :  { %v13433_v25 = vpop.eup %9766 }
0x14f5   :  { %v5957_v9 = vpack.c.bf16 %v13431_v55, %v13433_v25  ;;  %v13437_v15 = vpop.eup %9768 }
0x14f7   :  { %8992 = vmatprep.mubr.bf16.mxu0 %v5957_v9 }
0x14f8   :  { %v13439_v35 = vpop.eup %9770 }
0x14f9   :  { %v5958_v13 = vpack.c.bf16 %v13439_v35, %v13437_v15 }
0x14fb   :  { %8993 = vmatmul.mubr.bf16.gmra.mxu0 %v5958_v13 }
0x1509   :  { %v5712_v3 = vpop.xlane.xlu1 %5711 }
0x150a   :  { %v5729_v44 = vsub.f32 %v13314_v2, %v5712_v3 }
0x150b   :  { %v5708_v39 = vpop.xlane.xlu0 %5707 }
0x150c   :  { %v5727_v20 = vsub.f32 %v13324_v19, %v5708_v39  ;;  %v5759_v52 = vmul.f32 1.442695, %v5729_v44 }
0x150d   :  { %v6103_v5 = vpop.permute.xlu1 %6102 }
0x150e   :  { %v5755_v47 = vmul.f32 1.442695, %v5727_v20 }
0x150f   :  { %v6101_v33 = vpop.permute.xlu0 %6100 }
0x1510   :  { %9017 = vmatmul.mubr.msk.bf16.vlgmr.msra.gmra.mxu1 %vm769_vm1, %v6101_v33  ;;  %9772 = vpow2.f32 %v5755_v47 }
0x1511   :  { %v6105_v51 = vpop.permute.xlu1 %6104  ;;  %9020 = vmatprep.mubr.msk.bf16.mxu1 %vm769_vm1, %v6103_v5 }
0x1513   :  { %v6406_v4 = vpop.permute.xlu0 %6405 }
0x1515   :  { %v6107_v53 = vpop.permute.xlu1 %6106 }
0x1517   :  { %v6410_v9 = vpop.permute.xlu0 %6409 }
0x1518   :  { %9021 = vmatmul.mubr.msk.bf16.gmra.mxu1 %vm769_vm1, %v6105_v51 }
0x1519   :  { %9024 = vmatprep.mubr.msk.bf16.mxu1 %vm769_vm1, %v6107_v53  ;;  %v6109_v41 = vpop.permute.xlu1 %6108 }
0x151b   :  { %v6414_v3 = vpop.permute.xlu0 %6413 }
0x151d   :  { %v6111_v6 = vpop.permute.xlu1 %6110  ;;  %v13454_v19 = vpop.eup %9772 }
0x151f   :  { %v6418_v5 = vpop.permute.xlu0 %6417 }
0x1520   :  { %9025 = vmatmul.mubr.msk.bf16.gmra.mxu1 %vm769_vm1, %v6109_v41 }
0x1521   :  { %9028 = vmatprep.mubr.msk.bf16.mxu1 %vm769_vm1, %v6111_v6 }
0x154e   :  { %v5714_v8 = vpop.xlane.xlu1 %5713 }
0x154f   :  { %v5730_v61 = vsub.f32 %v13368_v30, %v5714_v8 }
0x1551   :  { %v5761_v40 = vmul.f32 1.442695, %v5730_v61 }
0x1552   :  { %v5710_v24 = vpop.xlane.xlu1 %5709 }
0x1553   :  { %v5728_v50 = vsub.f32 %v13378_v58, %v5710_v24  ;;  %9774 = vpow2.f32 %v5761_v40 }
0x1555   :  { %v5757_v27 = vmul.f32 1.442695, %v5728_v50 }
0x1556   :  { %v6113_v32 = vpop.permute.xlu1 %6112 }
0x1557   :  { %9776 = vpow2.f32 %v5757_v27  ;;  %9029 = vmatmul.mubr.msk.bf16.gmra.mxu1 %vm769_vm1, %v6113_v32 }
0x1558   :  { %9778 = vpow2.f32 %v5759_v52 }
0x155a   :  { %v6408_v21 = vpop.permute.xlu1 %6407 }
0x155e   :  { %v6412_v13 = vpop.permute.xlu1 %6411 }
0x1560   :  { %v13456_v28 = vpop.eup %9774 }
0x1562   :  { %v6416_v39 = vpop.permute.xlu1 %6415 }
0x1564   :  { %v13458_v30 = vpop.eup %9776 }
0x1565   :  { %v13460_v2 = vpop.eup %9778  ;;  %v5959_v58 = vpack.c.bf16 %v13458_v30, %v13454_v19 }
0x1566   :  { %v5960_v45 = vpack.c.bf16 %v13456_v28, %v13460_v2  ;;  %v6420_v33 = vpop.permute.xlu1 %6419 }
0x1567   :  { %8996 = vmatprep.mubr.bf16.mxu0 %v5959_v58 }
0x1568   :  { %8997 = vmatmul.mubr.bf16.gmra.mxu0 %v5960_v45 }
0x1569   :  { %9034 = vmatprep.mubr.msk.bf16.mxu0 %vm769_vm1, %v6406_v4 }
0x1570   :  { %9035 = vmatmul.mubr.msk.bf16.vlgmr.msra.gmra.mxu0 %vm769_vm1, %v6408_v21 }
0x1571   :  { %9038 = vmatprep.mubr.msk.bf16.mxu0 %vm769_vm1, %v6410_v9 }
0x1578   :  { %9039 = vmatmul.mubr.msk.bf16.gmra.mxu0 %vm769_vm1, %v6412_v13 }
0x1579   :  { %9042 = vmatprep.mubr.msk.bf16.mxu0 %vm769_vm1, %v6414_v3 }
0x1580   :  { %9043 = vmatmul.mubr.msk.bf16.gmra.mxu0 %vm769_vm1, %v6416_v39 }
0x1581   :  { %9046 = vmatprep.mubr.msk.bf16.mxu0 %vm769_vm1, %v6418_v5 }
0x1588   :  { %9047 = vmatmul.mubr.msk.bf16.gmra.mxu0 %vm769_vm1, %v6420_v33 }
0x15a0   :  { %v13522_v45 = vpop.f32.mrf.mxu0 }
0x15d0   :  { %v9018_v51 = vpop.f32.mrf.mxu1 }
0x15d1   :  { %v13479_v8 = vadd.f32 %v13187_v31, %v9018_v51 }
0x15d2   :  { %v6212_v53 = vpop.f32.mrf.mxu1 }
0x15d3   :  { %v13475_v41 = vadd.f32 %v13195_v46, %v6212_v53 }
0x15d4   :  { %v9019_v6 = vpop.f32.mrf.mxu1 }
0x15d5   :  { %6275 = vmax.xlane.f32.xlu0 %v13475_v41  ;;  %v13487_v40 = vadd.f32 %v13204_v11, %v9019_v6 }
0x15d6   :  { %v6215_v20 = vpop.f32.mrf.mxu1 }
0x15d7   :  { %v13482_v61 = vadd.f32 %v13214_v54, %v6215_v20 }
0x15d8   :  { %v9022_v44 = vpop.f32.mrf.mxu1 }
0x15d9   :  { %6277 = vmax.xlane.f32.xlu1 %v13482_v61  ;;  %6279 = vmax.xlane.f32.xlu0 %v13479_v8  ;;  %v13499_v27 = vadd.f32 %v13223_v42, %v9022_v44 }
0x15da   :  { %v6228_v47 = vpop.f32.mrf.mxu1 }
0x15db   :  { %v13491_v50 = vadd.f32 %v13232_v26, %v6228_v47 }
0x15dc   :  { %v9023_v46 = vpop.f32.mrf.mxu1 }
0x15dd   :  { %6281 = vmax.xlane.f32.xlu0 %v13487_v40  ;;  %v13502_v11 = vadd.f32 %v13241_v7, %v9023_v46 }
0x15de   :  { %v6231_v24 = vpop.f32.mrf.mxu1 }
0x15df   :  { %v13494_v31 = vadd.f32 %v13258_v1, %v6231_v24 }
0x15e0   :  { %v9026_v54 = vpop.f32.mrf.mxu1 }
0x15e1   :  { %6285 = vmax.xlane.f32.xlu1 %v13494_v31  ;;  %6283 = vmax.xlane.f32.xlu0 %v13491_v50  ;;  %v13515_v42 = vadd.f32 %v13268_v43, %v9026_v54 }
0x15e2   :  { %v6244_v52 = vpop.f32.mrf.mxu1 }
0x15e3   :  { %v13507_v1 = vadd.f32 %v13277_v10, %v6244_v52  ;;  %v13524_v10 = vpop.f32.mrf.mxu0 }
0x15e4   :  { %v9027_v32 = vpop.f32.mrf.mxu1 }
0x15e5   :  { %6289 = vmax.xlane.f32.xlu1 %v13502_v11  ;;  %6287 = vmax.xlane.f32.xlu0 %v13499_v27  ;;  %v13518_v7 = vadd.f32 %v13286_v23, %v9027_v32 }
0x15e6   :  { %v6247_v26 = vpop.f32.mrf.mxu1 }
0x15e7   :  { %v13510_v58 = vadd.f32 %v13249_v48, %v6247_v26  ;;  %v13526_v48 = vpop.f32.mrf.mxu0  ;;  %v14620_v26 = vld [vmem:[#allocation61_spill] sm:$0xff] }
0x15e9   :  { %6293 = vmax.xlane.f32.xlu1 %v13510_v58  ;;  %6291 = vmax.xlane.f32.xlu0 %v13507_v1  ;;  %v13528_v4 = vpop.f32.mrf.mxu0 }
0x15eb   :  { %v13530_v21 = vpop.f32.mrf.mxu0 }
0x15ed   :  { %6297 = vmax.xlane.f32.xlu1 %v13518_v7  ;;  %6295 = vmax.xlane.f32.xlu0 %v13515_v42  ;;  %v13532_v9 = vpop.f32.mrf.mxu0 }
0x15ef   :  { %v13534_v43 = vpop.f32.mrf.mxu0 }
0x15f0   :  { %14608 = vst [vmem:[#allocation45_spill] sm:$0xff] %v13534_v43 }
0x15f1   :  { %v13536_v13 = vpop.f32.mrf.mxu0 }
0x15f2   :  { %14609 = vst [vmem:[#allocation77_spill] sm:$0xff] %v13536_v13 }
0x15f3   :  { %v13538_v39 = vpop.f32.mrf.mxu0 }
0x15f4   :  { %14610 = vst [vmem:[#allocation85_spill] sm:$0xff] %v13538_v39  ;;  %v14629_v39 = vld [vmem:[#allocation78_spill] sm:$0xff] }
0x15f5   :  { %v13544_v53 = vpop.f32.mrf.mxu0 }
0x15f6   :  { %14611 = vst [vmem:[#allocation46_spill] sm:$0xff] %v13544_v53  ;;  %v14628_v53 = vld [vmem:[#allocation69_spill] sm:$0xff] }
0x15f7   :  { %v13554_v44 = vpop.f32.mrf.mxu0 }
0x15f8   :  { %14612 = vst [vmem:[#allocation86_spill] sm:$0xff] %v13554_v44  ;;  %v14627_v44 = vld [vmem:[#allocation68_spill] sm:$0xff] }
0x15f9   :  { %v13561_v47 = vpop.f32.mrf.mxu0 }
0x15fa   :  { %14613 = vst [vmem:[#allocation17_spill] sm:$0xff] %v13561_v47  ;;  %v14626_v47 = vld [vmem:[#allocation67_spill] sm:$0xff] }
0x1617   :  { %v9030_v23 = vpop.f32.mrf.mxu1 }
0x1618   :  { %v13547_v6 = vadd.f32 %v13311_v29, %v9030_v23 }
0x1619   :  { %v6260_v3 = vpop.f32.mrf.mxu1 }
0x161a   :  { %v13541_v5 = vadd.f32 %v13321_v60, %v6260_v3 }
0x161b   :  { %v9031_v33 = vpop.f32.mrf.mxu1 }
0x161c   :  { %6299 = vmax.xlane.f32.xlu0 %v13541_v5  ;;  %v13557_v60 = vadd.f32 %v13365_v38, %v9031_v33  ;;  %v14622_v33 = vld [vmem:[#allocation60_spill] sm:$0xff] }
0x161d   :  { %v6263_v51 = vpop.f32.mrf.mxu1 }
0x161e   :  { %v13550_v20 = vadd.f32 %v13375_v37, %v6263_v51  ;;  %v14623_v51 = vld [vmem:[#allocation59_spill] sm:$0xff] }
0x1620   :  { %6301 = vmax.xlane.f32.xlu1 %v13550_v20  ;;  %6303 = vmax.xlane.f32.xlu0 %v13547_v6 }
0x1624   :  { %6305 = vmax.xlane.f32.xlu1 %v13557_v60  ;;  %4571 = vadd.xlane.f32.xlu0 %v12849_v57 }
0x1628   :  { %v13563_v29 = vpop.f32.mrf.mxu0  ;;  %4573 = vadd.xlane.f32.xlu1 %v12854_v16  ;;  %4575 = vadd.xlane.f32.xlu0 %v12856_v34  ;;  %v14616_v16 = vld [vmem:[#allocation52_spill] sm:$0xff] }
0x1629   :  { %14614 = vst [vmem:[#allocation18_spill] sm:$0xff] %v13563_v29  ;;  %v14617_v34 = vld [vmem:[#allocation56_spill] sm:$0xff]  ;;  %v14625_v29 = vld [vmem:[#allocation62_spill] sm:$0xff] }
0x162a   :  { %v13567_v37 = vpop.f32.mrf.mxu0 }
0x162c   :  { %v13569_v46 = vpop.f32.mrf.mxu0  ;;  %4577 = vadd.xlane.f32.xlu1 %v12851_v17  ;;  %5175 = vadd.xlane.f32.xlu0 %v13085_v14  ;;  %v14618_v17 = vld [vmem:[#allocation57_spill] sm:$0xff]  ;;  %v14619_v14 = vld [vmem:[#allocation55_spill] sm:$0xff] }
0x162d   :  { %14615 = vst [vmem:[#allocation19_spill] sm:$0xff] %v13569_v46  ;;  %v14624_v46 = vld [vmem:[#allocation58_spill] sm:$0xff] }
0x162e   :  { %v13573_v38 = vpop.f32.mrf.mxu0 }
0x1630   :  { %4581 = vadd.xlane.f32.xlu1 %v12871_v22  ;;  %4579 = vadd.xlane.f32.xlu0 %v12867_v56  ;;  %v13577_v57 = vpop.f32.mrf.mxu0  ;;  %v14621_v56 = vld [vmem:[#allocation54_spill] sm:$0xff] }
0x1632   :  { %v13579_v24 = vpop.f32.mrf.mxu0 }
0x1634   :  { %4585 = vadd.xlane.f32.xlu1 %v14616_v16  ;;  %4583 = vadd.xlane.f32.xlu0 %v14617_v34  ;;  %v13583_v54 = vpop.f32.mrf.mxu0 }
0x1636   :  { %v13585_v52 = vpop.f32.mrf.mxu0 }
0x1638   :  { %4589 = vadd.xlane.f32.xlu1 %v14618_v17  ;;  %4587 = vadd.xlane.f32.xlu0 %v14619_v14  ;;  %v9040_v32 = vpop.f32.mrf.mxu0 }
0x163a   :  { %v6498_v22 = vpop.f32.mrf.mxu0 }
0x163c   :  { %4593 = vadd.xlane.f32.xlu1 %v14620_v26  ;;  %4591 = vadd.xlane.f32.xlu0 %v14621_v56  ;;  %v9041_v23 = vpop.f32.mrf.mxu0 }
0x163e   :  { %v6501_v3 = vpop.f32.mrf.mxu0 }
0x1640   :  { %4597 = vadd.xlane.f32.xlu1 %v14622_v33  ;;  %4595 = vadd.xlane.f32.xlu0 %v14623_v51  ;;  %v9044_v16 = vpop.f32.mrf.mxu0 }
0x1642   :  { %v6514_v34 = vpop.f32.mrf.mxu0 }
0x1644   :  { %4601 = vadd.xlane.f32.xlu1 %v14624_v46  ;;  %4599 = vadd.xlane.f32.xlu0 %v14625_v29  ;;  %v9045_v17 = vpop.f32.mrf.mxu0  ;;  %v14630_v46 = vld [vmem:[#allocation6_spill] sm:$0xff] }
0x1645   :  { %v14631_v29 = vld [vmem:[#allocation70_spill] sm:$0xff] }
0x1646   :  { %v6517_v14 = vpop.f32.mrf.mxu0 }
0x1648   :  { %5177 = vadd.xlane.f32.xlu1 %v14626_v47  ;;  %5171 = vadd.xlane.f32.xlu0 %v14627_v44  ;;  %v9048_v26 = vpop.f32.mrf.mxu0  ;;  %v6558_v44 = vpack.c.bf16 %v9045_v17, %v9044_v16  ;;  %v14632_v47 = vld [vmem:[#allocation71_spill] sm:$0xff]  ;;  %v14637_v16 = vld [vmem:[#allocation73_spill] sm:$0xff]  ;;  %v6555_v17 = vpack.c.bf16 %v6501_v3, %v6498_v22 }
0x164a   :  { %v6530_v56 = vpop.f32.mrf.mxu0 }
0x164c   :  { %5173 = vadd.xlane.f32.xlu1 %v14628_v53  ;;  %5183 = vadd.xlane.f32.xlu0 %v14629_v39  ;;  %v9049_v33 = vpop.f32.mrf.mxu0  ;;  %v14633_v53 = vld [vmem:[#allocation8_spill] sm:$0xff]  ;;  %v14634_v39 = vld [vmem:[#allocation79_spill] sm:$0xff] }
0x164d   :  { %v6560_v51 = vpack.c.bf16 %v9049_v33, %v9048_v26  ;;  %v14635_v26 = vld [vmem:[#allocation72_spill] sm:$0xff]  ;;  %v14636_v33 = vld [vmem:[#allocation5_spill] sm:$0xff] }
0x164e   :  { %v6533_v13 = vpop.f32.mrf.mxu0 }
0x164f   :  { %v6559_v43 = vpack.c.bf16 %v6533_v13, %v6530_v56  ;;  %9050 = vmatprep.subr.bf16.mxu0 %v6560_v51  ;;  %9172 = vmatprep.subr.bf16.mxu1 %v6560_v51  ;;  %v6557_v13 = vpack.c.bf16 %v6517_v14, %v6514_v34  ;;  %v6556_v56 = vpack.c.bf16 %v9041_v23, %v9040_v32  ;;  %v14638_v14 = vld [vmem:[#allocation7_spill] sm:$0xff] }
0x1650   :  { %5185 = vadd.xlane.f32.xlu1 %v14630_v46  ;;  %5179 = vadd.xlane.f32.xlu0 %v14631_v29 }
0x1651   :  { %9051 = vmatpush3.bf16.msra.mxu0 %v6560_v51  ;;  %9180 = vmatpush3.bf16.msra.mxu1 %v6560_v51  ;;  %v14639_v51 = vld [vmem:[#allocation80_spill] sm:$0xff] }
0x1652   :  { %9052 = vmatprep.subr.bf16.mxu0 %v6559_v43  ;;  %9173 = vmatprep.subr.bf16.mxu1 %v6559_v43 }
0x1654   :  { %5181 = vadd.xlane.f32.xlu1 %v14632_v47  ;;  %5191 = vadd.xlane.f32.xlu0 %v14633_v53  ;;  %v6554_v47 = vpack.c.bf16 %v13583_v54, %v13577_v57 }
0x1655   :  { %9053 = vmatpush3.bf16.msra.mxu0 %v6559_v43  ;;  %9181 = vmatpush3.bf16.msra.mxu1 %v6559_v43 }
0x1656   :  { %9054 = vmatprep.subr.bf16.mxu0 %v6558_v44  ;;  %9174 = vmatprep.subr.bf16.mxu1 %v6558_v44 }
0x1658   :  { %5193 = vadd.xlane.f32.xlu1 %v14634_v39  ;;  %5187 = vadd.xlane.f32.xlu0 %v14635_v26 }
0x1659   :  { %9055 = vmatpush3.bf16.msra.mxu0 %v6558_v44  ;;  %9182 = vmatpush3.bf16.msra.mxu1 %v6558_v44 }
0x165a   :  { %9056 = vmatprep.subr.bf16.mxu0 %v6557_v13  ;;  %9175 = vmatprep.subr.bf16.mxu1 %v6557_v13 }
0x165c   :  { %5189 = vadd.xlane.f32.xlu1 %v14636_v33  ;;  %5199 = vadd.xlane.f32.xlu0 %v14637_v16 }
0x165d   :  { %9057 = vmatpush3.bf16.msra.mxu0 %v6557_v13  ;;  %9183 = vmatpush3.bf16.msra.mxu1 %v6557_v13 }
0x165e   :  { %9058 = vmatprep.subr.bf16.mxu0 %v6556_v56  ;;  %9176 = vmatprep.subr.bf16.mxu1 %v6556_v56  ;;  %v6276_v43 = vpop.xlane.xlu0 %6275 }
0x165f   :  { %v6307_v34 = vsub.f32 %v13475_v41, %v6276_v43  ;;  %v14640_v41 = vld [vmem:[#allocation81_spill] sm:$0xff] }
0x1660   :  { %5201 = vadd.xlane.f32.xlu1 %v14638_v14  ;;  %5195 = vadd.xlane.f32.xlu0 %v14639_v51 }
0x1661   :  { %9059 = vmatpush3.bf16.msra.mxu0 %v6556_v56  ;;  %9184 = vmatpush3.bf16.msra.mxu1 %v6556_v56  ;;  %v6323_v46 = vmul.f32 1.442695, %v6307_v34 }
0x1662   :  { %9060 = vmatprep.subr.bf16.mxu0 %v6555_v17  ;;  %9177 = vmatprep.subr.bf16.mxu1 %v6555_v17  ;;  %v6278_v32 = vpop.xlane.xlu1 %6277  ;;  %v6280_v23 = vpop.xlane.xlu0 %6279 }
0x1663   :  { %v6308_v29 = vsub.f32 %v13482_v61, %v6278_v32  ;;  %v6309_v44 = vsub.f32 %v13479_v8, %v6280_v23  ;;  %9780 = vpow2.f32 %v6323_v46  ;;  %v6553_v8 = vpack.c.bf16 %v13585_v52, %v13579_v24 }
0x1664   :  { %5197 = vadd.xlane.f32.xlu1 %v14640_v41  ;;  %5767 = vadd.xlane.f32.xlu0 %v13396_v63 }
0x1665   :  { %v6325_v22 = vmul.f32 1.442695, %v6308_v29  ;;  %9061 = vmatpush3.bf16.msra.mxu0 %v6555_v17  ;;  %9185 = vmatpush3.bf16.msra.mxu1 %v6555_v17  ;;  %v6327_v3 = vmul.f32 1.442695, %v6309_v44 }
0x1666   :  { %9062 = vmatprep.subr.bf16.mxu0 %v6554_v47  ;;  %9178 = vmatprep.subr.bf16.mxu1 %v6554_v47  ;;  %v6282_v53 = vpop.xlane.xlu0 %6281 }
0x1667   :  { %9782 = vpow2.f32 %v6325_v22  ;;  %v6310_v61 = vsub.f32 %v13487_v40, %v6282_v53 }
0x1668   :  { %5769 = vadd.xlane.f32.xlu1 %v13391_v18  ;;  %5763 = vadd.xlane.f32.xlu0 %v13387_v62  ;;  %9784 = vpow2.f32 %v6327_v3 }
0x1669   :  { %v6329_v57 = vmul.f32 1.442695, %v6310_v61  ;;  %9063 = vmatpush3.bf16.msra.mxu0 %v6554_v47  ;;  %9186 = vmatpush3.bf16.msra.mxu1 %v6554_v47 }
0x166a   :  { %9064 = vmatprep.subr.bf16.mxu0 %v6553_v8  ;;  %9179 = vmatprep.subr.bf16.mxu1 %v6553_v8  ;;  %v6286_v63 = vpop.xlane.xlu1 %6285  ;;  %v6284_v54 = vpop.xlane.xlu0 %6283 }
0x166b   :  { %9786 = vpow2.f32 %v6329_v57  ;;  %v6312_v13 = vsub.f32 %v13494_v31, %v6286_v63  ;;  %v6311_v40 = vsub.f32 %v13491_v50, %v6284_v54 }
0x166c   :  { %5765 = vadd.xlane.f32.xlu1 %v13394_v0  ;;  %5775 = vadd.xlane.f32.xlu0 %v13425_v59 }
0x166d   :  { %v6333_v18 = vmul.f32 1.442695, %v6312_v13  ;;  %v6331_v24 = vmul.f32 1.442695, %v6311_v40  ;;  %9065 = vmatpush3.bf16.msra.mxu0 %v6553_v8  ;;  %9187 = vmatpush3.bf16.msra.mxu1 %v6553_v8 }
0x166e   :  { %v6290_v62 = vpop.xlane.xlu1 %6289  ;;  %v6288_v52 = vpop.xlane.xlu0 %6287 }
0x166f   :  { %9788 = vpow2.f32 %v6333_v18  ;;  %v6314_v39 = vsub.f32 %v13502_v11, %v6290_v62  ;;  %v6313_v26 = vsub.f32 %v13499_v27, %v6288_v52 }
0x1670   :  { %9790 = vpow2.f32 %v6331_v24  ;;  %5777 = vadd.xlane.f32.xlu1 %v13421_v36  ;;  %5771 = vadd.xlane.f32.xlu0 %v13415_v49  ;;  %v9781_v56 = vpop.eup %9780 }
0x1671   :  { %v6337_v50 = vmul.f32 1.442695, %v6314_v39  ;;  %v6335_v0 = vmul.f32 1.442695, %v6313_v26 }
0x1672   :  { %v6294_v31 = vpop.xlane.xlu1 %6293  ;;  %v6292_v59 = vpop.xlane.xlu0 %6291 }
0x1673   :  { %9792 = vpow2.f32 %v6337_v50  ;;  %v6316_v33 = vsub.f32 %v13510_v58, %v6294_v31  ;;  %v6315_v16 = vsub.f32 %v13507_v1, %v6292_v59 }
0x1674   :  { %v9783_v43 = vpop.eup %9782  ;;  %9794 = vpow2.f32 %v6335_v0  ;;  %5773 = vadd.xlane.f32.xlu1 %v13423_v12  ;;  %5783 = vadd.xlane.f32.xlu0 %v13437_v15 }
0x1675   :  { %v6341_v27 = vmul.f32 1.442695, %v6316_v33  ;;  %v6339_v36 = vmul.f32 1.442695, %v6315_v16  ;;  %v6545_v11 = vpack.c.bf16 %v9783_v43, %v9781_v56  ;;  %v9785_v17 = vpop.eup %9784 }
0x1676   :  { %v6298_v49 = vpop.xlane.xlu1 %6297  ;;  %v6296_v34 = vpop.xlane.xlu0 %6295 }
0x1677   :  { %9796 = vpow2.f32 %v6341_v27  ;;  %v6318_v14 = vsub.f32 %v13518_v7, %v6298_v49  ;;  %v6317_v51 = vsub.f32 %v13515_v42, %v6296_v34  ;;  %9066 = vmatprep.mubr.bf16.mxu0 %v6545_v11  ;;  %v14642_v49 = vld [vmem:[#allocation9_spill] sm:$0xff] }
0x1678   :  { %v9787_v58 = vpop.eup %9786  ;;  %9798 = vpow2.f32 %v6339_v36  ;;  %5785 = vadd.xlane.f32.xlu1 %v13439_v35  ;;  %5779 = vadd.xlane.f32.xlu0 %v13433_v25  ;;  %v14641_v36 = vld [vmem:[#allocation31_spill] sm:$0xff] }
0x1679   :  { %v6546_v12 = vpack.c.bf16 %v9787_v58, %v9785_v17  ;;  %v6345_v15 = vmul.f32 1.442695, %v6318_v14  ;;  %v6343_v1 = vmul.f32 1.442695, %v6317_v51 }
0x167b   :  { %9800 = vpow2.f32 %v6345_v15  ;;  %9067 = vmatmul.mubr.bf16.vlgmr.msra.gmra.mxu0 %v6546_v12 }
0x167c   :  { %v9789_v46 = vpop.eup %9788  ;;  %9802 = vpow2.f32 %v6343_v1  ;;  %5781 = vadd.xlane.f32.xlu1 %v13431_v55  ;;  %5787 = vadd.xlane.f32.xlu0 %v13454_v19 }
0x167d   :  { %v9791_v7 = vpop.eup %9790 }
0x167e   :  { %v6547_v42 = vpack.c.bf16 %v9789_v46, %v9791_v7 }
0x1680   :  { %v9793_v32 = vpop.eup %9792  ;;  %9070 = vmatprep.mubr.bf16.mxu0 %v6547_v42  ;;  %5789 = vadd.xlane.f32.xlu1 %v13458_v30 }
0x1681   :  { %v9795_v35 = vpop.eup %9794  ;;  %6359 = vadd.xlane.f32.xlu0 %v9785_v17 }
0x1682   :  { %v6548_v25 = vpack.c.bf16 %v9793_v32, %v9795_v35 }
0x1684   :  { %v9797_v23 = vpop.eup %9796  ;;  %9071 = vmatmul.mubr.bf16.gmra.mxu0 %v6548_v25  ;;  %6361 = vadd.xlane.f32.xlu1 %v9787_v58 }
0x1685   :  { %v9799_v29 = vpop.eup %9798  ;;  %6355 = vadd.xlane.f32.xlu0 %v9781_v56 }
0x1686   :  { %v6549_v44 = vpack.c.bf16 %v9797_v23, %v9799_v29 }
0x1688   :  { %v9801_v47 = vpop.eup %9800  ;;  %9074 = vmatprep.mubr.bf16.mxu0 %v6549_v44  ;;  %6357 = vadd.xlane.f32.xlu1 %v9783_v43  ;;  %v14643_v44 = vld [vmem:[#allocation33_spill] sm:$0xff] }
0x1689   :  { %v9803_v55 = vpop.eup %9802  ;;  %6367 = vadd.xlane.f32.xlu0 %v9795_v35 }
0x168a   :  { %v6550_v19 = vpack.c.bf16 %v9801_v47, %v9803_v55 }
0x168c   :  { %9075 = vmatmul.mubr.bf16.gmra.mxu0 %v6550_v19  ;;  %6369 = vadd.xlane.f32.xlu1 %v9793_v32 }
0x168d   :  { %6363 = vadd.xlane.f32.xlu0 %v9791_v7 }
0x1690   :  { %6365 = vadd.xlane.f32.xlu1 %v9789_v46 }
0x1691   :  { %6375 = vadd.xlane.f32.xlu0 %v9803_v55  ;;  %v14644_v55 = vld [vmem:[#allocation10_spill] sm:$0xff] }
0x1694   :  { %6377 = vadd.xlane.f32.xlu1 %v9801_v47 }
0x1695   :  { %6371 = vadd.xlane.f32.xlu0 %v9799_v29 }
0x1698   :  { %6373 = vadd.xlane.f32.xlu1 %v9797_v23 }
0x1699   :  { %5791 = vadd.xlane.f32.xlu0 %v13460_v2 }
0x169c   :  { %5793 = vadd.xlane.f32.xlu1 %v13456_v28 }
0x16a5   :  { %v6300_v30 = vpop.xlane.xlu0 %6299 }
0x16a6   :  { %v6319_v41 = vsub.f32 %v13541_v5, %v6300_v30 }
0x16a8   :  { %v6347_v22 = vmul.f32 1.442695, %v6319_v41 }
0x16a9   :  { %v6302_v3 = vpop.xlane.xlu1 %6301  ;;  %v6304_v53 = vpop.xlane.xlu0 %6303 }
0x16aa   :  { %9804 = vpow2.f32 %v6347_v22  ;;  %v6320_v61 = vsub.f32 %v13550_v20, %v6302_v3  ;;  %v6321_v8 = vsub.f32 %v13547_v6, %v6304_v53 }
0x16ac   :  { %v6349_v57 = vmul.f32 1.442695, %v6320_v61  ;;  %v6351_v63 = vmul.f32 1.442695, %v6321_v8 }
0x16ad   :  { %v6306_v54 = vpop.xlane.xlu1 %6305  ;;  %v13645_v13 = vpop.xlane.xlu0 %4571 }
0x16ae   :  { %9806 = vpow2.f32 %v6349_v57  ;;  %v6322_v2 = vsub.f32 %v13557_v60, %v6306_v54 }
0x16af   :  { %9808 = vpow2.f32 %v6351_v63  ;;  %v14645_v63 = vld [vmem:[#allocation64_spill] sm:$0xff] }
0x16b0   :  { %v6353_v28 = vmul.f32 1.442695, %v6322_v2  ;;  %v14646_v2 = vld [vmem:[#allocation12_spill] sm:$0xff] }
0x16b1   :  { %v13648_v40 = vpop.xlane.xlu1 %4573  ;;  %v4576_v5 = vpop.xlane.xlu0 %4575 }
0x16b2   :  { %9810 = vpow2.f32 %v6353_v28 }
0x16b3   :  { %9812 = vrcp.f32 %v4576_v5 }
0x16b5   :  { %v4578_v18 = vpop.xlane.xlu1 %4577  ;;  %v5176_v24 = vpop.xlane.xlu0 %5175 }
0x16b6   :  { %9814 = vrcp.f32 %v5176_v24  ;;  %v14647_v24 = vld [vmem:[#allocation63_spill] sm:$0xff] }
0x16b7   :  { %v9805_v20 = vpop.eup %9804  ;;  %9816 = vrcp.f32 %v4578_v18 }
0x16b8   :  { %6379 = vadd.xlane.f32.xlu0 %v9805_v20 }
0x16b9   :  { %v13650_v6 = vpop.xlane.xlu1 %4581  ;;  %v13652_v62 = vpop.xlane.xlu0 %4579 }
0x16bb   :  { %v9807_v52 = vpop.eup %9806 }
0x16bc   :  { %v9809_v39 = vpop.eup %9808  ;;  %6381 = vadd.xlane.f32.xlu1 %v9807_v52  ;;  %v6551_v60 = vpack.c.bf16 %v9807_v52, %v9805_v20  ;;  %v14648_v52 = vld [vmem:[#allocation14_spill] sm:$0xff] }
0x16bd   :  { %6383 = vadd.xlane.f32.xlu0 %v9809_v39  ;;  %v4586_v26 = vpop.xlane.xlu1 %4585  ;;  %v4584_v50 = vpop.xlane.xlu0 %4583 }
0x16be   :  { %9078 = vmatprep.mubr.bf16.mxu1 %v6551_v60 }
0x16bf   :  { %v9811_v0 = vpop.eup %9810 }
0x16c0   :  { %v6552_v31 = vpack.c.bf16 %v9811_v0, %v9809_v39  ;;  %6385 = vadd.xlane.f32.xlu1 %v9811_v0  ;;  %v9813_v33 = vpop.eup %9812 }
0x16c1   :  { %v13654_v59 = vpop.xlane.xlu1 %4589  ;;  %v13656_v56 = vpop.xlane.xlu0 %4587  ;;  %v4876_v11 = vmul.f32 %v9813_v33, %v14641_v36 }
0x16c2   :  { %9079 = vmatmul.mubr.bf16.vlgmr.msra.gmra.mxu1 %v6552_v31 }
0x16c3   :  { %v9815_v16 = vpop.eup %9814 }
0x16c4   :  { %v5476_v34 = vmul.f32 %v9815_v16, %v14642_v49  ;;  %v9817_v35 = vpop.eup %9816 }
0x16c5   :  { %v4594_v43 = vpop.xlane.xlu1 %4593  ;;  %v4592_v27 = vpop.xlane.xlu0 %4591  ;;  %v4877_v47 = vmul.f32 %v9817_v35, %v14643_v44 }
0x16c6   :  { %v13660_v17 = vadd.f32 %v5476_v34, %v4876_v11  ;;  %v14650_v11 = vld [vmem:[#allocation16_spill] sm:$0xff] }
0x16c9   :  { %v4598_v14 = vpop.xlane.xlu1 %4597  ;;  %v4596_v51 = vpop.xlane.xlu0 %4595 }
0x16cd   :  { %v4602_v58 = vpop.xlane.xlu1 %4601  ;;  %v4600_v12 = vpop.xlane.xlu0 %4599 }
0x16d1   :  { %v5178_v15 = vpop.xlane.xlu1 %5177  ;;  %v13662_v1 = vpop.xlane.xlu0 %5171 }
0x16d2   :  { %9818 = vrcp.f32 %v5178_v15  ;;  %v14652_v15 = vld [vmem:[#allocation43_spill] sm:$0xff] }
0x16d3   :  { %9820 = vrcp.f32 %v4584_v50 }
0x16d5   :  { %v13664_v46 = vpop.xlane.xlu1 %5173  ;;  %v5184_v7 = vpop.xlane.xlu0 %5183 }
0x16d6   :  { %9822 = vrcp.f32 %v5184_v7 }
0x16d7   :  { %9824 = vrcp.f32 %v4586_v26 }
0x16d9   :  { %v5186_v42 = vpop.xlane.xlu1 %5185  ;;  %v13666_v32 = vpop.xlane.xlu0 %5179 }
0x16da   :  { %9826 = vrcp.f32 %v5186_v42 }
0x16db   :  { %9828 = vrcp.f32 %v4592_v27  ;;  %v14649_v27 = vld [vmem:[#allocation37_spill] sm:$0xff] }
0x16dd   :  { %v13668_v25 = vpop.xlane.xlu1 %5181  ;;  %v5192_v23 = vpop.xlane.xlu0 %5191 }
0x16de   :  { %9830 = vrcp.f32 %v5192_v23 }
0x16df   :  { %v9819_v29 = vpop.eup %9818  ;;  %9832 = vrcp.f32 %v4594_v43 }
0x16e0   :  { %v5477_v19 = vmul.f32 %v9819_v29, %v14644_v55  ;;  %v9821_v22 = vpop.eup %9820 }
0x16e1   :  { %v5194_v30 = vpop.xlane.xlu1 %5193  ;;  %v13672_v41 = vpop.xlane.xlu0 %5187  ;;  %v4880_v54 = vmul.f32 %v9821_v22, %v14645_v63  ;;  %v14654_v22 = vld [vmem:[#allocation75_spill] sm:$0xff] }
0x16e2   :  { %9834 = vrcp.f32 %v5194_v30  ;;  %v13674_v3 = vadd.f32 %v5477_v19, %v4877_v47  ;;  %v14653_v19 = vld [vmem:[#allocation40_spill] sm:$0xff] }
0x16e3   :  { %v9823_v53 = vpop.eup %9822  ;;  %9836 = vrcp.f32 %v4600_v12 }
0x16e4   :  { %v9825_v61 = vpop.eup %9824  ;;  %v5480_v28 = vmul.f32 %v9823_v53, %v14646_v2  ;;  %v14655_v2 = vld [vmem:[#allocation39_spill] sm:$0xff] }
0x16e5   :  { %v13676_v8 = vpop.xlane.xlu1 %5189  ;;  %v5200_v57 = vpop.xlane.xlu0 %5199  ;;  %v4881_v20 = vmul.f32 %v9825_v61, %v14647_v24 }
0x16e6   :  { %9838 = vrcp.f32 %v5200_v57  ;;  %v13680_v18 = vadd.f32 %v5480_v28, %v4880_v54 }
0x16e7   :  { %v9827_v5 = vpop.eup %9826  ;;  %9840 = vrcp.f32 %v4602_v58 }
0x16e8   :  { %v5481_v39 = vmul.f32 %v9827_v5, %v14648_v52  ;;  %9842 = vrcp.f32 %v4596_v51  ;;  %v9829_v50 = vpop.eup %9828  ;;  %v14651_v51 = vld [vmem:[#allocation42_spill] sm:$0xff]  ;;  %v14656_v5 = vld [vmem:[#allocation84_spill] sm:$0xff] }
0x16e9   :  { %v5202_v60 = vpop.xlane.xlu1 %5201  ;;  %v5196_v26 = vpop.xlane.xlu0 %5195  ;;  %v4884_v36 = vmul.f32 %v9829_v50, %v14649_v27  ;;  %v14658_v50 = vld [vmem:[#allocation44_spill] sm:$0xff] }
0x16ea   :  { %9844 = vrcp.f32 %v5202_v60  ;;  %v13684_v0 = vadd.f32 %v5481_v39, %v4881_v20  ;;  %v14657_v60 = vld [vmem:[#allocation41_spill] sm:$0xff] }
0x16eb   :  { %9846 = vrcp.f32 %v5196_v26  ;;  %v9831_v31 = vpop.eup %9830 }
0x16ec   :  { %9848 = vrcp.f32 %v4598_v14  ;;  %v9833_v33 = vpop.eup %9832  ;;  %v5484_v49 = vmul.f32 %v9831_v31, %v14650_v11 }
0x16ed   :  { %v5198_v16 = vpop.xlane.xlu1 %5197  ;;  %v5768_v43 = vpop.xlane.xlu0 %5767  ;;  %v4885_v12 = vmul.f32 %v9833_v33, %v14651_v51 }
0x16ee   :  { %9850 = vrcp.f32 %v5198_v16  ;;  %v13688_v58 = vadd.f32 %v5484_v49, %v4884_v36  ;;  %v14659_v36 = vld [vmem:[#allocation66_spill] sm:$0xff]  ;;  %v14660_v49 = vld [vmem:[#allocation76_spill] sm:$0xff] }
0x16ef   :  { %v9835_v34 = vpop.eup %9834 }
0x16f0   :  { %v5485_v7 = vmul.f32 %v9835_v34, %v14652_v15  ;;  %v9837_v23 = vpop.eup %9836 }
0x16f1   :  { %v5770_v42 = vpop.xlane.xlu1 %5769  ;;  %v5764_v35 = vpop.xlane.xlu0 %5763  ;;  %v4888_v30 = vmul.f32 %v9837_v23, %v14653_v19 }
0x16f2   :  { %v13692_v29 = vadd.f32 %v5485_v7, %v4885_v12 }
0x16f3   :  { %v9839_v14 = vpop.eup %9838 }
0x16f4   :  { %v9841_v44 = vpop.eup %9840  ;;  %v5488_v53 = vmul.f32 %v9839_v14, %v14654_v22 }
0x16f5   :  { %v5766_v47 = vpop.xlane.xlu1 %5765  ;;  %v5776_v55 = vpop.xlane.xlu0 %5775  ;;  %v4889_v28 = vmul.f32 %v9841_v44, %v14655_v2 }
0x16f6   :  { %v9843_v61 = vpop.eup %9842  ;;  %v13696_v63 = vadd.f32 %v5488_v53, %v4888_v30 }
0x16f7   :  { %v9845_v57 = vpop.eup %9844  ;;  %v4886_v26 = vmul.f32 %v9843_v61, %v14657_v60 }
0x16f8   :  { %v9847_v54 = vpop.eup %9846  ;;  %v5489_v24 = vmul.f32 %v9845_v57, %v14656_v5  ;;  %v14661_v5 = vld [vmem:[#allocation82_spill] sm:$0xff] }
0x16f9   :  { %v9849_v20 = vpop.eup %9848  ;;  %v5778_v52 = vpop.xlane.xlu1 %5777  ;;  %v5486_v31 = vmul.f32 %v9847_v54, %v14658_v50 }
0x16fa   :  { %v5772_v39 = vpop.xlane.xlu0 %5771  ;;  %v13702_v33 = vadd.f32 %v5489_v24, %v4889_v28  ;;  %v4887_v11 = vmul.f32 %v9849_v20, %v14659_v36 }
0x16fb   :  { %v9851_v16 = vpop.eup %9850  ;;  %v5502_v27 = vadd.f32 %v5486_v31, %v4886_v26 }
0x16fc   :  { %v5487_v34 = vmul.f32 %v9851_v16, %v14660_v49  ;;  %v14663_v49 = vld [vmem:[#allocation11_spill] sm:$0xff] }
0x16fd   :  { %v5774_v51 = vpop.xlane.xlu1 %5773 }
0x16fe   :  { %v5784_v12 = vpop.xlane.xlu0 %5783  ;;  %v5503_v15 = vadd.f32 %v5487_v34, %v4887_v11 }
0x1701   :  { %v13706_v7 = vpop.xlane.xlu1 %5785 }
0x1702   :  { %v5780_v23 = vpop.xlane.xlu0 %5779 }
0x1705   :  { %v13708_v14 = vpop.xlane.xlu1 %5781 }
0x1706   :  { %v5788_v44 = vpop.xlane.xlu0 %5787 }
0x1707   :  { %9852 = vrcp.f32 %v5788_v44 }
0x1709   :  { %v5790_v19 = vpop.xlane.xlu1 %5789 }
0x170a   :  { %9854 = vrcp.f32 %v5790_v19  ;;  %v6360_v2 = vpop.xlane.xlu0 %6359  ;;  %v14664_v19 = vld [vmem:[#allocation34_spill] sm:$0xff] }
0x170b   :  { %9856 = vrcp.f32 %v13645_v13 }
0x170c   :  { %9858 = vrcp.f32 %v13648_v40 }
0x170d   :  { %9860 = vrcp.f32 %v13650_v6 }
0x170e   :  { %9862 = vrcp.f32 %v13652_v62 }
0x170f   :  { %9864 = vrcp.f32 %v13654_v59 }
0x1710   :  { %9866 = vrcp.f32 %v13656_v56 }
0x1711   :  { %9868 = vrcp.f32 %v13662_v1 }
0x1712   :  { %9870 = vrcp.f32 %v13664_v46 }
0x1713   :  { %9872 = vrcp.f32 %v13666_v32 }
0x1714   :  { %v9853_v30 = vpop.eup %9852  ;;  %9874 = vrcp.f32 %v5768_v43 }
0x1715   :  { %v6078_v22 = vmul.f32 %v9853_v30, %v13567_v37  ;;  %v6362_v37 = vpop.xlane.xlu1 %6361  ;;  %9876 = vrcp.f32 %v13668_v25 }
0x1716   :  { %9878 = vrcp.f32 %v5764_v35 }
0x1717   :  { %v9855_v53 = vpop.eup %9854  ;;  %v13711_v61 = vadd.f32 %v6078_v22, %v5502_v27  ;;  %9880 = vrcp.f32 %v13672_v41 }
0x1718   :  { %v6079_v57 = vmul.f32 %v9855_v53, %v13573_v38  ;;  %v6356_v38 = vpop.xlane.xlu0 %6355  ;;  %v9857_v40 = vpop.eup %9856  ;;  %9882 = vrcp.f32 %v5770_v42 }
0x1719   :  { %v6358_v13 = vpop.xlane.xlu1 %6357  ;;  %v9859_v62 = vpop.eup %9858  ;;  %9884 = vrcp.f32 %v5766_v47 }
0x171a   :  { %v13714_v54 = vadd.f32 %v6079_v57, %v5503_v15  ;;  %v9861_v59 = vpop.eup %9860  ;;  %9886 = vrcp.f32 %v6360_v2 }
0x171b   :  { %v13727_v56 = vpop.eup %9862  ;;  %9888 = vrcp.f32 %v5776_v55 }
0x171c   :  { %v6368_v6 = vpop.xlane.xlu0 %6367  ;;  %v13729_v1 = vpop.eup %9864  ;;  %9890 = vrcp.f32 %v6356_v38 }
0x171d   :  { %v6370_v46 = vpop.xlane.xlu1 %6369  ;;  %v13731_v32 = vpop.eup %9866  ;;  %9892 = vrcp.f32 %v5778_v52 }
0x171e   :  { %v9869_v25 = vpop.eup %9868  ;;  %9894 = vrcp.f32 %v6362_v37 }
0x171f   :  { %v9871_v43 = vpop.eup %9870  ;;  %9896 = vrcp.f32 %v5772_v39  ;;  %v5474_v24 = vmul.f32 %v9869_v25, %v14661_v5  ;;  %v14662_v39 = vld [vmem:[#allocation32_spill] sm:$0xff] }
0x1720   :  { %v6364_v41 = vpop.xlane.xlu0 %6363  ;;  %v9873_v42 = vpop.eup %9872  ;;  %9898 = vrcp.f32 %v6358_v13  ;;  %v4874_v50 = vmul.f32 %v9857_v40, %v14662_v39  ;;  %v5475_v34 = vmul.f32 %v9871_v43, %v14663_v49  ;;  %v14665_v13 = vld [vmem:[#allocation13_spill] sm:$0xff] }
0x1721   :  { %v9875_v35 = vpop.eup %9874  ;;  %9900 = vrcp.f32 %v5774_v51  ;;  %v6366_v55 = vpop.xlane.xlu1 %6365  ;;  %v5478_v40 = vmul.f32 %v9873_v42, %v14665_v13 }
0x1722   :  { %v13733_v47 = vpop.eup %9876  ;;  %9902 = vrcp.f32 %v5784_v12  ;;  %v6068_v60 = vmul.f32 %v9875_v35, %v13522_v45  ;;  %v5490_v11 = vadd.f32 %v5474_v24, %v4874_v50  ;;  %v14668_v24 = vld [vmem:[#allocation35_spill] sm:$0xff] }
0x1723   :  { %v9879_v28 = vpop.eup %9878  ;;  %9904 = vrcp.f32 %v6368_v6  ;;  %v14666_v6 = vld [vmem:[#allocation36_spill] sm:$0xff] }
0x1724   :  { %v13736_v20 = vpop.eup %9880  ;;  %9906 = vrcp.f32 %v5780_v23  ;;  %v6376_v52 = vpop.xlane.xlu0 %6375  ;;  %v6066_v16 = vmul.f32 %v9879_v28, %v13524_v10  ;;  %v6084_v45 = vadd.f32 %v6068_v60, %v13660_v17  ;;  %v4875_v10 = vmul.f32 %v9859_v62, %v14664_v19 }
0x1725   :  { %v9883_v26 = vpop.eup %9882  ;;  %9908 = vrcp.f32 %v6364_v41  ;;  %v6378_v12 = vpop.xlane.xlu1 %6377  ;;  %v14667_v41 = vld [vmem:[#allocation38_spill] sm:$0xff] }
0x1726   :  { %v9885_v31 = vpop.eup %9884  ;;  %9910 = vrcp.f32 %v13676_v8  ;;  %v6069_v23 = vmul.f32 %v9883_v26, %v13526_v48  ;;  %v6082_v2 = vadd.f32 %v6066_v16, %v5490_v11  ;;  %v13752_v48 = vld [vmem:[%s14256_s10 + $0x1] ss:$0 sm:$0xff]  ;;  %v5491_v38 = vadd.f32 %v5475_v34, %v4875_v10  ;;  %v14669_v16 = vld [vmem:[#allocation15_spill] sm:$0xff]  ;;  %v14671_v34 = vld [vmem:[#allocation21_spill] sm:$0xff] }
0x1727   :  { %v9887_v27 = vpop.eup %9886  ;;  %9912 = vrcp.f32 %v6370_v46  ;;  %v6067_v30 = vmul.f32 %v9885_v31, %v13528_v4  ;;  %v4879_v4 = vmul.f32 %v9861_v59, %v14666_v6  ;;  %v4878_v43 = vmul.f32 %v13727_v56, %v14667_v41 }
0x1728   :  { %v9889_v51 = vpop.eup %9888  ;;  %9914 = vrcp.f32 %v13706_v7  ;;  %v6372_v53 = vpop.xlane.xlu0 %6371 }
0x1729   :  { %v9891_v44 = vpop.eup %9890  ;;  %9916 = vrcp.f32 %v6366_v55  ;;  %v6083_v55 = vadd.f32 %v6067_v30, %v5491_v38  ;;  %v6072_v5 = vmul.f32 %v9889_v51, %v13530_v21  ;;  %v6374_v60 = vpop.xlane.xlu1 %6373  ;;  %v5494_v56 = vadd.f32 %v5478_v40, %v4878_v43  ;;  %v14675_v40 = vld [vmem:[#allocation23_spill] sm:$0xff] }
0x172a   :  { %v9893_v22 = vpop.eup %9892  ;;  %9918 = vrcp.f32 %v13708_v14  ;;  %v6085_v14 = vadd.f32 %v6069_v23, %v13674_v3 }
0x172b   :  { %v9895_v37 = vpop.eup %9894  ;;  %9920 = vrcp.f32 %v6376_v52  ;;  %v4882_v52 = vmul.f32 %v13731_v32, %v14668_v24  ;;  %v14670_v32 = vld [vmem:[#allocation45_spill] sm:$0xff] }
0x172c   :  { %v9897_v62 = vpop.eup %9896  ;;  %9922 = vrcp.f32 %v6372_v53  ;;  %v6073_v49 = vmul.f32 %v9893_v22, %v14670_v32  ;;  %v14674_v53 = vld [vmem:[#allocation22_spill] sm:$0xff] }
0x172d   :  { %v9899_v35 = vpop.eup %9898  ;;  %9924 = vrcp.f32 %v6378_v12  ;;  %v6070_v31 = vmul.f32 %v9897_v62, %v13532_v9  ;;  %v6088_v12 = vadd.f32 %v6072_v5, %v13680_v18  ;;  %v14673_v9 = vld [vmem:[#allocation77_spill] sm:$0xff] }
0x172e   :  { %v9901_v42 = vpop.eup %9900  ;;  %9926 = vrcp.f32 %v6374_v60  ;;  %v6089_v38 = vadd.f32 %v6073_v49, %v13684_v0  ;;  %v14676_v62 = vld [vmem:[#allocation85_spill] sm:$0xff]  ;;  %v14678_v60 = vld [vmem:[#allocation24_spill] sm:$0xff] }
0x172f   :  { %v9903_v50 = vpop.eup %9902 }
0x1730   :  { %v9905_v21 = vpop.eup %9904 }
0x1731   :  { %v9907_v23 = vpop.eup %9906 }
0x1732   :  { %v9909_v19 = vpop.eup %9908 }
0x173b   :  { %v9068_v36 = vpop.f32.mrf.mxu0 }
0x173c   :  { %v6660_v15 = vmul.f32 %v9887_v27, %v9068_v36  ;;  %v5479_v27 = vmul.f32 %v13733_v47, %v14669_v16  ;;  %v14679_v16 = vld [vmem:[#allocation86_spill] sm:$0xff] }
0x173d   :  { %v6595_v8 = vpop.f32.mrf.mxu0 }
0x173e   :  { %v6676_v57 = vadd.f32 %v6660_v15, %v6084_v45  ;;  %v6658_v7 = vmul.f32 %v9891_v44, %v6595_v8  ;;  %v14672_v45 = vld [vmem:[#allocation74_spill] sm:$0xff]  ;;  %v6071_v8 = vmul.f32 %v9901_v42, %v14673_v9  ;;  %v5495_v18 = vadd.f32 %v5479_v27, %v4879_v4 }
0x173f   :  { %v9069_v17 = vpop.f32.mrf.mxu0  ;;  %v5482_v15 = vmul.f32 %v13736_v20, %v14672_v45  ;;  %v9911_v20 = vpop.eup %9910 }
0x1740   :  { %v6674_v46 = vadd.f32 %v6658_v7, %v6082_v2  ;;  %v6661_v25 = vmul.f32 %v9895_v37, %v9069_v17  ;;  %v6700_v59 = vadd.f32 %v13752_v48, %v6676_v57  ;;  %v6086_v7 = vadd.f32 %v6070_v31, %v5494_v56  ;;  %v9913_v17 = vpop.eup %9912 }
0x1741   :  { %v6598_v28 = vpop.f32.mrf.mxu0 }
0x1742   :  { %v6698_v26 = vadd.f32 %v13752_v48, %v6674_v46  ;;  %v6677_v3 = vadd.f32 %v6661_v25, %v6085_v14  ;;  %v6659_v39 = vmul.f32 %v9899_v35, %v6598_v28  ;;  %v13780_v57 = vadd.f32 %v6700_v59, %v14674_v53  ;;  %v9915_v25 = vpop.eup %9914 }
0x1743   :  { %v6076_v46 = vmul.f32 %v9903_v50, %v14676_v62  ;;  %v5498_v14 = vadd.f32 %v5482_v15, %v4882_v52  ;;  %v6087_v35 = vadd.f32 %v6071_v8, %v5495_v18  ;;  %v9917_v5 = vpop.eup %9916  ;;  %v6077_v27 = vmul.f32 %v9915_v25, %v14679_v16  ;;  %v14682_v15 = vld [vmem:[#allocation26_spill] sm:$0xff]  ;;  %v14683_v8 = vld [vmem:[#allocation17_spill] sm:$0xff]  ;;  %v14690_v16 = vld [vmem:[#allocation47_spill] sm:$0xff] }
0x1744   :  { %v6675_v36 = vadd.f32 %v6659_v39, %v6083_v55  ;;  %v9072_v11 = vpop.f32.mrf.mxu0  ;;  %v13769_v51 = vadd.f32 %v6698_v26, %v14671_v34  ;;  %v6701_v47 = vadd.f32 %v13752_v48, %v6677_v3  ;;  %v14677_v55 = vld [vmem:[#allocation46_spill] sm:$0xff]  ;;  %v6740_v42 = vsel %vm143_vm0, %v13780_v57, 0.0  ;;  %v9919_v52 = vpop.eup %9918 }
0x1745   :  { %v6664_v44 = vmul.f32 %v9905_v21, %v9072_v11  ;;  %v6074_v28 = vmul.f32 %v9907_v23, %v14677_v55  ;;  %v9921_v50 = vpop.eup %9920  ;;  %v6092_v56 = vadd.f32 %v6076_v46, %v13688_v58  ;;  %v14680_v21 = vld [vmem:[#allocation65_spill] sm:$0xff]  ;;  %v14681_v11 = vld [vmem:[#allocation83_spill] sm:$0xff]  ;;  %v6093_v18 = vadd.f32 %v6077_v27, %v13692_v29 }
0x1746   :  { %v6699_v10 = vadd.f32 %v13752_v48, %v6675_v36  ;;  %v6611_v30 = vpop.f32.mrf.mxu0  ;;  %v6734_v22 = vsel %vm143_vm0, %v13769_v51, 0.0  ;;  %v13794_v59 = vadd.f32 %v6701_v47, %v14678_v60  ;;  %v4883_v36 = vmul.f32 %v13729_v1, %v14680_v21  ;;  %v14684_v47 = vld [vmem:[#allocation25_spill] sm:$0xff] }
0x1747   :  { %v6680_v2 = vadd.f32 %v6664_v44, %v6088_v12  ;;  %v6662_v37 = vmul.f32 %v9909_v19, %v6611_v30  ;;  %6735 = vadd.xlane.f32.xlu0 %v6734_v22  ;;  %v5483_v32 = vmul.f32 %v9911_v20, %v14681_v11  ;;  %v6090_v45 = vadd.f32 %v6074_v28, %v5498_v14  ;;  %v9923_v12 = vpop.eup %9922  ;;  %v5794_v11 = vpop.xlane.xlu1 %5793 }
0x1748   :  { %v9073_v13 = vpop.f32.mrf.mxu0  ;;  %v13784_v6 = vadd.f32 %v6699_v10, %v14675_v40  ;;  %v6743_v58 = vsel %vm143_vm0, %v13794_v59, 0.0  ;;  %v6075_v19 = vmul.f32 %v9919_v52, %v14683_v8  ;;  %v9925_v20 = vpop.eup %9924 }
0x1749   :  { %v6678_v41 = vadd.f32 %v6662_v37, %v6086_v7  ;;  %v6665_v43 = vmul.f32 %v9913_v17, %v9073_v13  ;;  %v6704_v24 = vadd.f32 %v13752_v48, %v6680_v2  ;;  %v5499_v7 = vadd.f32 %v5483_v32, %v4883_v36  ;;  %v9927_v40 = vpop.eup %9926  ;;  %v5792_v36 = vpop.xlane.xlu0 %5791 }
0x174a   :  { %v6614_v4 = vpop.f32.mrf.mxu0  ;;  %v6737_v0 = vsel %vm143_vm0, %v13784_v6, 0.0  ;;  %9928 = vrcp.f32 %v5792_v36 }
0x174b   :  { %v6702_v26 = vadd.f32 %v13752_v48, %v6678_v41  ;;  %v6681_v3 = vadd.f32 %v6665_v43, %v6089_v38  ;;  %v6663_v39 = vmul.f32 %v9917_v5, %v6614_v4  ;;  %6738 = vadd.xlane.f32.xlu1 %v6737_v0  ;;  %6741 = vadd.xlane.f32.xlu0 %v6740_v42  ;;  %v14685_v38 = vld [vmem:[#allocation29_spill] sm:$0xff]  ;;  %v14686_v41 = vld [vmem:[#allocation27_spill] sm:$0xff]  ;;  %9930 = vrcp.f32 %v5794_v11 }
0x174c   :  { %v9076_v31 = vpop.f32.mrf.mxu0  ;;  %v13810_v10 = vadd.f32 %v6704_v24, %v14684_v47  ;;  %v6091_v46 = vadd.f32 %v6075_v19, %v5499_v7  ;;  %v14687_v24 = vld [vmem:[#allocation28_spill] sm:$0xff] }
0x174d   :  { %v6679_v49 = vadd.f32 %v6663_v39, %v6087_v35  ;;  %v6668_v34 = vmul.f32 %v9921_v50, %v9076_v31  ;;  %v13803_v23 = vadd.f32 %v6702_v26, %v14682_v15  ;;  %v6705_v44 = vadd.f32 %v13752_v48, %v6681_v3  ;;  %v14688_v26 = vld [vmem:[#allocation30_spill] sm:$0xff]  ;;  %v14689_v39 = vld [vmem:[#allocation48_spill] sm:$0xff]  ;;  %v6380_v32 = vpop.xlane.xlu0 %6379 }
0x174e   :  { %v6627_v9 = vpop.f32.mrf.mxu0  ;;  %v6752_v25 = vsel %vm143_vm0, %v13810_v10, 0.0 }
0x174f   :  { %v6703_v1 = vadd.f32 %v13752_v48, %v6679_v49  ;;  %v6684_v30 = vadd.f32 %v6668_v34, %v6092_v56  ;;  %v6666_v22 = vmul.f32 %v9923_v12, %v6627_v9  ;;  %6744 = vadd.xlane.f32.xlu1 %v6743_v58  ;;  %v6746_v53 = vsel %vm143_vm0, %v13803_v23, 0.0  ;;  %v6382_v49 = vpop.xlane.xlu1 %6381  ;;  %v14691_v12 = vld [vmem:[#allocation18_spill] sm:$0xff] }
0x1750   :  { %v9077_v2 = vpop.f32.mrf.mxu0  ;;  %6747 = vadd.xlane.f32.xlu0 %v6746_v53  ;;  %v13823_v43 = vadd.f32 %v6705_v44, %v14686_v41 }
0x1751   :  { %v6682_v37 = vadd.f32 %v6666_v22, %v6090_v45  ;;  %v6669_v17 = vmul.f32 %v9925_v20, %v9077_v2  ;;  %v13817_v13 = vadd.f32 %v6703_v1, %v14685_v38  ;;  %v6708_v62 = vadd.f32 %v13752_v48, %v6684_v30  ;;  %v6384_v34 = vpop.xlane.xlu0 %6383  ;;  %v14692_v1 = vld [vmem:[#allocation19_spill] sm:$0xff] }
0x1752   :  { %v6630_v14 = vpop.f32.mrf.mxu0  ;;  %v6755_v0 = vsel %vm143_vm0, %v13823_v43, 0.0  ;;  %9932 = vrcp.f32 %v6384_v34 }
0x1753   :  { %v6706_v35 = vadd.f32 %v13752_v48, %v6682_v37  ;;  %v6685_v55 = vadd.f32 %v6669_v17, %v6093_v18  ;;  %v6667_v28 = vmul.f32 %v9927_v40, %v6630_v14  ;;  %v6749_v29 = vsel %vm143_vm0, %v13817_v13, 0.0  ;;  %v6386_v45 = vpop.xlane.xlu1 %6385 }
0x1754   :  { %6750 = vadd.xlane.f32.xlu1 %v6749_v29  ;;  %6753 = vadd.xlane.f32.xlu0 %v6752_v25  ;;  %v13838_v3 = vadd.f32 %v6708_v62, %v14688_v26  ;;  %9934 = vrcp.f32 %v6380_v32  ;;  %v14694_v29 = vld [vmem:[#allocation53_spill] sm:$0xff] }
0x1755   :  { %v6683_v5 = vadd.f32 %v6667_v28, %v6091_v46  ;;  %v13829_v4 = vadd.f32 %v6706_v35, %v14687_v24  ;;  %v6709_v42 = vadd.f32 %v13752_v48, %v6685_v55  ;;  %9936 = vrcp.f32 %v6386_v45  ;;  %v14693_v35 = vld [vmem:[#allocation49_spill] sm:$0xff]  ;;  %v14695_v24 = vld [vmem:[#allocation51_spill] sm:$0xff] }
0x1756   :  { %v6764_v31 = vsel %vm143_vm0, %v13838_v3, 0.0  ;;  %9938 = vrcp.f32 %v6382_v49 }
0x1757   :  { %v6707_v60 = vadd.f32 %v13752_v48, %v6683_v5  ;;  %v6758_v52 = vsel %vm143_vm0, %v13829_v4, 0.0  ;;  %v13848_v27 = vadd.f32 %v6709_v42, %v14690_v16  ;;  %v9929_v15 = vpop.eup %9928 }
0x1758   :  { %6756 = vadd.xlane.f32.xlu1 %v6755_v0  ;;  %6759 = vadd.xlane.f32.xlu0 %v6758_v52  ;;  %v6080_v44 = vmul.f32 %v9929_v15, %v14691_v12  ;;  %v9931_v9 = vpop.eup %9930 }
0x1759   :  { %v13841_v50 = vadd.f32 %v6707_v60, %v14689_v39  ;;  %v6767_v21 = vsel %vm143_vm0, %v13848_v27, 0.0  ;;  %v6081_v30 = vmul.f32 %v9931_v9, %v14692_v1  ;;  %v14696_v60 = vld [vmem:[#allocation50_spill] sm:$0xff] }
0x175a   :  { %v6096_v19 = vadd.f32 %v6080_v44, %v13696_v63 }
0x175b   :  { %v6761_v56 = vsel %vm143_vm0, %v13841_v50, 0.0  ;;  %v6097_v17 = vadd.f32 %v6081_v30, %v13702_v33 }
0x175c   :  { %6762 = vadd.xlane.f32.xlu1 %v6761_v56  ;;  %6765 = vadd.xlane.f32.xlu0 %v6764_v31 }
0x175f   :  { %v9933_v58 = vpop.eup %9932 }
0x1760   :  { %6768 = vadd.xlane.f32.xlu1 %v6767_v21 }
0x1761   :  { %v9935_v22 = vpop.eup %9934 }
0x1762   :  { %v9937_v7 = vpop.eup %9936 }
0x1763   :  { %v9939_v40 = vpop.eup %9938 }
0x1782   :  { %v9080_v8 = vpop.f32.mrf.mxu1 }
0x1783   :  { %v6672_v47 = vmul.f32 %v9933_v58, %v9080_v8 }
0x1784   :  { %v6643_v53 = vpop.f32.mrf.mxu1 }
0x1785   :  { %v6688_v20 = vadd.f32 %v6672_v47, %v6096_v19  ;;  %v6670_v2 = vmul.f32 %v9935_v22, %v6643_v53 }
0x1786   :  { %v9081_v37 = vpop.f32.mrf.mxu1 }
0x1787   :  { %v6686_v18 = vadd.f32 %v6670_v2, %v13711_v61  ;;  %v6673_v38 = vmul.f32 %v9937_v7, %v9081_v37  ;;  %v6712_v46 = vadd.f32 %v13752_v48, %v6688_v20 }
0x1788   :  { %v6646_v62 = vpop.f32.mrf.mxu1 }
0x1789   :  { %v6710_v63 = vadd.f32 %v13752_v48, %v6686_v18  ;;  %v6689_v14 = vadd.f32 %v6673_v38, %v6097_v17  ;;  %v6671_v25 = vmul.f32 %v9939_v40, %v6646_v62  ;;  %v13868_v5 = vadd.f32 %v6712_v46, %v14694_v29 }
0x178b   :  { %v6687_v41 = vadd.f32 %v6671_v25, %v13714_v54  ;;  %v13861_v55 = vadd.f32 %v6710_v63, %v14693_v35  ;;  %v6713_v28 = vadd.f32 %v13752_v48, %v6689_v14  ;;  %v6776_v42 = vsel %vm143_vm0, %v13868_v5, 0.0 }
0x178d   :  { %v6711_v61 = vadd.f32 %v13752_v48, %v6687_v41  ;;  %v6770_v33 = vsel %vm143_vm0, %v13861_v55, 0.0  ;;  %v13878_v52 = vadd.f32 %v6713_v28, %v14696_v60 }
0x178e   :  { %6771 = vadd.xlane.f32.xlu0 %v6770_v33 }
0x178f   :  { %v13871_v0 = vadd.f32 %v6711_v61, %v14695_v24  ;;  %v6779_v48 = vsel %vm143_vm0, %v13878_v52, 0.0 }
0x1791   :  { %v6773_v54 = vsel %vm143_vm0, %v13871_v0, 0.0 }
0x1792   :  { %6774 = vadd.xlane.f32.xlu1 %v6773_v54  ;;  %6777 = vadd.xlane.f32.xlu0 %v6776_v42 }
0x1796   :  { %6780 = vadd.xlane.f32.xlu1 %v6779_v48 }
0x17d0   :  { %v6736_v26 = vpop.xlane.xlu0 %6735 }
0x17d1   :  { %v6782_v39 = vmul.f32 0.03125, %v6736_v26 }
0x17d3   :  { %v13883_v56 = vsub.f32 %v13769_v51, %v6782_v39 }
0x17d4   :  { %v6739_v31 = vpop.xlane.xlu1 %6738  ;;  %v6742_v16 = vpop.xlane.xlu0 %6741 }
0x17d5   :  { %v6783_v21 = vmul.f32 0.03125, %v6739_v31  ;;  %v6784_v36 = vmul.f32 0.03125, %v6742_v16  ;;  %v6814_v11 = vmul.f32 %v13883_v56, %v13883_v56 }
0x17d7   :  { %v13888_v32 = vsub.f32 %v13784_v6, %v6783_v21  ;;  %v13891_v49 = vsub.f32 %v13780_v57, %v6784_v36  ;;  %v6830_v34 = vsel %vm143_vm0, %v6814_v11, 0.0 }
0x17d8   :  { %v6745_v45 = vpop.xlane.xlu1 %6744  ;;  %6831 = vadd.xlane.f32.xlu0 %v6830_v34 }
0x17d9   :  { %v6785_v15 = vmul.f32 0.03125, %v6745_v45  ;;  %v6748_v12 = vpop.xlane.xlu0 %6747  ;;  %v6815_v44 = vmul.f32 %v13888_v32, %v13888_v32  ;;  %v6816_v9 = vmul.f32 %v13891_v49, %v13891_v49 }
0x17da   :  { %v6786_v58 = vmul.f32 0.03125, %v6748_v12 }
0x17db   :  { %v13899_v8 = vsub.f32 %v13794_v59, %v6785_v15  ;;  %v6833_v19 = vsel %vm143_vm0, %v6815_v44, 0.0  ;;  %v6836_v47 = vsel %vm143_vm0, %v6816_v9, 0.0  ;;  %v9294_v9 = vld [vmem:[%s14259_s13 + $0x18] sm:$0xff]  }
0x17dc   :  { %v13904_v1 = vsub.f32 %v13803_v23, %v6786_v58  ;;  %6834 = vadd.xlane.f32.xlu1 %v6833_v19  ;;  %6837 = vadd.xlane.f32.xlu0 %v6836_v47  ;;  %v9295_v58 = vld [vmem:[%s14259_s13 + $0x10] sm:$0xff]   ;;  %s10087_s13 = smov [#allocation2]  }
0x17dd   :  { %v6751_v30 = vpop.xlane.xlu1 %6750  ;;  %v6754_v22 = vpop.xlane.xlu0 %6753  ;;  %v6817_v53 = vmul.f32 %v13899_v8, %v13899_v8  ;;  %9082 = vmatprep.subr.bf16.mxu1 %v9294_v9  ;;  %s7633_s28 = sshll.u32 %s10087_s13, 4  ;;  %s7634_s28 = int_to_ptr.vmem [resolvable:$true] %s7633_s28 }
0x17de   :  { %v6787_v20 = vmul.f32 0.03125, %v6751_v30  ;;  %v6788_v2 = vmul.f32 0.03125, %v6754_v22  ;;  %v6818_v7 = vmul.f32 %v13904_v1, %v13904_v1  ;;  %9083 = vmatpush3.bf16.msra.mxu1 %v9294_v9  ;;  %s10052_s20 = scalar_lea.vmem %s7634_s28, 32  ;;  %p10057_p1 = scmp.lt.s32.totalorder %s7634_s28, %s7634_s28 }
0x17df   :  { %v6839_v37 = vsel %vm143_vm0, %v6817_v53, 0.0  ;;  %9084 = vmatprep.subr.bf16.mxu1 %v9295_v58  ;;  %p10053_p0 = scmp.ne.s32.totalorder %s7634_s28, %s10052_s20  ;;  %p10058_p2 = scmp.lt.s32.totalorder %s10052_s20, %s10052_s20 }
0x17e0   :  { %v13912_v18 = vsub.f32 %v13817_v13, %v6787_v20  ;;  %v13915_v17 = vsub.f32 %v13810_v10, %v6788_v2  ;;  %6840 = vadd.xlane.f32.xlu1 %v6839_v37  ;;  %v6842_v38 = vsel %vm143_vm0, %v6818_v7, 0.0 }
0x17e1   :  { %v6757_v40 = vpop.xlane.xlu1 %6756  ;;  %6843 = vadd.xlane.f32.xlu0 %v6842_v38  ;;  %v6760_v62 = vpop.xlane.xlu0 %6759  ;;  %p10059_p3 = por %p10058_p2, %p10057_p1 }
0x17e2   :  { %v6789_v46 = vmul.f32 0.03125, %v6757_v40  ;;  %v6790_v63 = vmul.f32 0.03125, %v6760_v62  ;;  %v6819_v14 = vmul.f32 %v13912_v18, %v13912_v18  ;;  %v6820_v25 = vmul.f32 %v13915_v17, %v13915_v17  ;;  %9085 = vmatpush3.bf16.msra.mxu1 %v9295_v58 }
0x17e3   :  { %p10060_p4 = pnand %p10059_p3, %p10053_p0 }
0x17e4   :  { %v13923_v41 = vsub.f32 %v13823_v43, %v6789_v46  ;;  %v13926_v35 = vsub.f32 %v13829_v4, %v6790_v63  ;;  %v6845_v28 = vsel %vm143_vm0, %v6819_v14, 0.0  ;;  %v6848_v61 = vsel %vm143_vm0, %v6820_v25, 0.0 }
0x17e5   :  { %v6763_v33 = vpop.xlane.xlu1 %6762  ;;  %6846 = vadd.xlane.f32.xlu1 %v6845_v28  ;;  %6849 = vadd.xlane.f32.xlu0 %v6848_v61  ;;  %v6766_v29 = vpop.xlane.xlu0 %6765 }
0x17e6   :  { %v6791_v24 = vmul.f32 0.03125, %v6763_v33  ;;  %v6792_v54 = vmul.f32 0.03125, %v6766_v29  ;;  %v6821_v42 = vmul.f32 %v13923_v41, %v13923_v41  ;;  %v6822_v60 = vmul.f32 %v13926_v35, %v13926_v35 }
0x17e8   :  { %v13935_v48 = vsub.f32 %v13841_v50, %v6791_v24  ;;  %v13938_v26 = vsub.f32 %v13838_v3, %v6792_v54  ;;  %v6851_v39 = vsel %vm143_vm0, %v6821_v42, 0.0  ;;  %v6854_v31 = vsel %vm143_vm0, %v6822_v60, 0.0 }
0x17e9   :  { %v6769_v16 = vpop.xlane.xlu1 %6768  ;;  %6852 = vadd.xlane.f32.xlu1 %v6851_v39  ;;  %6855 = vadd.xlane.f32.xlu0 %v6854_v31 }
0x17ea   :  { %v6793_v21 = vmul.f32 0.03125, %v6769_v16  ;;  %v6823_v36 = vmul.f32 %v13935_v48, %v13935_v48  ;;  %v6824_v11 = vmul.f32 %v13938_v26, %v13938_v26 }
0x17ec   :  { %v13947_v34 = vsub.f32 %v13848_v27, %v6793_v21  ;;  %v6857_v45 = vsel %vm143_vm0, %v6823_v36, 0.0  ;;  %v6860_v15 = vsel %vm143_vm0, %v6824_v11, 0.0 }
0x17ed   :  { %6858 = vadd.xlane.f32.xlu1 %v6857_v45  ;;  %6861 = vadd.xlane.f32.xlu0 %v6860_v15 }
0x17ee   :  { %v6825_v12 = vmul.f32 %v13947_v34, %v13947_v34 }
0x17f0   :  { %v6863_v44 = vsel %vm143_vm0, %v6825_v12, 0.0 }
0x17f1   :  { %6864 = vadd.xlane.f32.xlu1 %v6863_v44 }
0x1817   :  { %v6772_v19 = vpop.xlane.xlu0 %6771 }
0x1818   :  { %v6794_v47 = vmul.f32 0.03125, %v6772_v19 }
0x181a   :  { %v13961_v30 = vsub.f32 %v13861_v55, %v6794_v47 }
0x181b   :  { %v6775_v22 = vpop.xlane.xlu1 %6774  ;;  %v6778_v53 = vpop.xlane.xlu0 %6777 }
0x181c   :  { %v6795_v20 = vmul.f32 0.03125, %v6775_v22  ;;  %v6796_v2 = vmul.f32 0.03125, %v6778_v53  ;;  %v6826_v7 = vmul.f32 %v13961_v30, %v13961_v30 }
0x181e   :  { %v13966_v37 = vsub.f32 %v13871_v0, %v6795_v20  ;;  %v13969_v38 = vsub.f32 %v13868_v5, %v6796_v2  ;;  %v6866_v40 = vsel %vm143_vm0, %v6826_v7, 0.0 }
0x181f   :  { %v6781_v62 = vpop.xlane.xlu1 %6780  ;;  %6867 = vadd.xlane.f32.xlu0 %v6866_v40 }
0x1820   :  { %v6797_v46 = vmul.f32 0.03125, %v6781_v62  ;;  %v6827_v63 = vmul.f32 %v13966_v37, %v13966_v37  ;;  %v6828_v14 = vmul.f32 %v13969_v38, %v13969_v38 }
0x1822   :  { %v13977_v25 = vsub.f32 %v13878_v52, %v6797_v46  ;;  %v6869_v28 = vsel %vm143_vm0, %v6827_v63, 0.0  ;;  %v6872_v61 = vsel %vm143_vm0, %v6828_v14, 0.0  ;;  %v13987_v63 = vld [vmem:[%s14257_s11 + $0x1] ss:$0 sm:$0xff] }
0x1823   :  { %6870 = vadd.xlane.f32.xlu1 %v6869_v28  ;;  %6873 = vadd.xlane.f32.xlu0 %v6872_v61 }
0x1824   :  { %v6829_v33 = vmul.f32 %v13977_v25, %v13977_v25 }
0x1826   :  { %v6875_v29 = vsel %vm143_vm0, %v6829_v33, 0.0 }
0x1827   :  { %6876 = vadd.xlane.f32.xlu1 %v6875_v29 }
0x1861   :  { %v6832_v24 = vpop.xlane.xlu0 %6831 }
0x1862   :  { %v6878_v54 = vmul.f32 0.03125, %v6832_v24 }
0x1864   :  { %v6894_v42 = vadd.f32 1e-05, %v6878_v54 }
0x1865   :  { %v6835_v60 = vpop.xlane.xlu1 %6834  ;;  %v6838_v39 = vpop.xlane.xlu0 %6837 }
0x1866   :  { %9940 = vrsqrt.f32 %v6894_v42  ;;  %v6879_v31 = vmul.f32 0.03125, %v6835_v60  ;;  %v6880_v16 = vmul.f32 0.03125, %v6838_v39 }
0x1868   :  { %v6895_v21 = vadd.f32 1e-05, %v6879_v31  ;;  %v6896_v36 = vadd.f32 1e-05, %v6880_v16  ;;  %v13994_v31 = vld [vmem:[%s14258_s12 + $0x1] ss:$0 sm:$0xff] }
0x1869   :  { %v6841_v11 = vpop.xlane.xlu1 %6840 }
0x186a   :  { %9942 = vrsqrt.f32 %v6895_v21  ;;  %v6881_v45 = vmul.f32 0.03125, %v6841_v11  ;;  %v6844_v15 = vpop.xlane.xlu0 %6843 }
0x186b   :  { %9944 = vrsqrt.f32 %v6896_v36  ;;  %v6882_v12 = vmul.f32 0.03125, %v6844_v15 }
0x186c   :  { %v6897_v44 = vadd.f32 1e-05, %v6881_v45 }
0x186d   :  { %v6898_v9 = vadd.f32 1e-05, %v6882_v12 }
0x186e   :  { %9946 = vrsqrt.f32 %v6897_v44  ;;  %v6847_v58 = vpop.xlane.xlu1 %6846  ;;  %v6850_v19 = vpop.xlane.xlu0 %6849 }
0x186f   :  { %9948 = vrsqrt.f32 %v6898_v9  ;;  %v6883_v47 = vmul.f32 0.03125, %v6847_v58  ;;  %v6884_v22 = vmul.f32 0.03125, %v6850_v19 }
0x1871   :  { %v6899_v53 = vadd.f32 1e-05, %v6883_v47  ;;  %v6900_v20 = vadd.f32 1e-05, %v6884_v22 }
0x1872   :  { %v6853_v2 = vpop.xlane.xlu1 %6852  ;;  %v6856_v7 = vpop.xlane.xlu0 %6855 }
0x1873   :  { %v9941_v40 = vpop.eup %9940  ;;  %9950 = vrsqrt.f32 %v6899_v53  ;;  %v6885_v62 = vmul.f32 0.03125, %v6853_v2  ;;  %v6886_v46 = vmul.f32 0.03125, %v6856_v7 }
0x1874   :  { %9952 = vrsqrt.f32 %v6900_v20  ;;  %v6926_v14 = vmul.f32 %v9941_v40, %v13883_v56 }
0x1875   :  { %v6901_v28 = vadd.f32 1e-05, %v6885_v62  ;;  %v6902_v61 = vadd.f32 1e-05, %v6886_v46 }
0x1876   :  { %v6859_v33 = vpop.xlane.xlu1 %6858  ;;  %v6862_v29 = vpop.xlane.xlu0 %6861  ;;  %v6948_v60 = vmul.f32 %v13987_v63, %v6926_v14 }
0x1877   :  { %v9943_v24 = vpop.eup %9942  ;;  %9954 = vrsqrt.f32 %v6901_v28  ;;  %v6887_v54 = vmul.f32 0.03125, %v6859_v33  ;;  %v6888_v42 = vmul.f32 0.03125, %v6862_v29 }
0x1878   :  { %v9945_v39 = vpop.eup %9944  ;;  %9956 = vrsqrt.f32 %v6902_v61  ;;  %v6927_v16 = vmul.f32 %v9943_v24, %v13888_v32  ;;  %v6970_v44 = vadd.f32 %v13994_v31, %v6948_v60 }
0x1879   :  { %v6928_v56 = vmul.f32 %v9945_v39, %v13891_v49  ;;  %v6903_v21 = vadd.f32 1e-05, %v6887_v54  ;;  %v6904_v36 = vadd.f32 1e-05, %v6888_v42 }
0x187a   :  { %v6865_v11 = vpop.xlane.xlu1 %6864  ;;  %v6949_v45 = vmul.f32 %v13987_v63, %v6927_v16 }
0x187b   :  { %v9947_v15 = vpop.eup %9946  ;;  %9958 = vrsqrt.f32 %v6903_v21  ;;  %v6889_v12 = vmul.f32 0.03125, %v6865_v11  ;;  %v6950_v58 = vmul.f32 %v13987_v63, %v6928_v56 }
0x187c   :  { %v9949_v9 = vpop.eup %9948  ;;  %v6929_v19 = vmul.f32 %v9947_v15, %v13899_v8  ;;  %9960 = vrsqrt.f32 %v6904_v36  ;;  %v6971_v32 = vadd.f32 %v13994_v31, %v6949_v45 }
0x187d   :  { %v6905_v47 = vadd.f32 1e-05, %v6889_v12  ;;  %v6930_v49 = vmul.f32 %v9949_v9, %v13904_v1  ;;  %v6972_v2 = vadd.f32 %v13994_v31, %v6950_v58 }
0x187e   :  { %v6951_v22 = vmul.f32 %v13987_v63, %v6929_v19  ;;  %v6986_v53 = vpack.c.bf16 %v6971_v32, %v6970_v44 }
0x187f   :  { %9962 = vrsqrt.f32 %v6905_v47  ;;  %v6952_v62 = vmul.f32 %v13987_v63, %v6930_v49 }
0x1880   :  { %v9951_v20 = vpop.eup %9950  ;;  %9086 = vmatprep.mubr.msk.bf16.mxu1 %vm143_vm0, %v6986_v53  ;;  %v6973_v7 = vadd.f32 %v13994_v31, %v6951_v22 }
0x1881   :  { %v9953_v40 = vpop.eup %9952  ;;  %v6931_v8 = vmul.f32 %v9951_v20, %v13912_v18  ;;  %v6974_v29 = vadd.f32 %v13994_v31, %v6952_v62 }
0x1882   :  { %v6932_v46 = vmul.f32 %v9953_v40, %v13915_v17  ;;  %v6987_v14 = vpack.c.bf16 %v6973_v7, %v6972_v2 }
0x1883   :  { %v6953_v1 = vmul.f32 %v13987_v63, %v6931_v8 }
0x1884   :  { %v9955_v28 = vpop.eup %9954  ;;  %9087 = vmatmul.mubr.msk.bf16.vlgmr.msra.gmra.mxu1 %vm143_vm0, %v6987_v14  ;;  %v6954_v54 = vmul.f32 %v13987_v63, %v6932_v46 }
0x1885   :  { %v9957_v61 = vpop.eup %9956  ;;  %v6933_v33 = vmul.f32 %v9955_v28, %v13923_v41  ;;  %v6975_v24 = vadd.f32 %v13994_v31, %v6953_v1 }
0x1886   :  { %v6934_v18 = vmul.f32 %v9957_v61, %v13926_v35  ;;  %v6976_v16 = vadd.f32 %v13994_v31, %v6954_v54 }
0x1887   :  { %v6988_v42 = vpack.c.bf16 %v6975_v24, %v6974_v29  ;;  %v6955_v17 = vmul.f32 %v13987_v63, %v6933_v33 }
0x1888   :  { %v9959_v60 = vpop.eup %9958  ;;  %v6956_v21 = vmul.f32 %v13987_v63, %v6934_v18 }
0x1889   :  { %v9961_v39 = vpop.eup %9960  ;;  %9090 = vmatprep.mubr.msk.bf16.mxu1 %vm143_vm0, %v6988_v42  ;;  %v6977_v56 = vadd.f32 %v13994_v31, %v6955_v17  ;;  %v6935_v41 = vmul.f32 %v9959_v60, %v13935_v48 }
0x188a   :  { %v6936_v36 = vmul.f32 %v9961_v39, %v13938_v26  ;;  %v6978_v12 = vadd.f32 %v13994_v31, %v6956_v21  ;;  %v14065_v21 = vld [vmem:[%s14260_s14 + $0x1] ss:$0 sm:$0xff] }
0x188b   :  { %v6989_v11 = vpack.c.bf16 %v6977_v56, %v6976_v16  ;;  %v6957_v35 = vmul.f32 %v13987_v63, %v6935_v41  ;;  %v9297_v41 = vld [vmem:[%s14261_s15 + $0x30] sm:$0xff]  }
0x188c   :  { %v9963_v45 = vpop.eup %9962  ;;  %v6958_v9 = vmul.f32 %v13987_v63, %v6936_v36 }
0x188d   :  { %v6937_v15 = vmul.f32 %v9963_v45, %v13947_v34  ;;  %9091 = vmatmul.mubr.msk.bf16.gmra.mxu1 %vm143_vm0, %v6989_v11  ;;  %v6979_v44 = vadd.f32 %v13994_v31, %v6957_v35 }
0x188e   :  { %v6980_v26 = vadd.f32 %v13994_v31, %v6958_v9 }
0x188f   :  { %v6990_v58 = vpack.c.bf16 %v6979_v44, %v6978_v12  ;;  %v6959_v48 = vmul.f32 %v13987_v63, %v6937_v15 }
0x1891   :  { %9094 = vmatprep.mubr.msk.bf16.mxu1 %vm143_vm0, %v6990_v58  ;;  %v6981_v19 = vadd.f32 %v13994_v31, %v6959_v48 }
0x1893   :  { %v6991_v32 = vpack.c.bf16 %v6981_v19, %v6980_v26 }
0x1895   :  { %9095 = vmatmul.mubr.msk.bf16.gmra.mxu1 %vm143_vm0, %v6991_v32 }
0x18a8   :  { %v6868_v34 = vpop.xlane.xlu0 %6867 }
0x18a9   :  { %v6890_v47 = vmul.f32 0.03125, %v6868_v34 }
0x18ab   :  { %v6906_v49 = vadd.f32 1e-05, %v6890_v47 }
0x18ac   :  { %v6871_v22 = vpop.xlane.xlu1 %6870  ;;  %v6874_v53 = vpop.xlane.xlu0 %6873 }
0x18ad   :  { %9964 = vrsqrt.f32 %v6906_v49  ;;  %v6891_v20 = vmul.f32 0.03125, %v6871_v22  ;;  %v6892_v2 = vmul.f32 0.03125, %v6874_v53 }
0x18af   :  { %v6907_v7 = vadd.f32 1e-05, %v6891_v20  ;;  %v6908_v40 = vadd.f32 1e-05, %v6892_v2 }
0x18b0   :  { %v6877_v8 = vpop.xlane.xlu1 %6876 }
0x18b1   :  { %9966 = vrsqrt.f32 %v6907_v7  ;;  %v6893_v62 = vmul.f32 0.03125, %v6877_v8 }
0x18b2   :  { %9968 = vrsqrt.f32 %v6908_v40 }
0x18b3   :  { %v6909_v46 = vadd.f32 1e-05, %v6893_v62 }
0x18b5   :  { %9970 = vrsqrt.f32 %v6909_v46 }
0x18ba   :  { %v9965_v14 = vpop.eup %9964 }
0x18bb   :  { %v6938_v1 = vmul.f32 %v9965_v14, %v13961_v30 }
0x18bd   :  { %v6960_v29 = vmul.f32 %v13987_v63, %v6938_v1 }
0x18be   :  { %v9967_v28 = vpop.eup %9966 }
0x18bf   :  { %v9969_v61 = vpop.eup %9968  ;;  %v6939_v33 = vmul.f32 %v9967_v28, %v13966_v37  ;;  %v6982_v17 = vadd.f32 %v13994_v31, %v6960_v29 }
0x18c0   :  { %v6940_v24 = vmul.f32 %v9969_v61, %v13969_v38 }
0x18c1   :  { %v6961_v54 = vmul.f32 %v13987_v63, %v6939_v33 }
0x18c2   :  { %v9971_v18 = vpop.eup %9970  ;;  %v6962_v39 = vmul.f32 %v13987_v63, %v6940_v24 }
0x18c3   :  { %v6941_v42 = vmul.f32 %v9971_v18, %v13977_v25  ;;  %v6983_v60 = vadd.f32 %v13994_v31, %v6961_v54  ;;  %v9296_v25 = vld [vmem:[%s14261_s15 + $0x38] sm:$0xff]  }
0x18c4   :  { %v6984_v37 = vadd.f32 %v13994_v31, %v6962_v39  ;;  %9102 = vmatprep.subr.bf16.mxu0 %v9296_v25 }
0x18c5   :  { %v6992_v30 = vpack.c.bf16 %v6983_v60, %v6982_v17  ;;  %v6963_v16 = vmul.f32 %v13987_v63, %v6941_v42  ;;  %9103 = vmatpush3.bf16.msra.mxu0 %v9296_v25  ;;  %v9298_v63 = vld [vmem:[%s14261_s15 + $0x28] sm:$0xff]  }
0x18c6   :  { %9104 = vmatprep.subr.bf16.mxu0 %v9297_v41 }
0x18c7   :  { %9098 = vmatprep.mubr.msk.bf16.mxu1 %vm143_vm0, %v6992_v30  ;;  %v6985_v38 = vadd.f32 %v13994_v31, %v6963_v16  ;;  %v9299_v31 = vld [vmem:[%s14261_s15 + $0x20] sm:$0xff]  }
0x18c9   :  { %v6993_v56 = vpack.c.bf16 %v6985_v38, %v6984_v37  ;;  %9105 = vmatpush3.bf16.msra.mxu0 %v9297_v41 }
0x18ca   :  { %9106 = vmatprep.subr.bf16.mxu0 %v9298_v63 }
0x18cb   :  { %9099 = vmatmul.mubr.msk.bf16.gmra.mxu1 %vm143_vm0, %v6993_v56 }
0x18cd   :  { %9107 = vmatpush3.bf16.msra.mxu0 %v9298_v63 }
0x18ce   :  { %9108 = vmatprep.subr.bf16.mxu0 %v9299_v31 }
0x18d1   :  { %9109 = vmatpush3.bf16.msra.mxu0 %v9299_v31 }
0x1944   :  { %v9088_v36 = vpop.f32.mrf.mxu1 }
0x1945   :  { %v14068_v11 = vadd.f32 %v9088_v36, %v14065_v21 }
0x1946   :  { %v7077_v35 = vpop.f32.mrf.mxu1 }
0x1947   :  { %v7158_v45 = vmul.f32 %v14068_v11, %v14068_v11  ;;  %v14073_v15 = vadd.f32 %v14065_v21, %v7077_v35 }
0x1948   :  { %v9089_v12 = vpop.f32.mrf.mxu1 }
0x1949   :  { %v7174_v44 = vmul.f32 %v7158_v45, %v14068_v11  ;;  %v7156_v9 = vmul.f32 %v14073_v15, %v14073_v15  ;;  %v14079_v58 = vadd.f32 %v9089_v12, %v14065_v21 }
0x194a   :  { %v7080_v48 = vpop.f32.mrf.mxu1 }
0x194b   :  { %v7190_v26 = vmul.f32 0.044715, %v7174_v44  ;;  %v7172_v19 = vmul.f32 %v7156_v9, %v14073_v15  ;;  %v7159_v32 = vmul.f32 %v14079_v58, %v14079_v58  ;;  %v14085_v34 = vadd.f32 %v14065_v21, %v7080_v48 }
0x194d   :  { %v7206_v47 = vadd.f32 %v7190_v26, %v14068_v11  ;;  %v7188_v49 = vmul.f32 0.044715, %v7172_v19  ;;  %v7175_v22 = vmul.f32 %v7159_v32, %v14079_v58  ;;  %v9092_v53 = vpop.f32.mrf.mxu1  ;;  %v7157_v20 = vmul.f32 %v14085_v34, %v14085_v34 }
0x194e   :  { %v14092_v2 = vadd.f32 %v9092_v53, %v14065_v21 }
0x194f   :  { %v7222_v7 = vmul.f32 0.7978846, %v7206_v47  ;;  %v7204_v40 = vadd.f32 %v7188_v49, %v14073_v15  ;;  %v7191_v8 = vmul.f32 0.044715, %v7175_v22  ;;  %v7093_v62 = vpop.f32.mrf.mxu1  ;;  %v7173_v46 = vmul.f32 %v7157_v20, %v14085_v34 }
0x1950   :  { %v7162_v14 = vmul.f32 %v14092_v2, %v14092_v2  ;;  %v14099_v1 = vadd.f32 %v14065_v21, %v7093_v62 }
0x1951   :  { %v7220_v28 = vmul.f32 0.7978846, %v7204_v40  ;;  %v7207_v61 = vadd.f32 %v7191_v8, %v14079_v58  ;;  %v9093_v33 = vpop.f32.mrf.mxu1  ;;  %9972 = vtanh.f32 %v7222_v7  ;;  %v7189_v29 = vmul.f32 0.044715, %v7173_v46 }
0x1952   :  { %v7178_v24 = vmul.f32 %v7162_v14, %v14092_v2  ;;  %v7160_v54 = vmul.f32 %v14099_v1, %v14099_v1  ;;  %v14106_v42 = vadd.f32 %v9093_v33, %v14065_v21 }
0x1953   :  { %9974 = vtanh.f32 %v7220_v28  ;;  %v7223_v18 = vmul.f32 0.7978846, %v7207_v61  ;;  %v7096_v17 = vpop.f32.mrf.mxu1  ;;  %v7205_v60 = vadd.f32 %v7189_v29, %v14085_v34 }
0x1954   :  { %v7194_v39 = vmul.f32 0.044715, %v7178_v24  ;;  %v7176_v30 = vmul.f32 %v7160_v54, %v14099_v1  ;;  %v14111_v16 = vadd.f32 %v14065_v21, %v7096_v17  ;;  %v7163_v37 = vmul.f32 %v14106_v42, %v14106_v42 }
0x1955   :  { %9976 = vtanh.f32 %v7223_v18  ;;  %v9096_v38 = vpop.f32.mrf.mxu1  ;;  %v7221_v56 = vmul.f32 0.7978846, %v7205_v60 }
0x1956   :  { %v7210_v25 = vadd.f32 %v7194_v39, %v14092_v2  ;;  %v7192_v41 = vmul.f32 0.044715, %v7176_v30  ;;  %v7179_v63 = vmul.f32 %v7163_v37, %v14106_v42  ;;  %v7161_v31 = vmul.f32 %v14111_v16, %v14111_v16 }
0x1957   :  { %v14120_v36 = vadd.f32 %v9096_v38, %v14065_v21  ;;  %v7109_v35 = vpop.f32.mrf.mxu1  ;;  %9978 = vtanh.f32 %v7221_v56 }
0x1958   :  { %v7208_v45 = vadd.f32 %v7192_v41, %v14099_v1  ;;  %v14124_v12 = vadd.f32 %v14065_v21, %v7109_v35  ;;  %v7195_v44 = vmul.f32 0.044715, %v7179_v63  ;;  %v7177_v9 = vmul.f32 %v7161_v31, %v14111_v16 }
0x1959   :  { %v7166_v48 = vmul.f32 %v14120_v36, %v14120_v36  ;;  %v9097_v26 = vpop.f32.mrf.mxu1  ;;  %v7226_v19 = vmul.f32 0.7978846, %v7210_v25  ;;  %v7140_v63 = vmul.f32 0.5, %v14073_v15 }
0x195a   :  { %v7224_v32 = vmul.f32 0.7978846, %v7208_v45  ;;  %v7164_v47 = vmul.f32 %v14124_v12, %v14124_v12  ;;  %v7211_v49 = vadd.f32 %v7195_v44, %v14106_v42  ;;  %v7193_v22 = vmul.f32 0.044715, %v7177_v9 }
0x195b   :  { %v7182_v53 = vmul.f32 %v7166_v48, %v14120_v36  ;;  %v14134_v20 = vadd.f32 %v9097_v26, %v14065_v21  ;;  %v7112_v7 = vpop.f32.mrf.mxu1  ;;  %v7143_v48 = vmul.f32 0.5, %v14079_v58  ;;  %v7141_v26 = vmul.f32 0.5, %v14085_v34 }
0x195c   :  { %v7180_v40 = vmul.f32 %v7164_v47, %v14124_v12  ;;  %v14138_v8 = vadd.f32 %v14065_v21, %v7112_v7  ;;  %9980 = vtanh.f32 %v7224_v32  ;;  %v7227_v62 = vmul.f32 0.7978846, %v7211_v49 }
0x195d   :  { %v7209_v46 = vadd.f32 %v7193_v22, %v14111_v16  ;;  %v7198_v14 = vmul.f32 0.044715, %v7182_v53  ;;  %9982 = vtanh.f32 %v7226_v19  ;;  %v7167_v61 = vmul.f32 %v14134_v20, %v14134_v20 }
0x195e   :  { %v7196_v28 = vmul.f32 0.044715, %v7180_v40  ;;  %v7165_v33 = vmul.f32 %v14138_v8, %v14138_v8  ;;  %v9973_v29 = vpop.eup %9972  ;;  %9984 = vtanh.f32 %v7227_v62  ;;  %v7142_v49 = vmul.f32 0.5, %v14068_v11 }
0x195f   :  { %v7225_v24 = vmul.f32 0.7978846, %v7209_v46  ;;  %v7214_v54 = vadd.f32 %v7198_v14, %v14120_v36  ;;  %v7183_v60 = vmul.f32 %v7167_v61, %v14134_v20  ;;  %v7254_v9 = vadd.f32 1.0, %v9973_v29 }
0x1960   :  { %v9975_v18 = vpop.eup %9974  ;;  %v7212_v17 = vadd.f32 %v7196_v28, %v14124_v12  ;;  %v7181_v39 = vmul.f32 %v7165_v33, %v14138_v8  ;;  %v7147_v11 = vmul.f32 0.5, %v14106_v42  ;;  %v7144_v29 = vmul.f32 0.5, %v14099_v1 }
0x1961   :  { %9986 = vtanh.f32 %v7225_v24  ;;  %v7230_v30 = vmul.f32 0.7978846, %v7214_v54  ;;  %v7199_v56 = vmul.f32 0.044715, %v7183_v60  ;;  %v7252_v45 = vadd.f32 1.0, %v9975_v18 }
0x1962   :  { %v9977_v37 = vpop.eup %9976  ;;  %v7228_v38 = vmul.f32 0.7978846, %v7212_v17  ;;  %v7197_v25 = vmul.f32 0.044715, %v7181_v39  ;;  %v7270_v7 = vmul.f32 %v7254_v9, %v7142_v49  ;;  %v7145_v24 = vmul.f32 0.5, %v14111_v16 }
0x1963   :  { %v7255_v41 = vadd.f32 1.0, %v9977_v37  ;;  %v7215_v31 = vadd.f32 %v7199_v56, %v14134_v20  ;;  %v7268_v15 = vmul.f32 %v7252_v45, %v7140_v63  ;;  %v7146_v18 = vmul.f32 0.5, %v14092_v2 }
0x1964   :  { %v7213_v35 = vadd.f32 %v7197_v25, %v14138_v8  ;;  %v9979_v44 = vpop.eup %9978  ;;  %9988 = vtanh.f32 %v7228_v38  ;;  %v7151_v1 = vmul.f32 0.5, %v14134_v20  ;;  %v7148_v2 = vmul.f32 0.5, %v14124_v12 }
0x1965   :  { %9990 = vtanh.f32 %v7230_v30  ;;  %v7231_v19 = vmul.f32 0.7978846, %v7215_v31  ;;  %v7253_v47 = vadd.f32 1.0, %v9979_v44  ;;  %v7271_v22 = vmul.f32 %v7255_v41, %v7143_v48 }
0x1966   :  { %v7229_v32 = vmul.f32 0.7978846, %v7213_v35  ;;  %v7149_v35 = vmul.f32 0.5, %v14138_v8  ;;  %v7150_v44 = vmul.f32 0.5, %v14120_v36 }
0x1967   :  { %9992 = vtanh.f32 %v7231_v19  ;;  %v7269_v53 = vmul.f32 %v7253_v47, %v7141_v26  ;;  %v7285_v14 = vpack.c.bf16 %v7271_v22, %v7270_v7 }
0x1968   :  { %9994 = vtanh.f32 %v7229_v32 }
0x1969   :  { %v9981_v40 = vpop.eup %9980  ;;  %v7284_v62 = vpack.c.bf16 %v7269_v53, %v7268_v15 }
0x196a   :  { %v9983_v46 = vpop.eup %9982  ;;  %v7256_v28 = vadd.f32 1.0, %v9981_v40 }
0x196b   :  { %v9985_v58 = vpop.eup %9984  ;;  %9110 = vmatprep.mubr.msk.bf16.mxu0 %vm3750_vm3, %v7284_v62  ;;  %v7258_v33 = vadd.f32 1.0, %v9983_v46 }
0x196c   :  { %v7259_v34 = vadd.f32 1.0, %v9985_v58  ;;  %9111 = vmatmul.mubr.msk.bf16.vlgmr.msra.gmra.mxu0 %vm3750_vm3, %v7285_v14  ;;  %v7272_v60 = vmul.f32 %v7256_v28, %v7144_v29 }
0x196d   :  { %v7274_v37 = vmul.f32 %v7258_v33, %v7146_v18 }
0x196e   :  { %v9987_v61 = vpop.eup %9986  ;;  %v7275_v17 = vmul.f32 %v7259_v34, %v7147_v11 }
0x196f   :  { %v7257_v54 = vadd.f32 1.0, %v9987_v61 }
0x1970   :  { %v7287_v25 = vpack.c.bf16 %v7275_v17, %v7274_v37 }
0x1971   :  { %v7273_v39 = vmul.f32 %v7257_v54, %v7145_v24  ;;  %v9989_v30 = vpop.eup %9988 }
0x1972   :  { %v9991_v38 = vpop.eup %9990  ;;  %v7260_v63 = vadd.f32 1.0, %v9989_v30 }
0x1973   :  { %v7286_v56 = vpack.c.bf16 %v7273_v39, %v7272_v60  ;;  %v7262_v31 = vadd.f32 1.0, %v9991_v38 }
0x1974   :  { %v9993_v41 = vpop.eup %9992  ;;  %v7276_v48 = vmul.f32 %v7260_v63, %v7148_v2 }
0x1975   :  { %9114 = vmatprep.mubr.msk.bf16.mxu0 %vm3750_vm3, %v7286_v56  ;;  %v9995_v42 = vpop.eup %9994  ;;  %v7263_v16 = vadd.f32 1.0, %v9993_v41  ;;  %v7278_v19 = vmul.f32 %v7262_v31, %v7150_v44 }
0x1976   :  { %9115 = vmatmul.mubr.msk.bf16.gmra.mxu0 %vm3750_vm3, %v7287_v25  ;;  %v7261_v45 = vadd.f32 1.0, %v9995_v42 }
0x1977   :  { %v7279_v9 = vmul.f32 %v7263_v16, %v7151_v1 }
0x1978   :  { %v7277_v26 = vmul.f32 %v7261_v45, %v7149_v35 }
0x1979   :  { %v7289_v47 = vpack.c.bf16 %v7279_v9, %v7278_v19 }
0x197a   :  { %v7288_v32 = vpack.c.bf16 %v7277_v26, %v7276_v48 }
0x197c   :  { %9118 = vmatprep.mubr.msk.bf16.mxu0 %vm3750_vm3, %v7288_v32  ;;  %v10085_v32 = vmov 0.0  }
0x197d   :  { %9126 = vmatprep.subr.mxu1 %v10085_v32  ;;  %9158 = vmatprep.mubr.msk.f32.mxu1 %vm10086_vm4, %v10085_v32 }
0x197e   :  { %9119 = vmatmul.mubr.msk.bf16.gmra.mxu0 %vm3750_vm3, %v7289_v47 }
0x198b   :  { %v9100_v20 = vpop.f32.mrf.mxu1 }
0x198c   :  { %v7134_v49 = vadd.f32 %v9100_v20, %v14065_v21 }
0x198d   :  { %v7125_v22 = vpop.f32.mrf.mxu1 }
0x198e   :  { %v7170_v12 = vmul.f32 %v7134_v49, %v7134_v49  ;;  %v7126_v8 = vadd.f32 %v14065_v21, %v7125_v22  ;;  %v7154_v35 = vmul.f32 0.5, %v7134_v49 }
0x198f   :  { %v9101_v15 = vpop.f32.mrf.mxu1 }
0x1990   :  { %v7186_v53 = vmul.f32 %v7170_v12, %v7134_v49  ;;  %v7168_v36 = vmul.f32 %v7126_v8, %v7126_v8  ;;  %v7137_v7 = vadd.f32 %v9101_v15, %v14065_v21  ;;  %v7152_v1 = vmul.f32 0.5, %v7126_v8 }
0x1991   :  { %v7128_v40 = vpop.f32.mrf.mxu1 }
0x1992   :  { %v7202_v62 = vmul.f32 0.044715, %v7186_v53  ;;  %v7184_v46 = vmul.f32 %v7168_v36, %v7126_v8  ;;  %v7171_v14 = vmul.f32 %v7137_v7, %v7137_v7  ;;  %v7129_v58 = vadd.f32 %v14065_v21, %v7128_v40 }
0x1993   :  { %v7155_v31 = vmul.f32 0.5, %v7137_v7 }
0x1994   :  { %v7218_v34 = vadd.f32 %v7202_v62, %v7134_v49  ;;  %v7200_v28 = vmul.f32 0.044715, %v7184_v46  ;;  %v7187_v61 = vmul.f32 %v7171_v14, %v7137_v7  ;;  %v7169_v33 = vmul.f32 %v7129_v58, %v7129_v58 }
0x1995   :  { %v7153_v16 = vmul.f32 0.5, %v7129_v58 }
0x1996   :  { %v7234_v11 = vmul.f32 0.7978846, %v7218_v34  ;;  %v7216_v29 = vadd.f32 %v7200_v28, %v7126_v8  ;;  %v7203_v24 = vmul.f32 0.044715, %v7187_v61  ;;  %v7185_v54 = vmul.f32 %v7169_v33, %v7129_v58 }
0x1998   :  { %v7232_v18 = vmul.f32 0.7978846, %v7216_v29  ;;  %v7219_v17 = vadd.f32 %v7203_v24, %v7137_v7  ;;  %v7201_v60 = vmul.f32 0.044715, %v7185_v54  ;;  %9996 = vtanh.f32 %v7234_v11 }
0x199a   :  { %v7235_v39 = vmul.f32 0.7978846, %v7219_v17  ;;  %9998 = vtanh.f32 %v7232_v18  ;;  %v7217_v30 = vadd.f32 %v7201_v60, %v7129_v58  ;;  %v7883_v58 = vld [vmem:[%s14262_s16 + $0x1] ss:$0 sm:$0xff] }
0x199c   :  { %10000 = vtanh.f32 %v7235_v39  ;;  %v7233_v37 = vmul.f32 0.7978846, %v7217_v30 }
0x199e   :  { %10002 = vtanh.f32 %v7233_v37 }
0x19a5   :  { %v9997_v38 = vpop.eup %9996 }
0x19a6   :  { %v7266_v42 = vadd.f32 1.0, %v9997_v38 }
0x19a7   :  { %v9999_v21 = vpop.eup %9998 }
0x19a8   :  { %v7264_v41 = vadd.f32 1.0, %v9999_v21  ;;  %v7282_v48 = vmul.f32 %v7266_v42, %v7154_v35  ;;  %v7896_v35 = vld [vmem:[%s14264_s18] ss:$0 sm:$0xff] }
0x19a9   :  { %v10001_v56 = vpop.eup %10000 }
0x19aa   :  { %v7267_v25 = vadd.f32 1.0, %v10001_v56  ;;  %v7280_v44 = vmul.f32 %v7264_v41, %v7152_v1  ;;  %v7541_v1 = vld [vmem:[%s14263_s17] sm:$0xff] }
0x19ab   :  { %v10003_v63 = vpop.eup %10002 }
0x19ac   :  { %v7265_v2 = vadd.f32 1.0, %v10003_v63  ;;  %v7283_v45 = vmul.f32 %v7267_v25, %v7155_v31 }
0x19ae   :  { %v7281_v9 = vmul.f32 %v7265_v2, %v7153_v16  ;;  %v7291_v19 = vpack.c.bf16 %v7283_v45, %v7282_v48 }
0x19b0   :  { %v7290_v26 = vpack.c.bf16 %v7281_v9, %v7280_v44 }
0x19b2   :  { %9122 = vmatprep.mubr.msk.bf16.mxu0 %vm3750_vm3, %v7290_v26 }
0x19b3   :  { %9123 = vmatmul.mubr.msk.bf16.gmra.mxu0 %vm3750_vm3, %v7291_v19 }
0x1a2c   :  { %v9112_v47 = vpop.f32.mrf.mxu0 }
0x1a2e   :  { %v14178_v20 = vpop.f32.mrf.mxu0 }
0x1a30   :  { %v9113_v49 = vpop.f32.mrf.mxu0 }
0x1a32   :  { %v14180_v22 = vpop.f32.mrf.mxu0 }
0x1a36   :  { %v9116_v12 = vpop.f32.mrf.mxu0 }
0x1a38   :  { %v7407_v8 = vpop.f32.mrf.mxu0 }
0x1a39   :  { %v7408_v25 = vadd.f32 %v7883_v58, %v7407_v8 }
0x1a3a   :  { %v9117_v15 = vpop.f32.mrf.mxu0 }
0x1a3b   :  { %v7458_v63 = vadd.f32 %v7408_v25, %v13803_v23 }
0x1a3c   :  { %v7410_v53 = vpop.f32.mrf.mxu0 }
0x1a3d   :  { %v7411_v56 = vadd.f32 %v7883_v58, %v7410_v53 }
0x1a3e   :  { %v9120_v36 = vpop.f32.mrf.mxu0 }
0x1a3f   :  { %v7432_v60 = vadd.f32 %v9120_v36, %v7883_v58  ;;  %v7459_v41 = vadd.f32 %v7411_v56, %v13817_v13  ;;  %v7392_v13 = vadd.f32 %v7883_v58, %v14178_v20 }
0x1a40   :  { %v7423_v7 = vpop.f32.mrf.mxu0 }
0x1a41   :  { %v7424_v37 = vadd.f32 %v7883_v58, %v7423_v7  ;;  %v7454_v23 = vadd.f32 %v7392_v13, %v13769_v51  ;;  %v7542_v51 = vld [vmem:[%s14263_s17 + $0x8] sm:$0xff] }
0x1a42   :  { %v9121_v40 = vpop.f32.mrf.mxu0 }
0x1a43   :  { %v7435_v18 = vadd.f32 %v9121_v40, %v7883_v58  ;;  %v7462_v21 = vadd.f32 %v7424_v37, %v13829_v4  ;;  %v7400_v4 = vadd.f32 %v9112_v47, %v7883_v58 }
0x1a44   :  { %v7426_v62 = vpop.f32.mrf.mxu0 }
0x1a45   :  { %v7427_v30 = vadd.f32 %v7883_v58, %v7426_v62  ;;  %v7456_v42 = vadd.f32 %v7400_v4, %v13780_v57  ;;  %v7544_v57 = vld [vmem:[%s14263_s17 + $0x18] sm:$0xff] }
0x1a47   :  { %v7463_v38 = vadd.f32 %v7427_v30, %v13841_v50  ;;  %v7403_v50 = vadd.f32 %v9113_v49, %v7883_v58 }
0x1a73   :  { %v9124_v46 = vpop.f32.mrf.mxu0 }
0x1a74   :  { %v7448_v28 = vadd.f32 %v9124_v46, %v7883_v58 }
0x1a75   :  { %v7439_v14 = vpop.f32.mrf.mxu0 }
0x1a76   :  { %v7468_v24 = vadd.f32 %v7448_v28, %v13868_v5  ;;  %v7440_v54 = vadd.f32 %v7883_v58, %v7439_v14  ;;  %v7464_v5 = vadd.f32 %v7432_v60, %v13838_v3 }
0x1a77   :  { %v9125_v34 = vpop.f32.mrf.mxu0 }
0x1a78   :  { %v7451_v61 = vadd.f32 %v9125_v34, %v7883_v58  ;;  %v7466_v39 = vadd.f32 %v7440_v54, %v13861_v55  ;;  %v7416_v55 = vadd.f32 %v9116_v12, %v7883_v58 }
0x1a79   :  { %v7442_v33 = vpop.f32.mrf.mxu0 }
0x1a7a   :  { %v7469_v11 = vadd.f32 %v7451_v61, %v13878_v52  ;;  %v7443_v29 = vadd.f32 %v7883_v58, %v7442_v33  ;;  %v7465_v52 = vadd.f32 %v7435_v18, %v13848_v27  ;;  %v7460_v3 = vadd.f32 %v7416_v55, %v13810_v10 }
0x1a7b   :  { %v7395_v10 = vadd.f32 %v7883_v58, %v14180_v22 }
0x1a7c   :  { %9127 = vmatpush3.msra.mxu1 %v7469_v11  ;;  %v7467_v17 = vadd.f32 %v7443_v29, %v13871_v0  ;;  %v7419_v0 = vadd.f32 %v9117_v15, %v7883_v58 }
0x1a7d   :  { %9128 = vmatprep.subr.mxu1 %v10085_v32  ;;  %v7455_v31 = vadd.f32 %v7395_v10, %v13784_v6  ;;  %v7543_v6 = vld [vmem:[%s14263_s17 + $0x10] sm:$0xff] }
0x1a7e   :  { %9129 = vmatpush3.msra.mxu1 %v7468_v24  ;;  %v7461_v27 = vadd.f32 %v7419_v0, %v13823_v43  ;;  %v7457_v43 = vadd.f32 %v7403_v50, %v13794_v59  ;;  %v7470_v59 = vld [vmem:[%s14251_s5] sm:$0x3] }
0x1a7f   :  { %9130 = vmatprep.subr.mxu1 %v10085_v32 }
0x1a80   :  { %9131 = vmatpush3.msra.mxu1 %v7467_v17 }
0x1a81   :  { %9132 = vmatprep.subr.mxu1 %v10085_v32 }
0x1a82   :  { %9133 = vmatpush3.msra.mxu1 %v7466_v39 }
0x1a83   :  { %9134 = vmatprep.subr.mxu1 %v10085_v32 }
0x1a84   :  { %9135 = vmatpush3.msra.mxu1 %v7465_v52 }
0x1a85   :  { %9136 = vmatprep.subr.mxu1 %v10085_v32 }
0x1a86   :  { %9137 = vmatpush3.msra.mxu1 %v7464_v5 }
0x1a87   :  { %9138 = vmatprep.subr.mxu1 %v10085_v32 }
0x1a88   :  { %9139 = vmatpush3.msra.mxu1 %v7463_v38 }
0x1a89   :  { %9140 = vmatprep.subr.mxu1 %v10085_v32 }
0x1a8a   :  { %9141 = vmatpush3.msra.mxu1 %v7462_v21 }
0x1a8b   :  { %9142 = vmatprep.subr.mxu1 %v10085_v32 }
0x1a8c   :  { %9143 = vmatpush3.msra.mxu1 %v7461_v27 }
0x1a8d   :  { %9144 = vmatprep.subr.mxu1 %v10085_v32 }
0x1a8e   :  { %9145 = vmatpush3.msra.mxu1 %v7460_v3 }
0x1a8f   :  { %9146 = vmatprep.subr.mxu1 %v10085_v32 }
0x1a90   :  { %9147 = vmatpush3.msra.mxu1 %v7459_v41 }
0x1a91   :  { %9148 = vmatprep.subr.mxu1 %v10085_v32 }
0x1a92   :  { %9149 = vmatpush3.msra.mxu1 %v7458_v63 }
0x1a93   :  { %9150 = vmatprep.subr.mxu1 %v10085_v32 }
0x1a94   :  { %9151 = vmatpush3.msra.mxu1 %v7457_v43 }
0x1a95   :  { %9152 = vmatprep.subr.mxu1 %v10085_v32 }
0x1a96   :  { %9153 = vmatpush3.msra.mxu1 %v7456_v42 }
0x1a97   :  { %9154 = vmatprep.subr.mxu1 %v10085_v32 }
0x1a98   :  { %9155 = vmatpush3.msra.mxu1 %v7455_v31 }
0x1a99   :  { %9156 = vmatprep.subr.mxu1 %v10085_v32 }
0x1a9a   :  { %9157 = vmatpush3.msra.mxu1 %v7454_v23 }
0x1a9b   :  { %9159 = vmatmul.mubr.f32.vlgmr.msra.gmra.mxu1 %v7470_v59  ;;  %9161 = vmatprep.subr.mxu1 %v10085_v32 }
0x1a9c   :  { %9162 = vmatpush3.msra.mxu1 %v7544_v57  ;;  %9169 = vmatprep.mubr.msk.f32.mxu1 %vm10086_vm4, %v10085_v32 }
0x1a9d   :  { %9163 = vmatprep.subr.mxu1 %v10085_v32 }
0x1a9e   :  { %9164 = vmatpush3.msra.mxu1 %v7543_v6 }
0x1a9f   :  { %9165 = vmatprep.subr.mxu1 %v10085_v32 }
0x1aa0   :  { %9166 = vmatpush3.msra.mxu1 %v7542_v51 }
0x1aa1   :  { %9167 = vmatprep.subr.mxu1 %v10085_v32 }
0x1aa2   :  { %9168 = vmatpush3.msra.mxu1 %v7541_v1 }
0x1b5b   :  { %v7537_v16 = vpop.f32.mrf.mxu1 }
0x1b5c   :  { %9170 = vmatmul.mubr.msk.f32.vlgmr.msra.gmra.mxu1 %vm143_vm0, %v7537_v16 }
0x1b5d   :  { %v9160_v2 = vpop.f32.mrf.mxu1 }
0x1c1c   :  { %v7621_v45 = vpop.f32.mrf.mxu1 }
0x1c1d   :  { %v7622_v44 = vadd.f32 %v7896_v35, %v7621_v45 }
0x1c1e   :  { %v9171_v9 = vpop.f32.mrf.mxu1 }
0x1c1f   :  { %7626 = vst.msk [vmem:[#allocation2] sm:$0x3] %vm7625_vm5, %v7622_v44 }
0x1c20   :  { %10063 = shalt.err (!%p10060_p4)
}
0x1c21   :  { %7636 = dma.vmem_to_hbm [thread:$0]  %s7634_s28, 32, %s14265_s19, [#allocation3]  }
0x1c22   :  { %10072 = dma.done.wait [#allocation3], 32  }
0x1c23   :  { %10073 = vsyncadd [#allocation3], 4294967264 }
0x1c24   :  { %7640 = vsyncpa [#allocation3], 1 }

</bundles_post_ra>
